<compile_context>
chip_gen: v6e
topology: v6e:2x2x1
jax: 0.10.0
libtpu: 0.0.40
codegen_flags: <defaults>
</compile_context>

<pallas_src>
import functools

import jax
import jax.numpy as jnp
from jax.experimental import pallas as pl
from jax.experimental.pallas import tpu as pltpu


def _round_up(x, m):
    return (x + m - 1) // m * m


def _vmem_capacity_bytes():
    """Per-TensorCore VMEM capacity; conservative fallback is v7x's 64 MiB."""
    try:
        cap = int(pltpu.get_tpu_info().vmem_capacity_bytes)
        if cap > 0:
            return cap
    except Exception:
        pass
    return 64 * 1024 * 1024


def _step_vmem_bytes(TH, Wq, Cp, K, p, nslot):
    """Physical per-grid-step VMEM footprint (Wq mult of 16, Cp mult of 128,
    so nominal == tiled/physical)."""
    THin, THp = TH + 4 * p, TH + 2 * p
    bf, f4 = 2, 4
    xs = nslot * (THin + 2) * Wq * Cp * bf        # manual (double-)buffered input strips
    xv = (THin + 2) * Wq * Cp * bf                # full-slab load temporary
    mid = (THp + 2) * Wq * Cp * bf                # conv1 output strip
    outb = 2 * TH * Wq * Cp * f4                  # Pallas double-buffered out block
    wts = 2 * 2 * K * K * Cp * Cp * bf            # w1, w2 (assume 2 buffers each)
    acc = (THp + TH) * Wq * Cp * f4               # f32 matmul accumulators
    tmp = 2 * THp * Wq * Cp * f4                  # temporaries / relayout slack
    return xs + xv + mid + outb + wts + acc + tmp


def _pick_tile_h(H, Wq, Cp, K, p, budget_bytes):
    """Largest row-strip height dividing H whose physical footprint fits."""
    divs = sorted((th for th in range(1, H + 1) if H % th == 0), reverse=True)
    for th in divs:
        nslot = 2 if H // th > 1 else 1
        if _step_vmem_bytes(th, Wq, Cp, K, p, nslot) <= budget_bytes:
            return th
    return divs[-1]                                # nothing fits: best effort


def _resblock_kernel(x_hbm, w1_ref, b1_ref, w2_ref, b2_ref, out_ref,
                     xs_ref, mid_ref, dma_sem,
                     *, H, W, Cp, K, TH, S, Wq, NSLOT):
    """One (image n, row-strip s) step of the fused ResBlock.

    Coordinates: all pitch buffers store original image column c at pitch
    column c + p; data rows of xs/mid start at flat row Wq (one leading slack
    row), so every tap offset is the same for both convs: kh*Wq + (kw - p).

    x_hbm   : (N, (H+4p)*Wq, Cp) bf16 HBM ref (pl.ANY), row+col+chan pre-padded
    w*_ref  : (K*K, Cp, Cp) bf16, tap-major
    b*_ref  : (1, Cp) f32
    out_ref : (1, TH*Wq, Cp) f32 output strip (auto-pipelined, full pitch width)
    xs_ref  : (NSLOT, (THin+2)*Wq, Cp) bf16 VMEM double-buffered input strips
    mid_ref : ((THp+2)*Wq, Cp) bf16 VMEM conv1 output strip
    """
    p = K // 2
    THin = TH + 4 * p
    THp = TH + 2 * p
    L1 = THp * Wq
    L2 = TH * Wq
    n = pl.program_id(0)
    s = pl.program_id(1)
    slot = (s % 2) if NSLOT == 2 else 0

    def strip_copy(n_idx, s_idx, slot_idx):
        # One contiguous chunk: padded-image rows [s_idx*TH, s_idx*TH + THin).
        return pltpu.make_async_copy(
            x_hbm.at[n_idx, pl.ds(s_idx * (TH * Wq), THin * Wq), :],
            xs_ref.at[slot_idx, pl.ds(Wq, THin * Wq), :],
            dma_sem.at[slot_idx])

    # First strip of each image was never prefetched -> start it now.
    @pl.when(s == 0)
    def _():
        strip_copy(n, s, slot).start()

    # Prefetch the next strip of this image into the other slot while the
    # current strip is being computed.
    if S > 1:
        @pl.when(s + 1 < S)
        def _():
            strip_copy(n, s + 1, 1 - slot).start()

    # Wait for the current strip (started here for s==0, or prefetched at s-1).
    strip_copy(n, s, slot).wait()

    xv = xs_ref[slot]                               # ((THin+2)*Wq, Cp) bf16

    # ---- conv1 + bias + ReLU ------------------------------------------------
    acc1 = None
    for kh in range(K):
        for kw in range(K):
            off = Wq + kh * Wq + (kw - p)
            tap = jnp.dot(xv[off:off + L1, :], w1_ref[kh * K + kw],
                          preferred_element_type=jnp.float32)
            acc1 = tap if acc1 is None else acc1 + tap
    a1 = jnp.maximum(acc1 + b1_ref[...], 0.0).reshape(THp, Wq, Cp)

    # Zero pad columns and out-of-image rows in registers (they are conv2's
    # SAME padding), then store full pitch width -- aligned, unmasked.
    col = jax.lax.broadcasted_iota(jnp.int32, (THp, Wq, 1), 1)
    row = jax.lax.broadcasted_iota(jnp.int32, (THp, Wq, 1), 0)
    img_row = s * TH - p + row
    keep = (col >= p) & (col < p + W) & (img_row >= 0) & (img_row < H)
    a1 = jnp.where(keep, a1, 0.0)
    mid_ref[Wq:Wq + L1, :] = a1.reshape(L1, Cp).astype(mid_ref.dtype)

    # ---- conv2 + bias + residual ---------------------------------------------
    acc2 = None
    for kh in range(K):
        for kw in range(K):
            off = Wq + kh * Wq + (kw - p)
            tap = jnp.dot(mid_ref[off:off + L2, :], w2_ref[kh * K + kw],
                          preferred_element_type=jnp.float32)
            acc2 = tap if acc2 is None else acc2 + tap

    # Residual: aligned full-width slice of the input strip (rows 2p..2p+TH of
    # the data region; pad columns are zero so the full-width add is exact).
    res = xv[(1 + 2 * p) * Wq:(1 + 2 * p) * Wq + L2, :].astype(jnp.float32)
    out_ref[0] = acc2 + b2_ref[...] + res


def resblock_pallas(x_nhwc, w1_hwio, b1, w2_hwio, b2, *, tile_h=None):
    """x_nhwc: (N, H, W, C) float32.  Returns (N, H, W, C) float32."""
    N, H, W, C = x_nhwc.shape
    K = w1_hwio.shape[0]
    p = K // 2
    Wq = _round_up(W + 2 * p, 16)      # pitch: bf16 sublane-tile aligned
    Cp = _round_up(max(C, 1), 128)     # lane-dense channel axis

    cap = _vmem_capacity_bytes()
    budget = int(0.70 * cap)
    TH = _pick_tile_h(H, Wq, Cp, K, p, budget) if tile_h is None else tile_h
    assert H % TH == 0, "strip height must divide H"
    S = H // TH
    NSLOT = 2 if S > 1 else 1
    THin = TH + 4 * p
    THp = TH + 2 * p

    # One-time wrapper-side padding: rows (+2p halo each side), columns (data
    # at pitch columns [p, p+W)), channels (to Cp).  Flatten rows*pitch so each
    # strip DMA is one contiguous chunk.
    x_p = jnp.pad(x_nhwc.astype(jnp.bfloat16),
                  ((0, 0), (2 * p, 2 * p), (p, Wq - W - p), (0, Cp - C)))
    x_flat = x_p.reshape(N, (H + 4 * p) * Wq, Cp)

    w1f = jnp.pad(w1_hwio, ((0, 0), (0, 0), (0, Cp - C), (0, Cp - C))
                  ).reshape(K * K, Cp, Cp).astype(jnp.bfloat16)
    w2f = jnp.pad(w2_hwio, ((0, 0), (0, 0), (0, Cp - C), (0, Cp - C))
                  ).reshape(K * K, Cp, Cp).astype(jnp.bfloat16)
    b1p = jnp.pad(b1, (0, Cp - C)).reshape(1, Cp).astype(jnp.float32)
    b2p = jnp.pad(b2, (0, Cp - C)).reshape(1, Cp).astype(jnp.float32)

    kernel = functools.partial(_resblock_kernel, H=H, W=W, Cp=Cp, K=K,
                               TH=TH, S=S, Wq=Wq, NSLOT=NSLOT)

    out_flat = pl.pallas_call(
        kernel,
        out_shape=jax.ShapeDtypeStruct((N, H * Wq, Cp), jnp.float32),
        grid_spec=pltpu.PrefetchScalarGridSpec(
            num_scalar_prefetch=0,
            grid=(N, S),
            in_specs=[
                pl.BlockSpec(memory_space=pl.ANY),                      # x (HBM)
                pl.BlockSpec((K * K, Cp, Cp), lambda n, s: (0, 0, 0)),  # w1
                pl.BlockSpec((1, Cp), lambda n, s: (0, 0)),             # b1
                pl.BlockSpec((K * K, Cp, Cp), lambda n, s: (0, 0, 0)),  # w2
                pl.BlockSpec((1, Cp), lambda n, s: (0, 0)),             # b2
            ],
            out_specs=pl.BlockSpec((1, TH * Wq, Cp), lambda n, s: (n, s, 0)),
            scratch_shapes=[
                pltpu.VMEM((NSLOT, (THin + 2) * Wq, Cp), jnp.bfloat16),
                pltpu.VMEM(((THp + 2) * Wq, Cp), jnp.bfloat16),
                pltpu.SemaphoreType.DMA((NSLOT,)),
            ],
        ),
        compiler_params=pltpu.CompilerParams(
            # Strip axis is "arbitrary": the cross-strip prefetch chain must
            # stay on one core; megacore shards the batch axis.
            dimension_semantics=("parallel", "arbitrary"),
            vmem_limit_bytes=int(0.85 * cap),
        ),
    )(x_flat, w1f, b1p, w2f, b2p)

    return out_flat.reshape(N, H, Wq, Cp)[:, :, p:p + W, :C]


def resblock_reference(x_nhwc, w1_hwio, b1, w2_hwio, b2):
    """Plain-JAX reference mirroring the kernel's quantization points
    (bf16 inputs/weights and conv1 activation, f32 accumulation)."""
    f32 = jnp.float32
    xq = x_nhwc.astype(jnp.bfloat16).astype(f32)
    w1q = w1_hwio.astype(jnp.bfloat16).astype(f32)
    w2q = w2_hwio.astype(jnp.bfloat16).astype(f32)
    dn = ("NHWC", "HWIO", "NHWC")
    hi = jax.lax.Precision.HIGHEST
    r = jax.lax.conv_general_dilated(xq, w1q, (1, 1), "SAME",
                                     dimension_numbers=dn, precision=hi) + b1
    r = jnp.maximum(r, 0.0).astype(jnp.bfloat16).astype(f32)
    r = jax.lax.conv_general_dilated(r, w2q, (1, 1), "SAME",
                                     dimension_numbers=dn, precision=hi) + b2
    return r + xq


if __name__ == "__main__":
    n_feats = 4
    kernel_size = 3
    N, H, W = 2, 16, 16

    key = jax.random.PRNGKey(0)
    kx, kw1, kb1, kw2, kb2 = jax.random.split(key, 5)

    # Input in PyTorch convention (NCHW), converted to NHWC for the kernel.
    x_nchw = jax.random.normal(kx, (N, n_feats, H, W), dtype=jnp.float32)
    x_nhwc = jnp.transpose(x_nchw, (0, 2, 3, 1))

    # Deterministic parameter init (Conv2d shapes: weight OIHW, bias (O,)).
    fan_in = n_feats * kernel_size * kernel_size
    scale = 1.0 / float(fan_in) ** 0.5
    w1_oihw = jax.random.uniform(kw1, (n_feats, n_feats, kernel_size, kernel_size),
                                 jnp.float32, -scale, scale)
    b1 = jax.random.uniform(kb1, (n_feats,), jnp.float32, -scale, scale)
    w2_oihw = jax.random.uniform(kw2, (n_feats, n_feats, kernel_size, kernel_size),
                                 jnp.float32, -scale, scale)
    b2 = jax.random.uniform(kb2, (n_feats,), jnp.float32, -scale, scale)

    # OIHW -> HWIO for the NHWC kernel.
    w1_hwio = jnp.transpose(w1_oihw, (2, 3, 1, 0))
    w2_hwio = jnp.transpose(w2_oihw, (2, 3, 1, 0))

    out = resblock_pallas(x_nhwc, w1_hwio, b1, w2_hwio, b2)
    out = jax.block_until_ready(out)

    ref = resblock_reference(x_nhwc, w1_hwio, b1, w2_hwio, b2)
    max_err = float(jnp.max(jnp.abs(out - ref)))
    assert jnp.allclose(out, ref, atol=1e-2, rtol=1e-2), \
        f"mismatch vs reference (max abs err = {max_err})"

    print("KERNEL_OK")
</pallas_src>

<mosaic_0001>
module attributes {stable_mosaic.version = 11 : i64} {
  func.func @_resblock_kernel(%arg0: i32, %arg1: i32, %arg2: memref<2x640x128xbf16, #tpu.memory_space<any>>, %arg3: memref<9x128x128xbf16, #tpu.memory_space<vmem>>, %arg4: memref<1x128xf32, #tpu.memory_space<vmem>>, %arg5: memref<9x128x128xbf16, #tpu.memory_space<vmem>>, %arg6: memref<1x128xf32, #tpu.memory_space<vmem>>, %arg7: memref<1x512x128xf32, #tpu.memory_space<vmem>>, %arg8: memref<1x704x128xbf16, #tpu.memory_space<vmem>>, %arg9: memref<640x128xbf16, #tpu.memory_space<vmem>>, %arg10: memref<1x!tpu.dma_semaphore, #tpu.memory_space<semaphore_mem>>) attributes {dimension_semantics = [#tpu.dimension_semantics<parallel>, #tpu.dimension_semantics<arbitrary>], iteration_bounds = array<i64: 2, 1>, scalar_prefetch = 0 : i64, scratch_operands = 3 : i64, tpu.core_type = #tpu.core_type<tc>, window_params = [{}, {pipeline_mode = #tpu.pipeline_mode<synchronous>, transform_indices = @transform_1, window_bounds = array<i64: 9, 128, 128>}, {pipeline_mode = #tpu.pipeline_mode<synchronous>, transform_indices = @transform_2, window_bounds = array<i64: 1, 128>}, {pipeline_mode = #tpu.pipeline_mode<synchronous>, transform_indices = @transform_3, window_bounds = array<i64: 9, 128, 128>}, {pipeline_mode = #tpu.pipeline_mode<synchronous>, transform_indices = @transform_4, window_bounds = array<i64: 1, 128>}, {transform_indices = @transform_5, window_bounds = array<i64: 1, 512, 128>}]} {
    %c0_i32 = arith.constant 0 : i32
    %0 = arith.cmpi eq, %arg1, %c0_i32 : i32
    %1 = arith.extui %0 : i1 to i32
    %c0_i32_0 = arith.constant 0 : i32
    %2 = arith.cmpi ne, %1, %c0_i32_0 : i32
    scf.if %2 {
      %c512_i32_93 = arith.constant 512 : i32
      %139 = arith.muli %arg1, %c512_i32_93 : i32
      %c0_i32_94 = arith.constant 0 : i32
      %c0_i32_95 = arith.constant 0 : i32
      %c0_i32_96 = arith.constant 0 : i32
      %140 = tpu.memref_slice %arg2[%arg0, %139, %c0_i32_96] : memref<2x640x128xbf16, #tpu.memory_space<any>> -> memref<1x640x128xbf16, #tpu.memory_space<any>>
      %141 = tpu.memref_squeeze %140 : memref<1x640x128xbf16, #tpu.memory_space<any>> -> memref<640x128xbf16, #tpu.memory_space<any>>
      %c32_i32_97 = arith.constant 32 : i32
      %c0_i32_98 = arith.constant 0 : i32
      %142 = tpu.memref_slice %arg8[%c0_i32_94, %c32_i32_97, %c0_i32_98] : memref<1x704x128xbf16, #tpu.memory_space<vmem>> -> memref<1x640x128xbf16, #tpu.memory_space<vmem>>
      %143 = tpu.memref_squeeze %142 : memref<1x640x128xbf16, #tpu.memory_space<vmem>> -> memref<640x128xbf16, #tpu.memory_space<vmem>>
      %144 = tpu.memref_slice %arg10[%c0_i32_95] : memref<1x!tpu.dma_semaphore, #tpu.memory_space<semaphore_mem>> -> memref<1x!tpu.dma_semaphore, #tpu.memory_space<semaphore_mem>>
      %145 = tpu.memref_squeeze %144 : memref<1x!tpu.dma_semaphore, #tpu.memory_space<semaphore_mem>> -> memref<!tpu.dma_semaphore, #tpu.memory_space<semaphore_mem>>
      tpu.enqueue_dma source(%141 : memref<640x128xbf16, #tpu.memory_space<any>>) target(%143 : memref<640x128xbf16, #tpu.memory_space<vmem>>) target_semaphore(%145 : memref<!tpu.dma_semaphore, #tpu.memory_space<semaphore_mem>>)
    } else {
    }
    %c512_i32 = arith.constant 512 : i32
    %3 = arith.muli %arg1, %c512_i32 : i32
    %c0_i32_1 = arith.constant 0 : i32
    %c0_i32_2 = arith.constant 0 : i32
    %c0_i32_3 = arith.constant 0 : i32
    %4 = tpu.memref_slice %arg2[%arg0, %3, %c0_i32_3] : memref<2x640x128xbf16, #tpu.memory_space<any>> -> memref<1x640x128xbf16, #tpu.memory_space<any>>
    %5 = tpu.memref_squeeze %4 : memref<1x640x128xbf16, #tpu.memory_space<any>> -> memref<640x128xbf16, #tpu.memory_space<any>>
    %c32_i32 = arith.constant 32 : i32
    %c0_i32_4 = arith.constant 0 : i32
    %6 = tpu.memref_slice %arg8[%c0_i32_1, %c32_i32, %c0_i32_4] : memref<1x704x128xbf16, #tpu.memory_space<vmem>> -> memref<1x640x128xbf16, #tpu.memory_space<vmem>>
    %7 = tpu.memref_squeeze %6 : memref<1x640x128xbf16, #tpu.memory_space<vmem>> -> memref<640x128xbf16, #tpu.memory_space<vmem>>
    %8 = tpu.memref_slice %arg10[%c0_i32_2] : memref<1x!tpu.dma_semaphore, #tpu.memory_space<semaphore_mem>> -> memref<1x!tpu.dma_semaphore, #tpu.memory_space<semaphore_mem>>
    %9 = tpu.memref_squeeze %8 : memref<1x!tpu.dma_semaphore, #tpu.memory_space<semaphore_mem>> -> memref<!tpu.dma_semaphore, #tpu.memory_space<semaphore_mem>>
    tpu.wait_dma2 semaphore(%9 : memref<!tpu.dma_semaphore, #tpu.memory_space<semaphore_mem>>) src(%5 : memref<640x128xbf16, #tpu.memory_space<any>>) dst(%7 : memref<640x128xbf16, #tpu.memory_space<vmem>>)
    %c0 = arith.constant 0 : index
    %c0_5 = arith.constant 0 : index
    %c0_6 = arith.constant 0 : index
    %10 = vector.load %arg8[%c0, %c0_5, %c0_6] : memref<1x704x128xbf16, #tpu.memory_space<vmem>>, vector<1x704x128xbf16>
    %11 = vector.shape_cast %10 : vector<1x704x128xbf16> to vector<704x128xbf16>
    %12 = vector.extract_strided_slice %11 {offsets = [31, 0], sizes = [576, 128], strides = [1, 1]} : vector<704x128xbf16> to vector<576x128xbf16>
    %c0_7 = arith.constant 0 : index
    %c0_8 = arith.constant 0 : index
    %c0_9 = arith.constant 0 : index
    %13 = vector.load %arg3[%c0_7, %c0_8, %c0_9] : memref<9x128x128xbf16, #tpu.memory_space<vmem>>, vector<1x128x128xbf16>
    %14 = vector.shape_cast %13 : vector<1x128x128xbf16> to vector<128x128xbf16>
    %cst = arith.constant dense<0.000000e+00> : vector<576x128xf32>
    %15 = tpu.matmul %12, %14, %cst {dimension_numbers = #tpu.dot_dimension_numbers<[1], [0], [0], [1], [0, 0, 1, 1], [], []>} : vector<576x128xbf16>, vector<128x128xbf16>, vector<576x128xf32> -> vector<576x128xf32>
    %16 = vector.extract_strided_slice %11 {offsets = [32, 0], sizes = [576, 128], strides = [1, 1]} : vector<704x128xbf16> to vector<576x128xbf16>
    %c1 = arith.constant 1 : index
    %c0_10 = arith.constant 0 : index
    %c0_11 = arith.constant 0 : index
    %17 = vector.load %arg3[%c1, %c0_10, %c0_11] : memref<9x128x128xbf16, #tpu.memory_space<vmem>>, vector<1x128x128xbf16>
    %18 = vector.shape_cast %17 : vector<1x128x128xbf16> to vector<128x128xbf16>
    %cst_12 = arith.constant dense<0.000000e+00> : vector<576x128xf32>
    %19 = tpu.matmul %16, %18, %cst_12 {dimension_numbers = #tpu.dot_dimension_numbers<[1], [0], [0], [1], [0, 0, 1, 1], [], []>} : vector<576x128xbf16>, vector<128x128xbf16>, vector<576x128xf32> -> vector<576x128xf32>
    %20 = arith.addf %15, %19 : vector<576x128xf32>
    %21 = vector.extract_strided_slice %11 {offsets = [33, 0], sizes = [576, 128], strides = [1, 1]} : vector<704x128xbf16> to vector<576x128xbf16>
    %c2 = arith.constant 2 : index
    %c0_13 = arith.constant 0 : index
    %c0_14 = arith.constant 0 : index
    %22 = vector.load %arg3[%c2, %c0_13, %c0_14] : memref<9x128x128xbf16, #tpu.memory_space<vmem>>, vector<1x128x128xbf16>
    %23 = vector.shape_cast %22 : vector<1x128x128xbf16> to vector<128x128xbf16>
    %cst_15 = arith.constant dense<0.000000e+00> : vector<576x128xf32>
    %24 = tpu.matmul %21, %23, %cst_15 {dimension_numbers = #tpu.dot_dimension_numbers<[1], [0], [0], [1], [0, 0, 1, 1], [], []>} : vector<576x128xbf16>, vector<128x128xbf16>, vector<576x128xf32> -> vector<576x128xf32>
    %25 = arith.addf %20, %24 : vector<576x128xf32>
    %26 = vector.extract_strided_slice %11 {offsets = [63, 0], sizes = [576, 128], strides = [1, 1]} : vector<704x128xbf16> to vector<576x128xbf16>
    %c3 = arith.constant 3 : index
    %c0_16 = arith.constant 0 : index
    %c0_17 = arith.constant 0 : index
    %27 = vector.load %arg3[%c3, %c0_16, %c0_17] : memref<9x128x128xbf16, #tpu.memory_space<vmem>>, vector<1x128x128xbf16>
    %28 = vector.shape_cast %27 : vector<1x128x128xbf16> to vector<128x128xbf16>
    %cst_18 = arith.constant dense<0.000000e+00> : vector<576x128xf32>
    %29 = tpu.matmul %26, %28, %cst_18 {dimension_numbers = #tpu.dot_dimension_numbers<[1], [0], [0], [1], [0, 0, 1, 1], [], []>} : vector<576x128xbf16>, vector<128x128xbf16>, vector<576x128xf32> -> vector<576x128xf32>
    %30 = arith.addf %25, %29 : vector<576x128xf32>
    %31 = vector.extract_strided_slice %11 {offsets = [64, 0], sizes = [576, 128], strides = [1, 1]} : vector<704x128xbf16> to vector<576x128xbf16>
    %c4 = arith.constant 4 : index
    %c0_19 = arith.constant 0 : index
    %c0_20 = arith.constant 0 : index
    %32 = vector.load %arg3[%c4, %c0_19, %c0_20] : memref<9x128x128xbf16, #tpu.memory_space<vmem>>, vector<1x128x128xbf16>
    %33 = vector.shape_cast %32 : vector<1x128x128xbf16> to vector<128x128xbf16>
    %cst_21 = arith.constant dense<0.000000e+00> : vector<576x128xf32>
    %34 = tpu.matmul %31, %33, %cst_21 {dimension_numbers = #tpu.dot_dimension_numbers<[1], [0], [0], [1], [0, 0, 1, 1], [], []>} : vector<576x128xbf16>, vector<128x128xbf16>, vector<576x128xf32> -> vector<576x128xf32>
    %35 = arith.addf %30, %34 : vector<576x128xf32>
    %36 = vector.extract_strided_slice %11 {offsets = [65, 0], sizes = [576, 128], strides = [1, 1]} : vector<704x128xbf16> to vector<576x128xbf16>
    %c5 = arith.constant 5 : index
    %c0_22 = arith.constant 0 : index
    %c0_23 = arith.constant 0 : index
    %37 = vector.load %arg3[%c5, %c0_22, %c0_23] : memref<9x128x128xbf16, #tpu.memory_space<vmem>>, vector<1x128x128xbf16>
    %38 = vector.shape_cast %37 : vector<1x128x128xbf16> to vector<128x128xbf16>
    %cst_24 = arith.constant dense<0.000000e+00> : vector<576x128xf32>
    %39 = tpu.matmul %36, %38, %cst_24 {dimension_numbers = #tpu.dot_dimension_numbers<[1], [0], [0], [1], [0, 0, 1, 1], [], []>} : vector<576x128xbf16>, vector<128x128xbf16>, vector<576x128xf32> -> vector<576x128xf32>
    %40 = arith.addf %35, %39 : vector<576x128xf32>
    %41 = vector.extract_strided_slice %11 {offsets = [95, 0], sizes = [576, 128], strides = [1, 1]} : vector<704x128xbf16> to vector<576x128xbf16>
    %c6 = arith.constant 6 : index
    %c0_25 = arith.constant 0 : index
    %c0_26 = arith.constant 0 : index
    %42 = vector.load %arg3[%c6, %c0_25, %c0_26] : memref<9x128x128xbf16, #tpu.memory_space<vmem>>, vector<1x128x128xbf16>
    %43 = vector.shape_cast %42 : vector<1x128x128xbf16> to vector<128x128xbf16>
    %cst_27 = arith.constant dense<0.000000e+00> : vector<576x128xf32>
    %44 = tpu.matmul %41, %43, %cst_27 {dimension_numbers = #tpu.dot_dimension_numbers<[1], [0], [0], [1], [0, 0, 1, 1], [], []>} : vector<576x128xbf16>, vector<128x128xbf16>, vector<576x128xf32> -> vector<576x128xf32>
    %45 = arith.addf %40, %44 : vector<576x128xf32>
    %46 = vector.extract_strided_slice %11 {offsets = [96, 0], sizes = [576, 128], strides = [1, 1]} : vector<704x128xbf16> to vector<576x128xbf16>
    %c7 = arith.constant 7 : index
    %c0_28 = arith.constant 0 : index
    %c0_29 = arith.constant 0 : index
    %47 = vector.load %arg3[%c7, %c0_28, %c0_29] : memref<9x128x128xbf16, #tpu.memory_space<vmem>>, vector<1x128x128xbf16>
    %48 = vector.shape_cast %47 : vector<1x128x128xbf16> to vector<128x128xbf16>
    %cst_30 = arith.constant dense<0.000000e+00> : vector<576x128xf32>
    %49 = tpu.matmul %46, %48, %cst_30 {dimension_numbers = #tpu.dot_dimension_numbers<[1], [0], [0], [1], [0, 0, 1, 1], [], []>} : vector<576x128xbf16>, vector<128x128xbf16>, vector<576x128xf32> -> vector<576x128xf32>
    %50 = arith.addf %45, %49 : vector<576x128xf32>
    %51 = vector.extract_strided_slice %11 {offsets = [97, 0], sizes = [576, 128], strides = [1, 1]} : vector<704x128xbf16> to vector<576x128xbf16>
    %c8 = arith.constant 8 : index
    %c0_31 = arith.constant 0 : index
    %c0_32 = arith.constant 0 : index
    %52 = vector.load %arg3[%c8, %c0_31, %c0_32] : memref<9x128x128xbf16, #tpu.memory_space<vmem>>, vector<1x128x128xbf16>
    %53 = vector.shape_cast %52 : vector<1x128x128xbf16> to vector<128x128xbf16>
    %cst_33 = arith.constant dense<0.000000e+00> : vector<576x128xf32>
    %54 = tpu.matmul %51, %53, %cst_33 {dimension_numbers = #tpu.dot_dimension_numbers<[1], [0], [0], [1], [0, 0, 1, 1], [], []>} : vector<576x128xbf16>, vector<128x128xbf16>, vector<576x128xf32> -> vector<576x128xf32>
    %55 = arith.addf %50, %54 : vector<576x128xf32>
    %c0_34 = arith.constant 0 : index
    %c0_35 = arith.constant 0 : index
    %56 = vector.load %arg4[%c0_34, %c0_35] : memref<1x128xf32, #tpu.memory_space<vmem>>, vector<1x128xf32>
    %57 = vector.broadcast %56 : vector<1x128xf32> to vector<576x128xf32>
    %58 = arith.addf %55, %57 : vector<576x128xf32>
    %cst_36 = arith.constant 0.000000e+00 : f32
    %59 = vector.broadcast %cst_36 : f32 to vector<576x128xf32>
    %60 = arith.maximumf %58, %59 : vector<576x128xf32>
    %61 = vector.shape_cast %60 : vector<576x128xf32> to vector<18x32x128xf32>
    %62 = tpu.iota {dimensions = array<i32: 1>} : vector<18x32x1xi32>
    %63 = tpu.iota {dimensions = array<i32: 0>} : vector<18x32x1xi32>
    %c16_i32 = arith.constant 16 : i32
    %64 = arith.muli %arg1, %c16_i32 : i32
    %c1_i32 = arith.constant 1 : i32
    %65 = arith.subi %64, %c1_i32 : i32
    %66 = vector.broadcast %65 : i32 to vector<18x32x1xi32>
    %67 = arith.addi %66, %63 : vector<18x32x1xi32>
    %c1_i32_37 = arith.constant 1 : i32
    %68 = vector.broadcast %c1_i32_37 : i32 to vector<18x32x1xi32>
    %69 = arith.cmpi sge, %62, %68 : vector<18x32x1xi32>
    %c17_i32 = arith.constant 17 : i32
    %70 = vector.broadcast %c17_i32 : i32 to vector<18x32x1xi32>
    %71 = arith.cmpi slt, %62, %70 : vector<18x32x1xi32>
    %72 = arith.andi %69, %71 : vector<18x32x1xi1>
    %c0_i32_38 = arith.constant 0 : i32
    %73 = vector.broadcast %c0_i32_38 : i32 to vector<18x32x1xi32>
    %74 = arith.cmpi sge, %67, %73 : vector<18x32x1xi32>
    %75 = arith.andi %72, %74 : vector<18x32x1xi1>
    %c16_i32_39 = arith.constant 16 : i32
    %76 = vector.broadcast %c16_i32_39 : i32 to vector<18x32x1xi32>
    %77 = arith.cmpi slt, %67, %76 : vector<18x32x1xi32>
    %78 = arith.andi %75, %77 : vector<18x32x1xi1>
    %cst_40 = arith.constant 0.000000e+00 : f32
    %79 = vector.shape_cast %78 : vector<18x32x1xi1> to vector<18x32x1xi1>
    %80 = vector.broadcast %79 : vector<18x32x1xi1> to vector<18x32x128xi1>
    %81 = vector.broadcast %cst_40 : f32 to vector<18x32x128xf32>
    %82 = arith.select %80, %61, %81 : vector<18x32x128xi1>, vector<18x32x128xf32>
    %83 = vector.shape_cast %82 : vector<18x32x128xf32> to vector<576x128xf32>
    %84 = arith.truncf %83 : vector<576x128xf32> to vector<576x128xbf16>
    %c32 = arith.constant 32 : index
    %c0_41 = arith.constant 0 : index
    %85 = vector.load %arg9[%c32, %c0_41] : memref<640x128xbf16, #tpu.memory_space<vmem>>, vector<576x128xbf16>
    tpu.vector_store %arg9[%c32, %c0_41], %84 {strides = array<i32>} : memref<640x128xbf16, #tpu.memory_space<vmem>>, vector<576x128xbf16>,
    %c31 = arith.constant 31 : index
    %c0_42 = arith.constant 0 : index
    %86 = vector.load %arg9[%c31, %c0_42] : memref<640x128xbf16, #tpu.memory_space<vmem>>, vector<512x128xbf16>
    %c0_43 = arith.constant 0 : index
    %c0_44 = arith.constant 0 : index
    %c0_45 = arith.constant 0 : index
    %87 = vector.load %arg5[%c0_43, %c0_44, %c0_45] : memref<9x128x128xbf16, #tpu.memory_space<vmem>>, vector<1x128x128xbf16>
    %88 = vector.shape_cast %87 : vector<1x128x128xbf16> to vector<128x128xbf16>
    %cst_46 = arith.constant dense<0.000000e+00> : vector<512x128xf32>
    %89 = tpu.matmul %86, %88, %cst_46 {dimension_numbers = #tpu.dot_dimension_numbers<[1], [0], [0], [1], [0, 0, 1, 1], [], []>} : vector<512x128xbf16>, vector<128x128xbf16>, vector<512x128xf32> -> vector<512x128xf32>
    %c32_47 = arith.constant 32 : index
    %c0_48 = arith.constant 0 : index
    %90 = vector.load %arg9[%c32_47, %c0_48] : memref<640x128xbf16, #tpu.memory_space<vmem>>, vector<512x128xbf16>
    %c1_49 = arith.constant 1 : index
    %c0_50 = arith.constant 0 : index
    %c0_51 = arith.constant 0 : index
    %91 = vector.load %arg5[%c1_49, %c0_50, %c0_51] : memref<9x128x128xbf16, #tpu.memory_space<vmem>>, vector<1x128x128xbf16>
    %92 = vector.shape_cast %91 : vector<1x128x128xbf16> to vector<128x128xbf16>
    %cst_52 = arith.constant dense<0.000000e+00> : vector<512x128xf32>
    %93 = tpu.matmul %90, %92, %cst_52 {dimension_numbers = #tpu.dot_dimension_numbers<[1], [0], [0], [1], [0, 0, 1, 1], [], []>} : vector<512x128xbf16>, vector<128x128xbf16>, vector<512x128xf32> -> vector<512x128xf32>
    %94 = arith.addf %89, %93 : vector<512x128xf32>
    %c33 = arith.constant 33 : index
    %c0_53 = arith.constant 0 : index
    %95 = vector.load %arg9[%c33, %c0_53] : memref<640x128xbf16, #tpu.memory_space<vmem>>, vector<512x128xbf16>
    %c2_54 = arith.constant 2 : index
    %c0_55 = arith.constant 0 : index
    %c0_56 = arith.constant 0 : index
    %96 = vector.load %arg5[%c2_54, %c0_55, %c0_56] : memref<9x128x128xbf16, #tpu.memory_space<vmem>>, vector<1x128x128xbf16>
    %97 = vector.shape_cast %96 : vector<1x128x128xbf16> to vector<128x128xbf16>
    %cst_57 = arith.constant dense<0.000000e+00> : vector<512x128xf32>
    %98 = tpu.matmul %95, %97, %cst_57 {dimension_numbers = #tpu.dot_dimension_numbers<[1], [0], [0], [1], [0, 0, 1, 1], [], []>} : vector<512x128xbf16>, vector<128x128xbf16>, vector<512x128xf32> -> vector<512x128xf32>
    %99 = arith.addf %94, %98 : vector<512x128xf32>
    %c63 = arith.constant 63 : index
    %c0_58 = arith.constant 0 : index
    %100 = vector.load %arg9[%c63, %c0_58] : memref<640x128xbf16, #tpu.memory_space<vmem>>, vector<512x128xbf16>
    %c3_59 = arith.constant 3 : index
    %c0_60 = arith.constant 0 : index
    %c0_61 = arith.constant 0 : index
    %101 = vector.load %arg5[%c3_59, %c0_60, %c0_61] : memref<9x128x128xbf16, #tpu.memory_space<vmem>>, vector<1x128x128xbf16>
    %102 = vector.shape_cast %101 : vector<1x128x128xbf16> to vector<128x128xbf16>
    %cst_62 = arith.constant dense<0.000000e+00> : vector<512x128xf32>
    %103 = tpu.matmul %100, %102, %cst_62 {dimension_numbers = #tpu.dot_dimension_numbers<[1], [0], [0], [1], [0, 0, 1, 1], [], []>} : vector<512x128xbf16>, vector<128x128xbf16>, vector<512x128xf32> -> vector<512x128xf32>
    %104 = arith.addf %99, %103 : vector<512x128xf32>
    %c64 = arith.constant 64 : index
    %c0_63 = arith.constant 0 : index
    %105 = vector.load %arg9[%c64, %c0_63] : memref<640x128xbf16, #tpu.memory_space<vmem>>, vector<512x128xbf16>
    %c4_64 = arith.constant 4 : index
    %c0_65 = arith.constant 0 : index
    %c0_66 = arith.constant 0 : index
    %106 = vector.load %arg5[%c4_64, %c0_65, %c0_66] : memref<9x128x128xbf16, #tpu.memory_space<vmem>>, vector<1x128x128xbf16>
    %107 = vector.shape_cast %106 : vector<1x128x128xbf16> to vector<128x128xbf16>
    %cst_67 = arith.constant dense<0.000000e+00> : vector<512x128xf32>
    %108 = tpu.matmul %105, %107, %cst_67 {dimension_numbers = #tpu.dot_dimension_numbers<[1], [0], [0], [1], [0, 0, 1, 1], [], []>} : vector<512x128xbf16>, vector<128x128xbf16>, vector<512x128xf32> -> vector<512x128xf32>
    %109 = arith.addf %104, %108 : vector<512x128xf32>
    %c65 = arith.constant 65 : index
    %c0_68 = arith.constant 0 : index
    %110 = vector.load %arg9[%c65, %c0_68] : memref<640x128xbf16, #tpu.memory_space<vmem>>, vector<512x128xbf16>
    %c5_69 = arith.constant 5 : index
    %c0_70 = arith.constant 0 : index
    %c0_71 = arith.constant 0 : index
    %111 = vector.load %arg5[%c5_69, %c0_70, %c0_71] : memref<9x128x128xbf16, #tpu.memory_space<vmem>>, vector<1x128x128xbf16>
    %112 = vector.shape_cast %111 : vector<1x128x128xbf16> to vector<128x128xbf16>
    %cst_72 = arith.constant dense<0.000000e+00> : vector<512x128xf32>
    %113 = tpu.matmul %110, %112, %cst_72 {dimension_numbers = #tpu.dot_dimension_numbers<[1], [0], [0], [1], [0, 0, 1, 1], [], []>} : vector<512x128xbf16>, vector<128x128xbf16>, vector<512x128xf32> -> vector<512x128xf32>
    %114 = arith.addf %109, %113 : vector<512x128xf32>
    %c95 = arith.constant 95 : index
    %c0_73 = arith.constant 0 : index
    %115 = vector.load %arg9[%c95, %c0_73] : memref<640x128xbf16, #tpu.memory_space<vmem>>, vector<512x128xbf16>
    %c6_74 = arith.constant 6 : index
    %c0_75 = arith.constant 0 : index
    %c0_76 = arith.constant 0 : index
    %116 = vector.load %arg5[%c6_74, %c0_75, %c0_76] : memref<9x128x128xbf16, #tpu.memory_space<vmem>>, vector<1x128x128xbf16>
    %117 = vector.shape_cast %116 : vector<1x128x128xbf16> to vector<128x128xbf16>
    %cst_77 = arith.constant dense<0.000000e+00> : vector<512x128xf32>
    %118 = tpu.matmul %115, %117, %cst_77 {dimension_numbers = #tpu.dot_dimension_numbers<[1], [0], [0], [1], [0, 0, 1, 1], [], []>} : vector<512x128xbf16>, vector<128x128xbf16>, vector<512x128xf32> -> vector<512x128xf32>
    %119 = arith.addf %114, %118 : vector<512x128xf32>
    %c96 = arith.constant 96 : index
    %c0_78 = arith.constant 0 : index
    %120 = vector.load %arg9[%c96, %c0_78] : memref<640x128xbf16, #tpu.memory_space<vmem>>, vector<512x128xbf16>
    %c7_79 = arith.constant 7 : index
    %c0_80 = arith.constant 0 : index
    %c0_81 = arith.constant 0 : index
    %121 = vector.load %arg5[%c7_79, %c0_80, %c0_81] : memref<9x128x128xbf16, #tpu.memory_space<vmem>>, vector<1x128x128xbf16>
    %122 = vector.shape_cast %121 : vector<1x128x128xbf16> to vector<128x128xbf16>
    %cst_82 = arith.constant dense<0.000000e+00> : vector<512x128xf32>
    %123 = tpu.matmul %120, %122, %cst_82 {dimension_numbers = #tpu.dot_dimension_numbers<[1], [0], [0], [1], [0, 0, 1, 1], [], []>} : vector<512x128xbf16>, vector<128x128xbf16>, vector<512x128xf32> -> vector<512x128xf32>
    %124 = arith.addf %119, %123 : vector<512x128xf32>
    %c97 = arith.constant 97 : index
    %c0_83 = arith.constant 0 : index
    %125 = vector.load %arg9[%c97, %c0_83] : memref<640x128xbf16, #tpu.memory_space<vmem>>, vector<512x128xbf16>
    %c8_84 = arith.constant 8 : index
    %c0_85 = arith.constant 0 : index
    %c0_86 = arith.constant 0 : index
    %126 = vector.load %arg5[%c8_84, %c0_85, %c0_86] : memref<9x128x128xbf16, #tpu.memory_space<vmem>>, vector<1x128x128xbf16>
    %127 = vector.shape_cast %126 : vector<1x128x128xbf16> to vector<128x128xbf16>
    %cst_87 = arith.constant dense<0.000000e+00> : vector<512x128xf32>
    %128 = tpu.matmul %125, %127, %cst_87 {dimension_numbers = #tpu.dot_dimension_numbers<[1], [0], [0], [1], [0, 0, 1, 1], [], []>} : vector<512x128xbf16>, vector<128x128xbf16>, vector<512x128xf32> -> vector<512x128xf32>
    %129 = arith.addf %124, %128 : vector<512x128xf32>
    %130 = vector.extract_strided_slice %11 {offsets = [96, 0], sizes = [512, 128], strides = [1, 1]} : vector<704x128xbf16> to vector<512x128xbf16>
    %131 = arith.extf %130 : vector<512x128xbf16> to vector<512x128xf32>
    %c0_88 = arith.constant 0 : index
    %c0_89 = arith.constant 0 : index
    %132 = vector.load %arg6[%c0_88, %c0_89] : memref<1x128xf32, #tpu.memory_space<vmem>>, vector<1x128xf32>
    %133 = vector.broadcast %132 : vector<1x128xf32> to vector<512x128xf32>
    %134 = arith.addf %129, %133 : vector<512x128xf32>
    %135 = arith.addf %134, %131 : vector<512x128xf32>
    %c0_90 = arith.constant 0 : index
    %c0_91 = arith.constant 0 : index
    %c0_92 = arith.constant 0 : index
    %136 = vector.load %arg7[%c0_90, %c0_91, %c0_92] : memref<1x512x128xf32, #tpu.memory_space<vmem>>, vector<1x512x128xf32>
    %137 = vector.shape_cast %136 : vector<1x512x128xf32> to vector<512x128xf32>
    %138 = vector.shape_cast %135 : vector<512x128xf32> to vector<1x512x128xf32>
    tpu.vector_store %arg7[%c0_90, %c0_91, %c0_92], %138 {strides = array<i32>} : memref<1x512x128xf32, #tpu.memory_space<vmem>>, vector<1x512x128xf32>,
    return
  }
  func.func @transform_1(%arg0: i32, %arg1: i32) -> (i32, i32, i32) {
    %c0_i32 = arith.constant 0 : i32
    %c0_i32_0 = arith.constant 0 : i32
    %c0_i32_1 = arith.constant 0 : i32
    %c0_i32_2 = arith.constant 0 : i32
    return %c0_i32, %c0_i32_0, %c0_i32_1 : i32, i32, i32
  }
  func.func @transform_2(%arg0: i32, %arg1: i32) -> (i32, i32) {
    %c0_i32 = arith.constant 0 : i32
    %c0_i32_0 = arith.constant 0 : i32
    %c0_i32_1 = arith.constant 0 : i32
    return %c0_i32, %c0_i32_0 : i32, i32
  }
  func.func @transform_3(%arg0: i32, %arg1: i32) -> (i32, i32, i32) {
    %c0_i32 = arith.constant 0 : i32
    %c0_i32_0 = arith.constant 0 : i32
    %c0_i32_1 = arith.constant 0 : i32
    %c0_i32_2 = arith.constant 0 : i32
    return %c0_i32, %c0_i32_0, %c0_i32_1 : i32, i32, i32
  }
  func.func @transform_4(%arg0: i32, %arg1: i32) -> (i32, i32) {
    %c0_i32 = arith.constant 0 : i32
    %c0_i32_0 = arith.constant 0 : i32
    %c0_i32_1 = arith.constant 0 : i32
    return %c0_i32, %c0_i32_0 : i32, i32
  }
  func.func @transform_5(%arg0: i32, %arg1: i32) -> (i32, i32, i32) {
    %c0_i32 = arith.constant 0 : i32
    %c0_i32_0 = arith.constant 0 : i32
    return %arg0, %arg1, %c0_i32 : i32, i32, i32
  }
}

</mosaic_0001>

<bundles_post_ra>
// kernel: tpu_custom_call.1
= control target key start
LH: loop header
LB: loop body
LE: loop exit
PB: predicated region body
PF: predicated region fallthrough
CT: control target
= control target key end

     0   :  { %10 = vsyncpa [#allocation6], 0  ;;  %s22646_s0 = inlined_call_operand.hbm [shape: bf16[2,640,128], index: 0, kind: input, shape index: {}]   ;;  %s22647_s1 = inlined_call_operand.hbm [shape: bf16[9,128,128], index: 1, kind: input, shape index: {}]   ;;  %s22648_s2 = inlined_call_operand.vmem [shape: f32[1,128], index: 2, kind: input, shape index: {}]   ;;  %s22649_s3 = inlined_call_operand.hbm [shape: bf16[9,128,128], index: 3, kind: input, shape index: {}]   ;;  %s22650_s4 = inlined_call_operand.vmem [shape: f32[1,128], index: 4, kind: input, shape index: {}]   ;;  %s22651_s5 = inlined_call_operand.hbm [shape: f32[2,512,128], index: 5, kind: output, shape index: {}]  }
   0x1   :  { %11 = vsyncpa [#allocation9], 0 }
   0x2   :  { %12 = vsyncpa [#allocation7], 0 }
   0x3   :  { %14 = vsyncpa [#allocation7 + $0x1], 0  ;;  %s17867_s18 = smov 0   ;;  %s17869_s19 = smov 0  }
   0x4   :  { %s17871_s20 = smov 0   ;;  %s17873_s21 = smov 0  }
   0x5   :  { %s17875_s22 = smov 0   ;;  %s17877_s23 = smov 0  }
   0x6 LB: > { %s13774_s24 = sadd.s32 4294967295, %s17824_s23   ;;  %s13775_s25 = sadd.s32 4294967294, %s17824_s23   ;;  %s17824_s23 = sphi %s17877_s23, %s20_s23   ;;  %s17820_s22 = sphi %s17875_s22, %s24131_s22   ;;  %s17816_s21 = sphi %s17873_s21, %s24130_s21   ;;  %s17812_s20 = sphi %s17871_s20, %s24129_s20   ;;  %s17808_s19 = sphi %s17869_s19, %s24128_s19   ;;  %s17804_s18 = sphi %s17867_s18, %s24127_s18  }
   0x7   : > { %s32_s26 = sadd.s32 1, %s17820_s22  ;;  %s125_s27 = sadd.s32 1, %s17812_s20 }
   0x8   : > { %p34_p0 = scmp.ge.s32.totalorder %s32_s26, 2  ;;  %p135_p1 = scmp.ne.s32.totalorder %s17812_s20, %s17808_s19 }
   0x9   : > { %p136_p2 = scmp.eq.s32.totalorder %s13774_s24, 1  ;;  %p141_p3 = scmp.ne.s32.totalorder %s17808_s19, %s17804_s18 }
   0xa   : > { %s24133_s26 = smov (%p34_p0, %s32_s26), 0  ;;  %p142_p5 = scmp.eq.s32.totalorder %s13775_s25, 1 }
   0xb   : > { %p17907_p4 = por %p136_p2, %p135_p1  ;;  %s120_s29 = ssub.s32 %s17820_s22, %s24133_s26 }
   0xc   : > { %p13776_p6 = scmp.ge.s32.totalorder %s17824_s23, 1  ;;  %p123_p7 = scmp.eq.s32.totalorder %s120_s29, 0 }
   0xd   : > { %s22865_s28 = scalar_select %p17907_p4, 1, 0 }
   0xe   : > { %p17914_p8 = por %p142_p5, %p141_p3  ;;  %p149_p9 = scmp.lt.s32.totalorder %s17824_s23, 3 }
   0xf   : > { %s17920_s6 = scalar_select %p123_p7, %s17812_s20, %s125_s27  }
  0x10   : > { %s22866_s30 = scalar_select %p17914_p8, 1, 0 }
  0x11   : > { %p17922_p10 = pnand %p13776_p6, %p149_p9  ;;  %p17926_p11 = scmp.eq.s32.totalorder %s13774_s24, 0 }
  0x12   : > { %s17826_s9 = smov [#allocation5]   ;;  %s17827_s12 = smov [#allocation8]  }
  0x13   : > { %p16924_p12 = pneg %p17922_p10  ;;  %s161_s10 = sshll.u32 %s17826_s9, 4  ;;  %s162_s10 = int_to_ptr.vmem [resolvable:$true] %s161_s10 }
  0x14   : > { %s177_s13 = sshll.u32 %s17827_s12, 4  ;;  %s17675_s14 = scalar_lea.vmem %s162_s10, 9216  ;;  %s178_s13 = int_to_ptr.vmem [resolvable:$true] %s177_s13 }
  0x15   : > { %p17934_p13 = pnand %p17926_p11, %p16924_p12  ;;  %p17676_p1 = scmp.ne.s32.totalorder %s162_s10, %s17675_s14 }
  0x16   : > { %p17683_p5 = scmp.lt.s32.totalorder %s162_s10, %s162_s10  ;;  %p17684_p6 = scmp.lt.s32.totalorder %s17675_s14, %s17675_s14 }
  0x17   : > { %p17666_p0 = pneg %p17934_p13 }
  0x18   : > { %p17685_p7 = por %p17684_p6, %p17683_p5 }
  0x19   : > { %p17678_p2 = pnand %p17676_p1, %p17666_p0 }
  0x1b   : > { %p17679_p3 = pneg %p17678_p2 }
  0x1d   : > { %p17686_p9 = pnand %p17685_p7, %p17679_p3 }
  0x1f   : > { %17689 = shalt.err (!%p17686_p9)
}
  0x20   : > { %s17828_s15 = smov 64   ;;  %s17829_s16 = smov 4  }
  0x21   : > { %16927 = dma.hbm_to_vmem [thread:$0]  (!%p17934_p13), %s22647_s1, 9216, %s162_s10, [#allocation6], %s17828_s15, %s17828_s15, %s17829_s16  }
  0x22   : > { %s17701_s25 = scalar_lea.vmem %s178_s13, 9216  ;;  %p17709_p8 = scmp.lt.s32.totalorder %s178_s13, %s178_s13 }
  0x23   : > { %p17702_p12 = scmp.ne.s32.totalorder %s178_s13, %s17701_s25  ;;  %p17710_p4 = scmp.lt.s32.totalorder %s17701_s25, %s17701_s25 }
  0x25   : > { %p17704_p1 = pnand %p17702_p12, %p17666_p0  ;;  %p17711_p5 = por %p17710_p4, %p17709_p8 }
  0x27   : > { %p17705_p2 = pneg %p17704_p1 }
  0x29   : > { %p17712_p3 = pnand %p17711_p5, %p17705_p2 }
  0x2b   : > { %17715 = shalt.err (!%p17712_p3)
}
  0x2c   : > { %16930 = dma.hbm_to_vmem [thread:$0]  (!%p17934_p13), %s22649_s3, 9216, %s178_s13, [#allocation9], %s17828_s15, %s17828_s15, %s17829_s16  }
  0x2d   : > { %196 = sbr.rel (%p17922_p10) target bundleno = 1769 (0x6e9), region = 36 }
  0x32   : > { %17789 = dma.done.wait (%p17926_p11), [#allocation6], 9216  }
  0x33   : > { %17791 = vsyncadd (%p17926_p11), [#allocation6], 4294958080 }
  0x34   : > { %17793 = dma.done.wait (%p17926_p11), [#allocation9], 9216  }
  0x35   : > { %17795 = vsyncadd (%p17926_p11), [#allocation9], 4294958080  ;;  %s218_s9 = sand.u32 1, %s17808_s19   ;;  %s14388_s10 = smul.u32 5120, %s17816_s21 }
  0x36   : > { %s13782_s7 = sshll.u32 %s218_s9, 9  ;;  %s17830_s14 = smov [#allocation2 + $0x10]  }
  0x37   : > { %s233_s13 = scalar_lea.hbm %s22646_s0, %s14388_s10  ;;  %s242_s15 = sshll.u32 %s17830_s14, 4  ;;  %s243_s15 = int_to_ptr.vmem [resolvable:$true] %s242_s15 }
  0x38   : > { %s17716_s16 = scalar_lea.hbm %s233_s13, 5120  ;;  %s17718_s8 = scalar_lea.hbm %s22646_s0, 10240 }
  0x39   : > { %p17717_p4 = scmp.ne.s32.totalorder %s233_s13, %s17716_s16  ;;  %p17719_p8 = scmp.lt.s32.totalorder %s233_s13, %s22646_s0 }
  0x3a   : > { %p17720_p10 = scmp.lt.s32.totalorder %s17718_s8, %s17716_s16 }
  0x3c   : > { %p17721_p11 = por %p17720_p10, %p17719_p8 }
  0x3e   : > { %p17722_p13 = pnand %p17721_p11, %p17717_p4 }
  0x40   : > { %17725 = shalt.err (!%p17722_p13)  }
  0x41   : > { %s17726_s29 = scalar_lea.vmem %s243_s15, 5120  ;;  %s17831_s10 = smov [#allocation2]  }
  0x42   : > { %p17727_p0 = scmp.ne.s32.totalorder %s243_s15, %s17726_s29  ;;  %s17728_s11 = sshll.u32 %s17831_s10, 4  ;;  %s17729_s11 = int_to_ptr.vmem [resolvable:$false] %s17728_s11 }
  0x43   : > { %s17730_s12 = scalar_lea.vmem %s17729_s11, 5632  ;;  %p17731_p6 = scmp.lt.s32.totalorder %s243_s15, %s17729_s11 }
  0x44   : > { %p17732_p7 = scmp.lt.s32.totalorder %s17730_s12, %s17726_s29 }
  0x46   : > { %p17733_p9 = por %p17732_p7, %p17731_p6 }
  0x48   : > { %p17734_p12 = pnand %p17733_p9, %p17727_p0 }
  0x4a   : > { %17737 = shalt.err (!%p17734_p12)  }
  0x4b   : > { %245 = dma.hbm_to_vmem [thread:$0]  %s233_s13, 5120, %s243_s15, [#allocation4] }
  0x4c   : > { %s17979_s14 = scalar_lea.vmem [#allocation10], %s13782_s7 }
  0x4d   : > { %17796 = dma.done.wait [#allocation4], 5120 }
  0x4e   : > { %17797 = vsyncadd [#allocation4], 4294962176  ;;  %v16997_v0 = vld [vmem:[#allocation5 + $0x78] sm:$0xff]   ;;  %v16999_v2 = vld [vmem:[#allocation5 + $0x70] sm:$0xff]   ;;  %vm989_vm0 = vsmask.f32 4352 }
  0x4f   : > { %v16998_v1 = vld [vmem:[#allocation5 + $0x38] sm:$0xff]   ;;  %15386 = vmatprep.subr.bf16.mxu0 %v16997_v0  ;;  %v17000_v3 = vld [vmem:[#allocation5 + $0x30] sm:$0xff]   ;;  %v17001_v4 = vld [vmem:[#allocation5 + $0x68] sm:$0xff]   ;;  %vm1747_vm1 = vsmask.f32 7424  ;;  %s14453_s27 = sshll.u32 %s17816_s21, 13 }
  0x50   : > { %15474 = vmatprep.subr.bf16.mxu1 %v16998_v1  ;;  %15387 = vmatpush3.bf16.msra.mxu0 %v16997_v0  ;;  %v17002_v5 = vld [vmem:[#allocation5 + $0x28] sm:$0xff]   ;;  %v17003_v6 = vld [vmem:[#allocation5 + $0x60] sm:$0xff]   ;;  %v17005_v8 = vld [vmem:[#allocation5 + $0x58] sm:$0xff]   ;;  %s13681_s29 = sshll.u32 %s17979_s14, 4  ;;  %s22593_s12 = scalar_lea.hbm %s22651_s5, %s14453_s27  ;;  %s22595_s29 = int_to_ptr.vmem [resolvable:$true] %s13681_s29 }
  0x51   : > { %15475 = vmatpush3.bf16.msra.mxu1 %v16998_v1  ;;  %15388 = vmatprep.subr.bf16.mxu0 %v16999_v2  ;;  %v17004_v7 = vld [vmem:[#allocation5 + $0x20] sm:$0xff]   ;;  %v17006_v9 = vld [vmem:[#allocation5 + $0x18] sm:$0xff]   ;;  %v17007_v10 = vld [vmem:[#allocation5 + $0x50] sm:$0xff]   ;;  %s22601_s7 = scalar_lea.sflag [#allocation7], %s218_s9  ;;  %s17738_s21 = scalar_lea.vmem %s22595_s29, 8192 }
  0x52   : > { %15476 = vmatprep.subr.bf16.mxu1 %v17000_v3  ;;  %v17008_v11 = vld [vmem:[#allocation5 + $0x10] sm:$0xff]   ;;  %v250_v12 = vld [vmem:[#allocation2 + $0xc] sm:$0xf]  ;;  %v17981_v15 = vld [vmem:[#allocation2 + $0x18] sm:$0xf]  ;;  %p17739_p1 = scmp.ne.s32.totalorder %s22595_s29, %s17738_s21  ;;  %p24125_p2 = scmp.ne.s32.totalorder %s22865_s28, 0 }
  0x53   : > { %v251_v13 = vld [vmem:[#allocation2 + $0x10] sm:$0xf]  ;;  %v252_v14 = vld [vmem:[#allocation2 + $0x14] sm:$0xf]  ;;  %v254_v18 = vld [vmem:[#allocation2 + $0x1c] sm:$0xf] }
  0x54   : > { %15389 = vmatpush3.bf16.msra.mxu0 %v16999_v2  ;;  %v17983_v16 = vcombine.low %v251_v13, %v252_v14  ;;  %v13828_v17 = vcombine.low %v250_v12, %v251_v13  ;;  %v17985_v19 = vld [vmem:[#allocation2 + $0x20] sm:$0xf]  ;;  %v13829_v20 = vcombine.low %v252_v14, %v17981_v15  ;;  %v17009_v22 = vld [vmem:[#allocation5 + $0x48] sm:$0xff]   ;;  %v256_v25 = vld [vmem:[#allocation2 + $0x24] sm:$0xf]  ;;  %v18011_v63 = vcombine.low %v17981_v15, %v254_v18  ;;  %p17740_p5 = pnand %p17739_p1, %p24125_p2  ;;  %s17834_s13 = smov [#allocation10]  }
  0x55   : > { %15477 = vmatpush3.bf16.msra.mxu1 %v17000_v3  ;;  %15390 = vmatprep.subr.bf16.mxu0 %v17001_v4  ;;  %v13830_v21 = vcombine.low %v254_v18, %v17985_v19  ;;  %v17990_v30 = vld [vmem:[#allocation2 + $0x28] sm:$0xf]  ;;  %v17992_v34 = vld [vmem:[#allocation2 + $0x2c] sm:$0xf]  ;;  %v17994_v37 = vld [vmem:[#allocation2 + $0x30] sm:$0xf] }
  0x56   : > { %15478 = vmatprep.subr.bf16.mxu1 %v17002_v5  ;;  %15402 = vmatprep.mubr.bf16.mxu0 %v17983_v16  ;;  %v991_v23 = vshrl.u32 %v13828_v17, 16  ;;  %v994_v24 = vshll.u32 %v13828_v17, 16  ;;  %v999_v26 = vshrl.u32 %v13829_v20, 16  ;;  %v1002_v27 = vshll.u32 %v13829_v20, 16  ;;  %v17010_v31 = vld [vmem:[#allocation5 + $0x8] sm:$0xff]   ;;  %v17011_v38 = vld [vmem:[#allocation5 + $0x40] sm:$0xff]   ;;  %p17741_p3 = pneg %p17740_p5 }
  0x57   : > { %v1008_v28 = vshrl.u32 %v13830_v21, 16  ;;  %v1011_v29 = vshll.u32 %v13830_v21, 16  ;;  %v13831_v40 = vcombine.low %v256_v25, %v17990_v30  ;;  %v17997_v41 = vld [vmem:[#allocation2 + $0x34] sm:$0xf]  ;;  %v17999_v42 = vld [vmem:[#allocation2 + $0x38] sm:$0xf]  ;;  %v13832_v46 = vcombine.low %v17992_v34, %v17994_v37 }
  0x58   : > { %15391 = vmatpush3.bf16.msra.mxu0 %v17001_v4  ;;  %v993_v32 = vrot.slane %v991_v23, 3  ;;  %v996_v33 = vrot.slane %v994_v24, 4  ;;  %v1001_v35 = vrot.slane %v999_v26, 3  ;;  %v1004_v36 = vrot.slane %v1002_v27, 4  ;;  %v17012_v47 = vld [vmem:[#allocation5] sm:$0xff]   ;;  %v17018_v52 = vld [vmem:[#allocation5 + $0xb8] sm:$0xff]  }
  0x59   : > { %15479 = vmatpush3.bf16.msra.mxu1 %v17002_v5  ;;  %15392 = vmatprep.subr.bf16.mxu0 %v17003_v6  ;;  %v1010_v44 = vrot.slane %v1008_v28, 3  ;;  %v1013_v45 = vrot.slane %v1011_v29, 4  ;;  %v1017_v48 = vshrl.u32 %v13831_v40, 16  ;;  %v1020_v49 = vshll.u32 %v13831_v40, 16  ;;  %v18006_v58 = vld [vmem:[#allocation2 + $0x3c] sm:$0xf] }
  0x5a   : > { %15480 = vmatprep.subr.bf16.mxu1 %v17004_v7  ;;  %v997_v39 = vor.u32 %v996_v33, %v993_v32  ;;  %v1005_v43 = vor.u32 %v1004_v36, %v1001_v35  ;;  %v13833_v51 = vcombine.low %v17997_v41, %v17999_v42  ;;  %v1026_v56 = vshrl.u32 %v13832_v46, 16  ;;  %v18008_v59 = vld [vmem:[#allocation2 + $0x40] sm:$0xf]  ;;  %v18013_v0 = vld [vmem:[#allocation2 + $0x44] sm:$0xf]  ;;  %v17036_v15 = vld [vmem:[#allocation5 + $0xa8] sm:$0xff]  }
  0x5b   : > { %v1019_v53 = vrot.slane %v1017_v48, 3  ;;  %v1022_v54 = vrot.slane %v1020_v49, 4  ;;  %v1014_v55 = vor.u32 %v1013_v45, %v1010_v44  ;;  %v1029_v57 = vshll.u32 %v13832_v46, 16  ;;  %v18015_v1 = vld [vmem:[#allocation2 + $0x48] sm:$0xf]  ;;  %v17081_v35 = vld [vmem:[#allocation5 + $0xf8] sm:$0xff]  }
  0x5c   : > { %15393 = vmatpush3.bf16.msra.mxu0 %v17003_v6  ;;  %v1006_v50 = vsel %vm989_vm0, %v997_v39, %v1005_v43  ;;  %v1035_v61 = vshrl.u32 %v13833_v51, 16  ;;  %v1038_v62 = vshll.u32 %v13833_v51, 16  ;;  %v13834_v2 = vcombine.low %v18006_v58, %v18008_v59  ;;  %v18031_v20 = vld [vmem:[#allocation2 + $0x4c] sm:$0xf]  ;;  %v18033_v21 = vld [vmem:[#allocation2 + $0x50] sm:$0xf] }
  0x5d   : > { %15481 = vmatpush3.bf16.msra.mxu1 %v17004_v7  ;;  %15394 = vmatprep.subr.bf16.mxu0 %v17005_v8  ;;  %v1023_v60 = vor.u32 %v1022_v54, %v1019_v53  ;;  %v1015_v3 = vsel %vm989_vm0, %v1005_v43, %v1014_v55  ;;  %v18021_v4 = vcombine.low %v17985_v19, %v256_v25  ;;  %v1028_v5 = vrot.slane %v1026_v56, 3  ;;  %v18039_v23 = vld [vmem:[#allocation2 + $0x54] sm:$0xf]  ;;  %v18041_v24 = vld [vmem:[#allocation2 + $0x58] sm:$0xf]  ;;  %s17742_s15 = sshll.u32 %s17834_s13, 4  ;;  %s17743_s15 = int_to_ptr.vmem [resolvable:$false] %s17742_s15 }
  0x5e   : > { %15482 = vmatprep.subr.bf16.mxu1 %v17006_v9  ;;  %15490 = vmatprep.mubr.bf16.mxu1 %v1006_v50  ;;  %v1031_v6 = vrot.slane %v1029_v57, 4  ;;  %v1044_v12 = vshrl.u32 %v13834_v2, 16  ;;  %v1047_v13 = vshll.u32 %v13834_v2, 16  ;;  %v18045_v25 = vcombine.low %v17994_v37, %v17997_v41  ;;  %v18060_v37 = vld [vmem:[#allocation2 + $0x5c] sm:$0xf]  ;;  %s17744_s16 = scalar_lea.vmem %s17743_s15, 16384  ;;  %p17745_p4 = scmp.lt.s32.totalorder %s22595_s29, %s17743_s15 }
  0x5f   : > { %v18024_v7 = vsel %vm989_vm0, %v1014_v55, %v1023_v60  ;;  %v13836_v29 = vcombine.low %v18031_v20, %v18033_v21  ;;  %v13837_v33 = vcombine.low %v18039_v23, %v18041_v24  ;;  %v18063_v41 = vld [vmem:[#allocation2 + $0x60] sm:$0xf]  ;;  %v18065_v43 = vld [vmem:[#allocation2 + $0x64] sm:$0xf]  ;;  %v17058_v48 = vld [vmem:[#allocation5 + $0x98] sm:$0xff]   ;;  %v18071_v49 = vcombine.low %v17999_v42, %v18006_v58  ;;  %p17746_p8 = scmp.lt.s32.totalorder %s17744_s16, %s17738_s21 }
  0x60   : > { %15395 = vmatpush3.bf16.msra.mxu0 %v17005_v8  ;;  %v1037_v8 = vrot.slane %v1035_v61, 3  ;;  %v1032_v14 = vor.u32 %v1031_v6, %v1028_v5  ;;  %v1046_v26 = vrot.slane %v1044_v12, 3  ;;  %v1049_v27 = vrot.slane %v1047_v13, 4  ;;  %v17067_v58 = vld [vmem:[#allocation5 + $0x90] sm:$0xff]   ;;  %v17089_v5 = vld [vmem:[#allocation5 + $0xe0] sm:$0xff]  }
  0x61   : > { %15483 = vmatpush3.bf16.msra.mxu1 %v17006_v9  ;;  %15396 = vmatprep.subr.bf16.mxu0 %v17007_v10  ;;  %v1040_v9 = vrot.slane %v1038_v62, 4  ;;  %v1062_v39 = vshrl.u32 %v13836_v29, 16  ;;  %v1065_v40 = vshll.u32 %v13836_v29, 16  ;;  %v1071_v45 = vshrl.u32 %v13837_v33, 16  ;;  %v18101_v12 = vld [vmem:[#allocation2 + $0x78] sm:$0xf]  ;;  %p17747_p10 = por %p17746_p8, %p17745_p4 }
  0x62   : > { %15484 = vmatprep.subr.bf16.mxu1 %v17008_v11  ;;  %v18048_v28 = vsel %vm989_vm0, %v1023_v60, %v1032_v14  ;;  %v1050_v36 = vor.u32 %v1049_v27, %v1046_v26  ;;  %v1074_v46 = vshll.u32 %v13837_v33, 16  ;;  %v18078_v51 = vcombine.low %v18008_v59, %v18013_v0  ;;  %v17087_v59 = vld [vmem:[#allocation5 + $0xe8] sm:$0xff]   ;;  %v18123_v33 = vld [vmem:[#allocation2 + $0x80] sm:$0xf] }
  0x63   : > { %v1041_v17 = vor.u32 %v1040_v9, %v1037_v8  ;;  %v1067_v53 = vrot.slane %v1065_v40, 4  ;;  %v13838_v54 = vcombine.low %v18060_v37, %v18063_v41  ;;  %v1073_v56 = vrot.slane %v1071_v45, 3  ;;  %v18090_v60 = vld [vmem:[#allocation2 + $0x6c] sm:$0xf]  ;;  %v18095_v9 = vld [vmem:[#allocation2 + $0x74] sm:$0xf]  ;;  %p17748_p11 = pnand %p17747_p10, %p17741_p3 }
  0x64   : > { %15397 = vmatpush3.bf16.msra.mxu0 %v17007_v10  ;;  %v17027_v10 = vld [vmem:[#allocation5 + $0xb0] sm:$0xff]   ;;  %v1076_v57 = vrot.slane %v1074_v46, 4  ;;  %v18105_v13 = vcombine.low %v18033_v21, %v18039_v23  ;;  %v13841_v21 = vcombine.low %v18095_v9, %v18101_v12  ;;  %v17094_v23 = vld [vmem:[#allocation5 + $0xd8] sm:$0xff]   ;;  %v18129_v40 = vcombine.low %v18041_v24, %v18060_v37  ;;  %v17100_v24 = vld [vmem:[#allocation5 + $0xc8] sm:$0xff]  }
  0x65   : > { %15485 = vmatpush3.bf16.msra.mxu1 %v17008_v11  ;;  %15398 = vmatprep.subr.bf16.mxu0 %v17009_v22  ;;  %v13835_v11 = vcombine.low %v18013_v0, %v18015_v1  ;;  %v18074_v50 = vsel %vm989_vm0, %v1041_v17, %v1050_v36  ;;  %v1080_v62 = vshrl.u32 %v13838_v54, 16  ;;  %v1083_v0 = vshll.u32 %v13838_v54, 16 }
  0x66   : > { %15486 = vmatprep.subr.bf16.mxu1 %v17010_v31  ;;  %22871 = vst [vmem:[#allocation20_spill] sm:$0xff] %v18074_v50  ;;  %v1077_v6 = vor.u32 %v1076_v57, %v1073_v56  ;;  %v18135_v45 = vcombine.low %v18063_v41, %v18065_v43  ;;  %v18150_v57 = vld [vmem:[#allocation2 + $0x90] sm:$0xf] }
  0x67   : > { %v1053_v18 = vshrl.u32 %v13835_v11, 16  ;;  %v1056_v19 = vshll.u32 %v13835_v11, 16  ;;  %v18099_v11 = vcombine.low %v18015_v1, %v18031_v20  ;;  %v17088_v1 = vld [vmem:[#allocation5 + $0x80] sm:$0xff]  }
  0x68   : > { %15399 = vmatpush3.bf16.msra.mxu0 %v17009_v22  ;;  %v18037_v22 = vcombine.low %v17990_v30, %v17992_v34  ;;  %v18053_v30 = vsel %vm989_vm0, %v1032_v14, %v1041_v17  ;;  %v17045_v34 = vld [vmem:[#allocation5 + $0xa0] sm:$0xff]   ;;  %v1082_v17 = vrot.slane %v1080_v62, 3 }
  0x69   : > { %15487 = vmatpush3.bf16.msra.mxu1 %v17010_v31  ;;  %15400 = vmatprep.subr.bf16.mxu0 %v17011_v38  ;;  %22870 = vst [vmem:[#allocation19_spill] sm:$0xff] %v18053_v30  ;;  %v1055_v31 = vrot.slane %v1053_v18, 3  ;;  %v1058_v32 = vrot.slane %v1056_v19, 4  ;;  %v1085_v18 = vrot.slane %v1083_v0, 4 }
  0x6a   : > { %15488 = vmatprep.subr.bf16.mxu1 %v17012_v47 }
  0x6b   : > { %v1059_v44 = vor.u32 %v1058_v32, %v1055_v31  ;;  %v1086_v29 = vor.u32 %v1085_v18, %v1082_v17  ;;  %v18121_v32 = vld [vmem:[#allocation2 + $0x7c] sm:$0xf] }
  0x6c   : > { %15401 = vmatpush3.bf16.msra.mxu0 %v17011_v38  ;;  %v17082_v38 = vld [vmem:[#allocation5 + $0xf0] sm:$0xff]   ;;  %v13842_v54 = vcombine.low %v18121_v32, %v18123_v33 }
  0x6d   : > { %15489 = vmatpush3.bf16.msra.mxu1 %v17012_v47  ;;  %15562 = vmatprep.subr.bf16.mxu0 %v17018_v52  ;;  %v18067_v47 = vld [vmem:[#allocation2 + $0x68] sm:$0xf]  ;;  %v18085_v42 = vsel %vm989_vm0, %v1050_v36, %v1059_v44  ;;  %v1107_v36 = vshrl.u32 %v13841_v21, 16 }
  0x6e   : > { %15650 = vmatprep.subr.bf16.mxu1 %v17081_v35  ;;  %v13839_v55 = vcombine.low %v18065_v43, %v18067_v47  ;;  %22872 = vst [vmem:[#allocation21_spill] sm:$0xff] %v18085_v42  ;;  %v18148_v43 = vld [vmem:[#allocation2 + $0x8c] sm:$0xf]  ;;  %v1119_v62 = vshll.u32 %v13842_v54, 16 }
  0x6f   : > { %15403 = vmatmul.mubr.bf16.vlgmr.msra.gmra.mxu0 %v18011_v63  ;;  %v13844_v17 = vcombine.low %v18148_v43, %v18150_v57 }
  0x70   : > { %15491 = vmatmul.mubr.bf16.vlgmr.msra.gmra.mxu1 %v1015_v3  ;;  %15563 = vmatpush3.bf16.msra.mxu0 %v17018_v52  ;;  %v1064_v52 = vrot.slane %v1062_v39, 3  ;;  %v1089_v2 = vshrl.u32 %v13839_v55, 16  ;;  %v18093_v3 = vld [vmem:[#allocation2 + $0x70] sm:$0xf]  ;;  %v1092_v8 = vshll.u32 %v13839_v55, 16  ;;  %v1109_v55 = vrot.slane %v1107_v36, 3 }
  0x71   : > { %15406 = vmatprep.mubr.bf16.mxu0 %v18021_v4  ;;  %15494 = vmatprep.mubr.bf16.mxu1 %v18024_v7  ;;  %v13840_v14 = vcombine.low %v18090_v60, %v18093_v3  ;;  %v18125_v39 = vld [vmem:[#allocation2 + $0x84] sm:$0xf] }
  0x72   : > { %15564 = vmatprep.subr.bf16.mxu0 %v17027_v10  ;;  %15651 = vmatpush3.bf16.msra.mxu1 %v17081_v35  ;;  %v1068_v61 = vor.u32 %v1067_v53, %v1064_v52  ;;  %v1091_v19 = vrot.slane %v1089_v2, 3  ;;  %v1094_v26 = vrot.slane %v1092_v8, 4  ;;  %v18138_v52 = vsel %vm989_vm0, %v1077_v6, %v1086_v29 }
  0x73   : > { %15652 = vmatprep.subr.bf16.mxu1 %v17082_v38  ;;  %v1098_v27 = vshrl.u32 %v13840_v14, 16  ;;  %v1101_v31 = vshll.u32 %v13840_v14, 16  ;;  %22875 = vst [vmem:[#allocation24_spill] sm:$0xff] %v18138_v52  ;;  %v18157_v8 = vcombine.low %v18067_v47, %v18090_v60  ;;  %v18163_v14 = vcombine.low %v18093_v3, %v18095_v9 }
  0x74   : > { %15565 = vmatpush3.bf16.msra.mxu0 %v17027_v10  ;;  %v17076_v10 = vld [vmem:[#allocation5 + $0x88] sm:$0xff]   ;;  %v18113_v20 = vsel %vm989_vm0, %v1068_v61, %v1077_v6  ;;  %v1095_v35 = vor.u32 %v1094_v26, %v1091_v19  ;;  %v284_v6 = vld [vmem:[#allocation2 + $0x94] sm:$0xf]  ;;  %v1134_v3 = vshrl.u32 %v13844_v17, 16  ;;  %v1137_v9 = vshll.u32 %v13844_v17, 16 }
  0x75   : > { %15566 = vmatprep.subr.bf16.mxu0 %v17036_v15  ;;  %22874 = vst [vmem:[#allocation23_spill] sm:$0xff] %v18113_v20  ;;  %v1100_v46 = vrot.slane %v1098_v27, 3  ;;  %v1103_v53 = vrot.slane %v1101_v31, 4  ;;  %22877 = vst [vmem:[#allocation26_spill] sm:$0xff] %v18157_v8  ;;  %v288_v31 = vld [vmem:[#allocation2 + $0xa4] sm:$0xf] }
  0x76   : > { %15653 = vmatpush3.bf16.msra.mxu1 %v17082_v38  ;;  %v1110_v38 = vshll.u32 %v13841_v21, 16  ;;  %v18143_v37 = vsel %vm989_vm0, %v1086_v29, %v1095_v35  ;;  %22878 = vst [vmem:[#allocation27_spill] sm:$0xff] %v18163_v14  ;;  %v287_v29 = vld [vmem:[#allocation2 + $0xa0] sm:$0xf]  ;;  %v292_v17 = vld [vmem:[#allocation2 + $0xb4] sm:$0xf] }
  0x77   : > { %15407 = vmatmul.mubr.bf16.gmra.mxu0 %v18037_v22  ;;  %15654 = vmatprep.subr.bf16.mxu1 %v17087_v59  ;;  %22876 = vst [vmem:[#allocation25_spill] sm:$0xff] %v18143_v37 }
  0x78   : > { %15495 = vmatmul.mubr.bf16.gmra.mxu1 %v18048_v28  ;;  %15410 = vmatprep.mubr.bf16.mxu0 %v18045_v25  ;;  %v1112_v56 = vrot.slane %v1110_v38, 4  ;;  %v18180_v38 = vcombine.low %v18101_v12, %v18121_v32  ;;  %v290_v32 = vld [vmem:[#allocation2 + $0xac] sm:$0xf] }
  0x79   : > { %15498 = vmatprep.mubr.bf16.mxu1 %v18053_v30  ;;  %15567 = vmatpush3.bf16.msra.mxu0 %v17036_v15  ;;  %v18110_v15 = vsel %vm989_vm0, %v1059_v44, %v1068_v61  ;;  %v18131_v44 = vld [vmem:[#allocation2 + $0x88] sm:$0xf]  ;;  %v1116_v61 = vshrl.u32 %v13842_v54, 16  ;;  %v1139_v54 = vrot.slane %v1137_v9, 4 }
  0x7a   : > { %15568 = vmatprep.subr.bf16.mxu0 %v17045_v34  ;;  %15655 = vmatpush3.bf16.msra.mxu1 %v17087_v59  ;;  %22873 = vst [vmem:[#allocation22_spill] sm:$0xff] %v18110_v15  ;;  %v13843_v41 = vcombine.low %v18125_v39, %v18131_v44  ;;  %v1104_v59 = vor.u32 %v1103_v53, %v1100_v46  ;;  %22881 = vst [vmem:[#allocation30_spill] sm:$0xff] %v18180_v38  ;;  %v18182_v46 = vld [vmem:[#allocation2 + $0xa8] sm:$0xf]  ;;  %v1136_v53 = vrot.slane %v1134_v3, 3 }
  0x7b   : > { %15656 = vmatprep.subr.bf16.mxu1 %v17089_v5  ;;  %v1113_v0 = vor.u32 %v1112_v56, %v1109_v55  ;;  %v1118_v19 = vrot.slane %v1116_v61, 3  ;;  %v13847_v12 = vcombine.low %v288_v31, %v18182_v46  ;;  %v291_v61 = vld [vmem:[#allocation2 + $0xb0] sm:$0xf] }
  0x7c   : > { %v1125_v2 = vshrl.u32 %v13843_v41, 16  ;;  %v18168_v18 = vsel %vm989_vm0, %v1095_v35, %v1104_v59  ;;  %v13848_v3 = vcombine.low %v290_v32, %v291_v61 }
  0x7d   : > { %15569 = vmatpush3.bf16.msra.mxu0 %v17045_v34  ;;  %v17095_v34 = vld [vmem:[#allocation5 + $0xd0] sm:$0xff]   ;;  %22879 = vst [vmem:[#allocation28_spill] sm:$0xff] %v18168_v18  ;;  %v18171_v26 = vsel %vm989_vm0, %v1104_v59, %v1113_v0 }
  0x7e   : > { %15570 = vmatprep.subr.bf16.mxu0 %v17058_v48  ;;  %15657 = vmatpush3.bf16.msra.mxu1 %v17089_v5  ;;  %v1128_v5 = vshll.u32 %v13843_v41, 16  ;;  %22880 = vst [vmem:[#allocation29_spill] sm:$0xff] %v18171_v26  ;;  %v1127_v47 = vrot.slane %v1125_v2, 3  ;;  %v1164_v2 = vshll.u32 %v13847_v12, 16 }
  0x7f   : > { %15411 = vmatmul.mubr.bf16.gmra.mxu0 %v18071_v49  ;;  %15658 = vmatprep.subr.bf16.mxu1 %v17094_v23 }
  0x80   : > { %15499 = vmatmul.mubr.bf16.gmra.mxu1 %v18074_v50  ;;  %15414 = vmatprep.mubr.bf16.mxu0 %v18078_v51  ;;  %v1130_v60 = vrot.slane %v1128_v5, 4  ;;  %v18201_v5 = vcombine.low %v18131_v44, %v18148_v43  ;;  %v294_v43 = vld [vmem:[#allocation2 + $0xbc] sm:$0xf] }
  0x81   : > { %15502 = vmatprep.mubr.bf16.mxu1 %v18085_v42  ;;  %15571 = vmatpush3.bf16.msra.mxu0 %v17058_v48  ;;  %v17102_v48 = vld [vmem:[#allocation5 + $0x138] sm:$0xff]  }
  0x82   : > { %15572 = vmatprep.subr.bf16.mxu0 %v17067_v58  ;;  %15659 = vmatpush3.bf16.msra.mxu1 %v17094_v23  ;;  %v286_v23 = vld [vmem:[#allocation2 + $0x9c] sm:$0xf]  ;;  %22885 = vst [vmem:[#allocation34_spill] sm:$0xff] %v18201_v5 }
  0x83   : > { %15660 = vmatprep.subr.bf16.mxu1 %v17095_v34  ;;  %v13846_v55 = vcombine.low %v286_v23, %v287_v29 }
  0x85   : > { %15573 = vmatpush3.bf16.msra.mxu0 %v17067_v58  ;;  %v17101_v58 = vld [vmem:[#allocation5 + $0xc0] sm:$0xff]   ;;  %v1155_v59 = vshll.u32 %v13846_v55, 16 }
  0x86   : > { %15574 = vmatprep.subr.bf16.mxu0 %v17076_v10  ;;  %15661 = vmatpush3.bf16.msra.mxu1 %v17095_v34  ;;  %v1131_v34 = vor.u32 %v1130_v60, %v1127_v47 }
  0x87   : > { %15415 = vmatmul.mubr.bf16.gmra.mxu0 %v18099_v11  ;;  %15662 = vmatprep.subr.bf16.mxu1 %v17100_v24 }
  0x88   : > { %15503 = vmatmul.mubr.bf16.gmra.mxu1 %v18110_v15  ;;  %15418 = vmatprep.mubr.bf16.mxu0 %v18105_v13 }
  0x89   : > { %15506 = vmatprep.mubr.bf16.mxu1 %v18113_v20  ;;  %15575 = vmatpush3.bf16.msra.mxu0 %v17076_v10  ;;  %v18159_v10 = vld [vmem:[#allocation2 + $0x98] sm:$0xf] }
  0x8a   : > { %15576 = vmatprep.subr.bf16.mxu0 %v17088_v1  ;;  %15663 = vmatpush3.bf16.msra.mxu1 %v17100_v24  ;;  %v13845_v21 = vcombine.low %v284_v6, %v18159_v10 }
  0x8b   : > { %15664 = vmatprep.subr.bf16.mxu1 %v17101_v58 }
  0x8c   : > { %v1143_v35 = vshrl.u32 %v13845_v21, 16  ;;  %v1146_v36 = vshll.u32 %v13845_v21, 16  ;;  %v1157_v21 = vrot.slane %v1155_v59, 4 }
  0x8d   : > { %15577 = vmatpush3.bf16.msra.mxu0 %v17088_v1  ;;  %v1121_v1 = vrot.slane %v1119_v62, 4 }
  0x8e   : > { %15738 = vmatprep.subr.bf16.mxu0 %v17102_v48  ;;  %15665 = vmatpush3.bf16.msra.mxu1 %v17101_v58  ;;  %v18186_v48 = vcombine.low %v18123_v33, %v18125_v39  ;;  %v1145_v41 = vrot.slane %v1143_v35, 3  ;;  %v1148_v58 = vrot.slane %v1146_v36, 4  ;;  %v1140_v33 = vor.u32 %v1139_v54, %v1136_v53 }
  0x8f   : > { %15419 = vmatmul.mubr.bf16.gmra.mxu0 %v18129_v40  ;;  %v1122_v27 = vor.u32 %v1121_v1, %v1118_v19  ;;  %v1152_v39 = vshrl.u32 %v13846_v55, 16  ;;  %v18203_v19 = vld [vmem:[#allocation2 + $0xb8] sm:$0xf]  ;;  %v18206_v1 = vcombine.low %v18150_v57, %v284_v6  ;;  %v1166_v35 = vrot.slane %v1164_v2, 4  ;;  %v18218_v57 = vld [vmem:[#allocation2 + $0xc0] sm:$0xf] }
  0x90   : > { %15507 = vmatmul.mubr.bf16.gmra.mxu1 %v18138_v52  ;;  %15422 = vmatprep.mubr.bf16.mxu0 %v18135_v45  ;;  %22882 = vst [vmem:[#allocation31_spill] sm:$0xff] %v18186_v48  ;;  %v1149_v62 = vor.u32 %v1148_v58, %v1145_v41  ;;  %v18209_v47 = vsel %vm989_vm0, %v1131_v34, %v1140_v33  ;;  %v1173_v36 = vshll.u32 %v13848_v3, 16  ;;  %v296_v58 = vld [vmem:[#allocation2 + $0xc4] sm:$0xf] }
  0x91   : > { %15510 = vmatprep.mubr.bf16.mxu1 %v18143_v37  ;;  %v18189_v24 = vsel %vm989_vm0, %v1113_v0, %v1122_v27  ;;  %v18192_v56 = vsel %vm989_vm0, %v1122_v27, %v1131_v34  ;;  %v1161_v0 = vshrl.u32 %v13847_v12, 16  ;;  %22886 = vst [vmem:[#allocation35_spill] sm:$0xff] %v18206_v1  ;;  %22887 = vst [vmem:[#allocation36_spill] sm:$0xff] %v18209_v47  ;;  %v1154_v60 = vrot.slane %v1152_v39, 3  ;;  %v18224_v12 = vld [vmem:[#allocation2 + $0xc8] sm:$0xf] }
  0x92   : > { %22883 = vst [vmem:[#allocation32_spill] sm:$0xff] %v18189_v24  ;;  %22884 = vst [vmem:[#allocation33_spill] sm:$0xff] %v18192_v56  ;;  %v18212_v9 = vsel %vm989_vm0, %v1140_v33, %v1149_v62  ;;  %v13849_v44 = vcombine.low %v292_v17, %v18203_v19  ;;  %v1170_v34 = vshrl.u32 %v13848_v3, 16  ;;  %v18222_v41 = vcombine.low %v18159_v10, %v286_v23  ;;  %v298_v23 = vld [vmem:[#allocation2 + $0xcc] sm:$0xf] }
  0x93   : > { %22888 = vst [vmem:[#allocation37_spill] sm:$0xff] %v18212_v9  ;;  %v1163_v27 = vrot.slane %v1161_v0, 3  ;;  %v1158_v6 = vor.u32 %v1157_v21, %v1154_v60  ;;  %v18226_v33 = vcombine.low %v287_v29, %v288_v31  ;;  %v13850_v39 = vcombine.low %v294_v43, %v18218_v57 }
  0x94   : > { %v1179_v54 = vshrl.u32 %v13849_v44, 16  ;;  %v1182_v55 = vshll.u32 %v13849_v44, 16  ;;  %22889 = vst [vmem:[#allocation38_spill] sm:$0xff] %v18222_v41  ;;  %v1172_v0 = vrot.slane %v1170_v34, 3  ;;  %v1175_v2 = vrot.slane %v1173_v36, 4 }
  0x95   : > { %v1167_v53 = vor.u32 %v1166_v35, %v1163_v27  ;;  %22890 = vst [vmem:[#allocation39_spill] sm:$0xff] %v18226_v33  ;;  %v18230_v59 = vsel %vm989_vm0, %v1149_v62, %v1158_v6  ;;  %v13851_v10 = vcombine.low %v296_v58, %v18224_v12  ;;  %v1188_v29 = vshrl.u32 %v13850_v39, 16  ;;  %v18239_v62 = vld [vmem:[#allocation2 + $0xd0] sm:$0xf]  ;;  %v18242_v35 = vld [vmem:[#allocation2 + $0xd4] sm:$0xf] }
  0x96   : > { %22891 = vst [vmem:[#allocation40_spill] sm:$0xff] %v18230_v59  ;;  %v1181_v21 = vrot.slane %v1179_v54, 3  ;;  %v1184_v3 = vrot.slane %v1182_v55, 4  ;;  %v1191_v31 = vshll.u32 %v13850_v39, 16  ;;  %v1176_v27 = vor.u32 %v1175_v2, %v1172_v0  ;;  %v18244_v44 = vld [vmem:[#allocation2 + $0xd8] sm:$0xf] }
  0x97   : > { %15423 = vmatmul.mubr.bf16.gmra.mxu0 %v18157_v8  ;;  %v18233_v60 = vsel %vm989_vm0, %v1158_v6, %v1167_v53  ;;  %v1197_v34 = vshrl.u32 %v13851_v10, 16  ;;  %v1200_v36 = vshll.u32 %v13851_v10, 16  ;;  %v18247_v54 = vcombine.low %v18182_v46, %v290_v32  ;;  %v18257_v2 = vld [vmem:[#allocation2 + $0xdc] sm:$0xf]  ;;  %v18262_v32 = vld [vmem:[#allocation2 + $0xe0] sm:$0xf] }
  0x98   : > { %15511 = vmatmul.mubr.bf16.gmra.mxu1 %v18168_v18  ;;  %15426 = vmatprep.mubr.bf16.mxu0 %v18163_v14  ;;  %22892 = vst [vmem:[#allocation41_spill] sm:$0xff] %v18233_v60  ;;  %v1185_v6 = vor.u32 %v1184_v3, %v1181_v21  ;;  %v18249_v55 = vcombine.low %v291_v61, %v292_v17  ;;  %v18265_v61 = vld [vmem:[#allocation2 + $0xe4] sm:$0xf] }
  0x99   : > { %15514 = vmatprep.mubr.bf16.mxu1 %v18171_v26  ;;  %22893 = vst [vmem:[#allocation42_spill] sm:$0xff] %v18247_v54  ;;  %v13852_v39 = vcombine.low %v298_v23, %v18239_v62  ;;  %v13853_v0 = vcombine.low %v18242_v35, %v18244_v44  ;;  %v1199_v3 = vrot.slane %v1197_v34, 3  ;;  %v1202_v46 = vrot.slane %v1200_v36, 4 }
  0x9a   : > { %22894 = vst [vmem:[#allocation43_spill] sm:$0xff] %v18249_v55  ;;  %v18260_v21 = vsel %vm989_vm0, %v1176_v27, %v1185_v6  ;;  %v13854_v36 = vcombine.low %v18257_v2, %v18262_v32 }
  0x9b   : > { %22896 = vst [vmem:[#allocation45_spill] sm:$0xff] %v18260_v21  ;;  %v1209_v10 = vshll.u32 %v13852_v39, 16  ;;  %v1203_v34 = vor.u32 %v1202_v46, %v1199_v3  ;;  %v18291_v3 = vld [vmem:[#allocation2 + $0xf8] sm:$0xf] }
  0x9f   : > { %15427 = vmatmul.mubr.bf16.gmra.mxu0 %v18180_v38 }
  0xa0   : > { %15515 = vmatmul.mubr.bf16.gmra.mxu1 %v18189_v24  ;;  %15430 = vmatprep.mubr.bf16.mxu0 %v18186_v48 }
  0xa1   : > { %15518 = vmatprep.mubr.bf16.mxu1 %v18192_v56 }
  0xa7   : > { %15431 = vmatmul.mubr.bf16.gmra.mxu0 %v18201_v5 }
  0xa8   : > { %15519 = vmatmul.mubr.bf16.gmra.mxu1 %v18209_v47  ;;  %15434 = vmatprep.mubr.bf16.mxu0 %v18206_v1  ;;  %v1224_v47 = vshrl.u32 %v13854_v36, 16 }
  0xa9   : > { %15522 = vmatprep.mubr.bf16.mxu1 %v18212_v9  ;;  %v18253_v9 = vsel %vm989_vm0, %v1167_v53, %v1176_v27  ;;  %v1206_v53 = vshrl.u32 %v13852_v39, 16  ;;  %v1218_v27 = vshll.u32 %v13853_v0, 16  ;;  %v18287_v39 = vcombine.low %v18218_v57, %v296_v58 }
  0xaa   : > { %22895 = vst [vmem:[#allocation44_spill] sm:$0xff] %v18253_v9 }
  0xab   : > { %22899 = vst [vmem:[#allocation48_spill] sm:$0xff] %v18287_v39  ;;  %v1208_v46 = vrot.slane %v1206_v53, 3  ;;  %v18305_v53 = vcombine.low %v18224_v12, %v298_v23 }
  0xad   : > { %22901 = vst [vmem:[#allocation50_spill] sm:$0xff] %v18305_v53 }
  0xaf   : > { %15435 = vmatmul.mubr.bf16.gmra.mxu0 %v18222_v41  ;;  %v1227_v41 = vshll.u32 %v13854_v36, 16  ;;  %v18309_v36 = vld [vmem:[#allocation2 + $0x100] sm:$0xf] }
  0xb0   : > { %15523 = vmatmul.mubr.bf16.gmra.mxu1 %v18230_v59  ;;  %15438 = vmatprep.mubr.bf16.mxu0 %v18226_v33  ;;  %v1190_v59 = vrot.slane %v1188_v29, 3  ;;  %v1193_v33 = vrot.slane %v1191_v31, 4  ;;  %v18269_v29 = vld [vmem:[#allocation2 + $0xe8] sm:$0xf]  ;;  %v1215_v31 = vshrl.u32 %v13853_v0, 16 }
  0xb1   : > { %15526 = vmatprep.mubr.bf16.mxu1 %v18233_v60  ;;  %v18275_v60 = vcombine.low %v18203_v19, %v294_v43  ;;  %v18289_v0 = vld [vmem:[#allocation2 + $0xf4] sm:$0xf]  ;;  %v1211_v19 = vrot.slane %v1209_v10, 4 }
  0xb2   : > { %v1194_v17 = vor.u32 %v1193_v33, %v1190_v59  ;;  %v18281_v33 = vld [vmem:[#allocation2 + $0xf0] sm:$0xf]  ;;  %v1217_v43 = vrot.slane %v1215_v31, 3  ;;  %v1226_v31 = vrot.slane %v1224_v47, 3 }
  0xb3   : > { %22897 = vst [vmem:[#allocation46_spill] sm:$0xff] %v18275_v60  ;;  %v1212_v58 = vor.u32 %v1211_v19, %v1208_v46  ;;  %v18313_v46 = vcombine.low %v18239_v62, %v18242_v35  ;;  %v18315_v19 = vld [vmem:[#allocation2 + $0x104] sm:$0xf] }
  0xb4   : > { %v18284_v59 = vsel %vm989_vm0, %v1185_v6, %v1194_v17 }
  0xb5   : > { %22898 = vst [vmem:[#allocation47_spill] sm:$0xff] %v18284_v59  ;;  %22902 = vst [vmem:[#allocation51_spill] sm:$0xff] %v18313_v46  ;;  %v18320_v12 = vsel %vm989_vm0, %v1203_v34, %v1212_v58 }
  0xb6   : > { %22903 = vst [vmem:[#allocation52_spill] sm:$0xff] %v18320_v12 }
  0xb7   : > { %15439 = vmatmul.mubr.bf16.gmra.mxu0 %v18247_v54  ;;  %v18294_v54 = vsel %vm989_vm0, %v1194_v17, %v1203_v34  ;;  %v13857_v17 = vcombine.low %v18289_v0, %v18291_v3 }
  0xb8   : > { %15527 = vmatmul.mubr.bf16.gmra.mxu1 %v18253_v9  ;;  %15442 = vmatprep.mubr.bf16.mxu0 %v18249_v55  ;;  %v13855_v9 = vcombine.low %v18265_v61, %v18269_v29  ;;  %v18279_v55 = vld [vmem:[#allocation2 + $0xec] sm:$0xf]  ;;  %22900 = vst [vmem:[#allocation49_spill] sm:$0xff] %v18294_v54 }
  0xb9   : > { %15530 = vmatprep.mubr.bf16.mxu1 %v18260_v21  ;;  %v1220_v21 = vrot.slane %v1218_v27, 4  ;;  %v13856_v57 = vcombine.low %v18279_v55, %v18281_v33  ;;  %v1229_v27 = vrot.slane %v1227_v41, 4  ;;  %v1251_v47 = vshrl.u32 %v13857_v17, 16 }
  0xba   : > { %v1233_v6 = vshrl.u32 %v13855_v9, 16  ;;  %v1236_v1 = vshll.u32 %v13855_v9, 16  ;;  %v18307_v9 = vld [vmem:[#allocation2 + $0xfc] sm:$0xf]  ;;  %v1254_v41 = vshll.u32 %v13857_v17, 16 }
  0xbb   : > { %v1221_v10 = vor.u32 %v1220_v21, %v1217_v43  ;;  %v1242_v56 = vshrl.u32 %v13856_v57, 16  ;;  %v1230_v62 = vor.u32 %v1229_v27, %v1226_v31  ;;  %v18335_v21 = vcombine.low %v18244_v44, %v18257_v2  ;;  %v18345_v27 = vld [vmem:[#allocation2 + $0x114] sm:$0xf] }
  0xbc   : > { %v1253_v17 = vrot.slane %v1251_v47, 3  ;;  %v18343_v31 = vcombine.low %v18262_v32, %v18265_v61 }
  0xbd   : > { %v18323_v23 = vsel %vm989_vm0, %v1212_v58, %v1221_v10  ;;  %22905 = vst [vmem:[#allocation54_spill] sm:$0xff] %v18335_v21  ;;  %v1244_v43 = vrot.slane %v1242_v56, 3  ;;  %v18339_v58 = vld [vmem:[#allocation2 + $0x110] sm:$0xf] }
  0xbe   : > { %22904 = vst [vmem:[#allocation53_spill] sm:$0xff] %v18323_v23  ;;  %22906 = vst [vmem:[#allocation55_spill] sm:$0xff] %v18343_v31 }
  0xbf   : > { %15443 = vmatmul.mubr.bf16.gmra.mxu0 %v18275_v60  ;;  %v1235_v60 = vrot.slane %v1233_v6, 3 }
  0xc0   : > { %15531 = vmatmul.mubr.bf16.gmra.mxu1 %v18284_v59  ;;  %15446 = vmatprep.mubr.bf16.mxu0 %v18287_v39  ;;  %v1238_v59 = vrot.slane %v1236_v1, 4  ;;  %v1245_v39 = vshll.u32 %v13856_v57, 16  ;;  %v13858_v1 = vcombine.low %v18307_v9, %v18309_v36  ;;  %v18337_v57 = vld [vmem:[#allocation2 + $0x10c] sm:$0xf] }
  0xc1   : > { %15534 = vmatprep.mubr.bf16.mxu1 %v18294_v54  ;;  %v18317_v54 = vld [vmem:[#allocation2 + $0x108] sm:$0xf] }
  0xc2   : > { %v13859_v35 = vcombine.low %v18315_v19, %v18317_v54  ;;  %v1239_v34 = vor.u32 %v1238_v59, %v1235_v60  ;;  %v1247_v6 = vrot.slane %v1245_v39, 4  ;;  %v18350_v60 = vsel %vm989_vm0, %v1221_v10, %v1230_v62 }
  0xc3   : > { %22907 = vst [vmem:[#allocation56_spill] sm:$0xff] %v18350_v60  ;;  %v13860_v59 = vcombine.low %v18337_v57, %v18339_v58  ;;  %v18365_v39 = vcombine.low %v18269_v29, %v18279_v55  ;;  %v320_v29 = vld [vmem:[#allocation2 + $0x124] sm:$0xf] }
  0xc4   : > { %v1269_v56 = vshrl.u32 %v13859_v35, 16  ;;  %v1272_v44 = vshll.u32 %v13859_v35, 16  ;;  %v18353_v2 = vsel %vm989_vm0, %v1230_v62, %v1239_v34  ;;  %v1248_v32 = vor.u32 %v1247_v6, %v1244_v43  ;;  %v319_v43 = vld [vmem:[#allocation2 + $0x120] sm:$0xf] }
  0xc5   : > { %22908 = vst [vmem:[#allocation57_spill] sm:$0xff] %v18353_v2  ;;  %22909 = vst [vmem:[#allocation58_spill] sm:$0xff] %v18365_v39  ;;  %v1278_v35 = vshrl.u32 %v13860_v59, 16 }
  0xc6   : > { %v1274_v62 = vrot.slane %v1272_v44, 4  ;;  %v18372_v6 = vsel %vm989_vm0, %v1239_v34, %v1248_v32  ;;  %v18385_v34 = vld [vmem:[#allocation2 + $0x12c] sm:$0xf] }
  0xc7   : > { %15447 = vmatmul.mubr.bf16.gmra.mxu0 %v18305_v53  ;;  %v1263_v53 = vshll.u32 %v13858_v1, 16  ;;  %22911 = vst [vmem:[#allocation60_spill] sm:$0xff] %v18372_v6 }
  0xc8   : > { %15535 = vmatmul.mubr.bf16.gmra.mxu1 %v18320_v12  ;;  %15450 = vmatprep.mubr.bf16.mxu0 %v18313_v46  ;;  %v1256_v12 = vrot.slane %v1254_v41, 4  ;;  %v1260_v46 = vshrl.u32 %v13858_v1, 16  ;;  %v1271_v1 = vrot.slane %v1269_v56, 3 }
  0xc9   : > { %15538 = vmatprep.mubr.bf16.mxu1 %v18323_v23  ;;  %v18347_v23 = vld [vmem:[#allocation2 + $0x118] sm:$0xf]  ;;  %v1265_v41 = vrot.slane %v1263_v53, 4  ;;  %v321_v53 = vld [vmem:[#allocation2 + $0x128] sm:$0xf] }
  0xca   : > { %v13861_v61 = vcombine.low %v18345_v27, %v18347_v23  ;;  %v1257_v10 = vor.u32 %v1256_v12, %v1253_v17  ;;  %v1262_v47 = vrot.slane %v1260_v46, 3  ;;  %v18383_v46 = vcombine.low %v18291_v3, %v18307_v9 }
  0xcb   : > { %v1275_v12 = vor.u32 %v1274_v62, %v1271_v1  ;;  %v1280_v17 = vrot.slane %v1278_v35, 3  ;;  %v13864_v9 = vcombine.low %v18385_v34, %v18385_v34 }
  0xcc   : > { %v1290_v24 = vshll.u32 %v13861_v61, 16  ;;  %v18375_v55 = vsel %vm989_vm0, %v1248_v32, %v1257_v10  ;;  %22913 = vst [vmem:[#allocation62_spill] sm:$0xff] %v18383_v46  ;;  %v18389_v32 = vcombine.low %v18309_v36, %v18315_v19 }
  0xcd   : > { %22912 = vst [vmem:[#allocation61_spill] sm:$0xff] %v18375_v55  ;;  %v1314_v35 = vshrl.u32 %v13864_v9, 16 }
  0xce   : > { %22914 = vst [vmem:[#allocation63_spill] sm:$0xff] %v18389_v32 }
  0xcf   : > { %15451 = vmatmul.mubr.bf16.gmra.mxu0 %v18335_v21  ;;  %v1281_v21 = vshll.u32 %v13860_v59, 16  ;;  %v1292_v59 = vrot.slane %v1290_v24, 4 }
  0xd0   : > { %15539 = vmatmul.mubr.bf16.gmra.mxu1 %v18350_v60  ;;  %15454 = vmatprep.mubr.bf16.mxu0 %v18343_v31  ;;  %v18369_v60 = vcombine.low %v18281_v33, %v18289_v0  ;;  %v1287_v31 = vshrl.u32 %v13861_v61, 16  ;;  %v1266_v33 = vor.u32 %v1265_v41, %v1262_v47 }
  0xd1   : > { %15542 = vmatprep.mubr.bf16.mxu1 %v18353_v2  ;;  %v318_v2 = vld [vmem:[#allocation2 + $0x11c] sm:$0xf]  ;;  %v1283_v56 = vrot.slane %v1281_v21, 4  ;;  %v1751_v21 = vshll.u32 %v17983_v16, 16 }
  0xd2   : > { %22910 = vst [vmem:[#allocation59_spill] sm:$0xff] %v18369_v60  ;;  %v13862_v0 = vcombine.low %v318_v2, %v319_v43  ;;  %v1289_v44 = vrot.slane %v1287_v31, 3  ;;  %v18392_v61 = vsel %vm989_vm0, %v1257_v10, %v1266_v33  ;;  %v18395_v3 = vsel %vm989_vm0, %v1266_v33, %v1275_v12 }
  0xd3   : > { %22915 = vst [vmem:[#allocation64_spill] sm:$0xff] %v18392_v61  ;;  %22916 = vst [vmem:[#allocation65_spill] sm:$0xff] %v18395_v3  ;;  %v1284_v24 = vor.u32 %v1283_v56, %v1280_v17  ;;  %v18406_v10 = vcombine.low %v18317_v54, %v18337_v57  ;;  %v18410_v33 = vcombine.low %v18339_v58, %v18345_v27  ;;  %v1317_v57 = vshll.u32 %v13864_v9, 16 }
  0xd4   : > { %v1296_v47 = vshrl.u32 %v13862_v0, 16  ;;  %v1299_v41 = vshll.u32 %v13862_v0, 16  ;;  %v1293_v31 = vor.u32 %v1292_v59, %v1289_v44  ;;  %v18425_v27 = vcombine.low %v18347_v23, %v318_v2 }
  0xd5   : > { %22917 = vst [vmem:[#allocation66_spill] sm:$0xff] %v18406_v10  ;;  %22918 = vst [vmem:[#allocation67_spill] sm:$0xff] %v18410_v33  ;;  %v18413_v0 = vsel %vm989_vm0, %v1275_v12, %v1284_v24  ;;  %v1749_v12 = vshrl.u32 %v17983_v16, 16  ;;  %v18428_v44 = vcombine.low %v319_v43, %v320_v29  ;;  %v1316_v59 = vrot.slane %v1314_v35, 3  ;;  %v17109_v16 = vld [vmem:[#allocation5 + $0x178] sm:$0xff]  }
  0xd6   : > { %v1298_v1 = vrot.slane %v1296_v47, 3  ;;  %v1301_v62 = vrot.slane %v1299_v41, 4  ;;  %22919 = vst [vmem:[#allocation68_spill] sm:$0xff] %v18413_v0  ;;  %22921 = vst [vmem:[#allocation70_spill] sm:$0xff] %v18425_v27  ;;  %v1753_v47 = vrot.slane %v1751_v21, 1  ;;  %15826 = vmatprep.subr.bf16.mxu1 %v17109_v16  ;;  %v1764_v21 = vshll.u32 %v18021_v4, 16 }
  0xd7   : > { %15455 = vmatmul.mubr.bf16.gmra.mxu0 %v18365_v39  ;;  %22922 = vst [vmem:[#allocation71_spill] sm:$0xff] %v18428_v44  ;;  %v1772_v35 = vshll.u32 %v18037_v22, 16 }
  0xd8   : > { %15543 = vmatmul.mubr.bf16.gmra.mxu1 %v18372_v6  ;;  %15458 = vmatprep.mubr.bf16.mxu0 %v18369_v60  ;;  %v1302_v54 = vor.u32 %v1301_v62, %v1298_v1  ;;  %v1754_v2 = vor.u32 %v1753_v47, %v1749_v12  ;;  %v1768_v62 = vshrl.u32 %v18021_v4, 16  ;;  %v1776_v12 = vshrl.u32 %v18037_v22, 16 }
  0xd9   : > { %15546 = vmatprep.mubr.bf16.mxu1 %v18375_v55  ;;  %v13863_v55 = vcombine.low %v320_v29, %v321_v53  ;;  %v18443_v29 = vcombine.low %v321_v53, %v18385_v34  ;;  %v1766_v53 = vrot.slane %v1764_v21, 1  ;;  %v1788_v47 = vshll.u32 %v18071_v49, 16 }
  0xda   : > { %v18431_v41 = vsel %vm989_vm0, %v1293_v31, %v1302_v54 }
  0xdb   : > { %v1305_v36 = vshrl.u32 %v13863_v55, 16  ;;  %v1308_v19 = vshll.u32 %v13863_v55, 16  ;;  %v18416_v55 = vsel %vm989_vm0, %v1284_v24, %v1293_v31  ;;  %22923 = vst [vmem:[#allocation72_spill] sm:$0xff] %v18431_v41  ;;  %v1319_v24 = vrot.slane %v1317_v57, 4 }
  0xdc   : > { %22920 = vst [vmem:[#allocation69_spill] sm:$0xff] %v18416_v55  ;;  %v1790_v21 = vrot.slane %v1788_v47, 1 }
  0xdd   : > { %v1307_v17 = vrot.slane %v1305_v36, 3  ;;  %v1310_v56 = vrot.slane %v1308_v19, 4  ;;  %v1756_v36 = vshll.u32 %v18011_v63, 16  ;;  %v1320_v23 = vor.u32 %v1319_v24, %v1316_v59 }
  0xde   : > { %v1760_v19 = vshrl.u32 %v18011_v63, 16  ;;  %v1770_v63 = vor.u32 %v1768_v62, %v1766_v53  ;;  %v1784_v59 = vshrl.u32 %v18045_v25, 16  ;;  %v17111_v62 = vld [vmem:[#allocation5 + $0x168] sm:$0xff]  }
  0xdf   : > { %15459 = vmatmul.mubr.bf16.gmra.mxu0 %v18383_v46  ;;  %v18422_v58 = vor.u32 %v1310_v56, %v1307_v17  ;;  %v1758_v43 = vrot.slane %v1756_v36, 1  ;;  %v1774_v56 = vrot.slane %v1772_v35, 1  ;;  %v17103_v36 = vld [vmem:[#allocation5 + $0x130] sm:$0xff]  }
  0xe0   : > { %15547 = vmatmul.mubr.bf16.gmra.mxu1 %v18392_v61  ;;  %15462 = vmatprep.mubr.bf16.mxu0 %v18389_v32 }
  0xe1   : > { %15550 = vmatprep.mubr.bf16.mxu1 %v18395_v3  ;;  %v18436_v9 = vsel %vm989_vm0, %v1302_v54, %v18422_v58  ;;  %v1321_v31 = vsel %vm989_vm0, %v18422_v58, %v1320_v23  ;;  %v1759_v1 = vsel %vm1747_vm1, %v1754_v2, %v1758_v43  ;;  %v1762_v17 = vor.u32 %v1760_v19, %v1758_v43  ;;  %v17110_v2 = vld [vmem:[#allocation5 + $0x170] sm:$0xff]  }
  0xe2   : > { %22924 = vst [vmem:[#allocation73_spill] sm:$0xff] %v18436_v9  ;;  %v1780_v54 = vshll.u32 %v18045_v25, 16  ;;  %v18460_v24 = vsel %vm1747_vm1, %v1770_v63, %v1774_v56  ;;  %v1778_v43 = vor.u32 %v1776_v12, %v1774_v56  ;;  %v1804_v63 = vshll.u32 %v18099_v11, 16  ;;  %v17105_v56 = vld [vmem:[#allocation5 + $0x120] sm:$0xff]  }
  0xe3   : > { %v1767_v57 = vsel %vm1747_vm1, %v1762_v17, %v1766_v53  ;;  %v1792_v17 = vshrl.u32 %v18071_v49, 16 }
  0xe4   : > { %v1782_v23 = vrot.slane %v1780_v54, 1 }
  0xe5   : > { %v1794_v12 = vor.u32 %v1792_v17, %v1790_v21  ;;  %v1820_v17 = vshll.u32 %v18129_v40, 16 }
  0xe6   : > { %v1786_v19 = vor.u32 %v1784_v59, %v1782_v23  ;;  %v18467_v35 = vsel %vm1747_vm1, %v1778_v43, %v1782_v23  ;;  %v18480_v59 = vld [vmem:[#allocation2 + $0x134] sm:$0xf]  ;;  %v17115_v43 = vld [vmem:[#allocation5 + $0x158] sm:$0xff]  }
  0xe7   : > { %15463 = vmatmul.mubr.bf16.gmra.mxu0 %v18406_v10 }
  0xe8   : > { %15551 = vmatmul.mubr.bf16.gmra.mxu1 %v18413_v0  ;;  %15466 = vmatprep.mubr.bf16.mxu0 %v18410_v33  ;;  %v18472_v53 = vsel %vm1747_vm1, %v1786_v19, %v1790_v21  ;;  %v1808_v21 = vshrl.u32 %v18099_v11, 16 }
  0xe9   : > { %15554 = vmatprep.mubr.bf16.mxu1 %v18416_v55  ;;  %22925 = vst [vmem:[#allocation74_spill] sm:$0xff] %v18472_v53 }
  0xef   : > { %15467 = vmatmul.mubr.bf16.gmra.mxu0 %v18425_v27 }
  0xf0   : > { %15555 = vmatmul.mubr.bf16.gmra.mxu1 %v18431_v41  ;;  %15470 = vmatprep.mubr.bf16.mxu0 %v18428_v44 }
  0xf1   : > { %15558 = vmatprep.mubr.bf16.mxu1 %v18436_v9 }
  0xf7   : > { %15471 = vmatmul.mubr.bf16.gmra.mxu0 %v18443_v29 }
  0xf8   : > { %15559 = vmatmul.mubr.bf16.gmra.mxu1 %v1321_v31  ;;  %15578 = vmatprep.mubr.bf16.mxu0 %v1759_v1  ;;  %v17104_v31 = vld [vmem:[#allocation5 + $0x128] sm:$0xff]   ;;  %v1796_v1 = vshll.u32 %v18078_v51, 16 }
  0xf9   : > { %15666 = vmatprep.mubr.bf16.mxu1 %v18024_v7  ;;  %v17521_v7 = vld [vmem:[#allocation5 + $0x138] sm:$0xff]  }
  0xfa   : > { %v1798_v54 = vrot.slane %v1796_v1, 1 }
  0xfc   : > { %v18489_v19 = vsel %vm1747_vm1, %v1794_v12, %v1798_v54 }
  0xfd   : > { %22927 = vst [vmem:[#allocation76_spill] sm:$0xff] %v18489_v19 }
  0xff   : > { %15579 = vmatmul.mubr.bf16.vlgmr.msra.gmra.mxu0 %v1767_v57  ;;  %v18475_v57 = vld [vmem:[#allocation2 + $0x130] sm:$0xf] }
 0x100   : > { %15739 = vmatpush3.bf16.msra.mxu0 %v17521_v7  ;;  %15667 = vmatmul.mubr.bf16.vlgmr.msra.gmra.mxu1 %v18048_v28  ;;  %v1800_v28 = vshrl.u32 %v18078_v51, 16  ;;  %v18485_v23 = vcombine.low %v18475_v57, %v18480_v59  ;;  %v1812_v7 = vshll.u32 %v18105_v13, 16 }
 0x101   : > { %15582 = vmatprep.mubr.bf16.mxu0 %v18460_v24  ;;  %15670 = vmatprep.mubr.bf16.mxu1 %v18053_v30 }
 0x102   : > { %15740 = vmatprep.subr.bf16.mxu0 %v17103_v36  ;;  %15827 = vmatpush3.bf16.msra.mxu1 %v17109_v16  ;;  %v17113_v16 = vld [vmem:[#allocation5 + $0x160] sm:$0xff]   ;;  %v1802_v47 = vor.u32 %v1800_v28, %v1798_v54  ;;  %22926 = vst [vmem:[#allocation75_spill] sm:$0xff] %v18485_v23  ;;  %v17107_v28 = vld [vmem:[#allocation5 + $0x110] sm:$0xff]  }
 0x103   : > { %15828 = vmatprep.subr.bf16.mxu1 %v17110_v2 }
 0x104   : > { %15741 = vmatpush3.bf16.msra.mxu0 %v17103_v36  ;;  %v1806_v36 = vrot.slane %v1804_v63, 1  ;;  %v17116_v63 = vld [vmem:[#allocation5 + $0x150] sm:$0xff]  }
 0x105   : > { %15742 = vmatprep.subr.bf16.mxu0 %v17104_v31 }
 0x106   : > { %15829 = vmatpush3.bf16.msra.mxu1 %v17110_v2  ;;  %v17106_v2 = vld [vmem:[#allocation5 + $0x118] sm:$0xff]   ;;  %v18493_v1 = vsel %vm1747_vm1, %v1802_v47, %v1806_v36  ;;  %v1810_v54 = vor.u32 %v1808_v21, %v1806_v36  ;;  %v1822_v47 = vrot.slane %v1820_v17, 1  ;;  %v1832_v36 = vshrl.u32 %v18135_v45, 16 }
 0x107   : > { %15583 = vmatmul.mubr.bf16.gmra.mxu0 %v18467_v35  ;;  %15830 = vmatprep.subr.bf16.mxu1 %v17111_v62  ;;  %22928 = vst [vmem:[#allocation77_spill] sm:$0xff] %v18493_v1  ;;  %v1836_v21 = vshll.u32 %v18157_v8, 16 }
 0x108   : > { %15671 = vmatmul.mubr.bf16.gmra.mxu1 %v18074_v50  ;;  %15586 = vmatprep.mubr.bf16.mxu0 %v18472_v53 }
 0x109   : > { %15674 = vmatprep.mubr.bf16.mxu1 %v18085_v42  ;;  %15743 = vmatpush3.bf16.msra.mxu0 %v17104_v31  ;;  %v1816_v31 = vshrl.u32 %v18105_v13, 16  ;;  %v17121_v42 = vld [vmem:[#allocation5 + $0x148] sm:$0xff]  }
 0x10a   : > { %15744 = vmatprep.subr.bf16.mxu0 %v17105_v56  ;;  %15831 = vmatpush3.bf16.msra.mxu1 %v17111_v62  ;;  %v1814_v62 = vrot.slane %v1812_v7, 1 }
 0x10b   : > { %15832 = vmatprep.subr.bf16.mxu1 %v17113_v16 }
 0x10c   : > { %v1818_v12 = vor.u32 %v1816_v31, %v1814_v62  ;;  %v18503_v7 = vsel %vm1747_vm1, %v1810_v54, %v1814_v62  ;;  %v17122_v31 = vld [vmem:[#allocation5 + $0x140] sm:$0xff]   ;;  %v1838_v54 = vrot.slane %v1836_v21, 1 }
 0x10d   : > { %15745 = vmatpush3.bf16.msra.mxu0 %v17105_v56  ;;  %v17108_v56 = vld [vmem:[#allocation5 + $0x108] sm:$0xff]   ;;  %22929 = vst [vmem:[#allocation78_spill] sm:$0xff] %v18503_v7 }
 0x10e   : > { %15746 = vmatprep.subr.bf16.mxu0 %v17106_v2  ;;  %15833 = vmatpush3.bf16.msra.mxu1 %v17113_v16  ;;  %v1828_v16 = vshll.u32 %v18135_v45, 16  ;;  %v18507_v50 = vsel %vm1747_vm1, %v1818_v12, %v1822_v47 }
 0x10f   : > { %15587 = vmatmul.mubr.bf16.gmra.mxu0 %v18489_v19  ;;  %15834 = vmatprep.subr.bf16.mxu1 %v17115_v43  ;;  %22930 = vst [vmem:[#allocation79_spill] sm:$0xff] %v18507_v50 }
 0x110   : > { %15675 = vmatmul.mubr.bf16.gmra.mxu1 %v18110_v15  ;;  %15590 = vmatprep.mubr.bf16.mxu0 %v18493_v1  ;;  %v1824_v15 = vshrl.u32 %v18129_v40, 16 }
 0x111   : > { %15678 = vmatprep.mubr.bf16.mxu1 %v18113_v20  ;;  %15747 = vmatpush3.bf16.msra.mxu0 %v17106_v2  ;;  %v17112_v2 = vld [vmem:[#allocation5 + $0x100] sm:$0xff]  }
 0x112   : > { %15748 = vmatprep.subr.bf16.mxu0 %v17107_v28  ;;  %15835 = vmatpush3.bf16.msra.mxu1 %v17115_v43  ;;  %v1830_v43 = vrot.slane %v1828_v16, 1  ;;  %v1826_v17 = vor.u32 %v1824_v15, %v1822_v47  ;;  %v1840_v16 = vshrl.u32 %v18157_v8, 16  ;;  %v1848_v15 = vshrl.u32 %v18163_v14, 16 }
 0x113   : > { %15836 = vmatprep.subr.bf16.mxu1 %v17116_v63  ;;  %v1852_v47 = vshll.u32 %v18180_v38, 16 }
 0x114   : > { %v1834_v62 = vor.u32 %v1832_v36, %v1830_v43  ;;  %v18519_v12 = vsel %vm1747_vm1, %v1826_v17, %v1830_v43  ;;  %v1860_v43 = vshll.u32 %v18186_v48, 16 }
 0x115   : > { %15749 = vmatpush3.bf16.msra.mxu0 %v17107_v28  ;;  %v18515_v28 = vld [vmem:[#allocation5 + $0x1b8] sm:$0xff]   ;;  %22931 = vst [vmem:[#allocation80_spill] sm:$0xff] %v18519_v12  ;;  %v1854_v21 = vrot.slane %v1852_v47, 1  ;;  %v22936_v47 = vld [vmem:[#allocation33_spill] sm:$0xff] }
 0x116   : > { %15750 = vmatprep.subr.bf16.mxu0 %v17108_v56  ;;  %15837 = vmatpush3.bf16.msra.mxu1 %v17116_v63  ;;  %v1844_v63 = vshll.u32 %v18163_v14, 16 }
 0x117   : > { %15591 = vmatmul.mubr.bf16.gmra.mxu0 %v18503_v7  ;;  %15838 = vmatprep.subr.bf16.mxu1 %v17121_v42 }
 0x118   : > { %15679 = vmatmul.mubr.bf16.gmra.mxu1 %v18138_v52  ;;  %15594 = vmatprep.mubr.bf16.mxu0 %v18507_v50  ;;  %v18523_v52 = vsel %vm1747_vm1, %v1834_v62, %v1838_v54  ;;  %v1864_v62 = vshrl.u32 %v18186_v48, 16 }
 0x119   : > { %15682 = vmatprep.mubr.bf16.mxu1 %v18143_v37  ;;  %15751 = vmatpush3.bf16.msra.mxu0 %v17108_v56  ;;  %22932 = vst [vmem:[#allocation81_spill] sm:$0xff] %v18523_v52  ;;  %v1842_v56 = vor.u32 %v1840_v16, %v1838_v54  ;;  %v1862_v54 = vrot.slane %v1860_v43, 1  ;;  %v22935_v16 = vld [vmem:[#allocation32_spill] sm:$0xff]  ;;  %v1872_v37 = vshrl.u32 %v18201_v5, 16 }
 0x11a   : > { %15752 = vmatprep.subr.bf16.mxu0 %v17112_v2  ;;  %15839 = vmatpush3.bf16.msra.mxu1 %v17121_v42  ;;  %v1846_v42 = vrot.slane %v1844_v63, 1  ;;  %v1868_v63 = vshll.u32 %v18201_v5, 16 }
 0x11b   : > { %15840 = vmatprep.subr.bf16.mxu1 %v17122_v31 }
 0x11c   : > { %v1850_v36 = vor.u32 %v1848_v15, %v1846_v42  ;;  %v18534_v17 = vsel %vm1747_vm1, %v1842_v56, %v1846_v42  ;;  %v1866_v42 = vor.u32 %v1864_v62, %v1862_v54  ;;  %v1870_v56 = vrot.slane %v1868_v63, 1  ;;  %v22941_v62 = vld [vmem:[#allocation36_spill] sm:$0xff] }
 0x11d   : > { %15753 = vmatpush3.bf16.msra.mxu0 %v17112_v2  ;;  %22933 = vst [vmem:[#allocation82_spill] sm:$0xff] %v18534_v17  ;;  %v1856_v2 = vshrl.u32 %v18180_v38, 16 }
 0x11e   : > { %15841 = vmatpush3.bf16.msra.mxu1 %v17122_v31  ;;  %15914 = vmatprep.subr.bf16.mxu0 %v18515_v28  ;;  %v18538_v31 = vsel %vm1747_vm1, %v1850_v36, %v1854_v21  ;;  %v18552_v20 = vsel %vm1747_vm1, %v1866_v42, %v1870_v56  ;;  %v1874_v63 = vor.u32 %v1872_v37, %v1870_v56  ;;  %v22946_v56 = vld [vmem:[#allocation42_spill] sm:$0xff] }
 0x11f   : > { %15595 = vmatmul.mubr.bf16.gmra.mxu0 %v18519_v12  ;;  %22934 = vst [vmem:[#allocation83_spill] sm:$0xff] %v18538_v31  ;;  %v1858_v15 = vor.u32 %v1856_v2, %v1854_v21  ;;  %22939 = vst [vmem:[#allocation85_spill] sm:$0xff] %v18552_v20 }
 0x120   : > { %15683 = vmatmul.mubr.bf16.gmra.mxu1 %v18168_v18  ;;  %15598 = vmatprep.mubr.bf16.mxu0 %v18523_v52 }
 0x121   : > { %15686 = vmatprep.mubr.bf16.mxu1 %v18171_v26  ;;  %v22937_v26 = vld [vmem:[#allocation35_spill] sm:$0xff]  ;;  %v18548_v36 = vsel %vm1747_vm1, %v1858_v15, %v1862_v54  ;;  %v22942_v15 = vld [vmem:[#allocation37_spill] sm:$0xff] }
 0x122   : > { %v1876_v18 = vshll.u32 %v22937_v26, 16  ;;  %22938 = vst [vmem:[#allocation84_spill] sm:$0xff] %v18548_v36  ;;  %v1880_v43 = vshrl.u32 %v22937_v26, 16  ;;  %v22943_v26 = vld [vmem:[#allocation39_spill] sm:$0xff] }
 0x123   : > { %v1892_v38 = vshll.u32 %v22943_v26, 16  ;;  %v1896_v37 = vshrl.u32 %v22943_v26, 16 }
 0x124   : > { %v1878_v21 = vrot.slane %v1876_v18, 1 }
 0x127   : > { %15599 = vmatmul.mubr.bf16.gmra.mxu0 %v18534_v17 }
 0x128   : > { %15687 = vmatmul.mubr.bf16.gmra.mxu1 %v22935_v16  ;;  %15602 = vmatprep.mubr.bf16.mxu0 %v18538_v31  ;;  %v22940_v16 = vld [vmem:[#allocation38_spill] sm:$0xff] }
 0x129   : > { %15690 = vmatprep.mubr.bf16.mxu1 %v22936_v47  ;;  %v1884_v30 = vshll.u32 %v22940_v16, 16  ;;  %v1882_v47 = vor.u32 %v1880_v43, %v1878_v21  ;;  %v1888_v18 = vshrl.u32 %v22940_v16, 16 }
 0x12b   : > { %v1886_v42 = vrot.slane %v1884_v30, 1 }
 0x12f   : > { %v15404_v23 = vpop.f32.mrf.mxu0  ;;  %15603 = vmatmul.mubr.bf16.gmra.mxu0 %v18548_v36  ;;  %v22951_v36 = vld [vmem:[#allocation43_spill] sm:$0xff] }
 0x130   : > { %v15492_v2 = vpop.f32.mrf.mxu1  ;;  %15691 = vmatmul.mubr.bf16.gmra.mxu1 %v22941_v62  ;;  %15606 = vmatprep.mubr.bf16.mxu0 %v18552_v20  ;;  %v18562_v23 = vsel %vm1747_vm1, %v1874_v63, %v1878_v21  ;;  %v18566_v62 = vsel %vm1747_vm1, %v1882_v47, %v1886_v42  ;;  %v1890_v21 = vor.u32 %v1888_v18, %v1886_v42  ;;  %v22949_v47 = vld [vmem:[#allocation41_spill] sm:$0xff] }
 0x131   : > { %v663_v54 = vpop.f32.mrf.mxu0  ;;  %15694 = vmatprep.mubr.bf16.mxu1 %v22942_v15  ;;  %22944 = vst [vmem:[#allocation86_spill] sm:$0xff] %v18562_v23  ;;  %22945 = vst [vmem:[#allocation87_spill] sm:$0xff] %v18566_v62 }
 0x132   : > { %v1440_v5 = vpop.f32.mrf.mxu1  ;;  %v1900_v54 = vshll.u32 %v22946_v56, 16 }
 0x133   : > { %v15405_v48 = vpop.f32.mrf.mxu0 }
 0x134   : > { %v15493_v31 = vpop.f32.mrf.mxu1  ;;  %v1894_v48 = vrot.slane %v1892_v38, 1  ;;  %v1902_v26 = vrot.slane %v1900_v54, 1 }
 0x135   : > { %v666_v2 = vpop.f32.mrf.mxu0  ;;  %v22947_v31 = vld [vmem:[#allocation40_spill] sm:$0xff] }
 0x136   : > { %v1443_v43 = vpop.f32.mrf.mxu1  ;;  %v1898_v15 = vor.u32 %v1896_v37, %v1894_v48  ;;  %v18580_v14 = vsel %vm1747_vm1, %v1890_v21, %v1894_v48  ;;  %v22954_v37 = vld [vmem:[#allocation46_spill] sm:$0xff]  ;;  %v22956_v48 = vld [vmem:[#allocation44_spill] sm:$0xff] }
 0x137   : > { %v15408_v30 = vpop.f32.mrf.mxu0  ;;  %15607 = vmatmul.mubr.bf16.gmra.mxu0 %v18562_v23  ;;  %v1908_v23 = vshll.u32 %v22951_v36, 16  ;;  %22952 = vst [vmem:[#allocation90_spill] sm:$0xff] %v18580_v14  ;;  %v1916_v54 = vshll.u32 %v22954_v37, 16 }
 0x138   : > { %v15496_v5 = vpop.f32.mrf.mxu1  ;;  %15695 = vmatmul.mubr.bf16.gmra.mxu1 %v22947_v31  ;;  %15610 = vmatprep.mubr.bf16.mxu0 %v18566_v62  ;;  %v1904_v31 = vshrl.u32 %v22946_v56, 16  ;;  %v18584_v18 = vsel %vm1747_vm1, %v1898_v15, %v1902_v26  ;;  %v22958_v56 = vld [vmem:[#allocation45_spill] sm:$0xff] }
 0x139   : > { %v18573_v63 = vadd.f32 %v15496_v5, %v15408_v30  ;;  %v679_v2 = vpop.f32.mrf.mxu0  ;;  %15698 = vmatprep.mubr.bf16.mxu1 %v22949_v47  ;;  %22953 = vst [vmem:[#allocation91_spill] sm:$0xff] %v18584_v18  ;;  %v1912_v30 = vshrl.u32 %v22951_v36, 16 }
 0x13a   : > { %v1456_v16 = vpop.f32.mrf.mxu1  ;;  %v1906_v21 = vor.u32 %v1904_v31, %v1902_v26 }
 0x13b   : > { %22948 = vst [vmem:[#allocation88_spill] sm:$0xff] %v18573_v63  ;;  %v18576_v20 = vadd.f32 %v1456_v16, %v679_v2  ;;  %v15409_v43 = vpop.f32.mrf.mxu0 }
 0x13c   : > { %v15497_v38 = vpop.f32.mrf.mxu1  ;;  %v1910_v43 = vrot.slane %v1908_v23, 1 }
 0x13d   : > { %22950 = vst [vmem:[#allocation89_spill] sm:$0xff] %v18576_v20  ;;  %v682_v42 = vpop.f32.mrf.mxu0  ;;  %v1918_v20 = vrot.slane %v1916_v54, 1 }
 0x13e   : > { %v1459_v5 = vpop.f32.mrf.mxu1  ;;  %v1914_v36 = vor.u32 %v1912_v30, %v1910_v43  ;;  %v18600_v62 = vsel %vm1747_vm1, %v1906_v21, %v1910_v43  ;;  %v22963_v30 = vld [vmem:[#allocation50_spill] sm:$0xff]  ;;  %v22965_v43 = vld [vmem:[#allocation47_spill] sm:$0xff] }
 0x13f   : > { %v18588_v16 = vadd.f32 %v1459_v5, %v682_v42  ;;  %v15412_v2 = vpop.f32.mrf.mxu0  ;;  %15611 = vmatmul.mubr.bf16.gmra.mxu0 %v18580_v14  ;;  %22961 = vst [vmem:[#allocation95_spill] sm:$0xff] %v18600_v62  ;;  %v1932_v54 = vshll.u32 %v22963_v30, 16 }
 0x140   : > { %v15500_v38 = vpop.f32.mrf.mxu1  ;;  %15699 = vmatmul.mubr.bf16.gmra.mxu1 %v22956_v48  ;;  %15614 = vmatprep.mubr.bf16.mxu0 %v18584_v18  ;;  %v1920_v48 = vshrl.u32 %v22954_v37, 16  ;;  %v18604_v31 = vsel %vm1747_vm1, %v1914_v36, %v1918_v20  ;;  %v22967_v37 = vld [vmem:[#allocation49_spill] sm:$0xff] }
 0x141   : > { %22955 = vst [vmem:[#allocation92_spill] sm:$0xff] %v18588_v16  ;;  %v18593_v47 = vadd.f32 %v15500_v38, %v15412_v2  ;;  %v695_v15 = vpop.f32.mrf.mxu0  ;;  %15702 = vmatprep.mubr.bf16.mxu1 %v22958_v56  ;;  %v22960_v16 = vld [vmem:[#allocation48_spill] sm:$0xff]  ;;  %22962 = vst [vmem:[#allocation96_spill] sm:$0xff] %v18604_v31 }
 0x142   : > { %v1472_v63 = vpop.f32.mrf.mxu1  ;;  %v1924_v14 = vshll.u32 %v22960_v16, 16  ;;  %v1928_v2 = vshrl.u32 %v22960_v16, 16  ;;  %v1922_v21 = vor.u32 %v1920_v48, %v1918_v20 }
 0x143   : > { %22957 = vst [vmem:[#allocation93_spill] sm:$0xff] %v18593_v47  ;;  %v18596_v42 = vadd.f32 %v1472_v63, %v695_v15  ;;  %v15413_v5 = vpop.f32.mrf.mxu0 }
 0x144   : > { %v15501_v23 = vpop.f32.mrf.mxu1  ;;  %v1926_v5 = vrot.slane %v1924_v14, 1 }
 0x145   : > { %22959 = vst [vmem:[#allocation94_spill] sm:$0xff] %v18596_v42  ;;  %v698_v26 = vpop.f32.mrf.mxu0  ;;  %v1934_v42 = vrot.slane %v1932_v54, 1 }
 0x146   : > { %v1475_v38 = vpop.f32.mrf.mxu1  ;;  %v1930_v16 = vor.u32 %v1928_v2, %v1926_v5  ;;  %v18620_v18 = vsel %vm1747_vm1, %v1922_v21, %v1926_v5  ;;  %v22972_v2 = vld [vmem:[#allocation54_spill] sm:$0xff]  ;;  %v22974_v5 = vld [vmem:[#allocation52_spill] sm:$0xff] }
 0x147   : > { %v18608_v63 = vadd.f32 %v1475_v38, %v698_v26  ;;  %v15416_v15 = vpop.f32.mrf.mxu0  ;;  %15615 = vmatmul.mubr.bf16.gmra.mxu0 %v18600_v62  ;;  %22970 = vst [vmem:[#allocation100_spill] sm:$0xff] %v18620_v18  ;;  %v1948_v54 = vshll.u32 %v22972_v2, 16 }
 0x148   : > { %v15504_v23 = vpop.f32.mrf.mxu1  ;;  %15703 = vmatmul.mubr.bf16.gmra.mxu1 %v22965_v43  ;;  %15618 = vmatprep.mubr.bf16.mxu0 %v18604_v31  ;;  %v1936_v43 = vshrl.u32 %v22963_v30, 16  ;;  %v18624_v48 = vsel %vm1747_vm1, %v1930_v16, %v1934_v42  ;;  %v22975_v30 = vld [vmem:[#allocation53_spill] sm:$0xff] }
 0x149   : > { %22964 = vst [vmem:[#allocation97_spill] sm:$0xff] %v18608_v63  ;;  %v18613_v56 = vadd.f32 %v15504_v23, %v15416_v15  ;;  %v711_v36 = vpop.f32.mrf.mxu0  ;;  %15706 = vmatprep.mubr.bf16.mxu1 %v22967_v37  ;;  %v22969_v63 = vld [vmem:[#allocation51_spill] sm:$0xff]  ;;  %22971 = vst [vmem:[#allocation101_spill] sm:$0xff] %v18624_v48 }
 0x14a   : > { %v1488_v47 = vpop.f32.mrf.mxu1  ;;  %v1940_v62 = vshll.u32 %v22969_v63, 16  ;;  %v1944_v15 = vshrl.u32 %v22969_v63, 16  ;;  %v1938_v21 = vor.u32 %v1936_v43, %v1934_v42 }
 0x14b   : > { %22966 = vst [vmem:[#allocation98_spill] sm:$0xff] %v18613_v56  ;;  %v18616_v26 = vadd.f32 %v1488_v47, %v711_v36  ;;  %v15417_v38 = vpop.f32.mrf.mxu0 }
 0x14c   : > { %v15505_v14 = vpop.f32.mrf.mxu1  ;;  %v1942_v38 = vrot.slane %v1940_v62, 1 }
 0x14d   : > { %22968 = vst [vmem:[#allocation99_spill] sm:$0xff] %v18616_v26  ;;  %v714_v20 = vpop.f32.mrf.mxu0  ;;  %v1950_v26 = vrot.slane %v1948_v54, 1 }
 0x14e   : > { %v1491_v23 = vpop.f32.mrf.mxu1  ;;  %v1946_v63 = vor.u32 %v1944_v15, %v1942_v38  ;;  %v18640_v31 = vsel %vm1747_vm1, %v1938_v21, %v1942_v38  ;;  %v1964_v15 = vshll.u32 %v18365_v39, 16  ;;  %v22981_v38 = vld [vmem:[#allocation56_spill] sm:$0xff] }
 0x14f   : > { %v18628_v47 = vadd.f32 %v1491_v23, %v714_v20  ;;  %v15420_v36 = vpop.f32.mrf.mxu0  ;;  %15619 = vmatmul.mubr.bf16.gmra.mxu0 %v18620_v18  ;;  %22978 = vst [vmem:[#allocation104_spill] sm:$0xff] %v18640_v31 }
 0x150   : > { %v15508_v14 = vpop.f32.mrf.mxu1  ;;  %15707 = vmatmul.mubr.bf16.gmra.mxu1 %v22974_v5  ;;  %15622 = vmatprep.mubr.bf16.mxu0 %v18624_v48  ;;  %v1952_v5 = vshrl.u32 %v22972_v2, 16  ;;  %v18644_v43 = vsel %vm1747_vm1, %v1946_v63, %v1950_v26  ;;  %v1966_v2 = vrot.slane %v1964_v15, 1 }
 0x151   : > { %22973 = vst [vmem:[#allocation102_spill] sm:$0xff] %v18628_v47  ;;  %v18633_v37 = vadd.f32 %v15508_v14, %v15420_v36  ;;  %v727_v16 = vpop.f32.mrf.mxu0  ;;  %15710 = vmatprep.mubr.bf16.mxu1 %v22975_v30  ;;  %v22977_v47 = vld [vmem:[#allocation55_spill] sm:$0xff]  ;;  %22979 = vst [vmem:[#allocation105_spill] sm:$0xff] %v18644_v43  ;;  %v22982_v30 = vld [vmem:[#allocation57_spill] sm:$0xff] }
 0x152   : > { %v1504_v56 = vpop.f32.mrf.mxu1  ;;  %v1956_v18 = vshll.u32 %v22977_v47, 16  ;;  %v1960_v36 = vshrl.u32 %v22977_v47, 16  ;;  %v1954_v21 = vor.u32 %v1952_v5, %v1950_v26 }
 0x153   : > { %v18636_v20 = vadd.f32 %v1504_v56, %v727_v16  ;;  %v15421_v23 = vpop.f32.mrf.mxu0 }
 0x154   : > { %v15509_v62 = vpop.f32.mrf.mxu1  ;;  %v1958_v16 = vrot.slane %v1956_v18, 1 }
 0x155   : > { %22976 = vst [vmem:[#allocation103_spill] sm:$0xff] %v18636_v20  ;;  %v730_v42 = vpop.f32.mrf.mxu0 }
 0x156   : > { %v1507_v54 = vpop.f32.mrf.mxu1  ;;  %v1962_v47 = vor.u32 %v1960_v36, %v1958_v16  ;;  %v1980_v36 = vshll.u32 %v18383_v46, 16 }
 0x157   : > { %v18648_v56 = vadd.f32 %v1507_v54, %v730_v42  ;;  %v15424_v14 = vpop.f32.mrf.mxu0  ;;  %15623 = vmatmul.mubr.bf16.gmra.mxu0 %v18640_v31  ;;  %v18660_v31 = vsel %vm1747_vm1, %v1954_v21, %v1958_v16 }
 0x158   : > { %v15512_v23 = vpop.f32.mrf.mxu1  ;;  %15711 = vmatmul.mubr.bf16.gmra.mxu1 %v22981_v38  ;;  %15626 = vmatprep.mubr.bf16.mxu0 %v18644_v43  ;;  %22984 = vst [vmem:[#allocation108_spill] sm:$0xff] %v18660_v31  ;;  %v1968_v38 = vshrl.u32 %v18365_v39, 16  ;;  %v18664_v5 = vsel %vm1747_vm1, %v1962_v47, %v1966_v2 }
 0x159   : > { %22980 = vst [vmem:[#allocation106_spill] sm:$0xff] %v18648_v56  ;;  %v18653_v62 = vadd.f32 %v15512_v23, %v15424_v14  ;;  %v743_v63 = vpop.f32.mrf.mxu0  ;;  %15714 = vmatprep.mubr.bf16.mxu1 %v22982_v30  ;;  %v1972_v56 = vshll.u32 %v18369_v60, 16  ;;  %22985 = vst [vmem:[#allocation109_spill] sm:$0xff] %v18664_v5  ;;  %v1976_v14 = vshrl.u32 %v18369_v60, 16  ;;  %v1982_v60 = vrot.slane %v1980_v36, 1 }
 0x15a   : > { %v1520_v20 = vpop.f32.mrf.mxu1  ;;  %v1970_v16 = vor.u32 %v1968_v38, %v1966_v2 }
 0x15b   : > { %v18656_v42 = vadd.f32 %v1520_v20, %v743_v63  ;;  %v15425_v54 = vpop.f32.mrf.mxu0  ;;  %v1974_v63 = vrot.slane %v1972_v56, 1 }
 0x15c   : > { %v15513_v18 = vpop.f32.mrf.mxu1 }
 0x15d   : > { %22983 = vst [vmem:[#allocation107_spill] sm:$0xff] %v18656_v42  ;;  %v746_v26 = vpop.f32.mrf.mxu0  ;;  %v22987_v18 = vld [vmem:[#allocation61_spill] sm:$0xff]  ;;  %v1978_v30 = vor.u32 %v1976_v14, %v1974_v63  ;;  %v18680_v42 = vsel %vm1747_vm1, %v1970_v16, %v1974_v63  ;;  %v1996_v14 = vshll.u32 %v18406_v10, 16 }
 0x15e   : > { %v1523_v15 = vpop.f32.mrf.mxu1  ;;  %22988 = vst [vmem:[#allocation111_spill] sm:$0xff] %v18680_v42 }
 0x15f   : > { %v18668_v20 = vadd.f32 %v1523_v15, %v746_v26  ;;  %v15428_v23 = vpop.f32.mrf.mxu0  ;;  %15627 = vmatmul.mubr.bf16.gmra.mxu0 %v18660_v31  ;;  %v18684_v38 = vsel %vm1747_vm1, %v1978_v30, %v1982_v60 }
 0x160   : > { %v15516_v54 = vpop.f32.mrf.mxu1  ;;  %15715 = vmatmul.mubr.bf16.gmra.mxu1 %v18372_v6  ;;  %15630 = vmatprep.mubr.bf16.mxu0 %v18664_v5  ;;  %v1984_v6 = vshrl.u32 %v18383_v46, 16  ;;  %22989 = vst [vmem:[#allocation112_spill] sm:$0xff] %v18684_v38  ;;  %v2000_v46 = vshrl.u32 %v18406_v10, 16 }
 0x161   : > { %22986 = vst [vmem:[#allocation110_spill] sm:$0xff] %v18668_v20  ;;  %v18673_v21 = vadd.f32 %v15516_v54, %v15428_v23  ;;  %v759_v47 = vpop.f32.mrf.mxu0  ;;  %15718 = vmatprep.mubr.bf16.mxu1 %v22987_v18  ;;  %v1988_v20 = vshll.u32 %v18389_v32, 16  ;;  %v1992_v23 = vshrl.u32 %v18389_v32, 16  ;;  %v1998_v18 = vrot.slane %v1996_v14, 1 }
 0x162   : > { %v1536_v39 = vpop.f32.mrf.mxu1  ;;  %v1986_v63 = vor.u32 %v1984_v6, %v1982_v60  ;;  %v13882_v6 = vcombine.low %v18385_v34, %v18475_v57  ;;  %v2012_v14 = vshll.u32 %v18425_v27, 16 }
 0x163   : > { %v18676_v26 = vadd.f32 %v1536_v39, %v759_v47  ;;  %v15429_v15 = vpop.f32.mrf.mxu0  ;;  %v1990_v47 = vrot.slane %v1988_v20, 1  ;;  %v2004_v20 = vshll.u32 %v18410_v33, 16 }
 0x164   : > { %v15517_v56 = vpop.f32.mrf.mxu1 }
 0x165   : > { %v762_v2 = vpop.f32.mrf.mxu0  ;;  %v1994_v56 = vor.u32 %v1992_v23, %v1990_v47  ;;  %v18703_v60 = vsel %vm1747_vm1, %v1986_v63, %v1990_v47  ;;  %v2002_v47 = vor.u32 %v2000_v46, %v1998_v18  ;;  %v2006_v63 = vrot.slane %v2004_v20, 1 }
 0x166   : > { %v1539_v36 = vpop.f32.mrf.mxu1  ;;  %22993 = vst [vmem:[#allocation116_spill] sm:$0xff] %v18703_v60 }
 0x167   : > { %v18688_v39 = vadd.f32 %v1539_v36, %v762_v2  ;;  %v15432_v54 = vpop.f32.mrf.mxu0  ;;  %15631 = vmatmul.mubr.bf16.gmra.mxu0 %v18680_v42  ;;  %v18708_v23 = vsel %vm1747_vm1, %v1994_v56, %v1998_v18  ;;  %v2544_v56 = vshrl.u32 %v13882_v6, 16  ;;  %v18727_v20 = vsel %vm1747_vm1, %v2002_v47, %v2006_v63 }
 0x168   : > { %v15520_v15 = vpop.f32.mrf.mxu1  ;;  %15719 = vmatmul.mubr.bf16.gmra.mxu1 %v18392_v61  ;;  %15634 = vmatprep.mubr.bf16.mxu0 %v18684_v38  ;;  %22994 = vst [vmem:[#allocation117_spill] sm:$0xff] %v18708_v23  ;;  %22999 = vst [vmem:[#allocation122_spill] sm:$0xff] %v18727_v20 }
 0x169   : > { %22990 = vst [vmem:[#allocation113_spill] sm:$0xff] %v18688_v39  ;;  %v18693_v16 = vadd.f32 %v15520_v15, %v15432_v54  ;;  %v775_v30 = vpop.f32.mrf.mxu0  ;;  %15722 = vmatprep.mubr.bf16.mxu1 %v18395_v3  ;;  %v18700_v39 = vld [vmem:[#allocation2 + $0x138] sm:$0xf]  ;;  %v2547_v3 = vshll.u32 %v13882_v6, 16  ;;  %v2020_v6 = vshll.u32 %v18428_v44, 16 }
 0x16a   : > { %v1552_v32 = vpop.f32.mrf.mxu1  ;;  %22992 = vst [vmem:[#allocation115_spill] sm:$0xff] %v18700_v39 }
 0x16b   : > { %v18696_v2 = vadd.f32 %v1552_v32, %v775_v30  ;;  %v15433_v36 = vpop.f32.mrf.mxu0  ;;  %v2008_v32 = vshrl.u32 %v18410_v33, 16  ;;  %v13883_v30 = vcombine.low %v18480_v59, %v18700_v39 }
 0x16c   : > { %v15521_v61 = vpop.f32.mrf.mxu1 }
 0x16d   : > { %22991 = vst [vmem:[#allocation114_spill] sm:$0xff] %v18696_v2  ;;  %v778_v54 = vpop.f32.mrf.mxu0  ;;  %v2010_v59 = vor.u32 %v2008_v32, %v2006_v63  ;;  %v2553_v39 = vshrl.u32 %v13883_v30, 16  ;;  %v18722_v2 = vld [vmem:[#allocation2 + $0x13c] sm:$0xf]  ;;  %v2028_v32 = vshll.u32 %v18443_v29, 16 }
 0x16e   : > { %v1555_v15 = vpop.f32.mrf.mxu1  ;;  %22997 = vst [vmem:[#allocation120_spill] sm:$0xff] %v18722_v2 }
 0x16f   : > { %v18714_v36 = vadd.f32 %v1555_v15, %v778_v54  ;;  %v15436_v61 = vpop.f32.mrf.mxu0  ;;  %15635 = vmatmul.mubr.bf16.gmra.mxu0 %v18703_v60  ;;  %v2014_v54 = vrot.slane %v2012_v14, 1  ;;  %v2555_v63 = vrot.slane %v2553_v39, 3 }
 0x170   : > { %v15524_v34 = vpop.f32.mrf.mxu1  ;;  %15723 = vmatmul.mubr.bf16.gmra.mxu1 %v18413_v0  ;;  %15638 = vmatprep.mubr.bf16.mxu0 %v18708_v23  ;;  %v2546_v0 = vrot.slane %v2544_v56, 3 }
 0x171   : > { %22995 = vst [vmem:[#allocation118_spill] sm:$0xff] %v18714_v36  ;;  %v18719_v33 = vadd.f32 %v15524_v34, %v15436_v61  ;;  %v791_v10 = vpop.f32.mrf.mxu0  ;;  %15726 = vmatprep.mubr.bf16.mxu1 %v18416_v55  ;;  %v2556_v36 = vshll.u32 %v13883_v30, 16  ;;  %v2016_v34 = vshrl.u32 %v18425_v27, 16  ;;  %v2549_v55 = vrot.slane %v2547_v3, 4 }
 0x172   : > { %v1568_v15 = vpop.f32.mrf.mxu1  ;;  %v18733_v30 = vsel %vm1747_vm1, %v2010_v59, %v2014_v54  ;;  %v2022_v3 = vrot.slane %v2020_v6, 1 }
 0x173   : > { %22996 = vst [vmem:[#allocation119_spill] sm:$0xff] %v18719_v33  ;;  %v18724_v46 = vadd.f32 %v1568_v15, %v791_v10  ;;  %v15437_v18 = vpop.f32.mrf.mxu0  ;;  %23000 = vst [vmem:[#allocation123_spill] sm:$0xff] %v18733_v30  ;;  %v2024_v10 = vshrl.u32 %v18428_v44, 16  ;;  %v13884_v15 = vcombine.low %v18722_v2, %v18722_v2  ;;  %v2018_v59 = vor.u32 %v2016_v34, %v2014_v54 }
 0x174   : > { %v15525_v61 = vpop.f32.mrf.mxu1  ;;  %v2558_v18 = vrot.slane %v2556_v36, 4  ;;  %v2550_v27 = vor.u32 %v2549_v55, %v2546_v0  ;;  %v2030_v44 = vrot.slane %v2028_v32, 1  ;;  %v13873_v2 = vcombine.low %v18475_v57, %v18475_v57 }
 0x175   : > { %22998 = vst [vmem:[#allocation121_spill] sm:$0xff] %v18724_v46  ;;  %v794_v14 = vpop.f32.mrf.mxu0  ;;  %v2026_v36 = vor.u32 %v2024_v10, %v2022_v3  ;;  %v18753_v0 = vsel %vm1747_vm1, %v2018_v59, %v2022_v3  ;;  %v2032_v55 = vshrl.u32 %v18443_v29, 16  ;;  %v17130_v59 = vld [vmem:[#allocation5 + $0x1f8] sm:$0xff]  }
 0x176   : > { %v1571_v47 = vpop.f32.mrf.mxu1  ;;  %23003 = vst [vmem:[#allocation126_spill] sm:$0xff] %v18753_v0  ;;  %v2036_v57 = vshll.u32 %v13873_v2, 16  ;;  %v18758_v32 = vsel %vm989_vm0, %v18422_v58, %v2550_v27  ;;  %16002 = vmatprep.subr.bf16.mxu1 %v17130_v59 }
 0x177   : > { %v18738_v46 = vadd.f32 %v1571_v47, %v794_v14  ;;  %v15440_v61 = vpop.f32.mrf.mxu0  ;;  %15639 = vmatmul.mubr.bf16.gmra.mxu0 %v18727_v20  ;;  %v2562_v14 = vshrl.u32 %v13884_v15, 16  ;;  %v2565_v47 = vshll.u32 %v13884_v15, 16  ;;  %23004 = vst [vmem:[#allocation127_spill] sm:$0xff] %v18758_v32  ;;  %v18761_v10 = vsel %vm1747_vm1, %v2026_v36, %v2030_v44 }
 0x178   : > { %v15528_v56 = vpop.f32.mrf.mxu1  ;;  %15727 = vmatmul.mubr.bf16.gmra.mxu1 %v18431_v41  ;;  %15642 = vmatprep.mubr.bf16.mxu0 %v18733_v30  ;;  %23005 = vst [vmem:[#allocation128_spill] sm:$0xff] %v18761_v10  ;;  %v18772_v58 = vor.u32 %v2032_v55, %v2030_v44 }
 0x179   : > { %23001 = vst [vmem:[#allocation124_spill] sm:$0xff] %v18738_v46  ;;  %v18745_v33 = vadd.f32 %v15528_v56, %v15440_v61  ;;  %v807_v39 = vpop.f32.mrf.mxu0  ;;  %15730 = vmatprep.mubr.bf16.mxu1 %v18436_v9  ;;  %v18748_v46 = vor.u32 %v2558_v18, %v2555_v63  ;;  %v2564_v15 = vrot.slane %v2562_v14, 3  ;;  %v2567_v63 = vrot.slane %v2565_v47, 4  ;;  %v23015_v9 = vld [vmem:[#allocation30_spill] sm:$0xff] }
 0x17a   : > { %v1584_v6 = vpop.f32.mrf.mxu1  ;;  %v2038_v56 = vrot.slane %v2036_v57, 1 }
 0x17b   : > { %23002 = vst [vmem:[#allocation125_spill] sm:$0xff] %v18748_v46  ;;  %v18750_v41 = vadd.f32 %v1584_v6, %v807_v39  ;;  %v15441_v30 = vpop.f32.mrf.mxu0 }
 0x17c   : > { %v15529_v54 = vpop.f32.mrf.mxu1  ;;  %v18765_v30 = vsel %vm989_vm0, %v2550_v27, %v18748_v46  ;;  %v2568_v27 = vor.u32 %v2567_v63, %v2564_v15 }
 0x17d   : > { %v810_v34 = vpop.f32.mrf.mxu0  ;;  %23006 = vst [vmem:[#allocation129_spill] sm:$0xff] %v18765_v30 }
 0x17e   : > { %v1587_v18 = vpop.f32.mrf.mxu1  ;;  %v2569_v44 = vsel %vm989_vm0, %v18748_v46, %v2568_v27 }
 0x17f   : > { %v18767_v61 = vadd.f32 %v1587_v18, %v810_v34  ;;  %v15444_v3 = vpop.f32.mrf.mxu0  ;;  %15643 = vmatmul.mubr.bf16.gmra.mxu0 %v18753_v0  ;;  %v2039_v34 = vsel %vm1747_vm1, %v18772_v58, %v2038_v56 }
 0x180   : > { %v15532_v2 = vpop.f32.mrf.mxu1  ;;  %15731 = vmatmul.mubr.bf16.gmra.mxu1 %v18758_v32  ;;  %15646 = vmatprep.mubr.bf16.mxu0 %v18761_v10 }
 0x181   : > { %v18774_v39 = vadd.f32 %v15532_v2, %v15444_v3  ;;  %v823_v36 = vpop.f32.mrf.mxu0  ;;  %15734 = vmatprep.mubr.bf16.mxu1 %v18765_v30 }
 0x182   : > { %v1600_v14 = vpop.f32.mrf.mxu1 }
 0x183   : > { %v18777_v47 = vadd.f32 %v1600_v14, %v823_v36  ;;  %v15445_v6 = vpop.f32.mrf.mxu0 }
 0x184   : > { %v15533_v54 = vpop.f32.mrf.mxu1 }
 0x185   : > { %v826_v18 = vpop.f32.mrf.mxu0 }
 0x186   : > { %v1603_v55 = vpop.f32.mrf.mxu1 }
 0x187   : > { %v18783_v57 = vadd.f32 %v1603_v55, %v826_v18  ;;  %v15448_v3 = vpop.f32.mrf.mxu0  ;;  %15647 = vmatmul.mubr.bf16.gmra.mxu0 %v2039_v34  ;;  %v17124_v18 = vld [vmem:[#allocation5 + $0x1b0] sm:$0xff]  }
 0x188   : > { %v15536_v2 = vpop.f32.mrf.mxu1  ;;  %15735 = vmatmul.mubr.bf16.gmra.mxu1 %v2569_v44  ;;  %15754 = vmatprep.mubr.bf16.mxu0 %v18021_v4  ;;  %v17131_v44 = vld [vmem:[#allocation5 + $0x1f0] sm:$0xff]  }
 0x189   : > { %v18786_v15 = vadd.f32 %v15536_v2, %v15448_v3  ;;  %v839_v63 = vpop.f32.mrf.mxu0  ;;  %15842 = vmatprep.mubr.bf16.mxu1 %v18460_v24  ;;  %v17125_v2 = vld [vmem:[#allocation5 + $0x1a8] sm:$0xff]  }
 0x18a   : > { %v1616_v36 = vpop.f32.mrf.mxu1 }
 0x18b   : > { %v18789_v56 = vadd.f32 %v1616_v36, %v839_v63  ;;  %v15449_v14 = vpop.f32.mrf.mxu0 }
 0x18c   : > { %v15537_v6 = vpop.f32.mrf.mxu1  ;;  %v17132_v14 = vld [vmem:[#allocation5 + $0x1e8] sm:$0xff]  }
 0x18d   : > { %v842_v27 = vpop.f32.mrf.mxu0 }
 0x18e   : > { %v1619_v54 = vpop.f32.mrf.mxu1 }
 0x18f   : > { %v18791_v55 = vadd.f32 %v1619_v54, %v842_v27  ;;  %v15452_v34 = vpop.f32.mrf.mxu0  ;;  %15755 = vmatmul.mubr.bf16.vlgmr.msra.gmra.mxu0 %v18037_v22  ;;  %v17126_v27 = vld [vmem:[#allocation5 + $0x1a0] sm:$0xff]  }
 0x190   : > { %v15540_v4 = vpop.f32.mrf.mxu1  ;;  %15915 = vmatpush3.bf16.msra.mxu0 %v18515_v28  ;;  %15843 = vmatmul.mubr.bf16.vlgmr.msra.gmra.mxu1 %v18467_v35 }
 0x191   : > { %v18796_v24 = vadd.f32 %v15540_v4, %v15452_v34  ;;  %v855_v3 = vpop.f32.mrf.mxu0  ;;  %15758 = vmatprep.mubr.bf16.mxu0 %v18045_v25  ;;  %15846 = vmatprep.mubr.bf16.mxu1 %v18472_v53  ;;  %v17134_v4 = vld [vmem:[#allocation5 + $0x1e0] sm:$0xff]  }
 0x192   : > { %v1632_v63 = vpop.f32.mrf.mxu1  ;;  %15916 = vmatprep.subr.bf16.mxu0 %v17124_v18  ;;  %16003 = vmatpush3.bf16.msra.mxu1 %v17130_v59 }
 0x193   : > { %v18800_v36 = vadd.f32 %v1632_v63, %v855_v3  ;;  %v15453_v22 = vpop.f32.mrf.mxu0  ;;  %16004 = vmatprep.subr.bf16.mxu1 %v17131_v44 }
 0x194   : > { %v15541_v6 = vpop.f32.mrf.mxu1  ;;  %15917 = vmatpush3.bf16.msra.mxu0 %v17124_v18 }
 0x195   : > { %v858_v28 = vpop.f32.mrf.mxu0  ;;  %15918 = vmatprep.subr.bf16.mxu0 %v17125_v2 }
 0x196   : > { %v1635_v35 = vpop.f32.mrf.mxu1  ;;  %16005 = vmatpush3.bf16.msra.mxu1 %v17131_v44  ;;  %v17127_v44 = vld [vmem:[#allocation5 + $0x198] sm:$0xff]  }
 0x197   : > { %v18802_v54 = vadd.f32 %v1635_v35, %v858_v28  ;;  %v15456_v34 = vpop.f32.mrf.mxu0  ;;  %15759 = vmatmul.mubr.bf16.gmra.mxu0 %v18071_v49  ;;  %16006 = vmatprep.subr.bf16.mxu1 %v17132_v14  ;;  %v17135_v28 = vld [vmem:[#allocation5 + $0x1d8] sm:$0xff]  }
 0x198   : > { %v15544_v59 = vpop.f32.mrf.mxu1  ;;  %15847 = vmatmul.mubr.bf16.gmra.mxu1 %v18489_v19  ;;  %15762 = vmatprep.mubr.bf16.mxu0 %v18078_v51 }
 0x199   : > { %v18807_v3 = vadd.f32 %v15544_v59, %v15456_v34  ;;  %v871_v18 = vpop.f32.mrf.mxu0  ;;  %15850 = vmatprep.mubr.bf16.mxu1 %v18493_v1  ;;  %15919 = vmatpush3.bf16.msra.mxu0 %v17125_v2  ;;  %v17128_v34 = vld [vmem:[#allocation5 + $0x190] sm:$0xff]  }
 0x19a   : > { %v1648_v63 = vpop.f32.mrf.mxu1  ;;  %15920 = vmatprep.subr.bf16.mxu0 %v17126_v27  ;;  %16007 = vmatpush3.bf16.msra.mxu1 %v17132_v14  ;;  %v17136_v2 = vld [vmem:[#allocation5 + $0x1d0] sm:$0xff]  }
 0x19b   : > { %v18810_v22 = vadd.f32 %v1648_v63, %v871_v18  ;;  %v15457_v6 = vpop.f32.mrf.mxu0  ;;  %16008 = vmatprep.subr.bf16.mxu1 %v17134_v4 }
 0x19c   : > { %v15545_v35 = vpop.f32.mrf.mxu1  ;;  %v17139_v6 = vld [vmem:[#allocation5 + $0x1c8] sm:$0xff]  }
 0x19d   : > { %v874_v53 = vpop.f32.mrf.mxu0  ;;  %15921 = vmatpush3.bf16.msra.mxu0 %v17126_v27 }
 0x19e   : > { %v1651_v19 = vpop.f32.mrf.mxu1  ;;  %15922 = vmatprep.subr.bf16.mxu0 %v17127_v44  ;;  %16009 = vmatpush3.bf16.msra.mxu1 %v17134_v4 }
 0x19f   : > { %v18812_v59 = vadd.f32 %v1651_v19, %v874_v53  ;;  %v15460_v1 = vpop.f32.mrf.mxu0  ;;  %15763 = vmatmul.mubr.bf16.gmra.mxu0 %v18099_v11  ;;  %16010 = vmatprep.subr.bf16.mxu1 %v17135_v28  ;;  %v17129_v53 = vld [vmem:[#allocation5 + $0x188] sm:$0xff]  }
 0x1a0   : > { %v15548_v14 = vpop.f32.mrf.mxu1  ;;  %15851 = vmatmul.mubr.bf16.gmra.mxu1 %v18503_v7  ;;  %15766 = vmatprep.mubr.bf16.mxu0 %v18105_v13 }
 0x1a1   : > { %v18817_v18 = vadd.f32 %v15548_v14, %v15460_v1  ;;  %v887_v63 = vpop.f32.mrf.mxu0  ;;  %15854 = vmatprep.mubr.bf16.mxu1 %v18507_v50  ;;  %15923 = vmatpush3.bf16.msra.mxu0 %v17127_v44  ;;  %v17133_v1 = vld [vmem:[#allocation5 + $0x180] sm:$0xff]  }
 0x1a2   : > { %v1664_v27 = vpop.f32.mrf.mxu1  ;;  %15924 = vmatprep.subr.bf16.mxu0 %v17128_v34  ;;  %16011 = vmatpush3.bf16.msra.mxu1 %v17135_v28  ;;  %v17140_v44 = vld [vmem:[#allocation5 + $0x1c0] sm:$0xff]  }
 0x1a3   : > { %v18820_v19 = vadd.f32 %v1664_v27, %v887_v63  ;;  %v15461_v4 = vpop.f32.mrf.mxu0  ;;  %16012 = vmatprep.subr.bf16.mxu1 %v17136_v2 }
 0x1a4   : > { %v15549_v35 = vpop.f32.mrf.mxu1 }
 0x1a5   : > { %v890_v46 = vpop.f32.mrf.mxu0  ;;  %15925 = vmatpush3.bf16.msra.mxu0 %v17128_v34 }
 0x1a6   : > { %v1667_v7 = vpop.f32.mrf.mxu1  ;;  %15926 = vmatprep.subr.bf16.mxu0 %v17129_v53  ;;  %16013 = vmatpush3.bf16.msra.mxu1 %v17136_v2 }
 0x1a7   : > { %v18822_v14 = vadd.f32 %v1667_v7, %v890_v46  ;;  %v15464_v50 = vpop.f32.mrf.mxu0  ;;  %15767 = vmatmul.mubr.bf16.gmra.mxu0 %v18129_v40  ;;  %16014 = vmatprep.subr.bf16.mxu1 %v17139_v6  ;;  %v18830_v7 = vld [vmem:[#allocation5 + $0x238] sm:$0xff]  }
 0x1a8   : > { %v15552_v28 = vpop.f32.mrf.mxu1  ;;  %15855 = vmatmul.mubr.bf16.gmra.mxu1 %v18519_v12  ;;  %15770 = vmatprep.mubr.bf16.mxu0 %v18135_v45 }
 0x1a9   : > { %v18827_v63 = vadd.f32 %v15552_v28, %v15464_v50  ;;  %v903_v27 = vpop.f32.mrf.mxu0  ;;  %15858 = vmatprep.mubr.bf16.mxu1 %v18523_v52  ;;  %15927 = vmatpush3.bf16.msra.mxu0 %v17129_v53 }
 0x1aa   : > { %v1680_v34 = vpop.f32.mrf.mxu1  ;;  %15928 = vmatprep.subr.bf16.mxu0 %v17133_v1  ;;  %16015 = vmatpush3.bf16.msra.mxu1 %v17139_v6  ;;  %v23010_v6 = vld [vmem:[#allocation27_spill] sm:$0xff] }
 0x1ab   : > { %23007 = vst [vmem:[#allocation130_spill] sm:$0xff] %v18827_v63  ;;  %v18832_v46 = vadd.f32 %v1680_v34, %v903_v27  ;;  %v15465_v2 = vpop.f32.mrf.mxu0  ;;  %16016 = vmatprep.subr.bf16.mxu1 %v17140_v44 }
 0x1ac   : > { %v15553_v4 = vpop.f32.mrf.mxu1  ;;  %v23012_v2 = vld [vmem:[#allocation83_spill] sm:$0xff] }
 0x1ad   : > { %23008 = vst [vmem:[#allocation131_spill] sm:$0xff] %v18832_v46  ;;  %v906_v35 = vpop.f32.mrf.mxu0  ;;  %15929 = vmatpush3.bf16.msra.mxu0 %v17133_v1  ;;  %v23019_v46 = vld [vmem:[#allocation34_spill] sm:$0xff] }
 0x1ae   : > { %v1683_v12 = vpop.f32.mrf.mxu1  ;;  %16017 = vmatpush3.bf16.msra.mxu1 %v17140_v44  ;;  %16090 = vmatprep.subr.bf16.mxu0 %v18830_v7 }
 0x1af   : > { %v18835_v50 = vadd.f32 %v1683_v12, %v906_v35  ;;  %v15468_v28 = vpop.f32.mrf.mxu0  ;;  %15771 = vmatmul.mubr.bf16.gmra.mxu0 %v18157_v8 }
 0x1b0   : > { %v15556_v53 = vpop.f32.mrf.mxu1  ;;  %15859 = vmatmul.mubr.bf16.gmra.mxu1 %v18534_v17  ;;  %15774 = vmatprep.mubr.bf16.mxu0 %v23010_v6 }
 0x1b1   : > { %23009 = vst [vmem:[#allocation132_spill] sm:$0xff] %v18835_v50  ;;  %v18840_v27 = vadd.f32 %v15556_v53, %v15468_v28  ;;  %v919_v34 = vpop.f32.mrf.mxu0  ;;  %15862 = vmatprep.mubr.bf16.mxu1 %v23012_v2  ;;  %v23016_v50 = vld [vmem:[#allocation84_spill] sm:$0xff]  ;;  %v23017_v28 = vld [vmem:[#allocation31_spill] sm:$0xff] }
 0x1b2   : > { %v1696_v1 = vpop.f32.mrf.mxu1 }
 0x1b3   : > { %23011 = vst [vmem:[#allocation133_spill] sm:$0xff] %v18840_v27  ;;  %v18843_v4 = vadd.f32 %v1696_v1, %v919_v34  ;;  %v15469_v44 = vpop.f32.mrf.mxu0  ;;  %v23018_v27 = vld [vmem:[#allocation85_spill] sm:$0xff] }
 0x1b4   : > { %v15557_v52 = vpop.f32.mrf.mxu1 }
 0x1b5   : > { %23013 = vst [vmem:[#allocation134_spill] sm:$0xff] %v18843_v4  ;;  %v922_v12 = vpop.f32.mrf.mxu0 }
 0x1b6   : > { %v1699_v35 = vpop.f32.mrf.mxu1 }
 0x1b7   : > { %v18845_v30 = vadd.f32 %v1699_v35, %v922_v12  ;;  %v15472_v32 = vpop.f32.mrf.mxu0  ;;  %15775 = vmatmul.mubr.bf16.gmra.mxu0 %v23015_v9  ;;  %v23021_v35 = vld [vmem:[#allocation35_spill] sm:$0xff]  ;;  %v23031_v9 = vld [vmem:[#allocation92_spill] sm:$0xff] }
 0x1b8   : > { %v15560_v17 = vpop.f32.mrf.mxu1  ;;  %15863 = vmatmul.mubr.bf16.gmra.mxu1 %v23016_v50  ;;  %15778 = vmatprep.mubr.bf16.mxu0 %v23017_v28  ;;  %v23020_v32 = vld [vmem:[#allocation86_spill] sm:$0xff]  ;;  %v23022_v50 = vld [vmem:[#allocation87_spill] sm:$0xff] }
 0x1b9   : > { %23014 = vst [vmem:[#allocation135_spill] sm:$0xff] %v18845_v30  ;;  %v935_v53 = vpop.f32.mrf.mxu0  ;;  %15866 = vmatprep.mubr.bf16.mxu1 %v23018_v27 }
 0x1ba   : > { %v1712_v2 = vpop.f32.mrf.mxu1 }
 0x1bb   : > { %v15473_v34 = vpop.f32.mrf.mxu0 }
 0x1bc   : > { %v15561_v1 = vpop.f32.mrf.mxu1 }
 0x1bd   : > { %v938_v44 = vpop.f32.mrf.mxu0  ;;  %v23023_v1 = vld [vmem:[#allocation38_spill] sm:$0xff] }
 0x1be   : > { %v1715_v52 = vpop.f32.mrf.mxu1  ;;  %v23024_v44 = vld [vmem:[#allocation88_spill] sm:$0xff] }
 0x1bf   : > { %v15580_v4 = vpop.f32.mrf.mxu0  ;;  %15779 = vmatmul.mubr.bf16.gmra.mxu0 %v23019_v46  ;;  %v23025_v46 = vld [vmem:[#allocation90_spill] sm:$0xff] }
 0x1c0   : > { %v15668_v12 = vpop.f32.mrf.mxu1  ;;  %15867 = vmatmul.mubr.bf16.gmra.mxu1 %v23020_v32  ;;  %15782 = vmatprep.mubr.bf16.mxu0 %v23021_v35  ;;  %v23027_v35 = vld [vmem:[#allocation91_spill] sm:$0xff] }
 0x1c1   : > { %v2158_v17 = vpop.f32.mrf.mxu0  ;;  %15870 = vmatprep.mubr.bf16.mxu1 %v23022_v50  ;;  %v23026_v12 = vld [vmem:[#allocation39_spill] sm:$0xff] }
 0x1c2   : > { %v2655_v30 = vpop.f32.mrf.mxu1  ;;  %v23028_v17 = vld [vmem:[#allocation89_spill] sm:$0xff] }
 0x1c3   : > { %v15581_v53 = vpop.f32.mrf.mxu0 }
 0x1c4   : > { %v15669_v28 = vpop.f32.mrf.mxu1 }
 0x1c5   : > { %v2161_v27 = vpop.f32.mrf.mxu0 }
 0x1c6   : > { %v2658_v2 = vpop.f32.mrf.mxu1 }
 0x1c7   : > { %v15584_v34 = vpop.f32.mrf.mxu0  ;;  %15783 = vmatmul.mubr.bf16.gmra.mxu0 %v23023_v1 }
 0x1c8   : > { %v2451_v4 = vadd.f32 %v15584_v34, %v23024_v44  ;;  %v15672_v52 = vpop.f32.mrf.mxu1  ;;  %15871 = vmatmul.mubr.bf16.gmra.mxu1 %v23025_v46  ;;  %15786 = vmatprep.mubr.bf16.mxu0 %v23026_v12  ;;  %v23032_v46 = vld [vmem:[#allocation42_spill] sm:$0xff]  ;;  %v23033_v12 = vld [vmem:[#allocation93_spill] sm:$0xff] }
 0x1c9   : > { %v2174_v32 = vpop.f32.mrf.mxu0  ;;  %15874 = vmatprep.mubr.bf16.mxu1 %v23027_v35 }
 0x1ca   : > { %v2449_v50 = vadd.f32 %v2174_v32, %v23028_v17  ;;  %v18861_v30 = vadd.f32 %v15672_v52, %v2451_v4  ;;  %v2671_v28 = vpop.f32.mrf.mxu1  ;;  %v23035_v32 = vld [vmem:[#allocation95_spill] sm:$0xff]  ;;  %v23038_v17 = vld [vmem:[#allocation94_spill] sm:$0xff] }
 0x1cb   : > { %v15585_v27 = vpop.f32.mrf.mxu0  ;;  %v23036_v4 = vld [vmem:[#allocation43_spill] sm:$0xff] }
 0x1cc   : > { %23029 = vst [vmem:[#allocation88_spill] sm:$0xff] %v18861_v30  ;;  %v18863_v53 = vadd.f32 %v2671_v28, %v2449_v50  ;;  %v15673_v2 = vpop.f32.mrf.mxu1  ;;  %v23037_v50 = vld [vmem:[#allocation96_spill] sm:$0xff] }
 0x1cd   : > { %v2177_v1 = vpop.f32.mrf.mxu0 }
 0x1ce   : > { %23030 = vst [vmem:[#allocation89_spill] sm:$0xff] %v18863_v53  ;;  %v2450_v34 = vadd.f32 %v2177_v1, %v23031_v9  ;;  %v2674_v44 = vpop.f32.mrf.mxu1 }
 0x1cf   : > { %v15588_v6 = vpop.f32.mrf.mxu0  ;;  %15787 = vmatmul.mubr.bf16.gmra.mxu0 %v23032_v46 }
 0x1d0   : > { %v2455_v8 = vadd.f32 %v15588_v6, %v23033_v12  ;;  %v18868_v63 = vadd.f32 %v2674_v44, %v2450_v34  ;;  %v15676_v35 = vpop.f32.mrf.mxu1  ;;  %15875 = vmatmul.mubr.bf16.gmra.mxu1 %v23035_v32  ;;  %15790 = vmatprep.mubr.bf16.mxu0 %v23036_v4  ;;  %v23040_v12 = vld [vmem:[#allocation97_spill] sm:$0xff]  ;;  %v23041_v32 = vld [vmem:[#allocation46_spill] sm:$0xff] }
 0x1d1   : > { %v2190_v52 = vpop.f32.mrf.mxu0  ;;  %15878 = vmatprep.mubr.bf16.mxu1 %v23037_v50  ;;  %v23042_v4 = vld [vmem:[#allocation98_spill] sm:$0xff] }
 0x1d2   : > { %23034 = vst [vmem:[#allocation92_spill] sm:$0xff] %v18868_v63  ;;  %v2453_v28 = vadd.f32 %v2190_v52, %v23038_v17  ;;  %v18874_v27 = vadd.f32 %v15676_v35, %v2455_v8  ;;  %v2687_v9 = vpop.f32.mrf.mxu1  ;;  %v23044_v52 = vld [vmem:[#allocation100_spill] sm:$0xff] }
 0x1d3   : > { %v15589_v1 = vpop.f32.mrf.mxu0  ;;  %v23045_v8 = vld [vmem:[#allocation48_spill] sm:$0xff] }
 0x1d4   : > { %v18876_v2 = vadd.f32 %v2687_v9, %v2453_v28  ;;  %v15677_v53 = vpop.f32.mrf.mxu1 }
 0x1d5   : > { %v2193_v6 = vpop.f32.mrf.mxu0  ;;  %v23046_v53 = vld [vmem:[#allocation99_spill] sm:$0xff] }
 0x1d6   : > { %23039 = vst [vmem:[#allocation93_spill] sm:$0xff] %v18876_v2  ;;  %v2454_v34 = vadd.f32 %v2193_v6, %v23040_v12  ;;  %v2690_v44 = vpop.f32.mrf.mxu1 }
 0x1d7   : > { %v15592_v63 = vpop.f32.mrf.mxu0  ;;  %15791 = vmatmul.mubr.bf16.gmra.mxu0 %v23041_v32 }
 0x1d8   : > { %v2459_v46 = vadd.f32 %v15592_v63, %v23042_v4  ;;  %v18881_v30 = vadd.f32 %v2690_v44, %v2454_v34  ;;  %v15680_v50 = vpop.f32.mrf.mxu1  ;;  %15879 = vmatmul.mubr.bf16.gmra.mxu1 %v23044_v52  ;;  %15794 = vmatprep.mubr.bf16.mxu0 %v23045_v8  ;;  %v23048_v4 = vld [vmem:[#allocation102_spill] sm:$0xff] }
 0x1d9   : > { %v2206_v35 = vpop.f32.mrf.mxu0  ;;  %15882 = vmatprep.mubr.bf16.mxu1 %v18624_v48  ;;  %v23049_v52 = vld [vmem:[#allocation50_spill] sm:$0xff] }
 0x1da   : > { %23043 = vst [vmem:[#allocation94_spill] sm:$0xff] %v18881_v30  ;;  %v2457_v17 = vadd.f32 %v2206_v35, %v23046_v53  ;;  %v18887_v28 = vadd.f32 %v15680_v50, %v2459_v46  ;;  %v2703_v9 = vpop.f32.mrf.mxu1  ;;  %v23051_v35 = vld [vmem:[#allocation104_spill] sm:$0xff]  ;;  %v23052_v46 = vld [vmem:[#allocation51_spill] sm:$0xff] }
 0x1db   : > { %v15593_v1 = vpop.f32.mrf.mxu0  ;;  %v23053_v53 = vld [vmem:[#allocation103_spill] sm:$0xff] }
 0x1dc   : > { %v18889_v6 = vadd.f32 %v2703_v9, %v2457_v17  ;;  %v15681_v12 = vpop.f32.mrf.mxu1 }
 0x1dd   : > { %v2209_v63 = vpop.f32.mrf.mxu0 }
 0x1de   : > { %23047 = vst [vmem:[#allocation97_spill] sm:$0xff] %v18889_v6  ;;  %v2458_v34 = vadd.f32 %v2209_v63, %v23048_v4  ;;  %v2706_v44 = vpop.f32.mrf.mxu1 }
 0x1df   : > { %v15596_v30 = vpop.f32.mrf.mxu0  ;;  %15795 = vmatmul.mubr.bf16.gmra.mxu0 %v23049_v52 }
 0x1e0   : > { %v2463_v2 = vadd.f32 %v15596_v30, %v18633_v37  ;;  %v18894_v8 = vadd.f32 %v2706_v44, %v2458_v34  ;;  %v15684_v48 = vpop.f32.mrf.mxu1  ;;  %15883 = vmatmul.mubr.bf16.gmra.mxu1 %v23051_v35  ;;  %15798 = vmatprep.mubr.bf16.mxu0 %v23052_v46  ;;  %v23055_v30 = vld [vmem:[#allocation106_spill] sm:$0xff] }
 0x1e1   : > { %v2222_v50 = vpop.f32.mrf.mxu0  ;;  %15886 = vmatprep.mubr.bf16.mxu1 %v18644_v43  ;;  %v23056_v35 = vld [vmem:[#allocation54_spill] sm:$0xff] }
 0x1e2   : > { %23050 = vst [vmem:[#allocation46_spill] sm:$0xff] %v18894_v8  ;;  %v2461_v17 = vadd.f32 %v2222_v50, %v23053_v53  ;;  %v18900_v9 = vadd.f32 %v15684_v48, %v2463_v2  ;;  %v2719_v1 = vpop.f32.mrf.mxu1  ;;  %v23058_v48 = vld [vmem:[#allocation55_spill] sm:$0xff] }
 0x1e3   : > { %v15597_v12 = vpop.f32.mrf.mxu0  ;;  %v23059_v50 = vld [vmem:[#allocation107_spill] sm:$0xff] }
 0x1e4   : > { %v18902_v63 = vadd.f32 %v2719_v1, %v2461_v17  ;;  %v15685_v4 = vpop.f32.mrf.mxu1 }
 0x1e5   : > { %v2225_v37 = vpop.f32.mrf.mxu0 }
 0x1e6   : > { %23054 = vst [vmem:[#allocation98_spill] sm:$0xff] %v18902_v63  ;;  %v2462_v34 = vadd.f32 %v2225_v37, %v23055_v30  ;;  %v2722_v44 = vpop.f32.mrf.mxu1 }
 0x1e7   : > { %v15600_v8 = vpop.f32.mrf.mxu0  ;;  %15799 = vmatmul.mubr.bf16.gmra.mxu0 %v23056_v35 }
 0x1e8   : > { %v2467_v6 = vadd.f32 %v15600_v8, %v18653_v62  ;;  %v18907_v46 = vadd.f32 %v2722_v44, %v2462_v34  ;;  %v15688_v43 = vpop.f32.mrf.mxu1  ;;  %15887 = vmatmul.mubr.bf16.gmra.mxu1 %v18660_v31  ;;  %15802 = vmatprep.mubr.bf16.mxu0 %v23058_v48  ;;  %v23060_v8 = vld [vmem:[#allocation110_spill] sm:$0xff] }
 0x1e9   : > { %v2238_v2 = vpop.f32.mrf.mxu0  ;;  %15890 = vmatprep.mubr.bf16.mxu1 %v18664_v5  ;;  %v23061_v31 = vld [vmem:[#allocation58_spill] sm:$0xff] }
 0x1ea   : > { %23057 = vst [vmem:[#allocation99_spill] sm:$0xff] %v18907_v46  ;;  %v2465_v53 = vadd.f32 %v2238_v2, %v23059_v50  ;;  %v18913_v17 = vadd.f32 %v15688_v43, %v2467_v6  ;;  %v2735_v1 = vpop.f32.mrf.mxu1  ;;  %v23063_v43 = vld [vmem:[#allocation59_spill] sm:$0xff] }
 0x1eb   : > { %v15601_v12 = vpop.f32.mrf.mxu0 }
 0x1ec   : > { %v18915_v4 = vadd.f32 %v2735_v1, %v2465_v53  ;;  %v15689_v37 = vpop.f32.mrf.mxu1 }
 0x1ed   : > { %v2241_v62 = vpop.f32.mrf.mxu0 }
 0x1ee   : > { %v2466_v30 = vadd.f32 %v2241_v62, %v23060_v8  ;;  %v2738_v34 = vpop.f32.mrf.mxu1  ;;  %v23065_v62 = vld [vmem:[#allocation113_spill] sm:$0xff] }
 0x1ef   : > { %v15604_v44 = vpop.f32.mrf.mxu0  ;;  %15803 = vmatmul.mubr.bf16.gmra.mxu0 %v23061_v31 }
 0x1f0   : > { %v2471_v46 = vadd.f32 %v15604_v44, %v18673_v21  ;;  %v18920_v63 = vadd.f32 %v2738_v34, %v2466_v30  ;;  %v15692_v5 = vpop.f32.mrf.mxu1  ;;  %15891 = vmatmul.mubr.bf16.gmra.mxu1 %v18680_v42  ;;  %15806 = vmatprep.mubr.bf16.mxu0 %v23063_v43  ;;  %v23066_v44 = vld [vmem:[#allocation62_spill] sm:$0xff] }
 0x1f1   : > { %v2254_v6 = vpop.f32.mrf.mxu0  ;;  %15894 = vmatprep.mubr.bf16.mxu1 %v18684_v38 }
 0x1f2   : > { %23062 = vst [vmem:[#allocation102_spill] sm:$0xff] %v18920_v63  ;;  %v2469_v2 = vadd.f32 %v2254_v6, %v18676_v26  ;;  %v18926_v50 = vadd.f32 %v15692_v5, %v2471_v46  ;;  %v2751_v53 = vpop.f32.mrf.mxu1  ;;  %v23068_v5 = vld [vmem:[#allocation63_spill] sm:$0xff]  ;;  %v23069_v46 = vld [vmem:[#allocation114_spill] sm:$0xff] }
 0x1f3   : > { %v15605_v1 = vpop.f32.mrf.mxu0 }
 0x1f4   : > { %v18928_v12 = vadd.f32 %v2751_v53, %v2469_v2  ;;  %v15693_v37 = vpop.f32.mrf.mxu1 }
 0x1f5   : > { %v2257_v21 = vpop.f32.mrf.mxu0 }
 0x1f6   : > { %23064 = vst [vmem:[#allocation50_spill] sm:$0xff] %v18928_v12  ;;  %v2470_v8 = vadd.f32 %v2257_v21, %v23065_v62  ;;  %v2754_v30 = vpop.f32.mrf.mxu1  ;;  %v23071_v62 = vld [vmem:[#allocation118_spill] sm:$0xff] }
 0x1f7   : > { %v15608_v34 = vpop.f32.mrf.mxu0  ;;  %15807 = vmatmul.mubr.bf16.gmra.mxu0 %v23066_v44 }
 0x1f8   : > { %v2475_v42 = vadd.f32 %v15608_v34, %v18693_v16  ;;  %v18933_v63 = vadd.f32 %v2754_v30, %v2470_v8  ;;  %v15696_v38 = vpop.f32.mrf.mxu1  ;;  %15895 = vmatmul.mubr.bf16.gmra.mxu1 %v18703_v60  ;;  %15810 = vmatprep.mubr.bf16.mxu0 %v23068_v5  ;;  %v23072_v60 = vld [vmem:[#allocation66_spill] sm:$0xff] }
 0x1f9   : > { %v2270_v26 = vpop.f32.mrf.mxu0  ;;  %15898 = vmatprep.mubr.bf16.mxu1 %v18708_v23 }
 0x1fa   : > { %23067 = vst [vmem:[#allocation103_spill] sm:$0xff] %v18933_v63  ;;  %v2473_v6 = vadd.f32 %v2270_v26, %v23069_v46  ;;  %v18939_v2 = vadd.f32 %v15696_v38, %v2475_v42  ;;  %v2767_v53 = vpop.f32.mrf.mxu1  ;;  %v23073_v63 = vld [vmem:[#allocation119_spill] sm:$0xff]  ;;  %v23077_v46 = vld [vmem:[#allocation121_spill] sm:$0xff] }
 0x1fb   : > { %v15609_v1 = vpop.f32.mrf.mxu0  ;;  %v23075_v42 = vld [vmem:[#allocation67_spill] sm:$0xff] }
 0x1fc   : > { %v18941_v37 = vadd.f32 %v2767_v53, %v2473_v6  ;;  %v15697_v21 = vpop.f32.mrf.mxu1  ;;  %v23076_v26 = vld [vmem:[#allocation123_spill] sm:$0xff] }
 0x1fd   : > { %v2273_v16 = vpop.f32.mrf.mxu0  ;;  %v23079_v21 = vld [vmem:[#allocation120_spill] sm:$0xff] }
 0x1fe   : > { %23070 = vst [vmem:[#allocation106_spill] sm:$0xff] %v18941_v37  ;;  %v2474_v8 = vadd.f32 %v2273_v16, %v23071_v62  ;;  %v2770_v30 = vpop.f32.mrf.mxu1  ;;  %v23080_v16 = vld [vmem:[#allocation115_spill] sm:$0xff]  ;;  %v23083_v37 = vld [vmem:[#allocation124_spill] sm:$0xff] }
 0x1ff   : > { %v15612_v34 = vpop.f32.mrf.mxu0  ;;  %15811 = vmatmul.mubr.bf16.gmra.mxu0 %v23072_v60  ;;  %v18956_v62 = vcombine.low %v23080_v16, %v23079_v21  ;;  %v23086_v16 = vld [vmem:[#allocation71_spill] sm:$0xff] }
 0x200   : > { %v2479_v12 = vadd.f32 %v15612_v34, %v23073_v63  ;;  %v18946_v5 = vadd.f32 %v2770_v30, %v2474_v8  ;;  %v15700_v23 = vpop.f32.mrf.mxu1  ;;  %15899 = vmatmul.mubr.bf16.gmra.mxu1 %v18727_v20  ;;  %15814 = vmatprep.mubr.bf16.mxu0 %v23075_v42  ;;  %v23082_v34 = vld [vmem:[#allocation75_spill] sm:$0xff] }
 0x201   : > { %v2286_v38 = vpop.f32.mrf.mxu0  ;;  %15902 = vmatprep.mubr.bf16.mxu1 %v23076_v26  ;;  %v3497_v20 = vshll.u32 %v23082_v34, 16  ;;  %v3501_v26 = vshrl.u32 %v23082_v34, 16 }
 0x202   : > { %23074 = vst [vmem:[#allocation54_spill] sm:$0xff] %v18946_v5  ;;  %v2477_v6 = vadd.f32 %v2286_v38, %v23077_v46  ;;  %v18952_v53 = vadd.f32 %v15700_v23, %v2479_v12  ;;  %v2783_v1 = vpop.f32.mrf.mxu1  ;;  %v3505_v23 = vshll.u32 %v18956_v62, 16  ;;  %v18964_v12 = vld [vmem:[#allocation2 + $0x140] sm:$0xf]  ;;  %v23084_v46 = vld [vmem:[#allocation70_spill] sm:$0xff] }
 0x203   : > { %v15613_v63 = vpop.f32.mrf.mxu0 }
 0x204   : > { %23078 = vst [vmem:[#allocation55_spill] sm:$0xff] %v18952_v53  ;;  %v18958_v8 = vadd.f32 %v2783_v1, %v2477_v6  ;;  %v15701_v30 = vpop.f32.mrf.mxu1  ;;  %v13903_v63 = vcombine.low %v18964_v12, %v18964_v12 }
 0x205   : > { %v2289_v5 = vpop.f32.mrf.mxu0 }
 0x206   : > { %23081 = vst [vmem:[#allocation107_spill] sm:$0xff] %v18958_v8  ;;  %v2478_v42 = vadd.f32 %v2289_v5, %v23083_v37  ;;  %v2786_v60 = vpop.f32.mrf.mxu1  ;;  %v3499_v5 = vrot.slane %v3497_v20, 1 }
 0x207   : > { %v15616_v38 = vpop.f32.mrf.mxu0  ;;  %15815 = vmatmul.mubr.bf16.gmra.mxu0 %v23084_v46 }
 0x208   : > { %v2483_v21 = vadd.f32 %v15616_v38, %v18745_v33  ;;  %v18968_v6 = vadd.f32 %v2786_v60, %v2478_v42  ;;  %v15704_v1 = vpop.f32.mrf.mxu1  ;;  %15903 = vmatmul.mubr.bf16.gmra.mxu1 %v18753_v0  ;;  %15818 = vmatprep.mubr.bf16.mxu0 %v23086_v16  ;;  %v3503_v33 = vor.u32 %v3501_v26, %v3499_v5  ;;  %v3507_v60 = vrot.slane %v3505_v23, 1 }
 0x209   : > { %v2302_v37 = vpop.f32.mrf.mxu0  ;;  %15906 = vmatprep.mubr.bf16.mxu1 %v18761_v10  ;;  %v18982_v20 = vsel %vm1747_vm1, %v18772_v58, %v3499_v5  ;;  %v3509_v10 = vshrl.u32 %v18956_v62, 16  ;;  %v3513_v16 = vshll.u32 %v13903_v63, 16 }
 0x20a   : > { %23085 = vst [vmem:[#allocation110_spill] sm:$0xff] %v18968_v6  ;;  %v2481_v30 = vadd.f32 %v2302_v37, %v18750_v41  ;;  %v18976_v8 = vadd.f32 %v15704_v1, %v2483_v21  ;;  %v2799_v46 = vpop.f32.mrf.mxu1  ;;  %23087 = vst [vmem:[#allocation58_spill] sm:$0xff] %v18982_v20  ;;  %v18987_v21 = vsel %vm1747_vm1, %v3503_v33, %v3507_v60 }
 0x20b   : > { %v15617_v42 = vpop.f32.mrf.mxu0  ;;  %23088 = vst [vmem:[#allocation59_spill] sm:$0xff] %v18987_v21 }
 0x20c   : > { %v18978_v38 = vadd.f32 %v2799_v46, %v2481_v30  ;;  %v15705_v0 = vpop.f32.mrf.mxu1 }
 0x20d   : > { %v2305_v6 = vpop.f32.mrf.mxu0 }
 0x20e   : > { %v2482_v53 = vadd.f32 %v2305_v6, %v18767_v61  ;;  %v2802_v41 = vpop.f32.mrf.mxu1  ;;  %v18996_v61 = vor.u32 %v3509_v10, %v3507_v60  ;;  %v3515_v6 = vrot.slane %v3513_v16, 1  ;;  %v23090_v60 = vld [vmem:[#allocation19_spill] sm:$0xff] }
 0x20f   : > { %v15620_v26 = vpop.f32.mrf.mxu0  ;;  %15819 = vmatmul.mubr.bf16.gmra.mxu0 %v18443_v29 }
 0x210   : > { %v2487_v23 = vadd.f32 %v15620_v26, %v18774_v39  ;;  %v18991_v0 = vadd.f32 %v2802_v41, %v2482_v53  ;;  %v15708_v46 = vpop.f32.mrf.mxu1  ;;  %15907 = vmatmul.mubr.bf16.gmra.mxu1 %v18982_v20  ;;  %15822 = vmatprep.mubr.bf16.mxu0 %v23082_v34  ;;  %23089 = vst [vmem:[#allocation113_spill] sm:$0xff] %v18996_v61  ;;  %v23166_v20 = vld [vmem:[#allocation72_spill] sm:$0xff] }
 0x211   : > { %v2318_v58 = vpop.f32.mrf.mxu0  ;;  %15910 = vmatprep.mubr.bf16.mxu1 %v18987_v21  ;;  %v3516_v33 = vsel %vm1747_vm1, %v18996_v61, %v3515_v6 }
 0x212   : > { %v2485_v1 = vadd.f32 %v2318_v58, %v18777_v47  ;;  %v18999_v5 = vadd.f32 %v15708_v46, %v2487_v23  ;;  %v2815_v37 = vpop.f32.mrf.mxu1 }
 0x213   : > { %v15621_v63 = vpop.f32.mrf.mxu0 }
 0x214   : > { %v19001_v39 = vadd.f32 %v2815_v37, %v2485_v1  ;;  %v15709_v53 = vpop.f32.mrf.mxu1 }
 0x215   : > { %v2321_v30 = vpop.f32.mrf.mxu0 }
 0x216   : > { %v2486_v42 = vadd.f32 %v2321_v30, %v18783_v57  ;;  %v2818_v41 = vpop.f32.mrf.mxu1  ;;  %v17142_v30 = vld [vmem:[#allocation5 + $0x230] sm:$0xff]  }
 0x217   : > { %v15624_v26 = vpop.f32.mrf.mxu0  ;;  %15823 = vmatmul.mubr.bf16.gmra.mxu0 %v18956_v62 }
 0x218   : > { %v2491_v10 = vadd.f32 %v15624_v26, %v18786_v15  ;;  %v19008_v47 = vadd.f32 %v2818_v41, %v2486_v42  ;;  %v15712_v16 = vpop.f32.mrf.mxu1  ;;  %15911 = vmatmul.mubr.bf16.gmra.mxu1 %v3516_v33  ;;  %15930 = vmatprep.mubr.bf16.mxu0 %v23090_v60  ;;  %v23091_v42 = vld [vmem:[#allocation20_spill] sm:$0xff] }
 0x219   : > { %v2334_v23 = vpop.f32.mrf.mxu0  ;;  %16018 = vmatprep.mubr.bf16.mxu1 %v18045_v25 }
 0x21a   : > { %v2489_v46 = vadd.f32 %v2334_v23, %v18789_v56  ;;  %v19013_v58 = vadd.f32 %v15712_v16, %v2491_v10  ;;  %v2831_v57 = vpop.f32.mrf.mxu1  ;;  %v23092_v10 = vld [vmem:[#allocation21_spill] sm:$0xff] }
 0x21b   : > { %v15625_v6 = vpop.f32.mrf.mxu0 }
 0x21c   : > { %v19015_v1 = vadd.f32 %v2831_v57, %v2489_v46  ;;  %v15713_v37 = vpop.f32.mrf.mxu1 }
 0x21d   : > { %v2337_v63 = vpop.f32.mrf.mxu0  ;;  %v17144_v37 = vld [vmem:[#allocation5 + $0x220] sm:$0xff]  }
 0x21e   : > { %v2490_v15 = vadd.f32 %v2337_v63, %v18791_v55  ;;  %v2834_v53 = vpop.f32.mrf.mxu1  ;;  %v17143_v55 = vld [vmem:[#allocation5 + $0x228] sm:$0xff]  }
 0x21f   : > { %v15628_v33 = vpop.f32.mrf.mxu0  ;;  %15931 = vmatmul.mubr.bf16.vlgmr.msra.gmra.mxu0 %v23091_v42 }
 0x220   : > { %v2495_v41 = vadd.f32 %v15628_v33, %v18796_v24  ;;  %v19020_v25 = vadd.f32 %v2834_v53, %v2490_v15  ;;  %16091 = vmatpush3.bf16.msra.mxu0 %v18830_v7  ;;  %v15716_v56 = vpop.f32.mrf.mxu1  ;;  %16019 = vmatmul.mubr.bf16.vlgmr.msra.gmra.mxu1 %v18071_v49  ;;  %v23094_v33 = vld [vmem:[#allocation23_spill] sm:$0xff] }
 0x221   : > { %v2350_v26 = vpop.f32.mrf.mxu0  ;;  %15934 = vmatprep.mubr.bf16.mxu0 %v23092_v10  ;;  %16022 = vmatprep.mubr.bf16.mxu1 %v18078_v51  ;;  %v23093_v51 = vld [vmem:[#allocation22_spill] sm:$0xff] }
 0x222   : > { %v2493_v16 = vadd.f32 %v2350_v26, %v18800_v36  ;;  %v19027_v60 = vadd.f32 %v15716_v56, %v2495_v41  ;;  %v2847_v23 = vpop.f32.mrf.mxu1  ;;  %16092 = vmatprep.subr.bf16.mxu0 %v17142_v30  ;;  %v17145_v56 = vld [vmem:[#allocation5 + $0x218] sm:$0xff]  }
 0x223   : > { %v15629_v24 = vpop.f32.mrf.mxu0 }
 0x224   : > { %v19029_v46 = vadd.f32 %v2847_v23, %v2493_v16  ;;  %v15717_v57 = vpop.f32.mrf.mxu1  ;;  %16093 = vmatpush3.bf16.msra.mxu0 %v17142_v30  ;;  %v17146_v24 = vld [vmem:[#allocation5 + $0x210] sm:$0xff]  }
 0x225   : > { %v2353_v7 = vpop.f32.mrf.mxu0  ;;  %16094 = vmatprep.subr.bf16.mxu0 %v17143_v55 }
 0x226   : > { %v2494_v49 = vadd.f32 %v2353_v7, %v18802_v54  ;;  %v2850_v6 = vpop.f32.mrf.mxu1 }
 0x227   : > { %v15632_v63 = vpop.f32.mrf.mxu0  ;;  %15935 = vmatmul.mubr.bf16.gmra.mxu0 %v23093_v51  ;;  %v17147_v51 = vld [vmem:[#allocation5 + $0x208] sm:$0xff]  }
 0x228   : > { %v2499_v36 = vadd.f32 %v15632_v63, %v18807_v3  ;;  %v19034_v15 = vadd.f32 %v2850_v6, %v2494_v49  ;;  %v15720_v53 = vpop.f32.mrf.mxu1  ;;  %16023 = vmatmul.mubr.bf16.gmra.mxu1 %v18099_v11  ;;  %15938 = vmatprep.mubr.bf16.mxu0 %v23094_v33  ;;  %v23096_v49 = vld [vmem:[#allocation25_spill] sm:$0xff] }
 0x229   : > { %v2366_v42 = vpop.f32.mrf.mxu0  ;;  %16026 = vmatprep.mubr.bf16.mxu1 %v18105_v13  ;;  %16095 = vmatpush3.bf16.msra.mxu0 %v17143_v55  ;;  %v23095_v55 = vld [vmem:[#allocation24_spill] sm:$0xff] }
 0x22a   : > { %v2497_v54 = vadd.f32 %v2366_v42, %v18810_v22  ;;  %v19040_v30 = vadd.f32 %v15720_v53, %v2499_v36  ;;  %v2863_v41 = vpop.f32.mrf.mxu1  ;;  %16096 = vmatprep.subr.bf16.mxu0 %v17144_v37 }
 0x22b   : > { %v15633_v26 = vpop.f32.mrf.mxu0 }
 0x22c   : > { %v19042_v3 = vadd.f32 %v2863_v41, %v2497_v54  ;;  %v15721_v10 = vpop.f32.mrf.mxu1  ;;  %v17148_v54 = vld [vmem:[#allocation5 + $0x200] sm:$0xff]   ;;  %v23097_v41 = vld [vmem:[#allocation28_spill] sm:$0xff] }
 0x22d   : > { %v2369_v16 = vpop.f32.mrf.mxu0  ;;  %16097 = vmatpush3.bf16.msra.mxu0 %v17144_v37 }
 0x22e   : > { %v2498_v11 = vadd.f32 %v2369_v16, %v18812_v59  ;;  %v2866_v23 = vpop.f32.mrf.mxu1  ;;  %16098 = vmatprep.subr.bf16.mxu0 %v17145_v56  ;;  %v23099_v16 = vld [vmem:[#allocation26_spill] sm:$0xff] }
 0x22f   : > { %v15636_v13 = vpop.f32.mrf.mxu0  ;;  %15939 = vmatmul.mubr.bf16.gmra.mxu0 %v23095_v55 }
 0x230   : > { %v2503_v22 = vadd.f32 %v15636_v13, %v18817_v18  ;;  %v19047_v57 = vadd.f32 %v2866_v23, %v2498_v11  ;;  %v15724_v7 = vpop.f32.mrf.mxu1  ;;  %16027 = vmatmul.mubr.bf16.gmra.mxu1 %v18129_v40  ;;  %15942 = vmatprep.mubr.bf16.mxu0 %v23096_v49  ;;  %v23100_v11 = vld [vmem:[#allocation29_spill] sm:$0xff]  ;;  %v23101_v13 = vld [vmem:[#allocation27_spill] sm:$0xff] }
 0x231   : > { %v2382_v6 = vpop.f32.mrf.mxu0  ;;  %16030 = vmatprep.mubr.bf16.mxu1 %v18135_v45  ;;  %16099 = vmatpush3.bf16.msra.mxu0 %v17145_v56 }
 0x232   : > { %v2501_v59 = vadd.f32 %v2382_v6, %v18820_v19  ;;  %v19053_v37 = vadd.f32 %v15724_v7, %v2503_v22  ;;  %v2879_v63 = vpop.f32.mrf.mxu1  ;;  %16100 = vmatprep.subr.bf16.mxu0 %v17146_v24  ;;  %v23098_v19 = vld [vmem:[#allocation130_spill] sm:$0xff] }
 0x233   : > { %v15637_v36 = vpop.f32.mrf.mxu0 }
 0x234   : > { %v19055_v18 = vadd.f32 %v2879_v63, %v2501_v59  ;;  %v15725_v53 = vpop.f32.mrf.mxu1  ;;  %v23103_v63 = vld [vmem:[#allocation132_spill] sm:$0xff] }
 0x235   : > { %v2385_v33 = vpop.f32.mrf.mxu0  ;;  %16101 = vmatpush3.bf16.msra.mxu0 %v17146_v24 }
 0x236   : > { %v2502_v40 = vadd.f32 %v2385_v33, %v18822_v14  ;;  %v2882_v42 = vpop.f32.mrf.mxu1  ;;  %16102 = vmatprep.subr.bf16.mxu0 %v17147_v51  ;;  %v23102_v14 = vld [vmem:[#allocation131_spill] sm:$0xff] }
 0x237   : > { %v15640_v45 = vpop.f32.mrf.mxu0  ;;  %15943 = vmatmul.mubr.bf16.gmra.mxu0 %v23097_v41 }
 0x238   : > { %v2507_v56 = vadd.f32 %v15640_v45, %v23098_v19  ;;  %v19060_v26 = vadd.f32 %v2882_v42, %v2502_v40  ;;  %v15728_v10 = vpop.f32.mrf.mxu1  ;;  %16031 = vmatmul.mubr.bf16.gmra.mxu1 %v23099_v16  ;;  %15946 = vmatprep.mubr.bf16.mxu0 %v23100_v11  ;;  %v23104_v40 = vld [vmem:[#allocation32_spill] sm:$0xff]  ;;  %v23105_v42 = vld [vmem:[#allocation133_spill] sm:$0xff]  ;;  %v23106_v19 = vld [vmem:[#allocation30_spill] sm:$0xff] }
 0x239   : > { %v2398_v23 = vpop.f32.mrf.mxu0  ;;  %16034 = vmatprep.mubr.bf16.mxu1 %v23101_v13  ;;  %16103 = vmatpush3.bf16.msra.mxu0 %v17147_v51  ;;  %v23108_v16 = vld [vmem:[#allocation31_spill] sm:$0xff]  ;;  %v23109_v11 = vld [vmem:[#allocation134_spill] sm:$0xff] }
 0x23a   : > { %v2505_v24 = vadd.f32 %v2398_v23, %v23102_v14  ;;  %v19066_v55 = vadd.f32 %v15728_v10, %v2507_v56  ;;  %v2895_v22 = vpop.f32.mrf.mxu1  ;;  %16104 = vmatprep.subr.bf16.mxu0 %v17148_v54  ;;  %v23107_v56 = vld [vmem:[#allocation33_spill] sm:$0xff] }
 0x23b   : > { %v15641_v7 = vpop.f32.mrf.mxu0 }
 0x23c   : > { %v19068_v49 = vadd.f32 %v2895_v22, %v2505_v24  ;;  %v15729_v6 = vpop.f32.mrf.mxu1 }
 0x23d   : > { %v2401_v59 = vpop.f32.mrf.mxu0  ;;  %16105 = vmatpush3.bf16.msra.mxu0 %v17148_v54  ;;  %v23110_v6 = vld [vmem:[#allocation135_spill] sm:$0xff] }
 0x23e   : > { %v2506_v36 = vadd.f32 %v2401_v59, %v23103_v63  ;;  %v2898_v53 = vpop.f32.mrf.mxu1 }
 0x23f   : > { %v15644_v33 = vpop.f32.mrf.mxu0  ;;  %15947 = vmatmul.mubr.bf16.gmra.mxu0 %v23104_v40 }
 0x240   : > { %v2511_v51 = vadd.f32 %v15644_v33, %v23105_v42  ;;  %v19073_v45 = vadd.f32 %v2898_v53, %v2506_v36  ;;  %v15732_v41 = vpop.f32.mrf.mxu1  ;;  %16035 = vmatmul.mubr.bf16.gmra.mxu1 %v23106_v19  ;;  %15950 = vmatprep.mubr.bf16.mxu0 %v23107_v56  ;;  %v23111_v53 = vld [vmem:[#allocation36_spill] sm:$0xff]  ;;  %v23112_v42 = vld [vmem:[#allocation34_spill] sm:$0xff]  ;;  %v23113_v19 = vld [vmem:[#allocation37_spill] sm:$0xff] }
 0x241   : > { %v2414_v10 = vpop.f32.mrf.mxu0  ;;  %16038 = vmatprep.mubr.bf16.mxu1 %v23108_v16 }
 0x242   : > { %v2509_v54 = vadd.f32 %v2414_v10, %v23109_v11  ;;  %v19079_v23 = vadd.f32 %v15732_v41, %v2511_v51  ;;  %v2911_v13 = vpop.f32.mrf.mxu1  ;;  %v23114_v41 = vld [vmem:[#allocation35_spill] sm:$0xff] }
 0x243   : > { %v15645_v14 = vpop.f32.mrf.mxu0 }
 0x244   : > { %v19081_v24 = vadd.f32 %v2911_v13, %v2509_v54  ;;  %v15733_v22 = vpop.f32.mrf.mxu1  ;;  %v23115_v14 = vld [vmem:[#allocation40_spill] sm:$0xff] }
 0x245   : > { %v2417_v7 = vpop.f32.mrf.mxu0 }
 0x246   : > { %v2510_v59 = vadd.f32 %v2417_v7, %v23110_v6  ;;  %v2914_v63 = vpop.f32.mrf.mxu1  ;;  %v23116_v7 = vld [vmem:[#allocation38_spill] sm:$0xff]  ;;  %v23117_v6 = vld [vmem:[#allocation41_spill] sm:$0xff] }
 0x247   : > { %v15648_v36 = vpop.f32.mrf.mxu0  ;;  %15951 = vmatmul.mubr.bf16.gmra.mxu0 %v23111_v53 }
 0x248   : > { %v19085_v33 = vadd.f32 %v2914_v63, %v2510_v59  ;;  %v15736_v40 = vpop.f32.mrf.mxu1  ;;  %16039 = vmatmul.mubr.bf16.gmra.mxu1 %v23112_v42  ;;  %15954 = vmatprep.mubr.bf16.mxu0 %v23113_v19  ;;  %v23118_v63 = vld [vmem:[#allocation39_spill] sm:$0xff] }
 0x249   : > { %v2430_v51 = vpop.f32.mrf.mxu0  ;;  %16042 = vmatprep.mubr.bf16.mxu1 %v23114_v41  ;;  %v23119_v41 = vld [vmem:[#allocation44_spill] sm:$0xff] }
 0x24a   : > { %v2927_v56 = vpop.f32.mrf.mxu1 }
 0x24b   : > { %v15649_v10 = vpop.f32.mrf.mxu0  ;;  %v23120_v56 = vld [vmem:[#allocation88_spill] sm:$0xff] }
 0x24c   : > { %v15737_v16 = vpop.f32.mrf.mxu1 }
 0x24d   : > { %v2433_v11 = vpop.f32.mrf.mxu0 }
 0x24e   : > { %v2930_v54 = vpop.f32.mrf.mxu1  ;;  %v23121_v11 = vld [vmem:[#allocation42_spill] sm:$0xff] }
 0x24f   : > { %v15756_v13 = vpop.f32.mrf.mxu0  ;;  %15955 = vmatmul.mubr.bf16.gmra.mxu0 %v23115_v14  ;;  %v23122_v54 = vld [vmem:[#allocation45_spill] sm:$0xff]  ;;  %v23123_v14 = vld [vmem:[#allocation43_spill] sm:$0xff] }
 0x250   : > { %v15844_v22 = vpop.f32.mrf.mxu1  ;;  %16043 = vmatmul.mubr.bf16.gmra.mxu1 %v23116_v7  ;;  %15958 = vmatprep.mubr.bf16.mxu0 %v23117_v6 }
 0x251   : > { %v3117_v59 = vpop.f32.mrf.mxu0  ;;  %16046 = vmatprep.mubr.bf16.mxu1 %v23118_v63  ;;  %v23124_v22 = vld [vmem:[#allocation89_spill] sm:$0xff] }
 0x252   : > { %v3602_v36 = vpop.f32.mrf.mxu1 }
 0x253   : > { %v15757_v53 = vpop.f32.mrf.mxu0 }
 0x254   : > { %v15845_v40 = vpop.f32.mrf.mxu1 }
 0x255   : > { %v3120_v42 = vpop.f32.mrf.mxu0 }
 0x256   : > { %v3605_v19 = vpop.f32.mrf.mxu1  ;;  %v23125_v42 = vld [vmem:[#allocation92_spill] sm:$0xff] }
 0x257   : > { %v15760_v51 = vpop.f32.mrf.mxu0  ;;  %15959 = vmatmul.mubr.bf16.gmra.mxu0 %v23119_v41 }
 0x258   : > { %v3410_v10 = vadd.f32 %v15760_v51, %v23120_v56  ;;  %v15848_v16 = vpop.f32.mrf.mxu1  ;;  %16047 = vmatmul.mubr.bf16.gmra.mxu1 %v23121_v11  ;;  %15962 = vmatprep.mubr.bf16.mxu0 %v23122_v54  ;;  %v23126_v56 = vld [vmem:[#allocation47_spill] sm:$0xff] }
 0x259   : > { %v3133_v13 = vpop.f32.mrf.mxu0  ;;  %16050 = vmatprep.mubr.bf16.mxu1 %v23123_v14 }
 0x25a   : > { %v3408_v7 = vadd.f32 %v3133_v13, %v23124_v22  ;;  %v19100_v6 = vadd.f32 %v15848_v16, %v3410_v10  ;;  %v3618_v59 = vpop.f32.mrf.mxu1  ;;  %v23127_v10 = vld [vmem:[#allocation49_spill] sm:$0xff]  ;;  %v23128_v13 = vld [vmem:[#allocation48_spill] sm:$0xff] }
 0x25b   : > { %v15761_v63 = vpop.f32.mrf.mxu0  ;;  %v23129_v22 = vld [vmem:[#allocation93_spill] sm:$0xff] }
 0x25c   : > { %v19102_v36 = vadd.f32 %v3618_v59, %v3408_v7  ;;  %v15849_v53 = vpop.f32.mrf.mxu1 }
 0x25d   : > { %v3136_v40 = vpop.f32.mrf.mxu0 }
 0x25e   : > { %v3409_v19 = vadd.f32 %v3136_v40, %v23125_v42  ;;  %v3621_v51 = vpop.f32.mrf.mxu1 }
 0x25f   : > { %v15764_v41 = vpop.f32.mrf.mxu0  ;;  %15963 = vmatmul.mubr.bf16.gmra.mxu0 %v23126_v56 }
 0x260   : > { %v3414_v11 = vadd.f32 %v15764_v41, %v18874_v27  ;;  %v19107_v54 = vadd.f32 %v3621_v51, %v3409_v19  ;;  %v15852_v14 = vpop.f32.mrf.mxu1  ;;  %16051 = vmatmul.mubr.bf16.gmra.mxu1 %v23041_v32  ;;  %15966 = vmatprep.mubr.bf16.mxu0 %v23127_v10  ;;  %v23130_v19 = vld [vmem:[#allocation94_spill] sm:$0xff]  ;;  %v23131_v32 = vld [vmem:[#allocation52_spill] sm:$0xff] }
 0x261   : > { %v3149_v16 = vpop.f32.mrf.mxu0  ;;  %16054 = vmatprep.mubr.bf16.mxu1 %v23128_v13 }
 0x262   : > { %v3412_v7 = vadd.f32 %v3149_v16, %v23129_v22  ;;  %v19113_v59 = vadd.f32 %v15852_v14, %v3414_v11  ;;  %v3634_v63 = vpop.f32.mrf.mxu1  ;;  %v23132_v11 = vld [vmem:[#allocation53_spill] sm:$0xff]  ;;  %v23133_v16 = vld [vmem:[#allocation51_spill] sm:$0xff] }
 0x263   : > { %v15765_v53 = vpop.f32.mrf.mxu0  ;;  %v23134_v22 = vld [vmem:[#allocation97_spill] sm:$0xff] }
 0x264   : > { %v19115_v40 = vadd.f32 %v3634_v63, %v3412_v7  ;;  %v15853_v42 = vpop.f32.mrf.mxu1 }
 0x265   : > { %v3152_v27 = vpop.f32.mrf.mxu0 }
 0x266   : > { %v3413_v51 = vadd.f32 %v3152_v27, %v23130_v19  ;;  %v3637_v41 = vpop.f32.mrf.mxu1 }
 0x267   : > { %v15768_v56 = vpop.f32.mrf.mxu0  ;;  %15967 = vmatmul.mubr.bf16.gmra.mxu0 %v23131_v32 }
 0x268   : > { %v3418_v10 = vadd.f32 %v15768_v56, %v18887_v28  ;;  %v19120_v61 = vadd.f32 %v3637_v41, %v3413_v51  ;;  %v15856_v13 = vpop.f32.mrf.mxu1  ;;  %16055 = vmatmul.mubr.bf16.gmra.mxu1 %v23049_v52  ;;  %15970 = vmatprep.mubr.bf16.mxu0 %v23132_v11  ;;  %v23135_v51 = vld [vmem:[#allocation46_spill] sm:$0xff]  ;;  %v23136_v52 = vld [vmem:[#allocation56_spill] sm:$0xff] }
 0x269   : > { %v3165_v14 = vpop.f32.mrf.mxu0  ;;  %16058 = vmatprep.mubr.bf16.mxu1 %v23133_v16 }
 0x26a   : > { %v3416_v7 = vadd.f32 %v3165_v14, %v23134_v22  ;;  %v19126_v63 = vadd.f32 %v15856_v13, %v3418_v10  ;;  %v3650_v53 = vpop.f32.mrf.mxu1  ;;  %v23137_v10 = vld [vmem:[#allocation57_spill] sm:$0xff]  ;;  %v23138_v14 = vld [vmem:[#allocation98_spill] sm:$0xff] }
 0x26b   : > { %v15769_v42 = vpop.f32.mrf.mxu0 }
 0x26c   : > { %v19128_v27 = vadd.f32 %v3650_v53, %v3416_v7  ;;  %v15857_v19 = vpop.f32.mrf.mxu1 }
 0x26d   : > { %v3168_v28 = vpop.f32.mrf.mxu0 }
 0x26e   : > { %v3417_v41 = vadd.f32 %v3168_v28, %v23135_v51  ;;  %v3653_v56 = vpop.f32.mrf.mxu1  ;;  %v23140_v51 = vld [vmem:[#allocation99_spill] sm:$0xff] }
 0x26f   : > { %v15772_v32 = vpop.f32.mrf.mxu0  ;;  %15971 = vmatmul.mubr.bf16.gmra.mxu0 %v23136_v52 }
 0x270   : > { %v3422_v11 = vadd.f32 %v15772_v32, %v18900_v9  ;;  %v19133_v21 = vadd.f32 %v3653_v56, %v3417_v41  ;;  %v15860_v16 = vpop.f32.mrf.mxu1  ;;  %16059 = vmatmul.mubr.bf16.gmra.mxu1 %v23056_v35  ;;  %15974 = vmatprep.mubr.bf16.mxu0 %v23137_v10  ;;  %v23141_v35 = vld [vmem:[#allocation60_spill] sm:$0xff] }
 0x271   : > { %v3181_v13 = vpop.f32.mrf.mxu0  ;;  %16062 = vmatprep.mubr.bf16.mxu1 %v23058_v48 }
 0x272   : > { %v3420_v22 = vadd.f32 %v3181_v13, %v23138_v14  ;;  %v19139_v7 = vadd.f32 %v15860_v16, %v3422_v11  ;;  %v3666_v53 = vpop.f32.mrf.mxu1  ;;  %v23143_v11 = vld [vmem:[#allocation61_spill] sm:$0xff] }
 0x273   : > { %v15773_v42 = vpop.f32.mrf.mxu0 }
 0x274   : > { %v19141_v19 = vadd.f32 %v3666_v53, %v3420_v22  ;;  %v15861_v28 = vpop.f32.mrf.mxu1  ;;  %v17153_v53 = vld [vmem:[#allocation8 + $0x78] sm:$0xff]  }
 0x275   : > { %v3184_v9 = vpop.f32.mrf.mxu0  ;;  %16178 = vmatprep.subr.bf16.mxu1 %v17153_v53 }
 0x276   : > { %23139 = vst [vmem:[#allocation62_spill] sm:$0xff] %v19141_v19  ;;  %v3421_v41 = vadd.f32 %v3184_v9, %v23140_v51  ;;  %v3669_v56 = vpop.f32.mrf.mxu1  ;;  %16179 = vmatpush3.bf16.msra.mxu1 %v17153_v53  ;;  %v23146_v51 = vld [vmem:[#allocation102_spill] sm:$0xff] }
 0x277   : > { %v15776_v32 = vpop.f32.mrf.mxu0  ;;  %15975 = vmatmul.mubr.bf16.gmra.mxu0 %v23141_v35 }
 0x278   : > { %v3426_v52 = vadd.f32 %v15776_v32, %v18913_v17  ;;  %v19146_v10 = vadd.f32 %v3669_v56, %v3421_v41  ;;  %v15864_v48 = vpop.f32.mrf.mxu1  ;;  %16063 = vmatmul.mubr.bf16.gmra.mxu1 %v23061_v31  ;;  %15978 = vmatprep.mubr.bf16.mxu0 %v23143_v11  ;;  %v23147_v32 = vld [vmem:[#allocation64_spill] sm:$0xff]  ;;  %v23150_v11 = vld [vmem:[#allocation63_spill] sm:$0xff] }
 0x279   : > { %v3197_v16 = vpop.f32.mrf.mxu0  ;;  %16066 = vmatprep.mubr.bf16.mxu1 %v23063_v43 }
 0x27a   : > { %23142 = vst [vmem:[#allocation114_spill] sm:$0xff] %v19146_v10  ;;  %v3424_v13 = vadd.f32 %v3197_v16, %v18915_v4  ;;  %v19152_v14 = vadd.f32 %v15864_v48, %v3426_v52  ;;  %v3682_v22 = vpop.f32.mrf.mxu1  ;;  %v23149_v52 = vld [vmem:[#allocation65_spill] sm:$0xff]  ;;  %v23151_v16 = vld [vmem:[#allocation50_spill] sm:$0xff] }
 0x27b   : > { %v15777_v42 = vpop.f32.mrf.mxu0 }
 0x27c   : > { %23144 = vst [vmem:[#allocation118_spill] sm:$0xff] %v19152_v14  ;;  %v19154_v28 = vadd.f32 %v3682_v22, %v3424_v13  ;;  %v15865_v17 = vpop.f32.mrf.mxu1 }
 0x27d   : > { %v3200_v9 = vpop.f32.mrf.mxu0 }
 0x27e   : > { %23145 = vst [vmem:[#allocation119_spill] sm:$0xff] %v19154_v28  ;;  %v3425_v31 = vadd.f32 %v3200_v9, %v23146_v51  ;;  %v3685_v41 = vpop.f32.mrf.mxu1  ;;  %v23154_v51 = vld [vmem:[#allocation103_spill] sm:$0xff] }
 0x27f   : > { %v15780_v56 = vpop.f32.mrf.mxu0  ;;  %15979 = vmatmul.mubr.bf16.gmra.mxu0 %v23147_v32 }
 0x280   : > { %v3430_v43 = vadd.f32 %v15780_v56, %v18926_v50  ;;  %v19159_v4 = vadd.f32 %v3685_v41, %v3425_v31  ;;  %v15868_v35 = vpop.f32.mrf.mxu1  ;;  %16067 = vmatmul.mubr.bf16.gmra.mxu1 %v23066_v44  ;;  %15982 = vmatprep.mubr.bf16.mxu0 %v23149_v52  ;;  %v23155_v44 = vld [vmem:[#allocation68_spill] sm:$0xff] }
 0x281   : > { %v3213_v48 = vpop.f32.mrf.mxu0  ;;  %16070 = vmatprep.mubr.bf16.mxu1 %v23150_v11 }
 0x282   : > { %23148 = vst [vmem:[#allocation121_spill] sm:$0xff] %v19159_v4  ;;  %v3428_v13 = vadd.f32 %v3213_v48, %v23151_v16  ;;  %v19165_v22 = vadd.f32 %v15868_v35, %v3430_v43  ;;  %v3698_v53 = vpop.f32.mrf.mxu1  ;;  %v23157_v48 = vld [vmem:[#allocation66_spill] sm:$0xff]  ;;  %v23158_v43 = vld [vmem:[#allocation69_spill] sm:$0xff]  ;;  %v23159_v16 = vld [vmem:[#allocation67_spill] sm:$0xff] }
 0x283   : > { %v15781_v42 = vpop.f32.mrf.mxu0 }
 0x284   : > { %23152 = vst [vmem:[#allocation120_spill] sm:$0xff] %v19165_v22  ;;  %v19167_v17 = vadd.f32 %v3698_v53, %v3428_v13  ;;  %v15869_v9 = vpop.f32.mrf.mxu1  ;;  %v23160_v13 = vld [vmem:[#allocation106_spill] sm:$0xff] }
 0x285   : > { %v3216_v50 = vpop.f32.mrf.mxu0 }
 0x286   : > { %23153 = vst [vmem:[#allocation115_spill] sm:$0xff] %v19167_v17  ;;  %v3429_v31 = vadd.f32 %v3216_v50, %v23154_v51  ;;  %v3701_v41 = vpop.f32.mrf.mxu1  ;;  %v19180_v50 = vld [vmem:[#allocation2 + $0x144] sm:$0xf]  ;;  %v19182_v51 = vld [vmem:[#allocation2 + $0x148] sm:$0xf] }
 0x287   : > { %v15784_v56 = vpop.f32.mrf.mxu0  ;;  %15983 = vmatmul.mubr.bf16.gmra.mxu0 %v23155_v44  ;;  %v23170_v17 = vld [vmem:[#allocation71_spill] sm:$0xff] }
 0x288   : > { %v3434_v32 = vadd.f32 %v15784_v56, %v18939_v2  ;;  %v19172_v52 = vadd.f32 %v3701_v41, %v3429_v31  ;;  %v15872_v11 = vpop.f32.mrf.mxu1  ;;  %16071 = vmatmul.mubr.bf16.gmra.mxu1 %v23157_v48  ;;  %15986 = vmatprep.mubr.bf16.mxu0 %v23158_v43  ;;  %v17522_v56 = vld [vmem:[#allocation2 + $0x13c] sm:$0xf]  ;;  %v17154_v48 = vld [vmem:[#allocation8 + $0x70] sm:$0xff]  }
 0x289   : > { %v3229_v35 = vpop.f32.mrf.mxu0  ;;  %16074 = vmatprep.mubr.bf16.mxu1 %v23159_v16  ;;  %v13912_v44 = vcombine.low %v17522_v56, %v18964_v12  ;;  %v13913_v16 = vcombine.low %v19180_v50, %v19182_v51  ;;  %16180 = vmatprep.subr.bf16.mxu1 %v17154_v48  ;;  %v23169_v56 = vld [vmem:[#allocation73_spill] sm:$0xff] }
 0x28a   : > { %23156 = vst [vmem:[#allocation75_spill] sm:$0xff] %v19172_v52  ;;  %v3432_v53 = vadd.f32 %v3229_v35, %v23160_v13  ;;  %v19178_v42 = vadd.f32 %v15872_v11, %v3434_v32  ;;  %v3714_v9 = vpop.f32.mrf.mxu1  ;;  %v23163_v35 = vld [vmem:[#allocation54_spill] sm:$0xff]  ;;  %16181 = vmatpush3.bf16.msra.mxu1 %v17154_v48 }
 0x28b   : > { %v15785_v2 = vpop.f32.mrf.mxu0 }
 0x28c   : > { %23161 = vst [vmem:[#allocation124_spill] sm:$0xff] %v19178_v42  ;;  %v19184_v31 = vadd.f32 %v3714_v9, %v3432_v53  ;;  %v15873_v41 = vpop.f32.mrf.mxu1  ;;  %v23167_v53 = vld [vmem:[#allocation55_spill] sm:$0xff]  ;;  %v3991_v42 = vshll.u32 %v13912_v44, 16 }
 0x28d   : > { %v3232_v43 = vpop.f32.mrf.mxu0  ;;  %v23168_v41 = vld [vmem:[#allocation70_spill] sm:$0xff] }
 0x28e   : > { %23162 = vst [vmem:[#allocation19_spill] sm:$0xff] %v19184_v31  ;;  %v19190_v32 = vadd.f32 %v3232_v43, %v23163_v35  ;;  %v19192_v11 = vpop.f32.mrf.mxu1  ;;  %v3988_v31 = vshrl.u32 %v13912_v44, 16  ;;  %v3997_v43 = vshrl.u32 %v13913_v16, 16  ;;  %v4000_v35 = vshll.u32 %v13913_v16, 16  ;;  %v23172_v16 = vld [vmem:[#allocation110_spill] sm:$0xff] }
 0x28f   : > { %23165 = vst [vmem:[#allocation21_spill] sm:$0xff] %v19192_v11  ;;  %v15788_v13 = vpop.f32.mrf.mxu0  ;;  %15987 = vmatmul.mubr.bf16.gmra.mxu0 %v23166_v20  ;;  %v19199_v11 = vld [vmem:[#allocation2 + $0x14c] sm:$0xf] }
 0x290   : > { %23164 = vst [vmem:[#allocation20_spill] sm:$0xff] %v19190_v32  ;;  %v3438_v9 = vadd.f32 %v15788_v13, %v23167_v53  ;;  %v15876_v2 = vpop.f32.mrf.mxu1  ;;  %16075 = vmatmul.mubr.bf16.gmra.mxu1 %v23168_v41  ;;  %15990 = vmatprep.mubr.bf16.mxu0 %v23169_v56  ;;  %v23171_v32 = vld [vmem:[#allocation107_spill] sm:$0xff]  ;;  %v3990_v4 = vrot.slane %v3988_v31, 3  ;;  %v3993_v56 = vrot.slane %v3991_v42, 4  ;;  %v13914_v44 = vcombine.low %v19199_v11, %v19199_v11  ;;  %v23176_v42 = vld [vmem:[#allocation129_spill] sm:$0xff] }
 0x291   : > { %v3245_v52 = vpop.f32.mrf.mxu0  ;;  %16078 = vmatprep.mubr.bf16.mxu1 %v23170_v17  ;;  %v3999_v17 = vrot.slane %v3997_v43, 3  ;;  %v4002_v14 = vrot.slane %v4000_v35, 4 }
 0x292   : > { %v3436_v22 = vadd.f32 %v3245_v52, %v23171_v32  ;;  %v19202_v20 = vadd.f32 %v15876_v2, %v3438_v9  ;;  %v3730_v48 = vpop.f32.mrf.mxu1  ;;  %v23175_v32 = vld [vmem:[#allocation127_spill] sm:$0xff]  ;;  %v3994_v31 = vor.u32 %v3993_v56, %v3990_v4  ;;  %v4006_v2 = vshrl.u32 %v13914_v44, 16 }
 0x293   : > { %v15789_v13 = vpop.f32.mrf.mxu0 }
 0x294   : > { %v19204_v53 = vadd.f32 %v3730_v48, %v3436_v22  ;;  %v15877_v41 = vpop.f32.mrf.mxu1  ;;  %v4009_v48 = vshll.u32 %v13914_v44, 16 }
 0x295   : > { %v3248_v28 = vpop.f32.mrf.mxu0 }
 0x296   : > { %v19209_v10 = vadd.f32 %v3248_v28, %v23172_v16  ;;  %v19211_v19 = vpop.f32.mrf.mxu1  ;;  %v4003_v28 = vor.u32 %v4002_v14, %v3999_v17  ;;  %v4011_v4 = vrot.slane %v4009_v48, 4 }
 0x297   : > { %23174 = vst [vmem:[#allocation23_spill] sm:$0xff] %v19211_v19  ;;  %v15792_v52 = vpop.f32.mrf.mxu0  ;;  %15991 = vmatmul.mubr.bf16.gmra.mxu0 %v23175_v32  ;;  %v23237_v19 = vld [vmem:[#allocation20_spill] sm:$0xff] }
 0x298   : > { %23173 = vst [vmem:[#allocation22_spill] sm:$0xff] %v19209_v10  ;;  %v3442_v22 = vadd.f32 %v15792_v52, %v18976_v8  ;;  %v15880_v9 = vpop.f32.mrf.mxu1  ;;  %16079 = vmatmul.mubr.bf16.gmra.mxu1 %v18443_v29  ;;  %15994 = vmatprep.mubr.bf16.mxu0 %v23176_v42  ;;  %v23177_v52 = vld [vmem:[#allocation125_spill] sm:$0xff]  ;;  %v4008_v42 = vrot.slane %v4006_v2, 3  ;;  %v4004_v44 = vsel %vm989_vm0, %v3994_v31, %v4003_v28 }
 0x299   : > { %v3261_v43 = vpop.f32.mrf.mxu0  ;;  %16082 = vmatprep.mubr.bf16.mxu1 %v23082_v34  ;;  %v3995_v29 = vsel %vm989_vm0, %v23177_v52, %v3994_v31 }
 0x29a   : > { %v3440_v35 = vadd.f32 %v3261_v43, %v18978_v38  ;;  %v19219_v13 = vadd.f32 %v15880_v9, %v3442_v22  ;;  %v3746_v41 = vpop.f32.mrf.mxu1  ;;  %v17155_v38 = vld [vmem:[#allocation8 + $0x68] sm:$0xff]   ;;  %v19233_v22 = vcombine.low %v18964_v12, %v19180_v50  ;;  %v4012_v2 = vor.u32 %v4011_v4, %v4008_v42  ;;  %v23182_v42 = vld [vmem:[#allocation74_spill] sm:$0xff] }
 0x29b   : > { %v15793_v16 = vpop.f32.mrf.mxu0  ;;  %16182 = vmatprep.subr.bf16.mxu1 %v17155_v38 }
 0x29c   : > { %v19221_v32 = vadd.f32 %v3746_v41, %v3440_v35  ;;  %v15881_v8 = vpop.f32.mrf.mxu1  ;;  %16183 = vmatpush3.bf16.msra.mxu1 %v17155_v38 }
 0x29d   : > { %v3264_v56 = vpop.f32.mrf.mxu0 }
 0x29e   : > { %v19227_v34 = vadd.f32 %v3264_v56, %v18991_v0  ;;  %v19229_v14 = vpop.f32.mrf.mxu1 }
 0x29f   : > { %23179 = vst [vmem:[#allocation25_spill] sm:$0xff] %v19229_v14  ;;  %v15796_v17 = vpop.f32.mrf.mxu0  ;;  %15995 = vmatmul.mubr.bf16.gmra.mxu0 %v3995_v29 }
 0x2a0   : > { %23178 = vst [vmem:[#allocation24_spill] sm:$0xff] %v19227_v34  ;;  %v3446_v9 = vadd.f32 %v15796_v17, %v18999_v5  ;;  %v15884_v43 = vpop.f32.mrf.mxu1  ;;  %16083 = vmatmul.mubr.bf16.gmra.mxu1 %v18956_v62  ;;  %15998 = vmatprep.mubr.bf16.mxu0 %v4004_v44  ;;  %v4013_v5 = vsel %vm989_vm0, %v4003_v28, %v4012_v2  ;;  %v23235_v34 = vld [vmem:[#allocation19_spill] sm:$0xff] }
 0x2a1   : > { %v3277_v31 = vpop.f32.mrf.mxu0  ;;  %16086 = vmatprep.mubr.bf16.mxu1 %v19233_v22 }
 0x2a2   : > { %v3444_v0 = vadd.f32 %v3277_v31, %v19001_v39  ;;  %v19239_v48 = vadd.f32 %v15884_v43, %v3446_v9  ;;  %v3762_v35 = vpop.f32.mrf.mxu1  ;;  %v23185_v31 = vld [vmem:[#allocation76_spill] sm:$0xff] }
 0x2a3   : > { %v15797_v41 = vpop.f32.mrf.mxu0 }
 0x2a4   : > { %v19241_v12 = vadd.f32 %v3762_v35, %v3444_v0  ;;  %v15885_v50 = vpop.f32.mrf.mxu1  ;;  %v17156_v41 = vld [vmem:[#allocation8 + $0x60] sm:$0xff]  }
 0x2a5   : > { %v3280_v16 = vpop.f32.mrf.mxu0  ;;  %16184 = vmatprep.subr.bf16.mxu1 %v17156_v41 }
 0x2a6   : > { %v19245_v62 = vadd.f32 %v3280_v16, %v19008_v47  ;;  %v19247_v8 = vpop.f32.mrf.mxu1  ;;  %16185 = vmatpush3.bf16.msra.mxu1 %v17156_v41 }
 0x2a7   : > { %23181 = vst [vmem:[#allocation130_spill] sm:$0xff] %v19247_v8  ;;  %v15800_v52 = vpop.f32.mrf.mxu0  ;;  %15999 = vmatmul.mubr.bf16.gmra.mxu0 %v4013_v5 }
 0x2a8   : > { %23180 = vst [vmem:[#allocation28_spill] sm:$0xff] %v19245_v62  ;;  %v3450_v39 = vadd.f32 %v15800_v52, %v19013_v58  ;;  %v15888_v29 = vpop.f32.mrf.mxu1  ;;  %16106 = vmatprep.mubr.bf16.mxu0 %v23182_v42 }
 0x2a9   : > { %v3293_v4 = vpop.f32.mrf.mxu0 }
 0x2aa   : > { %v3448_v56 = vadd.f32 %v3293_v4, %v19015_v1  ;;  %v19252_v44 = vadd.f32 %v15888_v29, %v3450_v39  ;;  %v3778_v38 = vpop.f32.mrf.mxu1  ;;  %v23186_v1 = vld [vmem:[#allocation77_spill] sm:$0xff] }
 0x2ab   : > { %v15801_v28 = vpop.f32.mrf.mxu0 }
 0x2ac   : > { %v19254_v17 = vadd.f32 %v3778_v38, %v3448_v56  ;;  %v15889_v47 = vpop.f32.mrf.mxu1  ;;  %v23189_v38 = vld [vmem:[#allocation78_spill] sm:$0xff] }
 0x2ad   : > { %v3296_v9 = vpop.f32.mrf.mxu0  ;;  %v23190_v47 = vld [vmem:[#allocation79_spill] sm:$0xff] }
 0x2ae   : > { %v19257_v43 = vadd.f32 %v3296_v9, %v19020_v25  ;;  %v19259_v2 = vpop.f32.mrf.mxu1 }
 0x2af   : > { %23184 = vst [vmem:[#allocation29_spill] sm:$0xff] %v19259_v2  ;;  %v15804_v58 = vpop.f32.mrf.mxu0  ;;  %16107 = vmatmul.mubr.bf16.vlgmr.msra.gmra.mxu0 %v23185_v31 }
 0x2b0   : > { %23183 = vst [vmem:[#allocation26_spill] sm:$0xff] %v19257_v43  ;;  %v3454_v0 = vadd.f32 %v15804_v58, %v19027_v60  ;;  %v15892_v35 = vpop.f32.mrf.mxu1  ;;  %16110 = vmatprep.mubr.bf16.mxu0 %v23186_v1  ;;  %v17171_v43 = vld [vmem:[#allocation8 + $0x38] sm:$0xff]  }
 0x2b1   : > { %v3309_v50 = vpop.f32.mrf.mxu0 }
 0x2b2   : > { %v3452_v5 = vadd.f32 %v3309_v50, %v19029_v46  ;;  %v19265_v16 = vadd.f32 %v15892_v35, %v3454_v0  ;;  %v3794_v52 = vpop.f32.mrf.mxu1 }
 0x2b3   : > { %v15805_v25 = vpop.f32.mrf.mxu0 }
 0x2b4   : > { %v19267_v39 = vadd.f32 %v3794_v52, %v3452_v5  ;;  %v15893_v29 = vpop.f32.mrf.mxu1  ;;  %v23193_v52 = vld [vmem:[#allocation80_spill] sm:$0xff] }
 0x2b5   : > { %v3312_v42 = vpop.f32.mrf.mxu0 }
 0x2b6   : > { %v19270_v4 = vadd.f32 %v3312_v42, %v19034_v15  ;;  %v19272_v60 = vpop.f32.mrf.mxu1 }
 0x2b7   : > { %23188 = vst [vmem:[#allocation131_spill] sm:$0xff] %v19272_v60  ;;  %v15808_v56 = vpop.f32.mrf.mxu0  ;;  %16111 = vmatmul.mubr.bf16.gmra.mxu0 %v23189_v38 }
 0x2b8   : > { %23187 = vst [vmem:[#allocation27_spill] sm:$0xff] %v19270_v4  ;;  %v3458_v46 = vadd.f32 %v15808_v56, %v19040_v30  ;;  %v15896_v28 = vpop.f32.mrf.mxu1  ;;  %16114 = vmatprep.mubr.bf16.mxu0 %v23190_v47 }
 0x2b9   : > { %v3325_v9 = vpop.f32.mrf.mxu0 }
 0x2ba   : > { %v3456_v58 = vadd.f32 %v3325_v9, %v19042_v3  ;;  %v19278_v31 = vadd.f32 %v15896_v28, %v3458_v46  ;;  %v3810_v0 = vpop.f32.mrf.mxu1  ;;  %v23194_v3 = vld [vmem:[#allocation81_spill] sm:$0xff]  ;;  %v17157_v28 = vld [vmem:[#allocation8 + $0x58] sm:$0xff]  }
 0x2bb   : > { %v15809_v35 = vpop.f32.mrf.mxu0  ;;  %16186 = vmatprep.subr.bf16.mxu1 %v17157_v28 }
 0x2bc   : > { %v19280_v1 = vadd.f32 %v3810_v0, %v3456_v58  ;;  %v15897_v15 = vpop.f32.mrf.mxu1  ;;  %16187 = vmatpush3.bf16.msra.mxu1 %v17157_v28 }
 0x2bd   : > { %v3328_v41 = vpop.f32.mrf.mxu0  ;;  %v23197_v15 = vld [vmem:[#allocation82_spill] sm:$0xff] }
 0x2be   : > { %v19283_v50 = vadd.f32 %v3328_v41, %v19047_v57  ;;  %v19285_v5 = vpop.f32.mrf.mxu1 }
 0x2bf   : > { %23192 = vst [vmem:[#allocation32_spill] sm:$0xff] %v19285_v5  ;;  %v15812_v30 = vpop.f32.mrf.mxu0  ;;  %16115 = vmatmul.mubr.bf16.gmra.mxu0 %v23193_v52 }
 0x2c0   : > { %23191 = vst [vmem:[#allocation132_spill] sm:$0xff] %v19283_v50  ;;  %v3462_v25 = vadd.f32 %v15812_v30, %v19053_v37  ;;  %v15900_v29 = vpop.f32.mrf.mxu1  ;;  %16118 = vmatprep.mubr.bf16.mxu0 %v23194_v3  ;;  %v23198_v30 = vld [vmem:[#allocation83_spill] sm:$0xff]  ;;  %v17174_v50 = vld [vmem:[#allocation8 + $0x88] sm:$0xff]  }
 0x2c1   : > { %v3341_v42 = vpop.f32.mrf.mxu0 }
 0x2c2   : > { %v3460_v56 = vadd.f32 %v3341_v42, %v19055_v18  ;;  %v19291_v38 = vadd.f32 %v15900_v29, %v3462_v25  ;;  %v3826_v46 = vpop.f32.mrf.mxu1 }
 0x2c3   : > { %v15813_v47 = vpop.f32.mrf.mxu0 }
 0x2c4   : > { %v19293_v57 = vadd.f32 %v3826_v46, %v3460_v56  ;;  %v15901_v9 = vpop.f32.mrf.mxu1 }
 0x2c5   : > { %v3344_v58 = vpop.f32.mrf.mxu0  ;;  %v23201_v9 = vld [vmem:[#allocation84_spill] sm:$0xff] }
 0x2c6   : > { %v19296_v0 = vadd.f32 %v3344_v58, %v19060_v26  ;;  %v19298_v37 = vpop.f32.mrf.mxu1 }
 0x2c7   : > { %23196 = vst [vmem:[#allocation30_spill] sm:$0xff] %v19298_v37  ;;  %v15816_v35 = vpop.f32.mrf.mxu0  ;;  %16119 = vmatmul.mubr.bf16.gmra.mxu0 %v23197_v15 }
 0x2c8   : > { %23195 = vst [vmem:[#allocation133_spill] sm:$0xff] %v19296_v0  ;;  %v3466_v18 = vadd.f32 %v15816_v35, %v19066_v55  ;;  %v15904_v41 = vpop.f32.mrf.mxu1  ;;  %16122 = vmatprep.mubr.bf16.mxu0 %v23198_v30  ;;  %v23218_v0 = vld [vmem:[#allocation114_spill] sm:$0xff] }
 0x2c9   : > { %v3357_v52 = vpop.f32.mrf.mxu0 }
 0x2ca   : > { %v3464_v25 = vadd.f32 %v3357_v52, %v19068_v49  ;;  %v19304_v29 = vadd.f32 %v15904_v41, %v3466_v18  ;;  %v3842_v3 = vpop.f32.mrf.mxu1  ;;  %v23202_v49 = vld [vmem:[#allocation85_spill] sm:$0xff] }
 0x2cb   : > { %v15817_v42 = vpop.f32.mrf.mxu0 }
 0x2cc   : > { %v19306_v56 = vadd.f32 %v3842_v3, %v3464_v25  ;;  %v15905_v26 = vpop.f32.mrf.mxu1  ;;  %v17158_v3 = vld [vmem:[#allocation8 + $0x50] sm:$0xff]  }
 0x2cd   : > { %v3360_v46 = vpop.f32.mrf.mxu0  ;;  %16188 = vmatprep.subr.bf16.mxu1 %v17158_v3 }
 0x2ce   : > { %v19309_v28 = vadd.f32 %v3360_v46, %v19073_v45  ;;  %v19311_v47 = vpop.f32.mrf.mxu1  ;;  %16189 = vmatpush3.bf16.msra.mxu1 %v17158_v3 }
 0x2cf   : > { %23200 = vst [vmem:[#allocation31_spill] sm:$0xff] %v19311_v47  ;;  %v15820_v55 = vpop.f32.mrf.mxu0  ;;  %16123 = vmatmul.mubr.bf16.gmra.mxu0 %v23201_v9  ;;  %v23206_v9 = vld [vmem:[#allocation87_spill] sm:$0xff]  ;;  %v17159_v47 = vld [vmem:[#allocation8 + $0x48] sm:$0xff]  }
 0x2d0   : > { %23199 = vst [vmem:[#allocation33_spill] sm:$0xff] %v19309_v28  ;;  %v3470_v58 = vadd.f32 %v15820_v55, %v19079_v23  ;;  %v15908_v35 = vpop.f32.mrf.mxu1  ;;  %16126 = vmatprep.mubr.bf16.mxu0 %v23202_v49  ;;  %v23205_v55 = vld [vmem:[#allocation86_spill] sm:$0xff]  ;;  %16190 = vmatprep.subr.bf16.mxu1 %v17159_v47 }
 0x2d1   : > { %v3373_v15 = vpop.f32.mrf.mxu0 }
 0x2d2   : > { %v3468_v18 = vadd.f32 %v3373_v15, %v19081_v24  ;;  %v19317_v41 = vadd.f32 %v15908_v35, %v3470_v58  ;;  %v3858_v30 = vpop.f32.mrf.mxu1  ;;  %16191 = vmatpush3.bf16.msra.mxu1 %v17159_v47 }
 0x2d3   : > { %v15821_v52 = vpop.f32.mrf.mxu0 }
 0x2d4   : > { %v19319_v25 = vadd.f32 %v3858_v30, %v3468_v18  ;;  %v15909_v45 = vpop.f32.mrf.mxu1 }
 0x2d5   : > { %v3376_v42 = vpop.f32.mrf.mxu0  ;;  %v23207_v45 = vld [vmem:[#allocation90_spill] sm:$0xff] }
 0x2d6   : > { %v19322_v26 = vadd.f32 %v3376_v42, %v19085_v33  ;;  %v19324_v46 = vpop.f32.mrf.mxu1  ;;  %v23208_v42 = vld [vmem:[#allocation91_spill] sm:$0xff] }
 0x2d7   : > { %23204 = vst [vmem:[#allocation135_spill] sm:$0xff] %v19324_v46  ;;  %v15824_v23 = vpop.f32.mrf.mxu0  ;;  %16127 = vmatmul.mubr.bf16.gmra.mxu0 %v23205_v55 }
 0x2d8   : > { %23203 = vst [vmem:[#allocation134_spill] sm:$0xff] %v19322_v26  ;;  %v15912_v24 = vpop.f32.mrf.mxu1  ;;  %16130 = vmatprep.mubr.bf16.mxu0 %v23206_v9 }
 0x2d9   : > { %v3389_v58 = vpop.f32.mrf.mxu0 }
 0x2da   : > { %v3874_v35 = vpop.f32.mrf.mxu1  ;;  %v23209_v58 = vld [vmem:[#allocation95_spill] sm:$0xff] }
 0x2db   : > { %v15825_v49 = vpop.f32.mrf.mxu0 }
 0x2dc   : > { %v15913_v15 = vpop.f32.mrf.mxu1 }
 0x2dd   : > { %v3392_v18 = vpop.f32.mrf.mxu0  ;;  %v23210_v15 = vld [vmem:[#allocation96_spill] sm:$0xff] }
 0x2de   : > { %v3877_v30 = vpop.f32.mrf.mxu1 }
 0x2df   : > { %v15932_v52 = vpop.f32.mrf.mxu0  ;;  %16131 = vmatmul.mubr.bf16.gmra.mxu0 %v23207_v45 }
 0x2e0   : > { %v16020_v33 = vpop.f32.mrf.mxu1  ;;  %16134 = vmatprep.mubr.bf16.mxu0 %v23208_v42 }
 0x2e1   : > { %v4099_v46 = vpop.f32.mrf.mxu0 }
 0x2e2   : > { %v4561_v23 = vpop.f32.mrf.mxu1 }
 0x2e3   : > { %v15933_v26 = vpop.f32.mrf.mxu0 }
 0x2e4   : > { %v16021_v55 = vpop.f32.mrf.mxu1 }
 0x2e5   : > { %v4102_v3 = vpop.f32.mrf.mxu0 }
 0x2e6   : > { %v4564_v24 = vpop.f32.mrf.mxu1  ;;  %v23211_v3 = vld [vmem:[#allocation100_spill] sm:$0xff] }
 0x2e7   : > { %v15936_v9 = vpop.f32.mrf.mxu0  ;;  %16135 = vmatmul.mubr.bf16.gmra.mxu0 %v23209_v58 }
 0x2e8   : > { %v4392_v35 = vadd.f32 %v15936_v9, %v19100_v6  ;;  %v16024_v49 = vpop.f32.mrf.mxu1  ;;  %16138 = vmatprep.mubr.bf16.mxu0 %v23210_v15 }
 0x2e9   : > { %v4115_v18 = vpop.f32.mrf.mxu0 }
 0x2ea   : > { %v4390_v30 = vadd.f32 %v4115_v18, %v19102_v36  ;;  %v19334_v46 = vadd.f32 %v16024_v49, %v4392_v35  ;;  %v4577_v26 = vpop.f32.mrf.mxu1  ;;  %v23212_v36 = vld [vmem:[#allocation101_spill] sm:$0xff]  ;;  %v17160_v18 = vld [vmem:[#allocation8 + $0xb8] sm:$0xff]  }
 0x2eb   : > { %v15937_v52 = vpop.f32.mrf.mxu0  ;;  %16338 = vmatprep.subr.bf16.mxu0 %v17160_v18 }
 0x2ec   : > { %v19336_v45 = vadd.f32 %v4577_v26, %v4390_v30  ;;  %v16025_v33 = vpop.f32.mrf.mxu1  ;;  %16339 = vmatpush3.bf16.msra.mxu0 %v17160_v18 }
 0x2ed   : > { %v4118_v42 = vpop.f32.mrf.mxu0 }
 0x2ee   : > { %v19339_v23 = vadd.f32 %v4118_v42, %v19107_v54  ;;  %v19341_v6 = vpop.f32.mrf.mxu1  ;;  %v23213_v42 = vld [vmem:[#allocation104_spill] sm:$0xff] }
 0x2ef   : > { %v15940_v55 = vpop.f32.mrf.mxu0  ;;  %16139 = vmatmul.mubr.bf16.gmra.mxu0 %v23211_v3 }
 0x2f0   : > { %v4396_v47 = vadd.f32 %v15940_v55, %v19113_v59  ;;  %v16028_v24 = vpop.f32.mrf.mxu1  ;;  %16142 = vmatprep.mubr.bf16.mxu0 %v23212_v36  ;;  %v17832_v55 = vmov 0.0|0.0  }
 0x2f1   : > { %v4131_v9 = vpop.f32.mrf.mxu0  ;;  %v13943_v3 = vcombine.low %v17832_v55, %v17832_v55 }
 0x2f2   : > { %v4394_v58 = vadd.f32 %v4131_v9, %v19115_v40  ;;  %v19347_v35 = vadd.f32 %v16028_v24, %v4396_v47  ;;  %v4593_v49 = vpop.f32.mrf.mxu1  ;;  %v17162_v40 = vld [vmem:[#allocation8 + $0xb0] sm:$0xff]   ;;  %v13944_v47 = vcombine.high %v17832_v55, %v17832_v55 }
 0x2f3   : > { %v15941_v15 = vpop.f32.mrf.mxu0  ;;  %v23214_v9 = vld [vmem:[#allocation105_spill] sm:$0xff]  ;;  %16340 = vmatprep.subr.bf16.mxu0 %v17162_v40  ;;  %6277 = vst [vmem:[#allocation3 + $0x10] sm:$0xf] %v13943_v3  ;;  %6279 = vst [vmem:[#allocation3 + $0x18] sm:$0xf] %v13943_v3 }
 0x2f4   : > { %v19349_v54 = vadd.f32 %v4593_v49, %v4394_v58  ;;  %v16029_v30 = vpop.f32.mrf.mxu1  ;;  %6278 = vst [vmem:[#allocation3 + $0x14] sm:$0xf] %v13944_v47  ;;  %6280 = vst [vmem:[#allocation3 + $0x1c] sm:$0xf] %v13944_v47  ;;  %16341 = vmatpush3.bf16.msra.mxu0 %v17162_v40 }
 0x2f5   : > { %v4134_v26 = vpop.f32.mrf.mxu0  ;;  %6345 = vst [vmem:[#allocation3 + $0x120] sm:$0xf] %v13943_v3  ;;  %6346 = vst [vmem:[#allocation3 + $0x124] sm:$0xf] %v13944_v47  ;;  %v17164_v30 = vld [vmem:[#allocation8 + $0xa8] sm:$0xff]  }
 0x2f6   : > { %v19352_v52 = vadd.f32 %v4134_v26, %v19120_v61  ;;  %v19354_v59 = vpop.f32.mrf.mxu1  ;;  %6347 = vst [vmem:[#allocation3 + $0x128] sm:$0xf] %v13943_v3  ;;  %6348 = vst [vmem:[#allocation3 + $0x12c] sm:$0xf] %v13944_v47  ;;  %16342 = vmatprep.subr.bf16.mxu0 %v17164_v30  ;;  %v17161_v3 = vld [vmem:[#allocation8 + $0x40] sm:$0xff]   ;;  %v23215_v47 = vld [vmem:[#allocation108_spill] sm:$0xff] }
 0x2f7   : > { %v15944_v33 = vpop.f32.mrf.mxu0  ;;  %16143 = vmatmul.mubr.bf16.gmra.mxu0 %v23213_v42  ;;  %16192 = vmatprep.subr.bf16.mxu1 %v17161_v3 }
 0x2f8   : > { %v4400_v24 = vadd.f32 %v15944_v33, %v19126_v63  ;;  %v16032_v36 = vpop.f32.mrf.mxu1  ;;  %16146 = vmatprep.mubr.bf16.mxu0 %v23214_v9  ;;  %v19364_v63 = vcombine.low %v19182_v51, %v19199_v11  ;;  %16343 = vmatpush3.bf16.msra.mxu0 %v17164_v30  ;;  %v17165_v51 = vld [vmem:[#allocation8 + $0xa0] sm:$0xff]   ;;  %v23217_v30 = vld [vmem:[#allocation62_spill] sm:$0xff] }
 0x2f9   : > { %v4147_v58 = vpop.f32.mrf.mxu0  ;;  %16193 = vmatpush3.bf16.msra.mxu1 %v17161_v3  ;;  %16344 = vmatprep.subr.bf16.mxu0 %v17165_v51 }
 0x2fa   : > { %v4398_v61 = vadd.f32 %v4147_v58, %v19128_v27  ;;  %v19360_v49 = vadd.f32 %v16032_v36, %v4400_v24  ;;  %v4609_v15 = vpop.f32.mrf.mxu1  ;;  %16087 = vmatmul.mubr.bf16.gmra.mxu1 %v19364_v63  ;;  %v23216_v36 = vld [vmem:[#allocation109_spill] sm:$0xff]  ;;  %16258 = vmatprep.subr.bf16.mxu1 %v17171_v43 }
 0x2fb   : > { %v15945_v18 = vpop.f32.mrf.mxu0  ;;  %v6350_v9 = vld [vmem:[#allocation3 + $0x10] sm:$0xf]  ;;  %v6351_v58 = vld [vmem:[#allocation3 + $0x14] sm:$0xf]  ;;  %v17181_v4 = vld [vmem:[#allocation3 + $0x18] sm:$0xff]  }
 0x2fc   : > { %v19366_v26 = vadd.f32 %v4609_v15, %v4398_v61  ;;  %v16033_v33 = vpop.f32.mrf.mxu1  ;;  %v19377_v15 = vld [vmem:[#allocation3 + $0x1c] sm:$0xf]  ;;  %v14015_v18 = vcombine.low %v6350_v9, %v6351_v58  ;;  %16345 = vmatpush3.bf16.msra.mxu0 %v17165_v51  ;;  %v17172_v51 = vld [vmem:[#allocation8 + $0x90] sm:$0xff]  }
 0x2fd   : > { %v4150_v42 = vpop.f32.mrf.mxu0 }
 0x2fe   : > { %v19370_v55 = vadd.f32 %v4150_v42, %v19133_v21  ;;  %v19372_v27 = vpop.f32.mrf.mxu1  ;;  %v6352_v21 = vld [vmem:[#allocation3 + $0x18] sm:$0xf]  ;;  %16194 = vmatprep.mubr.bf16.mxu1 %v14015_v18 }
 0x2ff   : > { %v15948_v40 = vpop.f32.mrf.mxu0  ;;  %16147 = vmatmul.mubr.bf16.gmra.mxu0 %v23215_v47 }
 0x300   : > { %v4404_v11 = vadd.f32 %v15948_v40, %v19139_v7  ;;  %v16036_v24 = vpop.f32.mrf.mxu1  ;;  %16150 = vmatprep.mubr.bf16.mxu0 %v23216_v36  ;;  %v14016_v7 = vcombine.low %v6352_v21, %v19377_v15  ;;  %v17170_v36 = vld [vmem:[#allocation8 + $0x98] sm:$0xff]  }
 0x301   : > { %v4163_v61 = vpop.f32.mrf.mxu0  ;;  %16346 = vmatprep.subr.bf16.mxu0 %v17170_v36 }
 0x302   : > { %v4402_v33 = vadd.f32 %v4163_v61, %v23217_v30  ;;  %v19380_v42 = vadd.f32 %v16036_v24, %v4404_v11  ;;  %v4625_v47 = vpop.f32.mrf.mxu1  ;;  %16195 = vmatmul.mubr.bf16.vlgmr.msra.gmra.mxu1 %v14016_v7  ;;  %16347 = vmatpush3.bf16.msra.mxu0 %v17170_v36  ;;  %v23219_v24 = vld [vmem:[#allocation111_spill] sm:$0xff]  ;;  %v23220_v61 = vld [vmem:[#allocation118_spill] sm:$0xff] }
 0x303   : > { %v15949_v40 = vpop.f32.mrf.mxu0  ;;  %16348 = vmatprep.subr.bf16.mxu0 %v17172_v51  ;;  %16259 = vmatpush3.bf16.msra.mxu1 %v17171_v43 }
 0x304   : > { %v19383_v28 = vadd.f32 %v4625_v47, %v4402_v33  ;;  %v16037_v37 = vpop.f32.mrf.mxu1  ;;  %v23221_v40 = vld [vmem:[#allocation112_spill] sm:$0xff]  ;;  %v23222_v47 = vld [vmem:[#allocation119_spill] sm:$0xff] }
 0x305   : > { %v4166_v3 = vpop.f32.mrf.mxu0  ;;  %v19393_v37 = vcombine.low %v6351_v58, %v6352_v21  ;;  %v7929_v21 = vshll.u32 %v17181_v4, 16 }
 0x306   : > { %v19386_v5 = vadd.f32 %v4166_v3, %v23218_v0  ;;  %v19388_v9 = vpop.f32.mrf.mxu1  ;;  %16349 = vmatpush3.bf16.msra.mxu0 %v17172_v51  ;;  %v23225_v51 = vld [vmem:[#allocation120_spill] sm:$0xff] }
 0x307   : > { %v15952_v11 = vpop.f32.mrf.mxu0  ;;  %16151 = vmatmul.mubr.bf16.gmra.mxu0 %v23219_v24  ;;  %16350 = vmatprep.subr.bf16.mxu0 %v17174_v50 }
 0x308   : > { %v4408_v30 = vadd.f32 %v15952_v11, %v23220_v61  ;;  %v16040_v18 = vpop.f32.mrf.mxu1  ;;  %16154 = vmatprep.mubr.bf16.mxu0 %v23221_v40  ;;  %v23223_v61 = vld [vmem:[#allocation121_spill] sm:$0xff] }
 0x309   : > { %v4179_v33 = vpop.f32.mrf.mxu0 }
 0x30a   : > { %v4406_v7 = vadd.f32 %v4179_v33, %v23222_v47  ;;  %v19396_v0 = vadd.f32 %v16040_v18, %v4408_v30  ;;  %v4641_v3 = vpop.f32.mrf.mxu1  ;;  %16351 = vmatpush3.bf16.msra.mxu0 %v17174_v50  ;;  %v23224_v30 = vld [vmem:[#allocation116_spill] sm:$0xff]  ;;  %v17179_v18 = vld [vmem:[#allocation8 + $0x80] sm:$0xff]  }
 0x30b   : > { %v15953_v36 = vpop.f32.mrf.mxu0  ;;  %16352 = vmatprep.subr.bf16.mxu0 %v17179_v18 }
 0x30c   : > { %v19398_v60 = vadd.f32 %v4641_v3, %v4406_v7  ;;  %v16041_v24 = vpop.f32.mrf.mxu1  ;;  %v23226_v7 = vld [vmem:[#allocation117_spill] sm:$0xff]  ;;  %v19408_v3 = vrot.slane %v7929_v21, 1 }
 0x30d   : > { %v4182_v11 = vpop.f32.mrf.mxu0  ;;  %v7933_v24 = vshrl.u32 %v17181_v4, 16  ;;  %v23229_v4 = vld [vmem:[#allocation75_spill] sm:$0xff] }
 0x30e   : > { %v19401_v40 = vadd.f32 %v4182_v11, %v23223_v61  ;;  %v19403_v58 = vpop.f32.mrf.mxu1  ;;  %v23227_v11 = vld [vmem:[#allocation115_spill] sm:$0xff]  ;;  %16353 = vmatpush3.bf16.msra.mxu0 %v17179_v18 }
 0x30f   : > { %v15956_v33 = vpop.f32.mrf.mxu0  ;;  %16155 = vmatmul.mubr.bf16.gmra.mxu0 %v23224_v30  ;;  %v19414_v30 = vor.u32 %v7933_v24, %v19408_v3  ;;  %v23234_v24 = vld [vmem:[#allocation123_spill] sm:$0xff] }
 0x310   : > { %v4412_v47 = vadd.f32 %v15956_v33, %v23225_v51  ;;  %v16044_v36 = vpop.f32.mrf.mxu1  ;;  %16158 = vmatprep.mubr.bf16.mxu0 %v23226_v7 }
 0x311   : > { %v4195_v2 = vpop.f32.mrf.mxu0 }
 0x312   : > { %v4410_v61 = vadd.f32 %v4195_v2, %v23227_v11  ;;  %v19411_v8 = vadd.f32 %v16044_v36, %v4412_v47  ;;  %v4657_v50 = vpop.f32.mrf.mxu1  ;;  %v23232_v47 = vld [vmem:[#allocation122_spill] sm:$0xff]  ;;  %v23233_v36 = vld [vmem:[#allocation124_spill] sm:$0xff] }
 0x313   : > { %v15957_v62 = vpop.f32.mrf.mxu0 }
 0x314   : > { %v19416_v33 = vadd.f32 %v4657_v50, %v4410_v61  ;;  %v16045_v51 = vpop.f32.mrf.mxu1 }
 0x315   : > { %v4198_v21 = vpop.f32.mrf.mxu0 }
 0x316   : > { %23228 = vst [vmem:[#allocation36_spill] sm:$0xff] %v19416_v33  ;;  %v19419_v7 = vadd.f32 %v4198_v21, %v23229_v4  ;;  %v19421_v14 = vpop.f32.mrf.mxu1  ;;  %v23238_v21 = vld [vmem:[#allocation21_spill] sm:$0xff] }
 0x317   : > { %23231 = vst [vmem:[#allocation37_spill] sm:$0xff] %v19421_v14  ;;  %v15960_v2 = vpop.f32.mrf.mxu0  ;;  %16159 = vmatmul.mubr.bf16.gmra.mxu0 %v23232_v47  ;;  %v3918_v4 = vadd.f32 %v23238_v21, %v23237_v19 }
 0x318   : > { %23230 = vst [vmem:[#allocation34_spill] sm:$0xff] %v19419_v7  ;;  %v4416_v18 = vadd.f32 %v15960_v2, %v23233_v36  ;;  %v16048_v11 = vpop.f32.mrf.mxu1  ;;  %16162 = vmatprep.mubr.bf16.mxu0 %v23234_v24  ;;  %v23242_v24 = vld [vmem:[#allocation126_spill] sm:$0xff] }
 0x319   : > { %v4211_v62 = vpop.f32.mrf.mxu0 }
 0x31a   : > { %v4414_v61 = vadd.f32 %v4211_v62, %v23235_v34  ;;  %v19427_v50 = vadd.f32 %v16048_v11, %v4416_v18  ;;  %v4673_v43 = vpop.f32.mrf.mxu1  ;;  %v23243_v11 = vld [vmem:[#allocation128_spill] sm:$0xff] }
 0x31b   : > { %v15961_v51 = vpop.f32.mrf.mxu0 }
 0x31c   : > { %23236 = vst [vmem:[#allocation35_spill] sm:$0xff] %v19427_v50  ;;  %v19431_v10 = vadd.f32 %v4673_v43, %v4414_v61  ;;  %v16049_v33 = vpop.f32.mrf.mxu1  ;;  %v17188_v51 = vld [vmem:[#allocation8 + $0x30] sm:$0xff]  }
 0x31d   : > { %v4214_v14 = vpop.f32.mrf.mxu0  ;;  %16260 = vmatprep.subr.bf16.mxu1 %v17188_v51 }
 0x31e   : > { %23239 = vst [vmem:[#allocation40_spill] sm:$0xff] %v19431_v10  ;;  %v19433_v47 = vadd.f32 %v4214_v14, %v3918_v4  ;;  %v19435_v2 = vpop.f32.mrf.mxu1  ;;  %v4941_v14 = vshll.u32 %v19233_v22, 16  ;;  %16261 = vmatpush3.bf16.msra.mxu1 %v17188_v51 }
 0x31f   : > { %23241 = vst [vmem:[#allocation41_spill] sm:$0xff] %v19435_v2  ;;  %v15964_v36 = vpop.f32.mrf.mxu0  ;;  %16163 = vmatmul.mubr.bf16.gmra.mxu0 %v23242_v24 }
 0x320   : > { %23240 = vst [vmem:[#allocation38_spill] sm:$0xff] %v19433_v47  ;;  %v4420_v34 = vadd.f32 %v15964_v36, %v19202_v20  ;;  %v16052_v18 = vpop.f32.mrf.mxu1  ;;  %16166 = vmatprep.mubr.bf16.mxu0 %v23243_v11  ;;  %v4945_v20 = vshrl.u32 %v19233_v22, 16  ;;  %v4949_v36 = vshll.u32 %v19364_v63, 16  ;;  %v17180_v11 = vld [vmem:[#allocation3 + $0x10] sm:$0xff]  }
 0x321   : > { %v4227_v62 = vpop.f32.mrf.mxu0 }
 0x322   : > { %v4418_v19 = vadd.f32 %v4227_v62, %v19204_v53  ;;  %v19441_v61 = vadd.f32 %v16052_v18, %v4420_v34  ;;  %v4689_v33 = vpop.f32.mrf.mxu1  ;;  %v23248_v34 = vld [vmem:[#allocation58_spill] sm:$0xff]  ;;  %v4943_v18 = vrot.slane %v4941_v14, 1  ;;  %v23250_v14 = vld [vmem:[#allocation113_spill] sm:$0xff] }
 0x323   : > { %v15965_v43 = vpop.f32.mrf.mxu0 }
 0x324   : > { %23244 = vst [vmem:[#allocation39_spill] sm:$0xff] %v19441_v61  ;;  %v19444_v21 = vadd.f32 %v4689_v33, %v4418_v19  ;;  %v16053_v4 = vpop.f32.mrf.mxu1  ;;  %v23249_v19 = vld [vmem:[#allocation59_spill] sm:$0xff]  ;;  %v17173_v33 = vld [vmem:[#allocation2 + $0x150] ss:$0 sps:$4 sm:$0xff]   ;;  %v7924_v61 = vshll.u32 %v17180_v11, 16 }
 0x325   : > { %v19446_v24 = vpop.f32.mrf.mxu0  ;;  %v4947_v4 = vor.u32 %v4945_v20, %v4943_v18 }
 0x326   : > { %23245 = vst [vmem:[#allocation44_spill] sm:$0xff] %v19444_v21  ;;  %23246 = vst [vmem:[#allocation88_spill] sm:$0xff] %v19446_v24  ;;  %v19450_v2 = vpop.f32.mrf.mxu1  ;;  %v4951_v21 = vrot.slane %v4949_v36, 1  ;;  %v7922_v36 = vshrl.u32 %v17180_v11, 16  ;;  %v7926_v7 = vrot.slane %v7924_v61, 1 }
 0x327   : > { %23247 = vst [vmem:[#allocation42_spill] sm:$0xff] %v19450_v2  ;;  %v15968_v53 = vpop.f32.mrf.mxu0  ;;  %16167 = vmatmul.mubr.bf16.gmra.mxu0 %v23248_v34 }
 0x328   : > { %v4424_v62 = vadd.f32 %v15968_v53, %v19219_v13  ;;  %v16056_v43 = vpop.f32.mrf.mxu1  ;;  %16170 = vmatprep.mubr.bf16.mxu0 %v23249_v19  ;;  %v4944_v13 = vsel %vm1747_vm1, %v23250_v14, %v4943_v18  ;;  %v4953_v53 = vshrl.u32 %v19364_v63, 16  ;;  %v4957_v19 = vshll.u32 %v17173_v33, 16  ;;  %v17201_v63 = vld [vmem:[#allocation8 + $0x28] sm:$0xff]  }
 0x329   : > { %v4243_v51 = vpop.f32.mrf.mxu0  ;;  %v4952_v20 = vsel %vm1747_vm1, %v4947_v4, %v4951_v21  ;;  %16262 = vmatprep.subr.bf16.mxu1 %v17201_v63 }
 0x32a   : > { %v4422_v22 = vadd.f32 %v4243_v51, %v19221_v32  ;;  %v19456_v24 = vadd.f32 %v16056_v43, %v4424_v62  ;;  %v4705_v47 = vpop.f32.mrf.mxu1  ;;  %v4955_v43 = vor.u32 %v4953_v53, %v4951_v21  ;;  %v4959_v51 = vrot.slane %v4957_v19, 1  ;;  %16263 = vmatpush3.bf16.msra.mxu1 %v17201_v63 }
 0x32b   : > { %v15969_v2 = vpop.f32.mrf.mxu0 }
 0x32c   : > { %v19458_v10 = vadd.f32 %v4705_v47, %v4422_v22  ;;  %v16057_v34 = vpop.f32.mrf.mxu1  ;;  %v7927_v22 = vor.u32 %v7926_v7, %v7922_v36 }
 0x32d   : > { %v19463_v50 = vpop.f32.mrf.mxu0 }
 0x32e   : > { %v19466_v32 = vpop.f32.mrf.mxu1  ;;  %v7932_v21 = vsel %vm1747_vm1, %v7927_v22, %v19408_v3 }
 0x32f   : > { %v15972_v62 = vpop.f32.mrf.mxu0  ;;  %16171 = vmatmul.mubr.bf16.gmra.mxu0 %v4944_v13  ;;  %v4960_v13 = vsel %vm1747_vm1, %v4955_v43, %v4959_v51 }
 0x330   : > { %v4428_v47 = vadd.f32 %v15972_v62, %v19239_v48  ;;  %v16060_v2 = vpop.f32.mrf.mxu1  ;;  %16174 = vmatprep.mubr.bf16.mxu0 %v4952_v20 }
 0x331   : > { %v4259_v18 = vpop.f32.mrf.mxu0 }
 0x332   : > { %v4426_v33 = vadd.f32 %v4259_v18, %v19241_v12  ;;  %v19470_v34 = vadd.f32 %v16060_v2, %v4428_v47  ;;  %v4721_v4 = vpop.f32.mrf.mxu1 }
 0x333   : > { %v15973_v11 = vpop.f32.mrf.mxu0 }
 0x334   : > { %v19472_v61 = vadd.f32 %v4721_v4, %v4426_v33  ;;  %v16061_v14 = vpop.f32.mrf.mxu1  ;;  %v17214_v4 = vld [vmem:[#allocation8 + $0x20] sm:$0xff]  }
 0x335   : > { %v19475_v48 = vpop.f32.mrf.mxu0  ;;  %16264 = vmatprep.subr.bf16.mxu1 %v17214_v4 }
 0x336   : > { %v19479_v7 = vpop.f32.mrf.mxu1  ;;  %16265 = vmatpush3.bf16.msra.mxu1 %v17214_v4 }
 0x337   : > { %v15976_v53 = vpop.f32.mrf.mxu0  ;;  %16175 = vmatmul.mubr.bf16.gmra.mxu0 %v4960_v13 }
 0x338   : > { %v4432_v12 = vadd.f32 %v15976_v53, %v19252_v44  ;;  %v16064_v19 = vpop.f32.mrf.mxu1  ;;  %16354 = vmatprep.mubr.bf16.mxu0 %v7932_v21 }
 0x339   : > { %v4275_v20 = vpop.f32.mrf.mxu0 }
 0x33a   : > { %v4430_v36 = vadd.f32 %v4275_v20, %v19254_v17  ;;  %v19483_v62 = vadd.f32 %v16064_v19, %v4432_v12  ;;  %v4737_v47 = vpop.f32.mrf.mxu1 }
 0x33b   : > { %v15977_v2 = vpop.f32.mrf.mxu0 }
 0x33c   : > { %v19485_v43 = vadd.f32 %v4737_v47, %v4430_v36  ;;  %v16065_v51 = vpop.f32.mrf.mxu1 }
 0x33d   : > { %v19487_v18 = vpop.f32.mrf.mxu0 }
 0x33e   : > { %v19489_v3 = vpop.f32.mrf.mxu1 }
 0x33f   : > { %v15980_v22 = vpop.f32.mrf.mxu0 }
 0x340   : > { %v4436_v63 = vadd.f32 %v15980_v22, %v19265_v16  ;;  %v16068_v44 = vpop.f32.mrf.mxu1 }
 0x341   : > { %v4291_v33 = vpop.f32.mrf.mxu0 }
 0x342   : > { %v4434_v11 = vadd.f32 %v4291_v33, %v19267_v39  ;;  %v19493_v17 = vadd.f32 %v16068_v44, %v4436_v63  ;;  %v4753_v14 = vpop.f32.mrf.mxu1 }
 0x343   : > { %v15981_v13 = vpop.f32.mrf.mxu0 }
 0x344   : > { %v19495_v21 = vadd.f32 %v4753_v14, %v4434_v11  ;;  %v16069_v53 = vpop.f32.mrf.mxu1 }
 0x345   : > { %v19497_v12 = vpop.f32.mrf.mxu0  ;;  %v17227_v53 = vld [vmem:[#allocation8 + $0x18] sm:$0xff]  }
 0x346   : > { %v19499_v19 = vpop.f32.mrf.mxu1  ;;  %16266 = vmatprep.subr.bf16.mxu1 %v17227_v53 }
 0x347   : > { %v15984_v20 = vpop.f32.mrf.mxu0  ;;  %16267 = vmatpush3.bf16.msra.mxu1 %v17227_v53 }
 0x348   : > { %v4440_v16 = vadd.f32 %v15984_v20, %v19278_v31  ;;  %v16072_v36 = vpop.f32.mrf.mxu1 }
 0x349   : > { %v4307_v47 = vpop.f32.mrf.mxu0 }
 0x34a   : > { %v4438_v39 = vadd.f32 %v4307_v47, %v19280_v1  ;;  %v19503_v2 = vadd.f32 %v16072_v36, %v4440_v16  ;;  %v4769_v51 = vpop.f32.mrf.mxu1 }
 0x34b   : > { %v15985_v22 = vpop.f32.mrf.mxu0 }
 0x34c   : > { %v19505_v63 = vadd.f32 %v4769_v51, %v4438_v39  ;;  %v16073_v44 = vpop.f32.mrf.mxu1 }
 0x34d   : > { %v19507_v33 = vpop.f32.mrf.mxu0 }
 0x34e   : > { %23251 = vst [vmem:[#allocation45_spill] sm:$0xff] %v19505_v63  ;;  %v19509_v4 = vpop.f32.mrf.mxu1 }
 0x34f   : > { %v15988_v11 = vpop.f32.mrf.mxu0 }
 0x350   : > { %v4444_v14 = vadd.f32 %v15988_v11, %v19291_v38  ;;  %v16076_v13 = vpop.f32.mrf.mxu1 }
 0x351   : > { %v4323_v31 = vpop.f32.mrf.mxu0 }
 0x352   : > { %v4442_v20 = vadd.f32 %v4323_v31, %v19293_v57  ;;  %v19513_v1 = vadd.f32 %v16076_v13, %v4444_v14  ;;  %v4785_v16 = vpop.f32.mrf.mxu1 }
 0x353   : > { %v15989_v36 = vpop.f32.mrf.mxu0 }
 0x354   : > { %23252 = vst [vmem:[#allocation43_spill] sm:$0xff] %v19513_v1  ;;  %v19515_v47 = vadd.f32 %v4785_v16, %v4442_v20  ;;  %v16077_v39 = vpop.f32.mrf.mxu1 }
 0x355   : > { %v19517_v51 = vpop.f32.mrf.mxu0 }
 0x356   : > { %23253 = vst [vmem:[#allocation89_spill] sm:$0xff] %v19515_v47  ;;  %v19519_v22 = vpop.f32.mrf.mxu1 }
 0x357   : > { %23254 = vst [vmem:[#allocation92_spill] sm:$0xff] %v19519_v22  ;;  %v15992_v44 = vpop.f32.mrf.mxu0 }
 0x358   : > { %v4448_v38 = vadd.f32 %v15992_v44, %v19304_v29  ;;  %v16080_v11 = vpop.f32.mrf.mxu1 }
 0x359   : > { %v4339_v63 = vpop.f32.mrf.mxu0 }
 0x35a   : > { %v4446_v57 = vadd.f32 %v4339_v63, %v19306_v56  ;;  %v19523_v14 = vadd.f32 %v16080_v11, %v4448_v38  ;;  %v4801_v13 = vpop.f32.mrf.mxu1  ;;  %v17240_v63 = vld [vmem:[#allocation8 + $0x10] sm:$0xff]  }
 0x35b   : > { %v15993_v31 = vpop.f32.mrf.mxu0  ;;  %16268 = vmatprep.subr.bf16.mxu1 %v17240_v63 }
 0x35c   : > { %23255 = vst [vmem:[#allocation47_spill] sm:$0xff] %v19523_v14  ;;  %v19525_v36 = vadd.f32 %v4801_v13, %v4446_v57  ;;  %v16081_v20 = vpop.f32.mrf.mxu1  ;;  %16269 = vmatpush3.bf16.msra.mxu1 %v17240_v63 }
 0x35d   : > { %v19527_v16 = vpop.f32.mrf.mxu0 }
 0x35e   : > { %23256 = vst [vmem:[#allocation49_spill] sm:$0xff] %v19525_v36  ;;  %v19529_v53 = vpop.f32.mrf.mxu1 }
 0x35f   : > { %23257 = vst [vmem:[#allocation48_spill] sm:$0xff] %v19529_v53  ;;  %v15996_v39 = vpop.f32.mrf.mxu0  ;;  %v5556_v53 = vlaneseq }
 0x360   : > { %v4452_v47 = vadd.f32 %v15996_v39, %v19317_v41  ;;  %v16084_v22 = vpop.f32.mrf.mxu1 }
 0x361   : > { %v4355_v29 = vpop.f32.mrf.mxu0 }
 0x362   : > { %v4450_v44 = vadd.f32 %v4355_v29, %v19319_v25  ;;  %v19533_v1 = vadd.f32 %v16084_v22, %v4452_v47  ;;  %v4817_v56 = vpop.f32.mrf.mxu1  ;;  %v19539_v47 = vshrl.u32 %v5556_v53, 7  ;;  %v17253_v22 = vld [vmem:[#allocation8 + $0x8] sm:$0xff]  }
 0x363   : > { %v15997_v38 = vpop.f32.mrf.mxu0  ;;  %16270 = vmatprep.subr.bf16.mxu1 %v17253_v22 }
 0x364   : > { %23258 = vst [vmem:[#allocation93_spill] sm:$0xff] %v19533_v1  ;;  %v19535_v11 = vadd.f32 %v4817_v56, %v4450_v44  ;;  %v16085_v57 = vpop.f32.mrf.mxu1  ;;  %16271 = vmatpush3.bf16.msra.mxu1 %v17253_v22  ;;  %v19544_v56 = vld [vmem:[%s22648_s2] ss:$0 sm:$0xff]  ;;  %v19547_v63 = vadd.s32 16, %v19539_v47  ;;  %vm5581_vm3 = vcmp.ge.s32.totalorder %v19539_v47, 1 }
 0x365   : > { %v19537_v13 = vpop.f32.mrf.mxu0 }
 0x366   : > { %23259 = vst [vmem:[#allocation94_spill] sm:$0xff] %v19535_v11  ;;  %23260 = vst [vmem:[#allocation52_spill] sm:$0xff] %v19537_v13  ;;  %vm5587_vm2 = vcmp.lt.s32.totalorder %v19547_v63, 17 }
 0x367   : > { %v16000_v31 = vpop.f32.mrf.mxu0 }
 0x368   : > { %v4853_v31 = vadd.f32 %v19341_v6, %v19339_v23  ;;  %v17267_v6 = vld [vmem:[#allocation8] sm:$0xff]  }
 0x369   : > { %v4371_v20 = vpop.f32.mrf.mxu0  ;;  %16272 = vmatprep.subr.bf16.mxu1 %v17267_v6 }
 0x36a   : > { %16273 = vmatpush3.bf16.msra.mxu1 %v17267_v6  ;;  %v7023_v6 = vshll.u32 %v19393_v37, 16 }
 0x36b   : > { %v16001_v36 = vpop.f32.mrf.mxu0 }
 0x36d   : > { %v4374_v41 = vpop.f32.mrf.mxu0 }
 0x36f   : > { %v16108_v39 = vpop.f32.mrf.mxu0 }
 0x371   : > { %v5046_v14 = vpop.f32.mrf.mxu0 }
 0x373   : > { %v16109_v25 = vpop.f32.mrf.mxu0 }
 0x375   : > { %v5049_v29 = vpop.f32.mrf.mxu0 }
 0x376   : > { %v22809_v29 = vmov 0.0  }
 0x377   : > { %v16112_v44 = vpop.f32.mrf.mxu0 }
 0x378   : > { %v5339_v36 = vadd.f32 %v16112_v44, %v19334_v46  ;;  %v19558_v46 = vld [vmem:[#allocation8 + $0x138] sm:$0xff]  }
 0x379   : > { %v5062_v38 = vpop.f32.mrf.mxu0  ;;  %16498 = vmatprep.subr.bf16.mxu0 %v19558_v46 }
 0x37a   : > { %v5418_v14 = vadd.f32 %v19544_v56, %v5339_v36  ;;  %v5337_v53 = vadd.f32 %v5062_v38, %v19336_v45 }
 0x37b   : > { %v16113_v57 = vpop.f32.mrf.mxu0 }
 0x37c   : > { %v5490_v20 = vmax.f32 %v5418_v14, 0.0  ;;  %v5416_v41 = vadd.f32 %v19544_v56, %v5337_v53 }
 0x37d   : > { %v5065_v39 = vpop.f32.mrf.mxu0 }
 0x37e   : > { %v5923_v25 = vsel %vm5587_vm2, %v5490_v20, 0.0  ;;  %v5338_v22 = vadd.f32 %v5065_v39, %v4853_v31  ;;  %v5488_v45 = vmax.f32 %v5416_v41, 0.0  ;;  %v4857_v39 = vadd.f32 %v19354_v59, %v19352_v52 }
 0x37f   : > { %v14461_v44 = vpack.c.bf16 %v22809_v29, %v5923_v25  ;;  %v16116_v36 = vpop.f32.mrf.mxu0 }
 0x380   : > { %v5417_v38 = vadd.f32 %v19544_v56, %v5338_v22  ;;  %v5343_v23 = vadd.f32 %v16116_v36, %v19347_v35  ;;  %v5921_v20 = vsel %vm5581_vm3, %v5488_v45, 0.0 }
 0x381   : > { %14599 = vst [vmem:[#allocation3 + $0x28] sm:$0xff] %v14461_v44   ;;  %v5078_v14 = vpop.f32.mrf.mxu0 }
 0x382   : > { %v5489_v53 = vmax.f32 %v5417_v38, 0.0  ;;  %v5422_v57 = vadd.f32 %v19544_v56, %v5343_v23  ;;  %v5341_v31 = vadd.f32 %v5078_v14, %v19349_v54  ;;  %v7020_v54 = vshrl.u32 %v19393_v37, 16 }
 0x383   : > { %v16117_v41 = vpop.f32.mrf.mxu0  ;;  %v4861_v37 = vadd.f32 %v19372_v27, %v19370_v55 }
 0x384   : > { %v14457_v35 = vpack.c.bf16 %v5489_v53, %v5921_v20  ;;  %v5494_v25 = vmax.f32 %v5422_v57, 0.0  ;;  %v5420_v22 = vadd.f32 %v19544_v56, %v5341_v31 }
 0x385   : > { %v5081_v44 = vpop.f32.mrf.mxu0 }
 0x386   : > { %14598 = vst [vmem:[#allocation3 + $0x20] sm:$0xff] %v14457_v35   ;;  %v5927_v36 = vsel %vm5587_vm2, %v5494_v25, 0.0  ;;  %v5342_v38 = vadd.f32 %v5081_v44, %v4857_v39  ;;  %v5492_v45 = vmax.f32 %v5420_v22, 0.0  ;;  %v19585_v25 = vrot.slane %v7020_v54, 3 }
 0x387   : > { %v14470_v23 = vpack.c.bf16 %v22809_v29, %v5927_v36  ;;  %v16120_v14 = vpop.f32.mrf.mxu0  ;;  %v19591_v44 = vrot.slane %v7023_v6, 4  ;;  %v4865_v6 = vadd.f32 %v19388_v9, %v19386_v5 }
 0x388   : > { %v5421_v52 = vadd.f32 %v19544_v56, %v5342_v38  ;;  %v5347_v59 = vadd.f32 %v16120_v14, %v19360_v49  ;;  %v19579_v53 = vld [vmem:[#allocation3 + $0x28] sm:$0xff]   ;;  %v5925_v49 = vsel %vm5581_vm3, %v5492_v45, 0.0 }
 0x389   : > { %14601 = vst [vmem:[#allocation3 + $0x38] sm:$0xff] %v14470_v23   ;;  %v5094_v57 = vpop.f32.mrf.mxu0  ;;  %v6356_v39 = vld [vmem:[#allocation3 + $0x28] sm:$0xf]  ;;  %v19583_v35 = vld [vmem:[#allocation3 + $0x2c] sm:$0xf] }
 0x38a   : > { %v5493_v31 = vmax.f32 %v5421_v52, 0.0  ;;  %v5426_v20 = vadd.f32 %v19544_v56, %v5347_v59  ;;  %v5345_v41 = vadd.f32 %v5094_v57, %v19366_v26  ;;  %v7945_v26 = vshll.u32 %v19579_v53, 16 }
 0x38b   : > { %v16121_v22 = vpop.f32.mrf.mxu0  ;;  %v14018_v54 = vcombine.low %v6356_v39, %v19583_v35 }
 0x38c   : > { %v14466_v36 = vpack.c.bf16 %v5493_v31, %v5925_v49  ;;  %v5498_v38 = vmax.f32 %v5426_v20, 0.0  ;;  %v5424_v23 = vadd.f32 %v19544_v56, %v5345_v41 }
 0x38d   : > { %v5097_v14 = vpop.f32.mrf.mxu0  ;;  %v6354_v52 = vld [vmem:[#allocation3 + $0x20] sm:$0xf]  ;;  %v6355_v59 = vld [vmem:[#allocation3 + $0x24] sm:$0xf] }
 0x38e   : > { %14600 = vst [vmem:[#allocation3 + $0x30] sm:$0xff] %v14466_v36   ;;  %v5931_v55 = vsel %vm5587_vm2, %v5498_v38, 0.0  ;;  %v5346_v27 = vadd.f32 %v5097_v14, %v4861_v37  ;;  %v14017_v45 = vcombine.low %v6354_v52, %v6355_v59  ;;  %v17182_v57 = vld [vmem:[#allocation3 + $0x20] sm:$0xff]   ;;  %v5496_v20 = vmax.f32 %v5424_v23, 0.0 }
 0x38f   : > { %v14479_v31 = vpack.c.bf16 %v22809_v29, %v5931_v55  ;;  %v16124_v41 = vpop.f32.mrf.mxu0  ;;  %v14057_v49 = vcombine.low %v19377_v15, %v6354_v52  ;;  %v19601_v22 = vcombine.low %v6355_v59, %v6356_v39  ;;  %v7937_v1 = vshll.u32 %v17182_v57, 16  ;;  %v8616_v14 = vld [vmem:[#allocation3 + $0x24] sm:$0xf] }
 0x390   : > { %v5425_v11 = vadd.f32 %v19544_v56, %v5346_v27  ;;  %v5351_v36 = vadd.f32 %v16124_v41, %v19380_v42  ;;  %16198 = vmatprep.mubr.bf16.mxu1 %v14017_v45  ;;  %v7947_v38 = vrot.slane %v7945_v26, 1  ;;  %v6360_v37 = vld [vmem:[#allocation3 + $0x38] sm:$0xf]  ;;  %v19607_v15 = vld [vmem:[#allocation3 + $0x3c] sm:$0xf]  ;;  %v5929_v26 = vsel %vm5581_vm3, %v5496_v20, 0.0 }
 0x391   : > { %23261 = vst [vmem:[#allocation53_spill] sm:$0xff] %v19601_v22  ;;  %14603 = vst [vmem:[#allocation3 + $0x48] sm:$0xff] %v14479_v31   ;;  %v7029_v55 = vshrl.u32 %v14057_v49, 16  ;;  %v7032_v23 = vshll.u32 %v14057_v49, 16  ;;  %v5110_v29 = vpop.f32.mrf.mxu0  ;;  %16199 = vmatmul.mubr.bf16.gmra.mxu1 %v14018_v54  ;;  %v7939_v59 = vrot.slane %v7937_v1, 1  ;;  %v17281_v27 = vld [vmem:[#allocation8 + $0xf8] sm:$0xff]   ;;  %v14020_v20 = vcombine.low %v6360_v37, %v19607_v15 }
 0x392   : > { %v5497_v39 = vmax.f32 %v5425_v11, 0.0  ;;  %v5430_v52 = vadd.f32 %v19544_v56, %v5351_v36  ;;  %v5349_v42 = vadd.f32 %v5110_v29, %v19383_v28  ;;  %v7941_v9 = vshrl.u32 %v17182_v57, 16  ;;  %v17268_v31 = vld [vmem:[#allocation8 + $0x130] sm:$0xff]   ;;  %16418 = vmatprep.subr.bf16.mxu1 %v17281_v27  ;;  %v8617_v36 = vld [vmem:[#allocation3 + $0x28] sm:$0xf] }
 0x393   : > { %v7031_v45 = vrot.slane %v7029_v55, 3  ;;  %v7034_v41 = vrot.slane %v7032_v23, 4  ;;  %v16125_v5 = vpop.f32.mrf.mxu0  ;;  %v7940_v11 = vsel %vm1747_vm1, %v19414_v30, %v7939_v59  ;;  %v19617_v55 = vcombine.low %v8616_v14, %v8617_v36 }
 0x394   : > { %v14475_v49 = vpack.c.bf16 %v5497_v39, %v5929_v26  ;;  %v5502_v22 = vmax.f32 %v5430_v52, 0.0  ;;  %v5428_v54 = vadd.f32 %v19544_v56, %v5349_v42  ;;  %16355 = vmatmul.mubr.bf16.vlgmr.msra.gmra.mxu0 %v7940_v11  ;;  %v7943_v1 = vor.u32 %v7941_v9, %v7939_v59  ;;  %v19629_v9 = vld [vmem:[#allocation3 + $0x38] sm:$0xff]  }
 0x395   : > { %v5113_v28 = vpop.f32.mrf.mxu0  ;;  %v6358_v29 = vld [vmem:[#allocation3 + $0x30] sm:$0xf]  ;;  %v6359_v13 = vld [vmem:[#allocation3 + $0x34] sm:$0xf]  ;;  %23262 = vst [vmem:[#allocation51_spill] sm:$0xff] %v19617_v55  ;;  %16499 = vmatpush3.bf16.msra.mxu0 %v19558_v46  ;;  %v23263_v30 = vmov 0.0   ;;  %v19639_v36 = vor.u32 %v19591_v44, %v19585_v25 }
 0x396   : > { %14602 = vst [vmem:[#allocation3 + $0x40] sm:$0xff] %v14475_v49   ;;  %v5935_v57 = vsel %vm5587_vm2, %v5502_v22, 0.0  ;;  %v5500_v23 = vmax.f32 %v5428_v54, 0.0  ;;  %v5350_v39 = vadd.f32 %v5113_v28, %v4865_v6  ;;  %v14019_v52 = vcombine.low %v6358_v29, %v6359_v13  ;;  %v17189_v42 = vld [vmem:[#allocation3 + $0x30] sm:$0xff]   ;;  %16500 = vmatprep.subr.bf16.mxu0 %v17268_v31  ;;  %v17270_v22 = vld [vmem:[#allocation8 + $0x128] sm:$0xff]   ;;  %v17277_v44 = vld [vmem:[#allocation8 + $0x120] sm:$0xff]  }
 0x397   : > { %v14488_v27 = vpack.c.bf16 %v23263_v30, %v5935_v57  ;;  %v16128_v26 = vpop.f32.mrf.mxu0  ;;  %v7948_v59 = vsel %vm1747_vm1, %v7943_v1, %v7947_v38  ;;  %v19625_v5 = vcombine.low %v19583_v35, %v6358_v29  ;;  %v19627_v14 = vcombine.low %v6359_v13, %v6360_v37 }
 0x398   : > { %v5429_v6 = vadd.f32 %v19544_v56, %v5350_v39  ;;  %v5355_v49 = vadd.f32 %v16128_v26, %v19396_v0  ;;  %16358 = vmatprep.mubr.bf16.mxu0 %v7948_v59  ;;  %16202 = vmatprep.mubr.bf16.mxu1 %v14019_v52  ;;  %v7953_v46 = vshll.u32 %v17189_v42, 16  ;;  %v19633_v54 = vor.u32 %v7034_v41, %v7031_v45  ;;  %v6364_v37 = vld [vmem:[#allocation3 + $0x48] sm:$0xf]  ;;  %v19643_v57 = vld [vmem:[#allocation3 + $0x4c] sm:$0xf] }
 0x399   : > { %14605 = vst [vmem:[#allocation3 + $0x58] sm:$0xff] %v14488_v27   ;;  %v5126_v11 = vpop.f32.mrf.mxu0  ;;  %16203 = vmatmul.mubr.bf16.gmra.mxu1 %v14020_v20  ;;  %v23264_v35 = vshrl.u32 %v19579_v53, 16  ;;  %16501 = vmatpush3.bf16.msra.mxu0 %v17268_v31  ;;  %v4869_v45 = vadd.f32 %v19403_v58, %v19401_v40  ;;  %v5933_v53 = vsel %vm5581_vm3, %v5500_v23, 0.0  ;;  %v7957_v41 = vshrl.u32 %v17189_v42, 16 }
 0x39a   : > { %v5501_v28 = vmax.f32 %v5429_v6, 0.0  ;;  %v5434_v1 = vadd.f32 %v19544_v56, %v5355_v49  ;;  %v5353_v0 = vadd.f32 %v5126_v11, %v19398_v60  ;;  %v7955_v29 = vrot.slane %v7953_v46, 1  ;;  %16502 = vmatprep.subr.bf16.mxu0 %v17270_v22 }
 0x39b   : > { %v7951_v13 = vor.u32 %v23264_v35, %v7947_v38  ;;  %v16129_v38 = vpop.f32.mrf.mxu0  ;;  %v7961_v25 = vshll.u32 %v19629_v9, 16  ;;  %v14022_v23 = vcombine.low %v6364_v37, %v19643_v57  ;;  %v19656_v42 = vsel %vm989_vm0, %v19639_v36, %v19633_v54 }
 0x39c   : > { %v14484_v20 = vpack.c.bf16 %v5501_v28, %v5933_v53  ;;  %v5506_v39 = vmax.f32 %v5434_v1, 0.0  ;;  %v5432_v60 = vadd.f32 %v19544_v56, %v5353_v0  ;;  %v7959_v31 = vor.u32 %v7957_v41, %v7955_v29  ;;  %23265 = vst [vmem:[#allocation97_spill] sm:$0xff] %v19656_v42  ;;  %v23266_v41 = vld [vmem:[#allocation34_spill] sm:$0xff] }
 0x39d   : > { %v7956_v52 = vsel %vm1747_vm1, %v7951_v13, %v7955_v29  ;;  %v5129_v27 = vpop.f32.mrf.mxu0  ;;  %v7963_v26 = vrot.slane %v7961_v25, 1  ;;  %v6362_v40 = vld [vmem:[#allocation3 + $0x40] sm:$0xf]  ;;  %v6363_v58 = vld [vmem:[#allocation3 + $0x44] sm:$0xf]  ;;  %16503 = vmatpush3.bf16.msra.mxu0 %v17270_v22  ;;  %v17279_v29 = vld [vmem:[#allocation8 + $0x118] sm:$0xff]  }
 0x39e   : > { %16359 = vmatmul.mubr.bf16.gmra.mxu0 %v7956_v52  ;;  %14604 = vst [vmem:[#allocation3 + $0x50] sm:$0xff] %v14484_v20   ;;  %v5939_v59 = vsel %vm5587_vm2, %v5506_v39, 0.0  ;;  %v5504_v6 = vmax.f32 %v5432_v60, 0.0  ;;  %v5354_v49 = vadd.f32 %v5129_v27, %v4869_v45  ;;  %v14021_v46 = vcombine.low %v6362_v40, %v6363_v58  ;;  %v17195_v0 = vld [vmem:[#allocation3 + $0x40] sm:$0xff]   ;;  %16504 = vmatprep.subr.bf16.mxu0 %v17277_v44  ;;  %v19669_v22 = vld [vmem:[#allocation3 + $0x48] sm:$0xff]   ;;  %v23267_v25 = vld [vmem:[#allocation37_spill] sm:$0xff] }
 0x39f   : > { %v14497_v11 = vpack.c.bf16 %v23263_v30, %v5939_v59  ;;  %v16132_v35 = vpop.f32.mrf.mxu0  ;;  %v7964_v13 = vsel %vm1747_vm1, %v7959_v31, %v7963_v26  ;;  %v19663_v28 = vcombine.low %v19607_v15, %v6362_v40  ;;  %v19665_v1 = vcombine.low %v6363_v58, %v6364_v37  ;;  %v23268_v39 = vld [vmem:[#allocation36_spill] sm:$0xff]  ;;  %v17282_v52 = vld [vmem:[#allocation8 + $0x110] sm:$0xff]  }
 0x3a0   : > { %v5433_v53 = vadd.f32 %v19544_v56, %v5354_v49  ;;  %v5359_v38 = vadd.f32 %v16132_v35, %v19411_v8  ;;  %16362 = vmatprep.mubr.bf16.mxu0 %v7964_v13  ;;  %16206 = vmatprep.mubr.bf16.mxu1 %v14021_v46  ;;  %v4873_v15 = vadd.f32 %v23267_v25, %v23266_v41  ;;  %v5937_v8 = vsel %vm5581_vm3, %v5504_v6, 0.0  ;;  %v6368_v59 = vld [vmem:[#allocation3 + $0x58] sm:$0xf]  ;;  %v6369_v35 = vld [vmem:[#allocation3 + $0x5c] sm:$0xf] }
 0x3a1   : > { %14607 = vst [vmem:[#allocation3 + $0x68] sm:$0xff] %v14497_v11   ;;  %v5142_v45 = vpop.f32.mrf.mxu0  ;;  %16207 = vmatmul.mubr.bf16.gmra.mxu1 %v14022_v23  ;;  %16505 = vmatpush3.bf16.msra.mxu0 %v17277_v44  ;;  %v7965_v31 = vshrl.u32 %v19629_v9, 16  ;;  %v7969_v40 = vshll.u32 %v17195_v0, 16  ;;  %v7973_v58 = vshrl.u32 %v17195_v0, 16  ;;  %v7977_v11 = vshll.u32 %v19669_v22, 16 }
 0x3a2   : > { %v5505_v20 = vmax.f32 %v5433_v53, 0.0  ;;  %v5438_v37 = vadd.f32 %v19544_v56, %v5359_v38  ;;  %v5357_v60 = vadd.f32 %v5142_v45, %v23268_v39  ;;  %16506 = vmatprep.subr.bf16.mxu0 %v17279_v29 }
 0x3a3   : > { %v16133_v27 = vpop.f32.mrf.mxu0  ;;  %v7967_v44 = vor.u32 %v7965_v31, %v7963_v26  ;;  %v7971_v53 = vrot.slane %v7969_v40, 1  ;;  %v7979_v25 = vrot.slane %v7977_v11, 1  ;;  %v19692_v11 = vld [vmem:[#allocation3 + $0x58] sm:$0xff]  }
 0x3a4   : > { %v14493_v23 = vpack.c.bf16 %v5505_v20, %v5937_v8  ;;  %v5510_v49 = vmax.f32 %v5438_v37, 0.0  ;;  %v5436_v46 = vadd.f32 %v19544_v56, %v5357_v60  ;;  %v23269_v27 = vld [vmem:[#allocation35_spill] sm:$0xff] }
 0x3a5   : > { %v5145_v13 = vpop.f32.mrf.mxu0  ;;  %v6366_v38 = vld [vmem:[#allocation3 + $0x50] sm:$0xf]  ;;  %v6367_v45 = vld [vmem:[#allocation3 + $0x54] sm:$0xf]  ;;  %16507 = vmatpush3.bf16.msra.mxu0 %v17279_v29  ;;  %v7972_v37 = vsel %vm1747_vm1, %v7967_v44, %v7971_v53  ;;  %v7975_v60 = vor.u32 %v7973_v58, %v7971_v53  ;;  %v23270_v53 = vld [vmem:[#allocation22_spill] sm:$0xff] }
 0x3a6   : > { %v17202_v6 = vld [vmem:[#allocation3 + $0x50] sm:$0xff]   ;;  %14606 = vst [vmem:[#allocation3 + $0x60] sm:$0xff] %v14493_v23   ;;  %v5943_v9 = vsel %vm5587_vm2, %v5510_v49, 0.0  ;;  %v5508_v0 = vmax.f32 %v5436_v46, 0.0  ;;  %v5358_v41 = vadd.f32 %v5145_v13, %v4873_v15  ;;  %v14023_v8 = vcombine.low %v6366_v38, %v6367_v45  ;;  %16508 = vmatprep.subr.bf16.mxu0 %v17282_v52  ;;  %16363 = vmatmul.mubr.bf16.gmra.mxu0 %v7972_v37  ;;  %v17284_v15 = vld [vmem:[#allocation8 + $0x108] sm:$0xff]   ;;  %v23273_v37 = vld [vmem:[#allocation38_spill] sm:$0xff] }
 0x3a7   : > { %v14506_v20 = vpack.c.bf16 %v23263_v30, %v5943_v9  ;;  %v16136_v39 = vpop.f32.mrf.mxu0  ;;  %v19687_v40 = vcombine.low %v19643_v57, %v6366_v38  ;;  %v14024_v23 = vcombine.low %v6368_v59, %v6369_v35  ;;  %v7980_v29 = vsel %vm1747_vm1, %v7975_v60, %v7979_v25  ;;  %v23271_v38 = vld [vmem:[#allocation23_spill] sm:$0xff] }
 0x3a8   : > { %v5437_v26 = vadd.f32 %v19544_v56, %v5358_v41  ;;  %v5363_v31 = vadd.f32 %v16136_v39, %v23269_v27  ;;  %16210 = vmatprep.mubr.bf16.mxu1 %v14023_v8  ;;  %v19690_v49 = vcombine.low %v6367_v45, %v6368_v59  ;;  %v7985_v58 = vshll.u32 %v17202_v6, 16  ;;  %16366 = vmatprep.mubr.bf16.mxu0 %v7980_v29  ;;  %v23274_v39 = vld [vmem:[#allocation41_spill] sm:$0xff] }
 0x3a9   : > { %14609 = vst [vmem:[#allocation3 + $0x78] sm:$0xff] %v14506_v20   ;;  %v5158_v46 = vpop.f32.mrf.mxu0  ;;  %16211 = vmatmul.mubr.bf16.gmra.mxu1 %v14024_v23  ;;  %v7981_v57 = vshrl.u32 %v19669_v22, 16  ;;  %v3922_v9 = vadd.f32 %v23271_v38, %v23270_v53  ;;  %v5941_v41 = vsel %vm5581_vm3, %v5508_v0, 0.0  ;;  %v23272_v20 = vld [vmem:[#allocation40_spill] sm:$0xff]  ;;  %16509 = vmatpush3.bf16.msra.mxu0 %v17282_v52  ;;  %v4877_v60 = vadd.f32 %v23274_v39, %v23273_v37  ;;  %v17289_v22 = vld [vmem:[#allocation8 + $0x100] sm:$0xff]  }
 0x3aa   : > { %v5509_v13 = vmax.f32 %v5437_v26, 0.0  ;;  %v5442_v44 = vadd.f32 %v19544_v56, %v5363_v31  ;;  %v5361_v59 = vadd.f32 %v5158_v46, %v23272_v20  ;;  %v6372_v31 = vld [vmem:[#allocation3 + $0x68] sm:$0xf]  ;;  %v19703_v23 = vld [vmem:[#allocation3 + $0x6c] sm:$0xf]  ;;  %16510 = vmatprep.subr.bf16.mxu0 %v17284_v15  ;;  %v7987_v38 = vrot.slane %v7985_v58, 1 }
 0x3ab   : > { %v16137_v45 = vpop.f32.mrf.mxu0  ;;  %v7983_v27 = vor.u32 %v7981_v57, %v7979_v25  ;;  %v7989_v0 = vshrl.u32 %v17202_v6, 16  ;;  %v7993_v46 = vshll.u32 %v19692_v11, 16  ;;  %v23275_v52 = vld [vmem:[#allocation88_spill] sm:$0xff] }
 0x3ac   : > { %v14502_v8 = vpack.c.bf16 %v5509_v13, %v5941_v41  ;;  %v5514_v26 = vmax.f32 %v5442_v44, 0.0  ;;  %v5440_v29 = vadd.f32 %v19544_v56, %v5361_v59  ;;  %v4419_v45 = vadd.f32 %v23275_v52, %v3922_v9  ;;  %v23276_v9 = vld [vmem:[#allocation39_spill] sm:$0xff] }
 0x3ad   : > { %v5161_v53 = vpop.f32.mrf.mxu0  ;;  %v6370_v20 = vld [vmem:[#allocation3 + $0x60] sm:$0xf]  ;;  %v6371_v44 = vld [vmem:[#allocation3 + $0x64] sm:$0xf]  ;;  %v7988_v59 = vsel %vm1747_vm1, %v7983_v27, %v7987_v38  ;;  %v7991_v6 = vor.u32 %v7989_v0, %v7987_v38  ;;  %16511 = vmatpush3.bf16.msra.mxu0 %v17284_v15  ;;  %v7995_v52 = vrot.slane %v7993_v46, 1  ;;  %v23277_v0 = vld [vmem:[#allocation44_spill] sm:$0xff] }
 0x3ae   : > { %14608 = vst [vmem:[#allocation3 + $0x70] sm:$0xff] %v14502_v8   ;;  %v5947_v13 = vsel %vm5587_vm2, %v5514_v26, 0.0  ;;  %v5362_v25 = vadd.f32 %v5161_v53, %v4877_v60  ;;  %v19710_v57 = vcombine.low %v6369_v35, %v6370_v20  ;;  %v5512_v37 = vmax.f32 %v5440_v29, 0.0  ;;  %16367 = vmatmul.mubr.bf16.gmra.mxu0 %v7988_v59  ;;  %16512 = vmatprep.subr.bf16.mxu0 %v17289_v22  ;;  %v17208_v29 = vld [vmem:[#allocation3 + $0x60] sm:$0xff]   ;;  %v19719_v53 = vld [vmem:[#allocation3 + $0x68] sm:$0xff]   ;;  %v23280_v59 = vld [vmem:[#allocation42_spill] sm:$0xff] }
 0x3af   : > { %v14515_v41 = vpack.c.bf16 %v23263_v30, %v5947_v13  ;;  %v16140_v58 = vpop.f32.mrf.mxu0  ;;  %v14025_v55 = vcombine.low %v6370_v20, %v6371_v44  ;;  %v19716_v60 = vcombine.low %v6371_v44, %v6372_v31  ;;  %v14026_v26 = vcombine.low %v6372_v31, %v19703_v23  ;;  %v23278_v46 = vld [vmem:[#allocation24_spill] sm:$0xff]  ;;  %v23279_v20 = vld [vmem:[#allocation25_spill] sm:$0xff] }
 0x3b0   : > { %v5441_v39 = vadd.f32 %v19544_v56, %v5362_v25  ;;  %v5367_v8 = vadd.f32 %v16140_v58, %v23276_v9  ;;  %v7996_v38 = vsel %vm1747_vm1, %v7991_v6, %v7995_v52  ;;  %v3926_v25 = vadd.f32 %v23279_v20, %v23278_v46  ;;  %v19730_v6 = vld [vmem:[#allocation3 + $0x7c] sm:$0xf] }
 0x3b1   : > { %14611 = vst [vmem:[#allocation3 + $0x88] sm:$0xff] %v14515_v41   ;;  %v5174_v35 = vpop.f32.mrf.mxu0  ;;  %16214 = vmatprep.mubr.bf16.mxu1 %v14025_v55  ;;  %v5945_v44 = vsel %vm5581_vm3, %v5512_v37, 0.0  ;;  %16370 = vmatprep.mubr.bf16.mxu0 %v7996_v38  ;;  %v6376_v41 = vld [vmem:[#allocation3 + $0x78] sm:$0xf]  ;;  %v4881_v58 = vadd.f32 %v23280_v59, %v4419_v45  ;;  %v8005_v46 = vshrl.u32 %v17208_v29, 16  ;;  %v8009_v37 = vshll.u32 %v19719_v53, 16 }
 0x3b2   : > { %v5513_v27 = vmax.f32 %v5441_v39, 0.0  ;;  %v5446_v15 = vadd.f32 %v19544_v56, %v5367_v8  ;;  %v5365_v13 = vadd.f32 %v5174_v35, %v23277_v0  ;;  %16215 = vmatmul.mubr.bf16.gmra.mxu1 %v14026_v26  ;;  %16513 = vmatpush3.bf16.msra.mxu0 %v17289_v22  ;;  %v7997_v35 = vshrl.u32 %v19692_v11, 16 }
 0x3b3   : > { %v16141_v31 = vpop.f32.mrf.mxu0  ;;  %v8001_v0 = vshll.u32 %v17208_v29, 16  ;;  %v4423_v26 = vadd.f32 %v19463_v50, %v3926_v25  ;;  %v14028_v50 = vcombine.low %v6376_v41, %v19730_v6 }
 0x3b4   : > { %v14511_v39 = vpack.c.bf16 %v5513_v27, %v5945_v44  ;;  %v5518_v9 = vmax.f32 %v5446_v15, 0.0  ;;  %v5444_v8 = vadd.f32 %v19544_v56, %v5365_v13  ;;  %v7999_v22 = vor.u32 %v7997_v35, %v7995_v52 }
 0x3b5   : > { %v5177_v55 = vpop.f32.mrf.mxu0  ;;  %v6374_v38 = vld [vmem:[#allocation3 + $0x70] sm:$0xf]  ;;  %v6375_v13 = vld [vmem:[#allocation3 + $0x74] sm:$0xf]  ;;  %v8003_v44 = vrot.slane %v8001_v0, 1 }
 0x3b6   : > { %14610 = vst [vmem:[#allocation3 + $0x80] sm:$0xff] %v14511_v39   ;;  %v5951_v45 = vsel %vm5587_vm2, %v5518_v9, 0.0  ;;  %v5516_v27 = vmax.f32 %v5444_v8, 0.0  ;;  %v5366_v15 = vadd.f32 %v5177_v55, %v4881_v58  ;;  %v14027_v11 = vcombine.low %v6374_v38, %v6375_v13  ;;  %v17215_v8 = vld [vmem:[#allocation3 + $0x70] sm:$0xff]   ;;  %v19747_v55 = vpop.f32.mrf.mxu1 }
 0x3b7   : > { %v14524_v20 = vpack.c.bf16 %v23263_v30, %v5951_v45  ;;  %v16144_v31 = vpop.f32.mrf.mxu0  ;;  %v19741_v42 = vcombine.low %v19703_v23, %v6374_v38  ;;  %v8004_v25 = vsel %vm1747_vm1, %v7999_v22, %v8003_v44  ;;  %v8007_v58 = vor.u32 %v8005_v46, %v8003_v44  ;;  %v19750_v23 = vld [vmem:[#allocation3 + $0x78] sm:$0xff]   ;;  %v23281_v45 = vld [vmem:[#allocation28_spill] sm:$0xff] }
 0x3b8   : > { %v5445_v29 = vadd.f32 %v19544_v56, %v5366_v15  ;;  %v5371_v59 = vadd.f32 %v16144_v31, %v19456_v24  ;;  %v8011_v39 = vrot.slane %v8009_v37, 1  ;;  %16218 = vmatprep.mubr.bf16.mxu1 %v14027_v11  ;;  %v19745_v9 = vcombine.low %v6375_v13, %v6376_v41  ;;  %16371 = vmatmul.mubr.bf16.gmra.mxu0 %v8004_v25  ;;  %v23282_v15 = vld [vmem:[#allocation130_spill] sm:$0xff] }
 0x3b9   : > { %14613 = vst [vmem:[#allocation3 + $0x98] sm:$0xff] %v14524_v20   ;;  %v5190_v52 = vpop.f32.mrf.mxu0  ;;  %v5949_v0 = vsel %vm5581_vm3, %v5516_v27, 0.0  ;;  %v8013_v37 = vshrl.u32 %v19719_v53, 16  ;;  %v3930_v13 = vadd.f32 %v23282_v15, %v23281_v45  ;;  %v4885_v20 = vadd.f32 %v19466_v32, %v4423_v26  ;;  %v6381_v15 = vld [vmem:[#allocation3 + $0x8c] sm:$0xf] }
 0x3ba   : > { %v5517_v35 = vmax.f32 %v5445_v29, 0.0  ;;  %v5450_v24 = vadd.f32 %v19544_v56, %v5371_v59  ;;  %v8012_v38 = vsel %vm1747_vm1, %v8007_v58, %v8011_v39  ;;  %v5369_v46 = vadd.f32 %v5190_v52, %v19458_v10  ;;  %16219 = vmatmul.mubr.bf16.gmra.mxu1 %v14028_v50  ;;  %v16088_v31 = vpop.f32.mrf.mxu1 }
 0x3bb   : > { %v16145_v41 = vpop.f32.mrf.mxu0  ;;  %16374 = vmatprep.mubr.bf16.mxu0 %v8012_v38  ;;  %v8015_v29 = vor.u32 %v8013_v37, %v8011_v39  ;;  %v8017_v59 = vshll.u32 %v17215_v8, 16  ;;  %v8021_v25 = vshrl.u32 %v17215_v8, 16  ;;  %v8025_v52 = vshll.u32 %v19750_v23, 16 }
 0x3bc   : > { %v14520_v22 = vpack.c.bf16 %v5517_v35, %v5949_v0  ;;  %v5522_v44 = vmax.f32 %v5450_v24, 0.0  ;;  %v5448_v11 = vadd.f32 %v19544_v56, %v5369_v46  ;;  %v4833_v26 = vpop.f32.mrf.mxu1  ;;  %v6380_v46 = vld [vmem:[#allocation3 + $0x88] sm:$0xf]  ;;  %v4427_v8 = vadd.f32 %v19475_v48, %v3930_v13 }
 0x3bd   : > { %v5193_v27 = vpop.f32.mrf.mxu0  ;;  %v6378_v10 = vld [vmem:[#allocation3 + $0x80] sm:$0xf]  ;;  %v6379_v50 = vld [vmem:[#allocation3 + $0x84] sm:$0xf]  ;;  %v8019_v0 = vrot.slane %v8017_v59, 1  ;;  %v8027_v31 = vrot.slane %v8025_v52, 1 }
 0x3be   : > { %14612 = vst [vmem:[#allocation3 + $0x90] sm:$0xff] %v14520_v22   ;;  %v5955_v53 = vsel %vm5587_vm2, %v5522_v44, 0.0  ;;  %v5370_v58 = vadd.f32 %v5193_v27, %v4885_v20  ;;  %v14029_v32 = vcombine.low %v6378_v10, %v6379_v50  ;;  %v5520_v24 = vmax.f32 %v5448_v11, 0.0  ;;  %v16089_v20 = vpop.f32.mrf.mxu1  ;;  %v17221_v27 = vld [vmem:[#allocation3 + $0x80] sm:$0xff]   ;;  %v19775_v13 = vld [vmem:[#allocation3 + $0x88] sm:$0xff]  }
 0x3bf   : > { %v14533_v35 = vpack.c.bf16 %v23263_v30, %v5955_v53  ;;  %v16148_v38 = vpop.f32.mrf.mxu0  ;;  %v19766_v39 = vcombine.low %v19730_v6, %v6378_v10  ;;  %v19771_v45 = vcombine.low %v6379_v50, %v6380_v46  ;;  %v8020_v22 = vsel %vm1747_vm1, %v8015_v29, %v8019_v0  ;;  %v23284_v10 = vld [vmem:[#allocation29_spill] sm:$0xff] }
 0x3c0   : > { %v5449_v41 = vadd.f32 %v19544_v56, %v5370_v58  ;;  %v5375_v37 = vadd.f32 %v16148_v38, %v19470_v34  ;;  %16222 = vmatprep.mubr.bf16.mxu1 %v14029_v32  ;;  %v8023_v44 = vor.u32 %v8021_v25, %v8019_v0  ;;  %16375 = vmatmul.mubr.bf16.gmra.mxu0 %v8020_v22  ;;  %v4836_v59 = vpop.f32.mrf.mxu1  ;;  %v23283_v34 = vld [vmem:[#allocation26_spill] sm:$0xff]  ;;  %v5953_v53 = vsel %vm5581_vm3, %v5520_v24, 0.0 }
 0x3c1   : > { %14615 = vst [vmem:[#allocation3 + $0xa8] sm:$0xff] %v14533_v35   ;;  %v5206_v11 = vpop.f32.mrf.mxu0  ;;  %v3934_v50 = vadd.f32 %v23284_v10, %v23283_v34  ;;  %v4889_v52 = vadd.f32 %v19479_v7, %v4427_v8  ;;  %v14030_v35 = vcombine.low %v6380_v46, %v6381_v15  ;;  %v8037_v20 = vshrl.u32 %v17221_v27, 16  ;;  %v6384_v10 = vld [vmem:[#allocation3 + $0x98] sm:$0xf] }
 0x3c2   : > { %v5521_v6 = vmax.f32 %v5449_v41, 0.0  ;;  %v5454_v48 = vadd.f32 %v19544_v56, %v5375_v37  ;;  %v8028_v58 = vsel %vm1747_vm1, %v8023_v44, %v8027_v31  ;;  %v5373_v29 = vadd.f32 %v5206_v11, %v19472_v61 }
 0x3c3   : > { %v16149_v25 = vpop.f32.mrf.mxu0  ;;  %16378 = vmatprep.mubr.bf16.mxu0 %v8028_v58  ;;  %v8029_v41 = vshrl.u32 %v19750_v23, 16  ;;  %v8033_v37 = vshll.u32 %v17221_v27, 16  ;;  %16223 = vmatmul.mubr.bf16.gmra.mxu1 %v14030_v35  ;;  %v8041_v7 = vshll.u32 %v19775_v13, 16  ;;  %v4431_v27 = vadd.f32 %v19487_v18, %v3934_v50  ;;  %v6385_v18 = vld [vmem:[#allocation3 + $0x9c] sm:$0xf] }
 0x3c4   : > { %v14529_v32 = vpack.c.bf16 %v5521_v6, %v5953_v53  ;;  %v5526_v26 = vmax.f32 %v5454_v48, 0.0  ;;  %v5452_v0 = vadd.f32 %v19544_v56, %v5373_v29  ;;  %v19799_v50 = vld [vmem:[#allocation3 + $0x98] sm:$0xff]  }
 0x3c5   : > { %v5209_v38 = vpop.f32.mrf.mxu0  ;;  %v6382_v22 = vld [vmem:[#allocation3 + $0x90] sm:$0xf]  ;;  %v6383_v8 = vld [vmem:[#allocation3 + $0x94] sm:$0xf]  ;;  %v8031_v6 = vor.u32 %v8029_v41, %v8027_v31  ;;  %v8035_v48 = vrot.slane %v8033_v37, 1  ;;  %v23285_v41 = vld [vmem:[#allocation27_spill] sm:$0xff] }
 0x3c6   : > { %14614 = vst [vmem:[#allocation3 + $0xa0] sm:$0xff] %v14529_v32   ;;  %v5959_v24 = vsel %vm5587_vm2, %v5526_v26, 0.0  ;;  %v5374_v61 = vadd.f32 %v5209_v38, %v4889_v52  ;;  %v19789_v44 = vcombine.low %v6381_v15, %v6382_v22  ;;  %v5524_v11 = vmax.f32 %v5452_v0, 0.0  ;;  %v17228_v32 = vld [vmem:[#allocation3 + $0x90] sm:$0xff]   ;;  %v23286_v37 = vld [vmem:[#allocation131_spill] sm:$0xff] }
 0x3c7   : > { %v14542_v46 = vpack.c.bf16 %v23263_v30, %v5959_v24  ;;  %v16152_v23 = vpop.f32.mrf.mxu0  ;;  %v14031_v53 = vcombine.low %v6382_v22, %v6383_v8  ;;  %v8036_v58 = vsel %vm1747_vm1, %v8031_v6, %v8035_v48  ;;  %v8039_v29 = vor.u32 %v8037_v20, %v8035_v48 }
 0x3c8   : > { %v5453_v59 = vadd.f32 %v19544_v56, %v5374_v61  ;;  %v5379_v34 = vadd.f32 %v16152_v23, %v19483_v62  ;;  %v8043_v15 = vrot.slane %v8041_v7, 1  ;;  %v19796_v25 = vcombine.low %v6383_v8, %v6384_v10  ;;  %16379 = vmatmul.mubr.bf16.gmra.mxu0 %v8036_v58 }
 0x3c9   : > { %14617 = vst [vmem:[#allocation3 + $0xb8] sm:$0xff] %v14542_v46   ;;  %v5222_v52 = vpop.f32.mrf.mxu0  ;;  %16226 = vmatprep.mubr.bf16.mxu1 %v14031_v53  ;;  %v5957_v62 = vsel %vm5581_vm3, %v5524_v11, 0.0  ;;  %v3938_v20 = vadd.f32 %v23286_v37, %v23285_v41  ;;  %v4893_v22 = vadd.f32 %v19489_v3, %v4431_v27  ;;  %v14032_v8 = vcombine.low %v6384_v10, %v6385_v18 }
 0x3ca   : > { %v5525_v31 = vmax.f32 %v5453_v59, 0.0  ;;  %v5458_v26 = vadd.f32 %v19544_v56, %v5379_v34  ;;  %v8044_v35 = vsel %vm1747_vm1, %v8039_v29, %v8043_v15  ;;  %v5377_v0 = vadd.f32 %v5222_v52, %v19485_v43 }
 0x3cb   : > { %v16153_v38 = vpop.f32.mrf.mxu0  ;;  %16382 = vmatprep.mubr.bf16.mxu0 %v8044_v35  ;;  %v8045_v6 = vshrl.u32 %v19775_v13, 16  ;;  %v8049_v11 = vshll.u32 %v17228_v32, 16  ;;  %v8053_v34 = vshrl.u32 %v17228_v32, 16  ;;  %v8057_v3 = vshll.u32 %v19799_v50, 16  ;;  %16227 = vmatmul.mubr.bf16.gmra.mxu1 %v14032_v8 }
 0x3cc   : > { %v14538_v24 = vpack.c.bf16 %v5525_v31, %v5957_v62  ;;  %v5530_v61 = vmax.f32 %v5458_v26, 0.0  ;;  %v5456_v7 = vadd.f32 %v19544_v56, %v5377_v0  ;;  %v4435_v13 = vadd.f32 %v19497_v12, %v3938_v20  ;;  %v6388_v26 = vld [vmem:[#allocation3 + $0xa8] sm:$0xf]  ;;  %v19823_v12 = vld [vmem:[%s22648_s2] ss:$0 sm:$0xff] }
 0x3cd   : > { %v5225_v46 = vpop.f32.mrf.mxu0  ;;  %v6386_v48 = vld [vmem:[#allocation3 + $0xa0] sm:$0xf]  ;;  %v6387_v23 = vld [vmem:[#allocation3 + $0xa4] sm:$0xf]  ;;  %v8047_v58 = vor.u32 %v8045_v6, %v8043_v15  ;;  %v8051_v10 = vrot.slane %v8049_v11, 1  ;;  %v8059_v0 = vrot.slane %v8057_v3, 1 }
 0x3ce   : > { %14616 = vst [vmem:[#allocation3 + $0xb0] sm:$0xff] %v14538_v24   ;;  %v5963_v43 = vsel %vm5587_vm2, %v5530_v61, 0.0  ;;  %v5378_v59 = vadd.f32 %v5225_v46, %v4893_v22  ;;  %v5528_v53 = vmax.f32 %v5456_v7, 0.0  ;;  %v14033_v62 = vcombine.low %v6386_v48, %v6387_v23  ;;  %v6389_v20 = vld [vmem:[#allocation3 + $0xac] sm:$0xf]  ;;  %v17234_v22 = vld [vmem:[#allocation3 + $0xa0] sm:$0xff]  }
 0x3cf   : > { %v14551_v27 = vpack.c.bf16 %v23263_v30, %v5963_v43  ;;  %v16156_v29 = vpop.f32.mrf.mxu0  ;;  %v8052_v32 = vsel %vm1747_vm1, %v8047_v58, %v8051_v10  ;;  %v8055_v35 = vor.u32 %v8053_v34, %v8051_v10  ;;  %v19818_v38 = vcombine.low %v6385_v18, %v6386_v48  ;;  %v23287_v24 = vld [vmem:[#allocation132_spill] sm:$0xff] }
 0x3d0   : > { %v5457_v52 = vadd.f32 %v19544_v56, %v5378_v59  ;;  %v5383_v31 = vadd.f32 %v16156_v29, %v19493_v17  ;;  %16383 = vmatmul.mubr.bf16.gmra.mxu0 %v8052_v32  ;;  %16230 = vmatprep.mubr.bf16.mxu1 %v14033_v62  ;;  %v19826_v17 = vcombine.low %v6387_v23, %v6388_v26  ;;  %v23288_v18 = vld [vmem:[#allocation32_spill] sm:$0xff]  ;;  %v5961_v7 = vsel %vm5581_vm3, %v5528_v53, 0.0 }
 0x3d1   : > { %14619 = vst [vmem:[#allocation3 + $0xc8] sm:$0xff] %v14551_v27   ;;  %v5238_v41 = vpop.f32.mrf.mxu0  ;;  %v3942_v61 = vadd.f32 %v23288_v18, %v23287_v24  ;;  %v8060_v8 = vsel %vm1747_vm1, %v8055_v35, %v8059_v0  ;;  %v19834_v6 = vld [vmem:[#allocation3 + $0xa8] sm:$0xff]   ;;  %v4897_v11 = vadd.f32 %v19499_v19, %v4435_v13  ;;  %v14034_v59 = vcombine.low %v6388_v26, %v6389_v20  ;;  %v6392_v35 = vld [vmem:[#allocation3 + $0xb8] sm:$0xf] }
 0x3d2   : > { %v5529_v37 = vmax.f32 %v5457_v52, 0.0  ;;  %v5462_v56 = vadd.f32 %v19823_v12, %v5383_v31  ;;  %v5381_v15 = vadd.f32 %v5238_v41, %v19495_v21  ;;  %16386 = vmatprep.mubr.bf16.mxu0 %v8060_v8  ;;  %v8061_v3 = vshrl.u32 %v19799_v50, 16 }
 0x3d3   : > { %v16157_v46 = vpop.f32.mrf.mxu0  ;;  %v4439_v21 = vadd.f32 %v19507_v33, %v3942_v61  ;;  %v8065_v10 = vshll.u32 %v17234_v22, 16  ;;  %v8069_v29 = vshrl.u32 %v17234_v22, 16  ;;  %16231 = vmatmul.mubr.bf16.gmra.mxu1 %v14034_v59  ;;  %v8073_v26 = vshll.u32 %v19834_v6, 16  ;;  %v23289_v59 = vld [vmem:[#allocation45_spill] sm:$0xff] }
 0x3d4   : > { %v14547_v48 = vpack.c.bf16 %v5529_v37, %v5961_v7  ;;  %v5534_v23 = vmax.f32 %v5462_v56, 0.0  ;;  %v5460_v43 = vadd.f32 %v19823_v12, %v5381_v15  ;;  %v8063_v33 = vor.u32 %v8061_v3, %v8059_v0  ;;  %v6393_v7 = vld [vmem:[#allocation3 + $0xbc] sm:$0xf]  ;;  %v23290_v3 = vld [vmem:[#allocation133_spill] sm:$0xff] }
 0x3d5   : > { %v5241_v34 = vpop.f32.mrf.mxu0  ;;  %v6390_v27 = vld [vmem:[#allocation3 + $0xb0] sm:$0xf]  ;;  %v6391_v19 = vld [vmem:[#allocation3 + $0xb4] sm:$0xf]  ;;  %v8067_v50 = vrot.slane %v8065_v10, 1  ;;  %v8075_v37 = vrot.slane %v8073_v26, 1 }
 0x3d6   : > { %14618 = vst [vmem:[#allocation3 + $0xc0] sm:$0xff] %v14547_v48   ;;  %v5967_v53 = vsel %vm5587_vm2, %v5534_v23, 0.0  ;;  %v5382_v58 = vadd.f32 %v5241_v34, %v4897_v11  ;;  %v5532_v52 = vmax.f32 %v5460_v43, 0.0  ;;  %v14035_v41 = vcombine.low %v6390_v27, %v6391_v19  ;;  %v17241_v8 = vld [vmem:[#allocation3 + $0xb0] sm:$0xff]   ;;  %v19855_v11 = vld [vmem:[#allocation3 + $0xb8] sm:$0xff]  }
 0x3d7   : > { %v14560_v13 = vpack.c.bf16 %v23263_v30, %v5967_v53  ;;  %v16160_v31 = vpop.f32.mrf.mxu0  ;;  %v19846_v56 = vcombine.low %v6389_v20, %v6390_v27  ;;  %v19848_v15 = vcombine.low %v6391_v19, %v6392_v35  ;;  %v8068_v0 = vsel %vm1747_vm1, %v8063_v33, %v8067_v50  ;;  %v23291_v27 = vld [vmem:[#allocation30_spill] sm:$0xff] }
 0x3d8   : > { %v5461_v62 = vadd.f32 %v19823_v12, %v5382_v58  ;;  %v5387_v32 = vadd.f32 %v16160_v31, %v19503_v2  ;;  %v8071_v61 = vor.u32 %v8069_v29, %v8067_v50  ;;  %16234 = vmatprep.mubr.bf16.mxu1 %v14035_v41  ;;  %v4901_v2 = vadd.f32 %v19509_v4, %v4439_v21 }
 0x3d9   : > { %14621 = vst [vmem:[#allocation3 + $0xd8] sm:$0xff] %v14560_v13   ;;  %v5254_v22 = vpop.f32.mrf.mxu0  ;;  %v5965_v46 = vsel %vm5581_vm3, %v5532_v52, 0.0  ;;  %16387 = vmatmul.mubr.bf16.gmra.mxu0 %v8068_v0  ;;  %v3946_v53 = vadd.f32 %v23291_v27, %v23290_v3  ;;  %v14036_v58 = vcombine.low %v6392_v35, %v6393_v7  ;;  %v8077_v4 = vshrl.u32 %v19834_v6, 16  ;;  %v6396_v0 = vld [vmem:[#allocation3 + $0xc8] sm:$0xf] }
 0x3da   : > { %v5533_v24 = vmax.f32 %v5461_v62, 0.0  ;;  %v5466_v18 = vadd.f32 %v19823_v12, %v5387_v32  ;;  %v8076_v43 = vsel %vm1747_vm1, %v8071_v61, %v8075_v37  ;;  %v5385_v34 = vadd.f32 %v5254_v22, %v23289_v59  ;;  %v23292_v22 = vld [vmem:[#allocation43_spill] sm:$0xff] }
 0x3db   : > { %v16161_v20 = vpop.f32.mrf.mxu0  ;;  %16390 = vmatprep.mubr.bf16.mxu0 %v8076_v43  ;;  %v8081_v52 = vshll.u32 %v17241_v8, 16  ;;  %v4443_v31 = vadd.f32 %v19517_v51, %v3946_v53  ;;  %16235 = vmatmul.mubr.bf16.gmra.mxu1 %v14036_v58  ;;  %v8079_v62 = vor.u32 %v8077_v4, %v8075_v37  ;;  %v8089_v32 = vshll.u32 %v19855_v11, 16  ;;  %v23293_v43 = vld [vmem:[#allocation33_spill] sm:$0xff]  ;;  %v23294_v59 = vld [vmem:[#allocation31_spill] sm:$0xff]  ;;  %v19880_v58 = vld [vmem:[#allocation3 + $0xc8] sm:$0xff]  }
 0x3dc   : > { %v14556_v48 = vpack.c.bf16 %v5533_v24, %v5965_v46  ;;  %v5538_v23 = vmax.f32 %v5466_v18, 0.0  ;;  %v5464_v19 = vadd.f32 %v19823_v12, %v5385_v34  ;;  %v8085_v18 = vshrl.u32 %v17241_v8, 16 }
 0x3dd   : > { %v5257_v10 = vpop.f32.mrf.mxu0  ;;  %v6394_v21 = vld [vmem:[#allocation3 + $0xc0] sm:$0xf]  ;;  %v6395_v33 = vld [vmem:[#allocation3 + $0xc4] sm:$0xf]  ;;  %v8083_v41 = vrot.slane %v8081_v52, 1  ;;  %v3950_v34 = vadd.f32 %v23294_v59, %v23293_v43  ;;  %v8091_v27 = vrot.slane %v8089_v32, 1 }
 0x3de   : > { %14620 = vst [vmem:[#allocation3 + $0xd0] sm:$0xff] %v14556_v48   ;;  %v5971_v29 = vsel %vm5587_vm2, %v5538_v23, 0.0  ;;  %v5386_v13 = vadd.f32 %v5257_v10, %v4901_v2  ;;  %v5536_v6 = vmax.f32 %v5464_v19, 0.0  ;;  %v14037_v61 = vcombine.low %v6394_v21, %v6395_v33  ;;  %v6397_v23 = vld [vmem:[#allocation3 + $0xcc] sm:$0xf]  ;;  %v17247_v53 = vld [vmem:[#allocation3 + $0xc0] sm:$0xff]  }
 0x3df   : > { %v14569_v26 = vpack.c.bf16 %v23263_v30, %v5971_v29  ;;  %v16164_v50 = vpop.f32.mrf.mxu0  ;;  %v19870_v2 = vcombine.low %v6393_v7, %v6394_v21  ;;  %v19872_v51 = vcombine.low %v6395_v33, %v6396_v0  ;;  %v8084_v37 = vsel %vm1747_vm1, %v8079_v62, %v8083_v41  ;;  %v23295_v10 = vld [vmem:[#allocation92_spill] sm:$0xff]  ;;  %v23296_v19 = vld [vmem:[#allocation89_spill] sm:$0xff] }
 0x3e0   : > { %v5465_v35 = vadd.f32 %v19823_v12, %v5386_v13  ;;  %v5391_v24 = vadd.f32 %v16164_v50, %v23292_v22  ;;  %v5969_v3 = vsel %vm5581_vm3, %v5536_v6, 0.0  ;;  %v8087_v8 = vor.u32 %v8085_v18, %v8083_v41  ;;  %16238 = vmatprep.mubr.bf16.mxu1 %v14037_v61 }
 0x3e1   : > { %14623 = vst [vmem:[#allocation3 + $0xe8] sm:$0xff] %v14569_v26   ;;  %v5270_v46 = vpop.f32.mrf.mxu0  ;;  %16391 = vmatmul.mubr.bf16.gmra.mxu0 %v8084_v37  ;;  %v4905_v4 = vadd.f32 %v23295_v10, %v4443_v31  ;;  %v14038_v33 = vcombine.low %v6396_v0, %v6397_v23  ;;  %v4447_v6 = vadd.f32 %v19527_v16, %v3950_v34  ;;  %v8093_v22 = vshrl.u32 %v19855_v11, 16  ;;  %v23299_v11 = vld [vmem:[#allocation135_spill] sm:$0xff] }
 0x3e2   : > { %v5537_v20 = vmax.f32 %v5465_v35, 0.0  ;;  %v5470_v48 = vadd.f32 %v19823_v12, %v5391_v24  ;;  %v5389_v13 = vadd.f32 %v5270_v46, %v23296_v19  ;;  %v8092_v52 = vsel %vm1747_vm1, %v8087_v8, %v8091_v27  ;;  %v23297_v46 = vld [vmem:[#allocation47_spill] sm:$0xff] }
 0x3e3   : > { %v16165_v7 = vpop.f32.mrf.mxu0  ;;  %16394 = vmatprep.mubr.bf16.mxu0 %v8092_v52  ;;  %16239 = vmatmul.mubr.bf16.gmra.mxu1 %v14038_v33  ;;  %v8097_v24 = vshll.u32 %v17247_v53, 16  ;;  %v8105_v18 = vshll.u32 %v19880_v58, 16  ;;  %v8101_v37 = vshrl.u32 %v17247_v53, 16  ;;  %v8095_v43 = vor.u32 %v8093_v22, %v8091_v27  ;;  %v6401_v52 = vld [vmem:[#allocation3 + $0xdc] sm:$0xf] }
 0x3e4   : > { %v14565_v21 = vpack.c.bf16 %v5537_v20, %v5969_v3  ;;  %v5542_v29 = vmax.f32 %v5470_v48, 0.0  ;;  %v5468_v35 = vadd.f32 %v19823_v12, %v5389_v13  ;;  %v6400_v48 = vld [vmem:[#allocation3 + $0xd8] sm:$0xf] }
 0x3e5   : > { %v5273_v26 = vpop.f32.mrf.mxu0  ;;  %v6398_v62 = vld [vmem:[#allocation3 + $0xd0] sm:$0xf]  ;;  %v6399_v50 = vld [vmem:[#allocation3 + $0xd4] sm:$0xf]  ;;  %v8099_v59 = vrot.slane %v8097_v24, 1  ;;  %v23298_v7 = vld [vmem:[#allocation134_spill] sm:$0xff] }
 0x3e6   : > { %14622 = vst [vmem:[#allocation3 + $0xe0] sm:$0xff] %v14565_v21   ;;  %v5975_v32 = vsel %vm5587_vm2, %v5542_v29, 0.0  ;;  %v5390_v31 = vadd.f32 %v5273_v26, %v4905_v4  ;;  %v5540_v61 = vmax.f32 %v5468_v35, 0.0  ;;  %v14039_v34 = vcombine.low %v6398_v62, %v6399_v50  ;;  %v17254_v33 = vld [vmem:[#allocation3 + $0xd0] sm:$0xff]   ;;  %v23300_v26 = vld [vmem:[#allocation48_spill] sm:$0xff] }
 0x3e7   : > { %v14578_v41 = vpack.c.bf16 %v23263_v30, %v5975_v32  ;;  %v16168_v0 = vpop.f32.mrf.mxu0  ;;  %v19894_v3 = vcombine.low %v6397_v23, %v6398_v62  ;;  %v3954_v10 = vadd.f32 %v23299_v11, %v23298_v7  ;;  %v19899_v29 = vcombine.low %v6399_v50, %v6400_v48  ;;  %v23301_v50 = vld [vmem:[#allocation52_spill] sm:$0xff]  ;;  %v23302_v24 = vld [vmem:[#allocation49_spill] sm:$0xff] }
 0x3e8   : > { %v5469_v16 = vadd.f32 %v19823_v12, %v5390_v31  ;;  %v5395_v20 = vadd.f32 %v16168_v0, %v23297_v46  ;;  %v5973_v19 = vsel %vm5581_vm3, %v5540_v61, 0.0  ;;  %v8100_v53 = vsel %vm1747_vm1, %v8095_v43, %v8099_v59  ;;  %16242 = vmatprep.mubr.bf16.mxu1 %v14039_v34  ;;  %v19905_v31 = vld [vmem:[#allocation3 + $0xd8] sm:$0xff]   ;;  %v6349_v43 = vld [vmem:[#allocation3 + $0xc] sm:$0x8] }
 0x3e9   : > { %14625 = vst [vmem:[#allocation3 + $0xf8] sm:$0xff] %v14578_v41   ;;  %v5286_v8 = vpop.f32.mrf.mxu0  ;;  %v8103_v13 = vor.u32 %v8101_v37, %v8099_v59  ;;  %v8107_v27 = vrot.slane %v8105_v18, 1  ;;  %v4909_v62 = vadd.f32 %v23300_v26, %v4447_v6  ;;  %16395 = vmatmul.mubr.bf16.gmra.mxu0 %v8100_v53  ;;  %v4451_v41 = vadd.f32 %v23301_v50, %v3954_v10 }
 0x3ea   : > { %v5541_v4 = vmax.f32 %v5469_v16, 0.0  ;;  %v5474_v21 = vadd.f32 %v19823_v12, %v5395_v20  ;;  %v5393_v0 = vadd.f32 %v5286_v8, %v23302_v24  ;;  %v14040_v6 = vcombine.low %v6400_v48, %v6401_v52  ;;  %v6404_v48 = vld [vmem:[#allocation3 + $0xe8] sm:$0xf] }
 0x3eb   : > { %v16169_v23 = vpop.f32.mrf.mxu0  ;;  %v8108_v22 = vsel %vm1747_vm1, %v8103_v13, %v8107_v27  ;;  %v8109_v37 = vshrl.u32 %v19880_v58, 16  ;;  %v8113_v7 = vshll.u32 %v17254_v33, 16  ;;  %v8117_v8 = vshrl.u32 %v17254_v33, 16 }
 0x3ec   : > { %v14574_v32 = vpack.c.bf16 %v5541_v4, %v5973_v19  ;;  %v5546_v35 = vmax.f32 %v5474_v21, 0.0  ;;  %16398 = vmatprep.mubr.bf16.mxu0 %v8108_v22  ;;  %v5472_v34 = vadd.f32 %v19823_v12, %v5393_v0  ;;  %16243 = vmatmul.mubr.bf16.gmra.mxu1 %v14040_v6  ;;  %v23303_v21 = vld [vmem:[#allocation93_spill] sm:$0xff]  ;;  %v8121_v53 = vshll.u32 %v19905_v31, 16 }
 0x3ed   : > { %v5289_v61 = vpop.f32.mrf.mxu0  ;;  %v6402_v16 = vld [vmem:[#allocation3 + $0xe0] sm:$0xf]  ;;  %v6403_v18 = vld [vmem:[#allocation3 + $0xe4] sm:$0xf]  ;;  %v8111_v4 = vor.u32 %v8109_v37, %v8107_v27  ;;  %v8115_v58 = vrot.slane %v8113_v7, 1  ;;  %v4913_v6 = vadd.f32 %v19747_v55, %v4451_v41 }
 0x3ee   : > { %14624 = vst [vmem:[#allocation3 + $0xf0] sm:$0xff] %v14574_v32   ;;  %v5979_v46 = vsel %vm5587_vm2, %v5546_v35, 0.0  ;;  %v5394_v20 = vadd.f32 %v5289_v61, %v4909_v62  ;;  %v5544_v13 = vmax.f32 %v5472_v34, 0.0  ;;  %v14041_v23 = vcombine.low %v6402_v16, %v6403_v18  ;;  %v17524_v32 = vld [vmem:[#allocation3 + $0x10] sm:$0xf] }
 0x3ef   : > { %v14587_v59 = vpack.c.bf16 %v23263_v30, %v5979_v46  ;;  %v16172_v11 = vpop.f32.mrf.mxu0  ;;  %v19918_v26 = vcombine.low %v6401_v52, %v6402_v16  ;;  %v19920_v35 = vcombine.low %v6349_v43, %v17524_v32  ;;  %v19923_v22 = vcombine.low %v6403_v18, %v6404_v48  ;;  %v6405_v46 = vld [vmem:[#allocation3 + $0xec] sm:$0xf]  ;;  %v17260_v16 = vld [vmem:[#allocation3 + $0xe0] sm:$0xff]  }
 0x3f0   : > { %v5473_v10 = vadd.f32 %v19823_v12, %v5394_v20  ;;  %v5399_v19 = vadd.f32 %v16172_v11, %v23303_v21  ;;  %v5977_v27 = vsel %vm5581_vm3, %v5544_v13, 0.0  ;;  %v8116_v24 = vsel %vm1747_vm1, %v8111_v4, %v8115_v58  ;;  %16246 = vmatprep.mubr.bf16.mxu1 %v14041_v23  ;;  %v19929_v43 = vld [vmem:[#allocation3 + $0xe8] sm:$0xff]  }
 0x3f1   : > { %14627 = vst [vmem:[#allocation3 + $0x108] sm:$0xff] %v14587_v59   ;;  %v5302_v62 = vpop.f32.mrf.mxu0  ;;  %v8119_v0 = vor.u32 %v8117_v8, %v8115_v58  ;;  %v8123_v61 = vrot.slane %v8121_v53, 1  ;;  %16399 = vmatmul.mubr.bf16.gmra.mxu0 %v8116_v24  ;;  %v23304_v59 = vld [vmem:[#allocation94_spill] sm:$0xff]  ;;  %v7012_v8 = vshrl.u32 %v19920_v35, 16  ;;  %v14042_v55 = vcombine.low %v6404_v48, %v6405_v46 }
 0x3f2   : > { %v5545_v33 = vmax.f32 %v5473_v10, 0.0  ;;  %v5478_v50 = vadd.f32 %v19823_v12, %v5399_v19  ;;  %v5397_v34 = vadd.f32 %v5302_v62, %v23304_v59  ;;  %v8125_v53 = vshrl.u32 %v19905_v31, 16 }
 0x3f3   : > { %v16173_v52 = vpop.f32.mrf.mxu0  ;;  %v8124_v18 = vsel %vm1747_vm1, %v8119_v0, %v8123_v61  ;;  %v8129_v13 = vshll.u32 %v17260_v16, 16  ;;  %v8133_v62 = vshrl.u32 %v17260_v16, 16  ;;  %v8137_v32 = vshll.u32 %v19929_v43, 16  ;;  %v19947_v16 = vld [vmem:[#allocation3 + $0xf8] sm:$0xff]  }
 0x3f4   : > { %v14583_v20 = vpack.c.bf16 %v5545_v33, %v5977_v27  ;;  %v5550_v37 = vmax.f32 %v5478_v50, 0.0  ;;  %16402 = vmatprep.mubr.bf16.mxu0 %v8124_v18  ;;  %v5476_v19 = vadd.f32 %v19823_v12, %v5397_v34  ;;  %16247 = vmatmul.mubr.bf16.gmra.mxu1 %v14042_v55  ;;  %v6408_v33 = vld [vmem:[#allocation3 + $0xf8] sm:$0xf]  ;;  %v8127_v27 = vor.u32 %v8125_v53, %v8123_v61  ;;  %v23305_v52 = vld [vmem:[#allocation53_spill] sm:$0xff] }
 0x3f5   : > { %v5305_v7 = vpop.f32.mrf.mxu0  ;;  %v6406_v11 = vld [vmem:[#allocation3 + $0xf0] sm:$0xf]  ;;  %v6407_v10 = vld [vmem:[#allocation3 + $0xf4] sm:$0xf]  ;;  %v8131_v24 = vrot.slane %v8129_v13, 1  ;;  %v7015_v31 = vshll.u32 %v19920_v35, 16 }
 0x3f6   : > { %14626 = vst [vmem:[#allocation3 + $0x100] sm:$0xff] %v14583_v20   ;;  %v5983_v4 = vsel %vm5587_vm2, %v5550_v37, 0.0  ;;  %v5398_v41 = vadd.f32 %v5305_v7, %v4913_v6  ;;  %v14043_v63 = vcombine.low %v6406_v11, %v6407_v10  ;;  %v17269_v50 = vld [vmem:[#allocation3 + $0xf0] sm:$0xff]   ;;  %v5548_v48 = vmax.f32 %v5476_v19, 0.0 }
 0x3f7   : > { %v14596_v21 = vpack.c.bf16 %v23263_v30, %v5983_v4  ;;  %v16176_v58 = vpop.f32.mrf.mxu0  ;;  %v19941_v30 = vcombine.low %v6405_v46, %v6406_v11  ;;  %v7038_v6 = vshrl.u32 %v23305_v52, 16  ;;  %v8132_v18 = vsel %vm1747_vm1, %v8127_v27, %v8131_v24  ;;  %v6409_v46 = vld [vmem:[#allocation3 + $0xfc] sm:$0xf] }
 0x3f8   : > { %v5477_v23 = vadd.f32 %v19823_v12, %v5398_v41  ;;  %16250 = vmatprep.mubr.bf16.mxu1 %v14043_v63  ;;  %v19945_v12 = vcombine.low %v6407_v10, %v6408_v33  ;;  %v5981_v37 = vsel %vm5581_vm3, %v5548_v48, 0.0  ;;  %v8135_v61 = vor.u32 %v8133_v62, %v8131_v24  ;;  %v19955_v10 = vld [vmem:[#allocation8 + $0x1b8] sm:$0xff]  }
 0x3f9   : > { %14629 = vst [vmem:[#allocation3 + $0x118] sm:$0xff] %v14596_v21   ;;  %v5318_v0 = vpop.f32.mrf.mxu0  ;;  %v8139_v59 = vrot.slane %v8137_v32, 1  ;;  %v7047_v7 = vshrl.u32 %v19625_v5, 16  ;;  %v7050_v11 = vshll.u32 %v19625_v5, 16  ;;  %v7065_v4 = vshrl.u32 %v19663_v28, 16  ;;  %16403 = vmatmul.mubr.bf16.gmra.mxu0 %v8132_v18  ;;  %16658 = vmatprep.subr.bf16.mxu0 %v19955_v10 }
 0x3fa   : > { %v5549_v20 = vmax.f32 %v5477_v23, 0.0  ;;  %v7068_v41 = vshll.u32 %v19663_v28, 16  ;;  %v8141_v21 = vshrl.u32 %v19929_v43, 16  ;;  %v8145_v19 = vshll.u32 %v17269_v50, 16  ;;  %v6412_v32 = vld [vmem:[#allocation3 + $0x108] sm:$0xf] }
 0x3fb   : > { %v16177_v34 = vpop.f32.mrf.mxu0  ;;  %v8140_v47 = vsel %vm1747_vm1, %v8135_v61, %v8139_v59  ;;  %v14044_v58 = vcombine.low %v6408_v33, %v6409_v46  ;;  %v8149_v23 = vshrl.u32 %v17269_v50, 16  ;;  %v8153_v5 = vshll.u32 %v19947_v16, 16 }
 0x3fc   : > { %v14592_v55 = vpack.c.bf16 %v5549_v20, %v5981_v37  ;;  %16406 = vmatprep.mubr.bf16.mxu0 %v8140_v47  ;;  %v8143_v28 = vor.u32 %v8141_v21, %v8139_v59  ;;  %v8147_v48 = vrot.slane %v8145_v19, 1  ;;  %v7041_v0 = vshll.u32 %v23305_v52, 16  ;;  %v19969_v37 = vld [vmem:[#allocation3 + $0x108] sm:$0xff]  }
 0x3fd   : > { %v6410_v53 = vld [vmem:[#allocation3 + $0x100] sm:$0xf]  ;;  %v5321_v13 = vpop.f32.mrf.mxu0  ;;  %v6411_v62 = vld [vmem:[#allocation3 + $0x104] sm:$0xf]  ;;  %v7049_v20 = vrot.slane %v7047_v7, 3  ;;  %v7056_v33 = vshrl.u32 %v19627_v14, 16  ;;  %16251 = vmatmul.mubr.bf16.gmra.mxu1 %v14044_v58 }
 0x3fe   : > { %14628 = vst [vmem:[#allocation3 + $0x110] sm:$0xff] %v14592_v55   ;;  %v19961_v63 = vcombine.low %v6409_v46, %v6410_v53  ;;  %v14045_v27 = vcombine.low %v6410_v53, %v6411_v62  ;;  %v19964_v24 = vcombine.low %v6411_v62, %v6412_v32  ;;  %v17278_v43 = vld [vmem:[#allocation3 + $0x100] sm:$0xff]   ;;  %v7059_v50 = vshll.u32 %v19627_v14, 16  ;;  %v19976_v14 = vld [vmem:[#allocation3 + $0x10c] sm:$0xf] }
 0x3ff   : > { %v7052_v18 = vrot.slane %v7050_v11, 4  ;;  %v8148_v61 = vsel %vm1747_vm1, %v8143_v28, %v8147_v48  ;;  %v8151_v46 = vor.u32 %v8149_v23, %v8147_v48  ;;  %v8155_v59 = vrot.slane %v8153_v5, 1  ;;  %23307 = vst [vmem:[#allocation56_spill] sm:$0xff] %v19976_v14 }
 0x400   : > { %23306 = vst [vmem:[#allocation46_spill] sm:$0xff] %v19964_v24  ;;  %16254 = vmatprep.mubr.bf16.mxu1 %v14045_v27  ;;  %v7067_v34 = vrot.slane %v7065_v4, 3  ;;  %v7070_v55 = vrot.slane %v7068_v41, 4  ;;  %v7074_v47 = vshrl.u32 %v19665_v1, 16  ;;  %v7077_v52 = vshll.u32 %v19665_v1, 16 }
 0x401   : > { %v7083_v7 = vshrl.u32 %v19687_v40, 16  ;;  %v8156_v21 = vsel %vm1747_vm1, %v8151_v46, %v8155_v59  ;;  %v8157_v19 = vshrl.u32 %v19947_v16, 16  ;;  %v8161_v11 = vshll.u32 %v17278_v43, 16  ;;  %16407 = vmatmul.mubr.bf16.gmra.mxu0 %v8148_v61 }
 0x402   : > { %v8169_v53 = vshll.u32 %v19969_v37, 16  ;;  %v7014_v4 = vrot.slane %v7012_v8, 3  ;;  %v7017_v41 = vrot.slane %v7015_v31, 4  ;;  %v7040_v13 = vrot.slane %v7038_v6, 3  ;;  %16410 = vmatprep.mubr.bf16.mxu0 %v8156_v21  ;;  %v19985_v8 = vld [vmem:[#allocation3 + $0x34] sm:$0xf] }
 0x403   : > { %v8163_v58 = vrot.slane %v8161_v11, 1  ;;  %v8165_v1 = vshrl.u32 %v17278_v43, 16  ;;  %v7043_v23 = vrot.slane %v7041_v0, 4  ;;  %v7053_v5 = vor.u32 %v7052_v18, %v7049_v20 }
 0x404   : > { %v7086_v62 = vshll.u32 %v19687_v40, 16  ;;  %v14046_v28 = vcombine.low %v6412_v32, %v19976_v14  ;;  %v8159_v48 = vor.u32 %v8157_v19, %v8155_v59  ;;  %v7018_v16 = vor.u32 %v7017_v41, %v7014_v4  ;;  %v19995_v59 = vld [vmem:[#allocation3 + $0x38] sm:$0xf]  ;;  %v20003_v4 = vld [vmem:[#allocation3 + $0x40] sm:$0xf] }
 0x405   : > { %v17283_v27 = vld [vmem:[#allocation3 + $0x110] ss:$0 sps:$4 sm:$0x11]   ;;  %v7085_v61 = vrot.slane %v7083_v7, 3  ;;  %v7101_v46 = vshrl.u32 %v19710_v57, 16  ;;  %v8167_v24 = vor.u32 %v8165_v1, %v8163_v58  ;;  %v7044_v35 = vor.u32 %v7043_v23, %v7040_v13 }
 0x406   : > { %16255 = vmatmul.mubr.bf16.gmra.mxu1 %v14046_v28  ;;  %v8164_v31 = vsel %vm1747_vm1, %v8159_v48, %v8163_v58  ;;  %v8171_v6 = vrot.slane %v8169_v53, 1  ;;  %v7027_v43 = vsel %vm989_vm0, %v7018_v16, %v19639_v36  ;;  %v7058_v40 = vrot.slane %v7056_v33, 3  ;;  %v20008_v58 = vld [vmem:[#allocation3 + $0x44] sm:$0xf]  ;;  %v20010_v1 = vld [vmem:[#allocation3 + $0x20] sm:$0xf] }
 0x407   : > { %16274 = vmatprep.mubr.bf16.mxu1 %v7027_v43  ;;  %v7045_v32 = vsel %vm989_vm0, %v19633_v54, %v7044_v35  ;;  %v8177_v0 = vshll.u32 %v17283_v27, 16  ;;  %v19993_v20 = vsel %vm989_vm0, %v7044_v35, %v7053_v5  ;;  %v7061_v18 = vrot.slane %v7059_v50, 4  ;;  %v20022_v28 = vld [vmem:[#allocation3 + $0x48] sm:$0xf]  ;;  %v20035_v35 = vld [vmem:[#allocation3 + $0x50] sm:$0xf] }
 0x408   : > { %v7088_v7 = vrot.slane %v7086_v62, 4  ;;  %v7104_v21 = vshll.u32 %v19710_v57, 16  ;;  %v8172_v19 = vsel %vm1747_vm1, %v8167_v24, %v8171_v6  ;;  %v20001_v36 = vcombine.low %v19985_v8, %v19995_v59  ;;  %v17293_v62 = vld [vmem:[#allocation8 + $0xf0] sm:$0xff]   ;;  %v20103_v14 = vld [vmem:[#allocation3 + $0x78] sm:$0xf] }
 0x409   : > { %v7062_v33 = vor.u32 %v7061_v18, %v7058_v40  ;;  %v7071_v11 = vor.u32 %v7070_v55, %v7067_v34  ;;  %v7076_v53 = vrot.slane %v7074_v47, 3  ;;  %v7079_v54 = vrot.slane %v7077_v52, 4  ;;  %16411 = vmatmul.mubr.bf16.gmra.mxu0 %v8164_v31  ;;  %v20018_v52 = vld [vmem:[#allocation3 + $0x3c] sm:$0xf]  ;;  %v23311_v43 = vld [vmem:[#allocation97_spill] sm:$0xff]  ;;  %23320 = vst [vmem:[#allocation68_spill] sm:$0xff] %v20103_v14 }
 0x40a   : > { %23308 = vst [vmem:[#allocation57_spill] sm:$0xff] %v20001_v36  ;;  %v7092_v41 = vshrl.u32 %v19690_v49, 16  ;;  %v7095_v50 = vshll.u32 %v19690_v49, 16  ;;  %v7103_v13 = vrot.slane %v7101_v46, 3  ;;  %v8173_v57 = vshrl.u32 %v19969_v37, 16  ;;  %16414 = vmatprep.mubr.bf16.mxu0 %v8172_v19 }
 0x40b   : > { %v8179_v24 = vrot.slane %v8177_v0, 1  ;;  %v20013_v34 = vsel %vm989_vm0, %v7053_v5, %v7062_v33  ;;  %v20016_v55 = vsel %vm989_vm0, %v7062_v33, %v7071_v11  ;;  %v7080_v47 = vor.u32 %v7079_v54, %v7076_v53  ;;  %v20040_v0 = vld [vmem:[#allocation3 + $0x54] sm:$0xf]  ;;  %v20047_v33 = vld [vmem:[#allocation3 + $0x4c] sm:$0xf] }
 0x40c   : > { %v7106_v49 = vrot.slane %v7104_v21, 4  ;;  %v7119_v23 = vshrl.u32 %v19741_v42, 16  ;;  %v7122_v37 = vshll.u32 %v19741_v42, 16  ;;  %v20026_v48 = vcombine.low %v20018_v52, %v20003_v4  ;;  %v17526_v21 = vld [vmem:[#allocation3 + $0x24] sm:$0xf] }
 0x40d   : > { %v8175_v5 = vor.u32 %v8173_v57, %v8171_v6  ;;  %v20029_v16 = vsel %vm989_vm0, %v7071_v11, %v7080_v47  ;;  %v20033_v27 = vcombine.low %v20008_v58, %v20022_v28  ;;  %v7089_v46 = vor.u32 %v7088_v7, %v7085_v61  ;;  %v17525_v6 = vld [vmem:[#allocation8 + $0xf8] sm:$0xff]  }
 0x40e   : > { %23309 = vst [vmem:[#allocation98_spill] sm:$0xff] %v20026_v48  ;;  %v7110_v42 = vshrl.u32 %v19716_v60, 16  ;;  %v7113_v31 = vshll.u32 %v19716_v60, 16  ;;  %16275 = vmatmul.mubr.bf16.vlgmr.msra.gmra.mxu1 %v23311_v43  ;;  %v7094_v40 = vrot.slane %v7092_v41, 3  ;;  %v14178_v19 = vcombine.low %v20010_v1, %v17526_v21  ;;  %v17302_v41 = vld [vmem:[#allocation8 + $0xe8] sm:$0xff]  }
 0x40f   : > { %23310 = vst [vmem:[#allocation99_spill] sm:$0xff] %v20033_v27  ;;  %16278 = vmatprep.mubr.bf16.mxu1 %v7045_v32  ;;  %16419 = vmatpush3.bf16.msra.mxu1 %v17525_v6  ;;  %v8180_v18 = vsel %vm1747_vm1, %v8175_v5, %v8179_v24  ;;  %v20045_v61 = vsel %vm989_vm0, %v7080_v47, %v7089_v46  ;;  %v7097_v7 = vrot.slane %v7095_v50, 4  ;;  %v7121_v60 = vrot.slane %v7119_v23, 3  ;;  %v20051_v32 = vld [vmem:[#allocation3 + $0x58] sm:$0xf] }
 0x410   : > { %v7137_v11 = vshrl.u32 %v19766_v39, 16  ;;  %v7140_v53 = vshll.u32 %v19766_v39, 16  ;;  %16420 = vmatprep.subr.bf16.mxu1 %v17293_v62  ;;  %v20055_v54 = vcombine.low %v20047_v33, %v20035_v35  ;;  %v7124_v57 = vrot.slane %v7122_v37, 4  ;;  %v20057_v24 = vld [vmem:[#allocation3 + $0x2c] sm:$0xf] }
 0x411   : > { %v7098_v47 = vor.u32 %v7097_v7, %v7094_v40  ;;  %v20061_v50 = vcombine.low %v20040_v0, %v20051_v32  ;;  %v7107_v23 = vor.u32 %v7106_v49, %v7103_v13  ;;  %v20063_v5 = vld [vmem:[#allocation3 + $0x60] sm:$0xf]  ;;  %v7128_v39 = vshrl.u32 %v19745_v9, 16  ;;  %16415 = vmatmul.mubr.bf16.gmra.mxu0 %v8180_v18  ;;  %v20067_v27 = vld [vmem:[#allocation3 + $0x64] sm:$0xf] }
 0x412   : > { %23312 = vst [vmem:[#allocation60_spill] sm:$0xff] %v20055_v54  ;;  %v7131_v43 = vshll.u32 %v19745_v9, 16  ;;  %v7112_v6 = vrot.slane %v7110_v42, 3  ;;  %v7115_v21 = vrot.slane %v7113_v31, 4  ;;  %v7155_v37 = vshrl.u32 %v19789_v44, 16  ;;  %16514 = vmatprep.mubr.bf16.mxu0 %v14178_v19 }
 0x413   : > { %23313 = vst [vmem:[#allocation61_spill] sm:$0xff] %v20061_v50  ;;  %16421 = vmatpush3.bf16.msra.mxu1 %v17293_v62  ;;  %v20071_v40 = vsel %vm989_vm0, %v7089_v46, %v7098_v47  ;;  %v20074_v13 = vsel %vm989_vm0, %v7098_v47, %v7107_v23  ;;  %v20076_v49 = vld [vmem:[#allocation3 + $0x5c] sm:$0xf]  ;;  %v20078_v7 = vld [vmem:[#allocation3 + $0x68] sm:$0xf]  ;;  %v7139_v9 = vrot.slane %v7137_v11, 3 }
 0x414   : > { %23314 = vst [vmem:[#allocation102_spill] sm:$0xff] %v20078_v7  ;;  %v7142_v18 = vrot.slane %v7140_v53, 4  ;;  %v17527_v42 = vld [vmem:[#allocation3 + $0x28] sm:$0xf]  ;;  %v20081_v50 = vld [vmem:[#allocation3 + $0x30] sm:$0xf]  ;;  %16422 = vmatprep.subr.bf16.mxu1 %v17302_v41  ;;  %v7116_v19 = vor.u32 %v7115_v21, %v7112_v6  ;;  %v20088_v47 = vcombine.low %v20076_v49, %v20063_v5  ;;  %v20092_v11 = vcombine.low %v20067_v27, %v20078_v7 }
 0x415   : > { %v14179_v31 = vcombine.low %v17527_v42, %v20057_v24  ;;  %v20083_v62 = vld [vmem:[#allocation3 + $0x70] sm:$0xf]  ;;  %v17311_v46 = vld [vmem:[#allocation8 + $0xe0] sm:$0xff]   ;;  %v7158_v54 = vshll.u32 %v19789_v44, 16  ;;  %v7125_v53 = vor.u32 %v7124_v57, %v7121_v60  ;;  %v20094_v48 = vld [vmem:[#allocation3 + $0x6c] sm:$0xf] }
 0x416   : > { %23315 = vst [vmem:[#allocation64_spill] sm:$0xff] %v20083_v62  ;;  %23316 = vst [vmem:[#allocation65_spill] sm:$0xff] %v20088_v47  ;;  %v20096_v42 = vld [vmem:[#allocation3 + $0x74] sm:$0xf]  ;;  %v7146_v6 = vshrl.u32 %v19771_v45, 16  ;;  %16279 = vmatmul.mubr.bf16.gmra.mxu1 %v19993_v20  ;;  %v20101_v21 = vsel %vm989_vm0, %v7107_v23, %v7116_v19  ;;  %v7130_v44 = vrot.slane %v7128_v39, 3  ;;  %v20116_v39 = vcombine.low %v20094_v48, %v20083_v62 }
 0x417   : > { %23317 = vst [vmem:[#allocation63_spill] sm:$0xff] %v20092_v11  ;;  %23318 = vst [vmem:[#allocation50_spill] sm:$0xff] %v20094_v48  ;;  %v7133_v36 = vrot.slane %v7131_v43, 4  ;;  %v7149_v47 = vshll.u32 %v19771_v45, 16  ;;  %v7157_v7 = vrot.slane %v7155_v37, 3  ;;  %v7173_v60 = vshrl.u32 %v19818_v38, 16  ;;  %16282 = vmatprep.mubr.bf16.mxu1 %v20013_v34  ;;  %16423 = vmatpush3.bf16.msra.mxu1 %v17302_v41 }
 0x418   : > { %23319 = vst [vmem:[#allocation103_spill] sm:$0xff] %v20096_v42  ;;  %v7176_v57 = vshll.u32 %v19818_v38, 16  ;;  %v20109_v11 = vld [vmem:[#allocation3 + $0x80] sm:$0xf]  ;;  %v20112_v20 = vsel %vm989_vm0, %v7116_v19, %v7125_v53  ;;  %23322 = vst [vmem:[#allocation69_spill] sm:$0xff] %v20116_v39  ;;  %v20120_v45 = vcombine.low %v20096_v42, %v20103_v14  ;;  %16424 = vmatprep.subr.bf16.mxu1 %v17311_v46  ;;  %v17320_v38 = vld [vmem:[#allocation8 + $0xd8] sm:$0xff]  }
 0x419   : > { %23321 = vst [vmem:[#allocation66_spill] sm:$0xff] %v20109_v11  ;;  %v7134_v23 = vor.u32 %v7133_v36, %v7130_v44  ;;  %v20122_v43 = vld [vmem:[#allocation3 + $0x84] sm:$0xf]  ;;  %v7160_v34 = vrot.slane %v7158_v54, 4  ;;  %v14180_v41 = vcombine.low %v20081_v50, %v19985_v8  ;;  %v7143_v37 = vor.u32 %v7142_v18, %v7139_v9  ;;  %v20126_v19 = vld [vmem:[#allocation3 + $0x7c] sm:$0xf]  ;;  %16515 = vmatmul.mubr.bf16.vlgmr.msra.gmra.mxu0 %v14179_v31 }
 0x41a   : > { %23323 = vst [vmem:[#allocation67_spill] sm:$0xff] %v20120_v45  ;;  %23324 = vst [vmem:[#allocation106_spill] sm:$0xff] %v20126_v19  ;;  %v17349_v36 = vld [vmem:[#allocation8 + $0x1b0] sm:$0xff]   ;;  %v7164_v44 = vshrl.u32 %v19796_v25, 16  ;;  %v7167_v39 = vshll.u32 %v19796_v25, 16  ;;  %v7191_v62 = vshrl.u32 %v19846_v56, 16  ;;  %v20143_v31 = vcombine.low %v20126_v19, %v20109_v11  ;;  %16659 = vmatpush3.bf16.msra.mxu0 %v19955_v10 }
 0x41b   : > { %v20132_v45 = vsel %vm989_vm0, %v7125_v53, %v7134_v23  ;;  %v7194_v14 = vshll.u32 %v19846_v56, 16  ;;  %16518 = vmatprep.mubr.bf16.mxu0 %v14180_v41  ;;  %v20136_v54 = vsel %vm989_vm0, %v7134_v23, %v7143_v37  ;;  %v7148_v8 = vrot.slane %v7146_v6, 3  ;;  %16425 = vmatpush3.bf16.msra.mxu1 %v17311_v46  ;;  %v20138_v18 = vld [vmem:[#allocation3 + $0x88] sm:$0xf]  ;;  %v20145_v53 = vld [vmem:[#allocation3 + $0x90] sm:$0xf] }
 0x41c   : > { %v7151_v9 = vrot.slane %v7149_v47, 4  ;;  %v7175_v42 = vrot.slane %v7173_v60, 3  ;;  %v7178_v48 = vrot.slane %v7176_v57, 4  ;;  %v7182_v25 = vshrl.u32 %v19826_v17, 16  ;;  %23325 = vst [vmem:[#allocation54_spill] sm:$0xff] %v20143_v31  ;;  %16426 = vmatprep.subr.bf16.mxu1 %v17320_v38  ;;  %v17329_v56 = vld [vmem:[#allocation8 + $0xd0] sm:$0xff]   ;;  %16660 = vmatprep.subr.bf16.mxu0 %v17349_v36 }
 0x41d   : > { %v17351_v23 = vld [vmem:[#allocation8 + $0x1a8] sm:$0xff]   ;;  %v20150_v46 = vcombine.low %v20122_v43, %v20138_v18  ;;  %v7161_v47 = vor.u32 %v7160_v34, %v7157_v7  ;;  %v7185_v60 = vshll.u32 %v19826_v17, 16  ;;  %v7193_v57 = vrot.slane %v7191_v62, 3  ;;  %v20156_v19 = vld [vmem:[#allocation3 + $0x94] sm:$0xf] }
 0x41e   : > { %v7152_v6 = vor.u32 %v7151_v9, %v7148_v8  ;;  %16283 = vmatmul.mubr.bf16.gmra.mxu1 %v20016_v55  ;;  %v7166_v41 = vrot.slane %v7164_v44, 3  ;;  %v7169_v31 = vrot.slane %v7167_v39, 4  ;;  %v20154_v11 = vld [vmem:[#allocation3 + $0x8c] sm:$0xf]  ;;  %v20158_v10 = vld [vmem:[#allocation3 + $0x98] sm:$0xf]  ;;  %16661 = vmatpush3.bf16.msra.mxu0 %v17349_v36 }
 0x41f   : > { %23326 = vst [vmem:[#allocation72_spill] sm:$0xff] %v20150_v46  ;;  %23327 = vst [vmem:[#allocation55_spill] sm:$0xff] %v20158_v10  ;;  %v7196_v8 = vrot.slane %v7194_v14, 4  ;;  %v7209_v9 = vshrl.u32 %v19870_v2, 16  ;;  %16286 = vmatprep.mubr.bf16.mxu1 %v20029_v16  ;;  %16427 = vmatpush3.bf16.msra.mxu1 %v17320_v38  ;;  %v20168_v55 = vld [vmem:[#allocation3 + $0xa0] sm:$0xf]  ;;  %v14181_v14 = vcombine.low %v19995_v59, %v20018_v52 }
 0x420   : > { %v20163_v7 = vsel %vm989_vm0, %v7143_v37, %v7152_v6  ;;  %v20166_v17 = vsel %vm989_vm0, %v7152_v6, %v7161_v47  ;;  %v20170_v62 = vld [vmem:[#allocation3 + $0xa4] sm:$0xf]  ;;  %v7212_v39 = vshll.u32 %v19870_v2, 16  ;;  %v7170_v34 = vor.u32 %v7169_v31, %v7166_v41  ;;  %16428 = vmatprep.subr.bf16.mxu1 %v17329_v56  ;;  %v17338_v44 = vld [vmem:[#allocation8 + $0xc8] sm:$0xff]   ;;  %v20185_v2 = vld [vmem:[#allocation3 + $0x9c] sm:$0xf]  ;;  %16662 = vmatprep.subr.bf16.mxu0 %v17351_v23 }
 0x421   : > { %v14182_v16 = vcombine.low %v20003_v4, %v20008_v58  ;;  %v20179_v37 = vcombine.low %v20154_v11, %v20145_v53  ;;  %v20183_v38 = vcombine.low %v20156_v19, %v20158_v10  ;;  %v7179_v6 = vor.u32 %v7178_v48, %v7175_v42  ;;  %v20187_v46 = vld [vmem:[#allocation3 + $0xa8] sm:$0xf]  ;;  %16519 = vmatmul.mubr.bf16.gmra.mxu0 %v14181_v14  ;;  %v17355_v36 = vld [vmem:[#allocation8 + $0x1a0] sm:$0xff]  }
 0x422   : > { %23330 = vst [vmem:[#allocation71_spill] sm:$0xff] %v20187_v46  ;;  %v7227_v59 = vshrl.u32 %v19894_v3, 16  ;;  %v20191_v52 = vsel %vm989_vm0, %v7161_v47, %v7170_v34  ;;  %v7184_v4 = vrot.slane %v7182_v25, 3  ;;  %v7187_v58 = vrot.slane %v7185_v60, 4  ;;  %16663 = vmatpush3.bf16.msra.mxu0 %v17351_v23 }
 0x423   : > { %23328 = vst [vmem:[#allocation70_spill] sm:$0xff] %v20179_v37  ;;  %23329 = vst [vmem:[#allocation73_spill] sm:$0xff] %v20183_v38  ;;  %v7200_v31 = vshrl.u32 %v19848_v15, 16  ;;  %v7203_v41 = vshll.u32 %v19848_v15, 16  ;;  %v7218_v48 = vshrl.u32 %v19872_v51, 16  ;;  %v7230_v42 = vshll.u32 %v19894_v3, 16  ;;  %16522 = vmatprep.mubr.bf16.mxu0 %v14182_v16  ;;  %16429 = vmatpush3.bf16.msra.mxu1 %v17329_v56 }
 0x424   : > { %v20197_v38 = vld [vmem:[#allocation3 + $0xb0] sm:$0xf]  ;;  %v20200_v14 = vsel %vm989_vm0, %v7170_v34, %v7179_v6  ;;  %v7188_v47 = vor.u32 %v7187_v58, %v7184_v4  ;;  %v20204_v25 = vcombine.low %v20185_v2, %v20168_v55  ;;  %v20208_v60 = vcombine.low %v20170_v62, %v20187_v46  ;;  %16430 = vmatprep.subr.bf16.mxu1 %v17338_v44  ;;  %v17348_v15 = vld [vmem:[#allocation8 + $0xc0] sm:$0xff]   ;;  %v20211_v56 = vld [vmem:[#allocation3 + $0xac] sm:$0xf] }
 0x425   : > { %23331 = vst [vmem:[#allocation107_spill] sm:$0xff] %v20197_v38  ;;  %v7211_v37 = vrot.slane %v7209_v9, 3  ;;  %v7214_v3 = vrot.slane %v7212_v39, 4  ;;  %v7221_v16 = vshll.u32 %v19872_v51, 16  ;;  %v7197_v10 = vor.u32 %v7196_v8, %v7193_v57  ;;  %23334 = vst [vmem:[#allocation129_spill] sm:$0xff] %v20211_v56  ;;  %16664 = vmatprep.subr.bf16.mxu0 %v17355_v36  ;;  %v17357_v9 = vld [vmem:[#allocation8 + $0x198] sm:$0xff]  }
 0x426   : > { %23332 = vst [vmem:[#allocation110_spill] sm:$0xff] %v20204_v25  ;;  %23333 = vst [vmem:[#allocation127_spill] sm:$0xff] %v20208_v60  ;;  %v7229_v34 = vrot.slane %v7227_v59, 3  ;;  %v7236_v4 = vshrl.u32 %v19899_v29, 16  ;;  %v7245_v58 = vshrl.u32 %v19918_v26, 16  ;;  %16287 = vmatmul.mubr.bf16.gmra.mxu1 %v20045_v61  ;;  %v20217_v25 = vsel %vm989_vm0, %v7179_v6, %v7188_v47  ;;  %16665 = vmatpush3.bf16.msra.mxu0 %v17355_v36 }
 0x427   : > { %v20219_v60 = vld [vmem:[#allocation3 + $0xb4] sm:$0xf]  ;;  %v7248_v51 = vshll.u32 %v19918_v26, 16  ;;  %16290 = vmatprep.mubr.bf16.mxu1 %v20071_v40  ;;  %v20224_v23 = vsel %vm989_vm0, %v7188_v47, %v7197_v10  ;;  %v7202_v57 = vrot.slane %v7200_v31, 3  ;;  %v7205_v8 = vrot.slane %v7203_v41, 4  ;;  %16431 = vmatpush3.bf16.msra.mxu1 %v17338_v44  ;;  %v17361_v40 = vld [vmem:[#allocation8 + $0x178] sm:$0xff]  }
 0x428   : > { %v20226_v39 = vld [vmem:[#allocation3 + $0xb8] sm:$0xf]  ;;  %v7232_v61 = vrot.slane %v7230_v42, 4  ;;  %v14183_v6 = vcombine.low %v20022_v28, %v20047_v33  ;;  %v20232_v59 = vcombine.low %v20211_v56, %v20197_v38  ;;  %v20234_v46 = vld [vmem:[#allocation3 + $0xc0] sm:$0xf]  ;;  %16432 = vmatprep.subr.bf16.mxu1 %v17348_v15  ;;  %v14184_v31 = vcombine.low %v20035_v35, %v20040_v0  ;;  %16666 = vmatprep.subr.bf16.mxu0 %v17357_v9  ;;  %v17362_v35 = vld [vmem:[#allocation8 + $0x190] sm:$0xff]  }
 0x429   : > { %v20236_v26 = vld [vmem:[#allocation3 + $0xc4] sm:$0xf]  ;;  %v7206_v41 = vor.u32 %v7205_v8, %v7202_v57  ;;  %v20242_v44 = vcombine.low %v20219_v60, %v20226_v39  ;;  %v7215_v42 = vor.u32 %v7214_v3, %v7211_v37  ;;  %v7239_v28 = vshll.u32 %v19899_v29, 16  ;;  %v20246_v38 = vld [vmem:[#allocation3 + $0xbc] sm:$0xf] }
 0x42a   : > { %23335 = vst [vmem:[#allocation125_spill] sm:$0xff] %v20232_v59  ;;  %v7254_v33 = vshrl.u32 %v19923_v22, 16  ;;  %16523 = vmatmul.mubr.bf16.gmra.mxu0 %v14183_v6  ;;  %v7220_v47 = vrot.slane %v7218_v48, 3  ;;  %v7223_v59 = vrot.slane %v7221_v16, 4  ;;  %v20248_v56 = vld [vmem:[#allocation3 + $0xc8] sm:$0xf] }
 0x42b   : > { %v7247_v0 = vrot.slane %v7245_v58, 3  ;;  %v7250_v57 = vrot.slane %v7248_v51, 4  ;;  %16526 = vmatprep.mubr.bf16.mxu0 %v14184_v31  ;;  %v20251_v8 = vsel %vm989_vm0, %v7197_v10, %v7206_v41  ;;  %v20254_v37 = vsel %vm989_vm0, %v7206_v41, %v7215_v42  ;;  %v20256_v29 = vld [vmem:[#allocation3 + $0xd0] sm:$0xf]  ;;  %v20258_v36 = vld [vmem:[#allocation3 + $0xd4] sm:$0xf]  ;;  %16433 = vmatpush3.bf16.msra.mxu1 %v17348_v15 }
 0x42c   : > { %v7263_v48 = vshrl.u32 %v19941_v30, 16  ;;  %v7266_v3 = vshll.u32 %v19941_v30, 16  ;;  %v7224_v16 = vor.u32 %v7223_v59, %v7220_v47  ;;  %16578 = vmatprep.subr.bf16.mxu1 %v17361_v40  ;;  %v20264_v58 = vcombine.low %v20246_v38, %v20234_v46  ;;  %16667 = vmatpush3.bf16.msra.mxu0 %v17357_v9  ;;  %v17365_v40 = vld [vmem:[#allocation8 + $0x188] sm:$0xff]  }
 0x42d   : > { %v20268_v10 = vcombine.low %v20236_v26, %v20248_v56  ;;  %v7233_v51 = vor.u32 %v7232_v61, %v7229_v34  ;;  %v7257_v6 = vshll.u32 %v19923_v22, 16  ;;  %v7238_v30 = vrot.slane %v7236_v4, 3  ;;  %16668 = vmatprep.subr.bf16.mxu0 %v17362_v35  ;;  %v20286_v34 = vld [vmem:[#allocation3 + $0xd8] sm:$0xf] }
 0x42e   : > { %16291 = vmatmul.mubr.bf16.gmra.mxu1 %v20074_v13  ;;  %v20273_v15 = vsel %vm989_vm0, %v7215_v42, %v7224_v16  ;;  %v7241_v59 = vrot.slane %v7239_v28, 4  ;;  %v7281_v31 = vshrl.u32 %v19961_v63, 16  ;;  %v7284_v41 = vshll.u32 %v19961_v63, 16  ;;  %v20284_v13 = vld [vmem:[#allocation3 + $0xcc] sm:$0xf]  ;;  %23337 = vst [vmem:[#allocation76_spill] sm:$0xff] %v20286_v34 }
 0x42f   : > { %23336 = vst [vmem:[#allocation74_spill] sm:$0xff] %v20268_v10  ;;  %v20279_v47 = vcombine.low %v20057_v24, %v20081_v50  ;;  %16294 = vmatprep.mubr.bf16.mxu1 %v20101_v21  ;;  %v14185_v22 = vcombine.low %v20051_v32, %v20076_v49  ;;  %v20289_v4 = vsel %vm989_vm0, %v7224_v16, %v7233_v51  ;;  %v20299_v50 = vld [vmem:[#allocation3 + $0xe0] sm:$0xf]  ;;  %v7265_v21 = vrot.slane %v7263_v48, 3  ;;  %v20303_v42 = vld [vmem:[#allocation3 + $0xdc] sm:$0xf] }
 0x430   : > { %v7242_v9 = vor.u32 %v7241_v59, %v7238_v30  ;;  %v20293_v63 = vcombine.low %v20284_v13, %v20256_v29  ;;  %v20297_v24 = vcombine.low %v20258_v36, %v20286_v34  ;;  %23340 = vst [vmem:[#allocation79_spill] sm:$0xff] %v20299_v50  ;;  %v7268_v32 = vrot.slane %v7266_v3, 4  ;;  %16669 = vmatpush3.bf16.msra.mxu0 %v17362_v35  ;;  %v8614_v30 = vld [vmem:[#allocation3 + $0x1c] sm:$0x8]  ;;  %v17370_v48 = vld [vmem:[#allocation8 + $0x180] sm:$0xff]  }
 0x431   : > { %v14186_v49 = vcombine.low %v20063_v5, %v20067_v27  ;;  %v7251_v61 = vor.u32 %v7250_v57, %v7247_v0  ;;  %v7272_v28 = vshrl.u32 %v19945_v12, 16  ;;  %v7275_v16 = vshll.u32 %v19945_v12, 16  ;;  %16670 = vmatprep.subr.bf16.mxu0 %v17365_v40  ;;  %v23342_v3 = vld [vmem:[#allocation46_spill] sm:$0xff]  ;;  %v20316_v0 = vld [vmem:[#allocation3 + $0xe8] sm:$0xf] }
 0x432   : > { %23338 = vst [vmem:[#allocation77_spill] sm:$0xff] %v20293_v63  ;;  %23339 = vst [vmem:[#allocation78_spill] sm:$0xff] %v20297_v24  ;;  %16527 = vmatmul.mubr.bf16.gmra.mxu0 %v14185_v22  ;;  %v20308_v59 = vsel %vm989_vm0, %v7233_v51, %v7242_v9  ;;  %v20310_v24 = vld [vmem:[#allocation3 + $0xe4] sm:$0xf]  ;;  %v7290_v34 = vshrl.u32 %v23342_v3, 16  ;;  %v7256_v5 = vrot.slane %v7254_v33, 3  ;;  %v20321_v51 = vcombine.low %v20303_v42, %v20299_v50 }
 0x433   : > { %23341 = vst [vmem:[#allocation80_spill] sm:$0xff] %v20310_v24  ;;  %16530 = vmatprep.mubr.bf16.mxu0 %v14186_v49  ;;  %v20314_v27 = vsel %vm989_vm0, %v7242_v9, %v7251_v61  ;;  %v7259_v35 = vrot.slane %v7257_v6, 4  ;;  %23344 = vst [vmem:[#allocation82_spill] sm:$0xff] %v20316_v0  ;;  %v7283_v12 = vrot.slane %v7281_v31, 3  ;;  %v7286_v57 = vrot.slane %v7284_v41, 4 }
 0x434   : > { %23343 = vst [vmem:[#allocation81_spill] sm:$0xff] %v20314_v27  ;;  %v8877_v22 = vshrl.u32 %v20279_v47, 16  ;;  %23345 = vst [vmem:[#allocation83_spill] sm:$0xff] %v20321_v51  ;;  %v20323_v63 = vld [vmem:[#allocation3 + $0xf0] sm:$0xf]  ;;  %v20327_v49 = vcombine.low %v20310_v24, %v20316_v0  ;;  %v7269_v9 = vor.u32 %v7268_v32, %v7265_v21  ;;  %16671 = vmatpush3.bf16.msra.mxu0 %v17365_v40  ;;  %v7293_v33 = vshll.u32 %v23342_v3, 16 }
 0x435   : > { %23346 = vst [vmem:[#allocation84_spill] sm:$0xff] %v20323_v63  ;;  %v7260_v10 = vor.u32 %v7259_v35, %v7256_v5  ;;  %v8880_v6 = vshll.u32 %v20279_v47, 16  ;;  %v7274_v31 = vrot.slane %v7272_v28, 3  ;;  %v7277_v41 = vrot.slane %v7275_v16, 4  ;;  %v20332_v27 = vld [vmem:[#allocation3 + $0xec] sm:$0xf]  ;;  %16672 = vmatprep.subr.bf16.mxu0 %v17370_v48 }
 0x436   : > { %23347 = vst [vmem:[#allocation85_spill] sm:$0xff] %v20327_v49  ;;  %16295 = vmatmul.mubr.bf16.gmra.mxu1 %v20112_v20  ;;  %23348 = vst [vmem:[#allocation86_spill] sm:$0xff] %v20332_v27  ;;  %v20334_v50 = vld [vmem:[#allocation3 + $0xf4] sm:$0xf]  ;;  %v20336_v51 = vld [vmem:[#allocation3 + $0xf8] sm:$0xf]  ;;  %v14137_v5 = vcombine.low %v8614_v30, %v20010_v1 }
 0x437   : > { %23349 = vst [vmem:[#allocation87_spill] sm:$0xff] %v20334_v50  ;;  %23350 = vst [vmem:[#allocation90_spill] sm:$0xff] %v20336_v51  ;;  %16298 = vmatprep.mubr.bf16.mxu1 %v20132_v45  ;;  %v20341_v40 = vsel %vm989_vm0, %v7251_v61, %v7260_v10  ;;  %v20344_v47 = vsel %vm989_vm0, %v7260_v10, %v7269_v9  ;;  %v20346_v20 = vld [vmem:[#allocation3 + $0x100] sm:$0xf]  ;;  %v20348_v21 = vld [vmem:[#allocation3 + $0x104] sm:$0xf]  ;;  %v7278_v1 = vor.u32 %v7277_v41, %v7274_v31 }
 0x438   : > { %23351 = vst [vmem:[#allocation91_spill] sm:$0xff] %v20344_v47  ;;  %23352 = vst [vmem:[#allocation95_spill] sm:$0xff] %v20346_v20  ;;  %v23354_v32 = vld [vmem:[#allocation56_spill] sm:$0xff]  ;;  %v8879_v16 = vrot.slane %v8877_v22, 3  ;;  %v23355_v3 = vld [vmem:[#allocation50_spill] sm:$0xff]  ;;  %v20358_v61 = vcombine.low %v20332_v27, %v20323_v63  ;;  %v20362_v10 = vcombine.low %v20334_v50, %v20336_v51  ;;  %v7287_v47 = vor.u32 %v7286_v57, %v7283_v12  ;;  %v20406_v27 = vpop.f32.mrf.mxu1 }
 0x439   : > { %23353 = vst [vmem:[#allocation96_spill] sm:$0xff] %v20348_v21  ;;  %v14087_v28 = vcombine.low %v23354_v32, %v23354_v32  ;;  %v23356_v35 = vld [vmem:[#allocation102_spill] sm:$0xff]  ;;  %v23357_v30 = vld [vmem:[#allocation103_spill] sm:$0xff]  ;;  %v23358_v45 = vld [vmem:[#allocation64_spill] sm:$0xff]  ;;  %16673 = vmatpush3.bf16.msra.mxu0 %v17370_v48  ;;  %v8882_v22 = vrot.slane %v8880_v6, 4  ;;  %v20367_v32 = vsel %vm989_vm0, %v7269_v9, %v7278_v1  ;;  %v7292_v31 = vrot.slane %v7290_v34, 3 }
 0x43a   : > { %v14187_v0 = vcombine.low %v23356_v35, %v23355_v3  ;;  %v14188_v49 = vcombine.low %v23358_v45, %v23357_v30  ;;  %23359 = vst [vmem:[#allocation100_spill] sm:$0xff] %v20362_v10  ;;  %v20364_v24 = vld [vmem:[#allocation3 + $0xfc] sm:$0xf]  ;;  %23361 = vst [vmem:[#allocation104_spill] sm:$0xff] %v20367_v32  ;;  %v7295_v41 = vrot.slane %v7293_v33, 4  ;;  %v8860_v3 = vshrl.u32 %v14137_v5, 16 }
 0x43b   : > { %23360 = vst [vmem:[#allocation101_spill] sm:$0xff] %v20364_v24  ;;  %v8863_v35 = vshll.u32 %v14137_v5, 16  ;;  %v23362_v30 = vld [vmem:[#allocation51_spill] sm:$0xff]  ;;  %v20371_v51 = vld [vmem:[#allocation3 + $0x108] sm:$0xf]  ;;  %v20374_v12 = vsel %vm989_vm0, %v7278_v1, %v7287_v47  ;;  %v23367_v57 = vld [vmem:[#allocation57_spill] sm:$0xff] }
 0x43c   : > { %16531 = vmatmul.mubr.bf16.gmra.mxu0 %v14187_v0  ;;  %v8868_v45 = vshrl.u32 %v23362_v30, 16  ;;  %v8871_v63 = vshll.u32 %v23362_v30, 16  ;;  %23363 = vst [vmem:[#allocation105_spill] sm:$0xff] %v20371_v51  ;;  %23364 = vst [vmem:[#allocation108_spill] sm:$0xff] %v20374_v12  ;;  %v7296_v48 = vor.u32 %v7295_v41, %v7292_v31  ;;  %v20378_v0 = vcombine.low %v20364_v24, %v20346_v20  ;;  %v20385_v6 = vld [vmem:[#allocation3 + $0x110] sm:$0xf] }
 0x43d   : > { %16534 = vmatprep.mubr.bf16.mxu0 %v14188_v49  ;;  %v20382_v34 = vcombine.low %v20348_v21, %v20371_v51  ;;  %v8886_v9 = vshrl.u32 %v23367_v57, 16  ;;  %v7299_v33 = vshrl.u32 %v14087_v28, 16  ;;  %23368 = vst [vmem:[#allocation114_spill] sm:$0xff] %v20385_v6  ;;  %v8883_v49 = vor.u32 %v8882_v22, %v8879_v16  ;;  %v23369_v30 = vld [vmem:[#allocation98_spill] sm:$0xff]  ;;  %v20393_v41 = vld [vmem:[#allocation3 + $0x10c] sm:$0xf] }
 0x43e   : > { %23365 = vst [vmem:[#allocation109_spill] sm:$0xff] %v20378_v0  ;;  %v8889_v5 = vshll.u32 %v23367_v57, 16  ;;  %v8895_v1 = vshrl.u32 %v23369_v30, 16  ;;  %16299 = vmatmul.mubr.bf16.gmra.mxu1 %v20136_v54  ;;  %v20391_v31 = vsel %vm989_vm0, %v7287_v47, %v7296_v48  ;;  %v20395_v20 = vld [vmem:[#allocation3 + $0x114] sm:$0xf]  ;;  %v8898_v51 = vshll.u32 %v23369_v30, 16 }
 0x43f   : > { %23366 = vst [vmem:[#allocation62_spill] sm:$0xff] %v20382_v34  ;;  %23370 = vst [vmem:[#allocation111_spill] sm:$0xff] %v20391_v31  ;;  %16302 = vmatprep.mubr.bf16.mxu1 %v20163_v7  ;;  %v7301_v21 = vrot.slane %v7299_v33, 3  ;;  %v7302_v34 = vshll.u32 %v14087_v28, 16  ;;  %v8862_v16 = vrot.slane %v8860_v3, 3  ;;  %v23371_v57 = vld [vmem:[#allocation60_spill] sm:$0xff]  ;;  %v20410_v7 = vcombine.low %v20393_v41, %v20385_v6 }
 0x440   : > { %v20399_v22 = vld [vmem:[#allocation3 + $0x118] sm:$0xf]  ;;  %v8913_v24 = vshrl.u32 %v23371_v57, 16  ;;  %v23373_v54 = vld [vmem:[#allocation68_spill] sm:$0xff]  ;;  %v8865_v47 = vrot.slane %v8863_v35, 4  ;;  %v8870_v31 = vrot.slane %v8868_v45, 3 }
 0x441   : > { %v23372_v12 = vld [vmem:[#allocation106_spill] sm:$0xff]  ;;  %23375 = vst [vmem:[#allocation118_spill] sm:$0xff] %v20406_v27  ;;  %v7304_v30 = vrot.slane %v7302_v34, 4  ;;  %v8873_v32 = vrot.slane %v8871_v63, 4  ;;  %v8897_v28 = vrot.slane %v8895_v1, 3  ;;  %v20414_v33 = vcombine.low %v20395_v20, %v20399_v22  ;;  %v23377_v34 = vld [vmem:[#allocation99_spill] sm:$0xff] }
 0x442   : > { %v14189_v0 = vcombine.low %v23373_v54, %v23372_v12  ;;  %v23374_v10 = vld [vmem:[#allocation66_spill] sm:$0xff]  ;;  %v8866_v3 = vor.u32 %v8865_v47, %v8862_v16  ;;  %v8888_v35 = vrot.slane %v8886_v9, 3  ;;  %v8900_v12 = vrot.slane %v8898_v51, 4  ;;  %v20423_v16 = vpop.f32.mrf.mxu1 }
 0x443   : > { %v14190_v50 = vcombine.low %v23374_v10, %v20122_v43  ;;  %v20416_v45 = vld [vmem:[#allocation3 + $0x38] sm:$0xf]  ;;  %v8916_v43 = vshll.u32 %v23371_v57, 16  ;;  %v7305_v10 = vor.u32 %v7304_v30, %v7301_v21  ;;  %v8874_v63 = vor.u32 %v8873_v32, %v8870_v31  ;;  %v20420_v6 = vld [vmem:[#allocation3 + $0x3c] sm:$0xf] }
 0x444   : > { %16535 = vmatmul.mubr.bf16.gmra.mxu0 %v14189_v0  ;;  %23376 = vst [vmem:[#allocation112_spill] sm:$0xff] %v20416_v45  ;;  %v8904_v54 = vshrl.u32 %v23377_v34, 16  ;;  %v8891_v27 = vrot.slane %v8889_v5, 4  ;;  %23378 = vst [vmem:[#allocation119_spill] sm:$0xff] %v20420_v6  ;;  %v8907_v0 = vshll.u32 %v23377_v34, 16  ;;  %v8915_v1 = vrot.slane %v8913_v24, 3 }
 0x445   : > { %16538 = vmatprep.mubr.bf16.mxu0 %v14190_v50  ;;  %v20426_v9 = vsel %vm989_vm0, %v7296_v48, %v7305_v10  ;;  %v20429_v51 = vsel %vm989_vm0, %v8866_v3, %v8874_v63  ;;  %v20433_v50 = vsel %vm989_vm0, %v8874_v63, %v8883_v49  ;;  %v8918_v32 = vrot.slane %v8916_v43, 4  ;;  %v23379_v5 = vld [vmem:[#allocation65_spill] sm:$0xff]  ;;  %v20447_v3 = vpop.f32.mrf.mxu1  ;;  %v23381_v10 = vld [vmem:[#allocation63_spill] sm:$0xff] }
 0x446   : > { %16303 = vmatmul.mubr.bf16.gmra.mxu1 %v20166_v17  ;;  %v8892_v21 = vor.u32 %v8891_v27, %v8888_v35  ;;  %v8931_v31 = vshrl.u32 %v23379_v5, 16  ;;  %v8901_v57 = vor.u32 %v8900_v12, %v8897_v28  ;;  %v8934_v48 = vshll.u32 %v23379_v5, 16  ;;  %v23380_v43 = vld [vmem:[#allocation61_spill] sm:$0xff] }
 0x447   : > { %16306 = vmatprep.mubr.bf16.mxu1 %v20191_v52  ;;  %v14191_v47 = vcombine.low %v20138_v18, %v20154_v11  ;;  %v8906_v30 = vrot.slane %v8904_v54, 3  ;;  %v14192_v27 = vcombine.low %v20145_v53, %v20156_v19  ;;  %v8909_v35 = vrot.slane %v8907_v0, 4  ;;  %v23382_v54 = vld [vmem:[#allocation69_spill] sm:$0xff]  ;;  %v20457_v5 = vpop.f32.mrf.mxu1 }
 0x448   : > { %v20443_v17 = vsel %vm989_vm0, %v8883_v49, %v8892_v21  ;;  %v20450_v52 = vsel %vm989_vm0, %v8892_v21, %v8901_v57  ;;  %v8922_v28 = vshrl.u32 %v23380_v43, 16  ;;  %v8925_v12 = vshll.u32 %v23380_v43, 16  ;;  %23383 = vst [vmem:[#allocation121_spill] sm:$0xff] %v20457_v5 }
 0x449   : > { %v8940_v11 = vshrl.u32 %v23381_v10, 16  ;;  %v8910_v18 = vor.u32 %v8909_v35, %v8906_v30  ;;  %v8933_v49 = vrot.slane %v8931_v31, 3  ;;  %v8936_v63 = vrot.slane %v8934_v48, 4 }
 0x44a   : > { %v8919_v34 = vor.u32 %v8918_v32, %v8915_v1  ;;  %v8949_v19 = vshrl.u32 %v23382_v54, 16  ;;  %v8952_v53 = vshll.u32 %v23382_v54, 16  ;;  %v8943_v31 = vshll.u32 %v23381_v10, 16  ;;  %v23385_v32 = vld [vmem:[#allocation55_spill] sm:$0xff] }
 0x44b   : > { %v20460_v0 = vsel %vm989_vm0, %v8901_v57, %v8910_v18  ;;  %v14193_v48 = vcombine.low %v23385_v32, %v20185_v2  ;;  %v8937_v35 = vor.u32 %v8936_v63, %v8933_v49  ;;  %v23388_v49 = vld [vmem:[#allocation67_spill] sm:$0xff] }
 0x44c   : > { %16539 = vmatmul.mubr.bf16.gmra.mxu0 %v14191_v47  ;;  %v20464_v21 = vsel %vm989_vm0, %v8910_v18, %v8919_v34  ;;  %v8924_v47 = vrot.slane %v8922_v28, 3  ;;  %v8951_v57 = vrot.slane %v8949_v19, 3  ;;  %v8954_v43 = vrot.slane %v8952_v53, 4  ;;  %v23390_v53 = vld [vmem:[#allocation72_spill] sm:$0xff] }
 0x44d   : > { %16542 = vmatprep.mubr.bf16.mxu0 %v14192_v27  ;;  %v8927_v27 = vrot.slane %v8925_v12, 4  ;;  %v8942_v28 = vrot.slane %v8940_v11, 3  ;;  %v23387_v12 = vld [vmem:[#allocation54_spill] sm:$0xff]  ;;  %v8958_v63 = vshrl.u32 %v23388_v49, 16  ;;  %v8961_v11 = vshll.u32 %v23388_v49, 16 }
 0x44e   : > { %16307 = vmatmul.mubr.bf16.gmra.mxu1 %v20200_v14  ;;  %v14194_v14 = vcombine.low %v20168_v55, %v20170_v62  ;;  %v8967_v54 = vshrl.u32 %v23387_v12, 16  ;;  %v8970_v10 = vshll.u32 %v23387_v12, 16  ;;  %v8945_v62 = vrot.slane %v8943_v31, 4 }
 0x44f   : > { %16310 = vmatprep.mubr.bf16.mxu1 %v20217_v25  ;;  %v8928_v30 = vor.u32 %v8927_v27, %v8924_v47  ;;  %v8976_v47 = vshrl.u32 %v23390_v53, 16  ;;  %v8979_v24 = vshll.u32 %v23390_v53, 16 }
 0x450   : > { %v8972_v12 = vrot.slane %v8970_v10, 4 }
 0x451   : > { %v20468_v1 = vpop.f32.mrf.mxu1  ;;  %v20479_v25 = vsel %vm989_vm0, %v8919_v34, %v8928_v30  ;;  %v20482_v2 = vsel %vm989_vm0, %v8928_v30, %v8937_v35  ;;  %v8946_v34 = vor.u32 %v8945_v62, %v8942_v28  ;;  %v8969_v30 = vrot.slane %v8967_v54, 3  ;;  %v23396_v28 = vld [vmem:[#allocation129_spill] sm:$0xff]  ;;  %v23397_v54 = vld [vmem:[#allocation71_spill] sm:$0xff] }
 0x452   : > { %23384 = vst [vmem:[#allocation116_spill] sm:$0xff] %v20468_v1  ;;  %v14195_v10 = vcombine.low %v23397_v54, %v23396_v28  ;;  %v23402_v54 = vld [vmem:[#allocation73_spill] sm:$0xff] }
 0x453   : > { %v20474_v18 = vpop.f32.mrf.mxu1  ;;  %v8994_v5 = vshrl.u32 %v23402_v54, 16 }
 0x454   : > { %23386 = vst [vmem:[#allocation120_spill] sm:$0xff] %v20474_v18  ;;  %16543 = vmatmul.mubr.bf16.gmra.mxu0 %v14193_v48  ;;  %v20487_v55 = vpop.f32.mrf.mxu0  ;;  %v8955_v48 = vor.u32 %v8954_v43, %v8951_v57  ;;  %v8960_v43 = vrot.slane %v8958_v63, 3 }
 0x455   : > { %16546 = vmatprep.mubr.bf16.mxu0 %v14194_v14  ;;  %v20485_v19 = vpop.f32.mrf.mxu1  ;;  %v23393_v14 = vld [vmem:[#allocation70_spill] sm:$0xff] }
 0x456   : > { %23389 = vst [vmem:[#allocation117_spill] sm:$0xff] %v20485_v19  ;;  %v20493_v32 = vpop.f32.mrf.mxu0  ;;  %v8985_v18 = vshrl.u32 %v23393_v14, 16  ;;  %16311 = vmatmul.mubr.bf16.gmra.mxu1 %v20224_v23  ;;  %v8988_v31 = vshll.u32 %v23393_v14, 16  ;;  %v20508_v57 = vsel %vm989_vm0, %v8946_v34, %v8955_v48  ;;  %v23398_v23 = vld [vmem:[#allocation107_spill] sm:$0xff]  ;;  %v8963_v14 = vrot.slane %v8961_v11, 4 }
 0x457   : > { %v20491_v27 = vpop.f32.mrf.mxu1  ;;  %23392 = vst [vmem:[#allocation75_spill] sm:$0xff] %v20493_v32  ;;  %16314 = vmatprep.mubr.bf16.mxu1 %v20251_v8  ;;  %v14196_v62 = vcombine.low %v23398_v23, %v20219_v60  ;;  %v8997_v60 = vshll.u32 %v23402_v54, 16 }
 0x458   : > { %23391 = vst [vmem:[#allocation115_spill] sm:$0xff] %v20491_v27  ;;  %v20502_v19 = vpop.f32.mrf.mxu0  ;;  %v20505_v27 = vsel %vm989_vm0, %v8937_v35, %v8946_v34  ;;  %v8981_v35 = vrot.slane %v8979_v24, 4  ;;  %v8987_v1 = vrot.slane %v8985_v18, 3  ;;  %v8990_v32 = vrot.slane %v8988_v31, 4 }
 0x459   : > { %v20500_v49 = vpop.f32.mrf.mxu1  ;;  %23395 = vst [vmem:[#allocation124_spill] sm:$0xff] %v20502_v19  ;;  %v8978_v19 = vrot.slane %v8976_v47, 3  ;;  %v8964_v28 = vor.u32 %v8963_v14, %v8960_v43  ;;  %v23408_v14 = vld [vmem:[#allocation127_spill] sm:$0xff] }
 0x45a   : > { %23394 = vst [vmem:[#allocation122_spill] sm:$0xff] %v20500_v49  ;;  %v20516_v8 = vpop.f32.mrf.mxu0  ;;  %v8973_v49 = vor.u32 %v8972_v12, %v8969_v30  ;;  %v8991_v43 = vor.u32 %v8990_v32, %v8987_v1 }
 0x45b   : > { %v20514_v53 = vpop.f32.mrf.mxu1  ;;  %23400 = vst [vmem:[#allocation19_spill] sm:$0xff] %v20516_v8  ;;  %v8982_v23 = vor.u32 %v8981_v35, %v8978_v19  ;;  %v20531_v18 = vsel %vm989_vm0, %v8955_v48, %v8964_v28  ;;  %v8996_v48 = vrot.slane %v8994_v5, 3  ;;  %v9012_v35 = vshrl.u32 %v23408_v14, 16 }
 0x45c   : > { %23399 = vst [vmem:[#allocation123_spill] sm:$0xff] %v20514_v53  ;;  %16547 = vmatmul.mubr.bf16.gmra.mxu0 %v14195_v10  ;;  %v23403_v53 = vld [vmem:[#allocation110_spill] sm:$0xff]  ;;  %v20535_v47 = vsel %vm989_vm0, %v8964_v28, %v8973_v49  ;;  %v14197_v10 = vcombine.low %v20226_v39, %v20246_v38  ;;  %v9015_v5 = vshll.u32 %v23408_v14, 16 }
 0x45d   : > { %16550 = vmatprep.mubr.bf16.mxu0 %v14196_v62  ;;  %v20518_v34 = vpop.f32.mrf.mxu1  ;;  %v9003_v8 = vshrl.u32 %v23403_v53, 16  ;;  %v9006_v11 = vshll.u32 %v23403_v53, 16  ;;  %v20538_v12 = vsel %vm989_vm0, %v8973_v49, %v8982_v23  ;;  %v8999_v62 = vrot.slane %v8997_v60, 4 }
 0x45e   : > { %23401 = vst [vmem:[#allocation20_spill] sm:$0xff] %v20518_v34  ;;  %v20520_v63 = vpop.f32.mrf.mxu0  ;;  %16315 = vmatmul.mubr.bf16.gmra.mxu1 %v20254_v37  ;;  %v14198_v49 = vcombine.low %v20234_v46, %v20236_v26  ;;  %v20557_v38 = vsel %vm989_vm0, %v8982_v23, %v8991_v43  ;;  %v9030_v26 = vshrl.u32 %v20242_v44, 16  ;;  %v9039_v23 = vshrl.u32 %v20264_v58, 16 }
 0x45f   : > { %v20526_v30 = vpop.f32.mrf.mxu1  ;;  %16318 = vmatprep.mubr.bf16.mxu1 %v20273_v15  ;;  %v9005_v53 = vrot.slane %v9003_v8, 3  ;;  %v9008_v37 = vrot.slane %v9006_v11, 4  ;;  %v23410_v15 = vld [vmem:[#allocation125_spill] sm:$0xff]  ;;  %v9000_v39 = vor.u32 %v8999_v62, %v8996_v48  ;;  %v9014_v11 = vrot.slane %v9012_v35, 3 }
 0x460   : > { %23404 = vst [vmem:[#allocation21_spill] sm:$0xff] %v20526_v30  ;;  %v20528_v24 = vpop.f32.mrf.mxu0  ;;  %v9021_v54 = vshrl.u32 %v23410_v15, 16  ;;  %v9042_v48 = vshll.u32 %v20264_v58, 16  ;;  %v9017_v14 = vrot.slane %v9015_v5, 4  ;;  %v14200_v58 = vcombine.low %v20256_v29, %v20258_v36  ;;  %v23445_v30 = vld [vmem:[#allocation84_spill] sm:$0xff] }
 0x461   : > { %23405 = vst [vmem:[#allocation126_spill] sm:$0xff] %v20528_v24  ;;  %v20541_v19 = vpop.f32.mrf.mxu1  ;;  %v20563_v46 = vsel %vm989_vm0, %v8991_v43, %v9000_v39  ;;  %v9009_v60 = vor.u32 %v9008_v37, %v9005_v53  ;;  %v14199_v53 = vcombine.low %v20248_v56, %v20284_v13  ;;  %v9041_v35 = vrot.slane %v9039_v23, 3  ;;  %v23420_v56 = vld [vmem:[#allocation77_spill] sm:$0xff] }
 0x462   : > { %23406 = vst [vmem:[#allocation128_spill] sm:$0xff] %v20541_v19  ;;  %v20543_v31 = vpop.f32.mrf.mxu0  ;;  %v9024_v19 = vshll.u32 %v23410_v15, 16  ;;  %v9057_v13 = vshrl.u32 %v23420_v56, 16 }
 0x463   : > { %23407 = vst [vmem:[#allocation58_spill] sm:$0xff] %v20543_v31  ;;  %v20550_v28 = vpop.f32.mrf.mxu1  ;;  %v20575_v43 = vsel %vm989_vm0, %v9000_v39, %v9009_v60 }
 0x464   : > { %23409 = vst [vmem:[#allocation59_spill] sm:$0xff] %v20550_v28  ;;  %16551 = vmatmul.mubr.bf16.gmra.mxu0 %v14197_v10  ;;  %v20554_v1 = vpop.f32.mrf.mxu0  ;;  %v9023_v10 = vrot.slane %v9021_v54, 3  ;;  %v9026_v15 = vrot.slane %v9024_v19, 4  ;;  %v9044_v54 = vrot.slane %v9042_v48, 4  ;;  %v9060_v28 = vshll.u32 %v23420_v56, 16  ;;  %v23426_v56 = vld [vmem:[#allocation76_spill] sm:$0xff] }
 0x465   : > { %23411 = vst [vmem:[#allocation113_spill] sm:$0xff] %v20554_v1  ;;  %16554 = vmatprep.mubr.bf16.mxu0 %v14198_v49  ;;  %v20560_v32 = vpop.f32.mrf.mxu1  ;;  %v9033_v49 = vshll.u32 %v20242_v44, 16  ;;  %v9032_v44 = vrot.slane %v9030_v26, 3 }
 0x466   : > { %23412 = vst [vmem:[#allocation34_spill] sm:$0xff] %v20560_v32  ;;  %16319 = vmatmul.mubr.bf16.gmra.mxu1 %v20289_v4  ;;  %v20571_v62 = vpop.f32.mrf.mxu0  ;;  %v9018_v4 = vor.u32 %v9017_v14, %v9014_v11  ;;  %v9027_v5 = vor.u32 %v9026_v15, %v9023_v10  ;;  %v23423_v10 = vld [vmem:[#allocation81_spill] sm:$0xff] }
 0x467   : > { %v20566_v8 = vpop.f32.mrf.mxu1  ;;  %23414 = vst [vmem:[#allocation36_spill] sm:$0xff] %v20571_v62  ;;  %16322 = vmatprep.mubr.bf16.mxu1 %v20308_v59  ;;  %v9035_v23 = vrot.slane %v9033_v49, 4 }
 0x468   : > { %23413 = vst [vmem:[#allocation37_spill] sm:$0xff] %v20566_v8  ;;  %v20580_v19 = vpop.f32.mrf.mxu0  ;;  %v23419_v8 = vld [vmem:[#allocation74_spill] sm:$0xff]  ;;  %v20601_v11 = vsel %vm989_vm0, %v9018_v4, %v9027_v5 }
 0x469   : > { %23415 = vst [vmem:[#allocation35_spill] sm:$0xff] %v20580_v19  ;;  %v20582_v37 = vpop.f32.mrf.mxu1  ;;  %v9048_v32 = vshrl.u32 %v23419_v8, 16  ;;  %v9051_v26 = vshll.u32 %v23419_v8, 16  ;;  %v9036_v14 = vor.u32 %v9035_v23, %v9032_v44 }
 0x46a   : > { %23416 = vst [vmem:[#allocation22_spill] sm:$0xff] %v20582_v37  ;;  %v20586_v59 = vpop.f32.mrf.mxu0  ;;  %v20594_v37 = vsel %vm989_vm0, %v9009_v60, %v9018_v4  ;;  %v9059_v60 = vrot.slane %v9057_v13, 3 }
 0x46b   : > { %23417 = vst [vmem:[#allocation23_spill] sm:$0xff] %v20586_v59  ;;  %v20588_v39 = vpop.f32.mrf.mxu1  ;;  %v9050_v4 = vrot.slane %v9048_v32, 3 }
 0x46c   : > { %16555 = vmatmul.mubr.bf16.gmra.mxu0 %v14199_v53  ;;  %23418 = vst [vmem:[#allocation40_spill] sm:$0xff] %v20588_v39  ;;  %v20596_v29 = vpop.f32.mrf.mxu0  ;;  %v9045_v53 = vor.u32 %v9044_v54, %v9041_v35  ;;  %v23427_v39 = vld [vmem:[#allocation83_spill] sm:$0xff]  ;;  %v23429_v35 = vld [vmem:[#allocation78_spill] sm:$0xff]  ;;  %v23430_v54 = vld [vmem:[#allocation80_spill] sm:$0xff] }
 0x46d   : > { %16558 = vmatprep.mubr.bf16.mxu0 %v14200_v58  ;;  %23421 = vst [vmem:[#allocation38_spill] sm:$0xff] %v20596_v29  ;;  %v20598_v36 = vpop.f32.mrf.mxu1  ;;  %v9062_v58 = vrot.slane %v9060_v28, 4  ;;  %v9075_v49 = vshrl.u32 %v23427_v39, 16  ;;  %v9078_v8 = vshll.u32 %v23427_v39, 16  ;;  %v9066_v28 = vshrl.u32 %v23429_v35, 16 }
 0x46e   : > { %23422 = vst [vmem:[#allocation41_spill] sm:$0xff] %v20598_v36  ;;  %16323 = vmatmul.mubr.bf16.gmra.mxu1 %v23423_v10  ;;  %v20605_v15 = vpop.f32.mrf.mxu0  ;;  %v14201_v36 = vcombine.low %v23426_v56, %v20303_v42  ;;  %v20617_v10 = vsel %vm989_vm0, %v9027_v5, %v9036_v14  ;;  %v20620_v44 = vsel %vm989_vm0, %v9036_v14, %v9045_v53  ;;  %v9053_v42 = vrot.slane %v9051_v26, 4  ;;  %v23434_v56 = vld [vmem:[#allocation85_spill] sm:$0xff] }
 0x46f   : > { %23424 = vst [vmem:[#allocation88_spill] sm:$0xff] %v20605_v15  ;;  %v20607_v48 = vpop.f32.mrf.mxu1  ;;  %16326 = vmatprep.mubr.bf16.mxu1 %v20341_v40  ;;  %v23431_v40 = vld [vmem:[#allocation79_spill] sm:$0xff]  ;;  %v9069_v39 = vshll.u32 %v23429_v35, 16  ;;  %v9077_v15 = vrot.slane %v9075_v49, 3  ;;  %v9080_v59 = vrot.slane %v9078_v8, 4  ;;  %v9087_v19 = vshll.u32 %v23434_v56, 16 }
 0x470   : > { %23425 = vst [vmem:[#allocation39_spill] sm:$0xff] %v20607_v48  ;;  %v20614_v29 = vpop.f32.mrf.mxu0  ;;  %v14202_v13 = vcombine.low %v23431_v40, %v23430_v54  ;;  %v9084_v48 = vshrl.u32 %v23434_v56, 16  ;;  %v9054_v14 = vor.u32 %v9053_v42, %v9050_v4  ;;  %v9093_v26 = vshrl.u32 %v20358_v61, 16  ;;  %v23442_v56 = vld [vmem:[#allocation86_spill] sm:$0xff] }
 0x471   : > { %23428 = vst [vmem:[#allocation44_spill] sm:$0xff] %v20614_v29  ;;  %v9063_v29 = vor.u32 %v9062_v58, %v9059_v60  ;;  %v9096_v40 = vshll.u32 %v20358_v61, 16  ;;  %v9068_v4 = vrot.slane %v9066_v28, 3  ;;  %v23438_v60 = vld [vmem:[#allocation91_spill] sm:$0xff]  ;;  %v23439_v58 = vld [vmem:[#allocation104_spill] sm:$0xff]  ;;  %v9071_v8 = vrot.slane %v9069_v39, 4 }
 0x472   : > { %v20625_v23 = vpop.f32.mrf.mxu1  ;;  %v20627_v32 = vpop.f32.mrf.mxu0  ;;  %v20641_v35 = vsel %vm989_vm0, %v9045_v53, %v9054_v14  ;;  %v9081_v61 = vor.u32 %v9080_v59, %v9077_v15  ;;  %v9089_v53 = vrot.slane %v9087_v19, 4  ;;  %v23450_v19 = vld [vmem:[#allocation109_spill] sm:$0xff] }
 0x473   : > { %23432 = vst [vmem:[#allocation24_spill] sm:$0xff] %v20625_v23  ;;  %23433 = vst [vmem:[#allocation25_spill] sm:$0xff] %v20627_v32  ;;  %v9086_v23 = vrot.slane %v9084_v48, 3  ;;  %v9098_v32 = vrot.slane %v9096_v40, 4  ;;  %v9111_v15 = vshrl.u32 %v23450_v19, 16  ;;  %v9114_v48 = vshll.u32 %v23450_v19, 16 }
 0x474   : > { %16559 = vmatmul.mubr.bf16.gmra.mxu0 %v14201_v36  ;;  %v20631_v5 = vpop.f32.mrf.mxu1  ;;  %v20634_v54 = vpop.f32.mrf.mxu0 }
 0x475   : > { %16562 = vmatprep.mubr.bf16.mxu0 %v14202_v13  ;;  %23435 = vst [vmem:[#allocation42_spill] sm:$0xff] %v20631_v5  ;;  %23436 = vst [vmem:[#allocation28_spill] sm:$0xff] %v20634_v54  ;;  %v20644_v13 = vsel %vm989_vm0, %v9054_v14, %v9063_v29  ;;  %v9095_v54 = vrot.slane %v9093_v26, 3  ;;  %v23444_v14 = vld [vmem:[#allocation87_spill] sm:$0xff]  ;;  %v9090_v34 = vor.u32 %v9089_v53, %v9086_v23  ;;  %v20669_v26 = vld [vmem:[#allocation8 + $0x238] sm:$0xff]  }
 0x476   : > { %v20637_v36 = vpop.f32.mrf.mxu1  ;;  %16327 = vmatmul.mubr.bf16.gmra.mxu1 %v23438_v60  ;;  %v14204_v28 = vcombine.low %v23445_v30, %v23444_v14  ;;  %v9072_v60 = vor.u32 %v9071_v8, %v9068_v4  ;;  %v11009_v4 = vld [vmem:[#allocation3 + $0x30] sm:$0xf]  ;;  %16818 = vmatprep.subr.bf16.mxu0 %v20669_v26  ;;  %v23456_v14 = vld [vmem:[#allocation90_spill] sm:$0xff] }
 0x477   : > { %23437 = vst [vmem:[#allocation130_spill] sm:$0xff] %v20637_v36  ;;  %16330 = vmatprep.mubr.bf16.mxu1 %v23439_v58  ;;  %v23443_v36 = vld [vmem:[#allocation82_spill] sm:$0xff]  ;;  %v23447_v58 = vld [vmem:[#allocation100_spill] sm:$0xff]  ;;  %v20677_v40 = vsel %vm989_vm0, %v9081_v61, %v9090_v34  ;;  %v9099_v8 = vor.u32 %v9098_v32, %v9095_v54  ;;  %v23455_v53 = vld [vmem:[#allocation101_spill] sm:$0xff]  ;;  %v9129_v32 = vshrl.u32 %v20410_v7, 16 }
 0x478   : > { %v20648_v49 = vpop.f32.mrf.mxu1  ;;  %v20650_v42 = vpop.f32.mrf.mxu0  ;;  %v14203_v5 = vcombine.low %v23443_v36, %v23442_v56  ;;  %v9105_v39 = vshll.u32 %v23447_v58, 16  ;;  %v20667_v30 = vsel %vm989_vm0, %v9063_v29, %v9072_v60  ;;  %v20674_v36 = vsel %vm989_vm0, %v9072_v60, %v9081_v61  ;;  %v23453_v56 = vld [vmem:[#allocation108_spill] sm:$0xff] }
 0x479   : > { %23440 = vst [vmem:[#allocation26_spill] sm:$0xff] %v20648_v49  ;;  %23441 = vst [vmem:[#allocation29_spill] sm:$0xff] %v20650_v42  ;;  %v9102_v49 = vshrl.u32 %v23447_v58, 16  ;;  %v11010_v58 = vld [vmem:[#allocation3 + $0x34] sm:$0xf]  ;;  %v9113_v61 = vrot.slane %v9111_v15, 3 }
 0x47a   : > { %v20656_v62 = vpop.f32.mrf.mxu1  ;;  %v20660_v42 = vpop.f32.mrf.mxu0  ;;  %v9107_v60 = vrot.slane %v9105_v39, 4  ;;  %v11008_v54 = vld [vmem:[#allocation3 + $0x2c] sm:$0x8]  ;;  %v23462_v15 = vld [vmem:[#allocation95_spill] sm:$0xff] }
 0x47b   : > { %23446 = vst [vmem:[#allocation27_spill] sm:$0xff] %v20656_v62  ;;  %23448 = vst [vmem:[#allocation131_spill] sm:$0xff] %v20660_v42  ;;  %v9104_v19 = vrot.slane %v9102_v49, 3  ;;  %v9116_v62 = vrot.slane %v9114_v48, 4  ;;  %v14259_v1 = vcombine.low %v11008_v54, %v11009_v4 }
 0x47c   : > { %16563 = vmatmul.mubr.bf16.gmra.mxu0 %v14203_v5  ;;  %v20662_v59 = vpop.f32.mrf.mxu1  ;;  %v20671_v5 = vpop.f32.mrf.mxu0 }
 0x47d   : > { %16566 = vmatprep.mubr.bf16.mxu0 %v14204_v28  ;;  %23449 = vst [vmem:[#allocation132_spill] sm:$0xff] %v20662_v59  ;;  %23451 = vst [vmem:[#allocation32_spill] sm:$0xff] %v20671_v5  ;;  %v14205_v28 = vcombine.low %v23456_v14, %v23455_v53  ;;  %v23457_v59 = vld [vmem:[#allocation111_spill] sm:$0xff]  ;;  %v23458_v5 = vld [vmem:[#allocation62_spill] sm:$0xff]  ;;  %v20696_v53 = vsel %vm989_vm0, %v9090_v34, %v9099_v8  ;;  %v9108_v49 = vor.u32 %v9107_v60, %v9104_v19 }
 0x47e   : > { %v20679_v23 = vpop.f32.mrf.mxu1  ;;  %16331 = vmatmul.mubr.bf16.gmra.mxu1 %v23453_v56  ;;  %v20683_v29 = vpop.f32.mrf.mxu0  ;;  %v9123_v39 = vshll.u32 %v23458_v5, 16  ;;  %v14260_v14 = vcombine.low %v11010_v58, %v20416_v45  ;;  %v9117_v4 = vor.u32 %v9116_v62, %v9113_v61  ;;  %v11254_v58 = vshrl.u32 %v14259_v1, 16 }
 0x47f   : > { %23452 = vst [vmem:[#allocation45_spill] sm:$0xff] %v20679_v23  ;;  %23454 = vst [vmem:[#allocation133_spill] sm:$0xff] %v20683_v29  ;;  %16334 = vmatprep.mubr.bf16.mxu1 %v23457_v59  ;;  %v9120_v23 = vshrl.u32 %v23458_v5, 16  ;;  %v9132_v29 = vshll.u32 %v20410_v7, 16  ;;  %v23461_v59 = vld [vmem:[#allocation96_spill] sm:$0xff]  ;;  %v9138_v7 = vshrl.u32 %v20414_v33, 16 }
 0x480   : > { %v20690_v42 = vpop.f32.mrf.mxu0  ;;  %v20692_v56 = vpop.f32.mrf.mxu1  ;;  %v14206_v48 = vcombine.low %v23462_v15, %v23461_v59  ;;  %v9131_v5 = vrot.slane %v9129_v32, 3  ;;  %v20712_v59 = vld [vmem:[#allocation3 + $0x11c] sm:$0xf]  ;;  %v11013_v15 = vld [vmem:[#allocation3 + $0x40] sm:$0xf]  ;;  %v11262_v45 = vshrl.u32 %v14260_v14, 16 }
 0x481   : > { %23459 = vst [vmem:[#allocation30_spill] sm:$0xff] %v20690_v42  ;;  %23460 = vst [vmem:[#allocation43_spill] sm:$0xff] %v20692_v56  ;;  %v20705_v42 = vsel %vm989_vm0, %v9099_v8, %v9108_v49  ;;  %v9122_v34 = vrot.slane %v9120_v23, 3  ;;  %v9134_v60 = vrot.slane %v9132_v29, 4  ;;  %v11265_v56 = vshll.u32 %v14260_v14, 16  ;;  %v23468_v29 = vld [vmem:[#allocation105_spill] sm:$0xff] }
 0x482   : > { %v20702_v31 = vpop.f32.mrf.mxu0  ;;  %v20715_v8 = vsel %vm989_vm0, %v9108_v49, %v9117_v4  ;;  %v9141_v61 = vshll.u32 %v20414_v33, 16  ;;  %v23469_v32 = vld [vmem:[#allocation114_spill] sm:$0xff]  ;;  %v14169_v49 = vcombine.low %v20712_v59, %v20712_v59  ;;  %v11256_v33 = vrot.slane %v11254_v58, 3 }
 0x483   : > { %23463 = vst [vmem:[#allocation33_spill] sm:$0xff] %v20702_v31  ;;  %v20708_v54 = vpop.f32.mrf.mxu1  ;;  %v14208_v14 = vcombine.low %v23469_v32, %v20395_v20  ;;  %v11264_v24 = vrot.slane %v11262_v45, 3 }
 0x484   : > { %16567 = vmatmul.mubr.bf16.gmra.mxu0 %v14205_v28  ;;  %23464 = vst [vmem:[#allocation31_spill] sm:$0xff] %v20708_v54  ;;  %v20710_v19 = vpop.f32.mrf.mxu0  ;;  %v11257_v28 = vshll.u32 %v14259_v1, 16  ;;  %v14207_v1 = vcombine.low %v23468_v29, %v20393_v41  ;;  %v11267_v41 = vrot.slane %v11265_v56, 4  ;;  %v11015_v29 = vld [vmem:[#allocation3 + $0x48] sm:$0xf]  ;;  %v9147_v56 = vshrl.u32 %v14169_v49, 16 }
 0x485   : > { %16570 = vmatprep.mubr.bf16.mxu0 %v14206_v48  ;;  %23465 = vst [vmem:[#allocation92_spill] sm:$0xff] %v20710_v19  ;;  %v9125_v48 = vrot.slane %v9123_v39, 4  ;;  %v20718_v62 = vpop.f32.mrf.mxu1  ;;  %v11014_v39 = vld [vmem:[#allocation3 + $0x44] sm:$0xf]  ;;  %v9135_v19 = vor.u32 %v9134_v60, %v9131_v5  ;;  %v9150_v60 = vshll.u32 %v14169_v49, 16  ;;  %v17528_v49 = vld [vmem:[#allocation8 + $0x178] sm:$0xff]  }
 0x486   : > { %16335 = vmatmul.mubr.bf16.gmra.mxu1 %v20426_v9  ;;  %23466 = vst [vmem:[#allocation89_spill] sm:$0xff] %v20718_v62  ;;  %v20720_v23 = vpop.f32.mrf.mxu0  ;;  %v11259_v31 = vrot.slane %v11257_v28, 4  ;;  %v11268_v28 = vor.u32 %v11267_v41, %v11264_v24  ;;  %v11018_v24 = vld [vmem:[#allocation3 + $0x54] sm:$0xf]  ;;  %v17377_v41 = vld [vmem:[#allocation8 + $0x168] sm:$0xff]  }
 0x487   : > { %23467 = vst [vmem:[#allocation47_spill] sm:$0xff] %v20720_v23  ;;  %16434 = vmatprep.mubr.bf16.mxu1 %v20429_v51  ;;  %v9126_v54 = vor.u32 %v9125_v48, %v9122_v34  ;;  %v20730_v9 = vpop.f32.mrf.mxu1  ;;  %v14261_v23 = vcombine.low %v20420_v6, %v11013_v15  ;;  %v9140_v51 = vrot.slane %v9138_v7, 3  ;;  %v14262_v48 = vcombine.low %v11014_v39, %v11015_v29  ;;  %v17372_v7 = vld [vmem:[#allocation8 + $0x170] sm:$0xff]  }
 0x488   : > { %23470 = vst [vmem:[#allocation134_spill] sm:$0xff] %v20730_v9  ;;  %v20732_v62 = vpop.f32.mrf.mxu0  ;;  %v9143_v15 = vrot.slane %v9141_v61, 4  ;;  %v11017_v61 = vld [vmem:[#allocation3 + $0x50] sm:$0xf] }
 0x489   : > { %v20736_v20 = vsel %vm989_vm0, %v9117_v4, %v9126_v54  ;;  %v20738_v32 = vpop.f32.mrf.mxu1  ;;  %v20743_v9 = vsel %vm989_vm0, %v9126_v54, %v9135_v19  ;;  %v11260_v4 = vor.u32 %v11259_v31, %v11256_v33  ;;  %v11274_v6 = vshll.u32 %v14261_v23, 16  ;;  %v11016_v33 = vld [vmem:[#allocation3 + $0x4c] sm:$0xf] }
 0x48a   : > { %23471 = vst [vmem:[#allocation135_spill] sm:$0xff] %v20738_v32  ;;  %v20740_v34 = vpop.f32.mrf.mxu0  ;;  %v9144_v45 = vor.u32 %v9143_v15, %v9140_v51  ;;  %v11280_v54 = vshrl.u32 %v14262_v48, 16  ;;  %v11283_v29 = vshll.u32 %v14262_v48, 16  ;;  %v9149_v32 = vrot.slane %v9147_v56, 3 }
 0x48b   : > { %v20747_v58 = vpop.f32.mrf.mxu1  ;;  %v9152_v31 = vrot.slane %v9150_v60, 4  ;;  %v11276_v15 = vrot.slane %v11274_v6, 4  ;;  %v14263_v56 = vcombine.low %v11016_v33, %v11017_v61  ;;  %v17382_v6 = vld [vmem:[#allocation8 + $0x160] sm:$0xff]   ;;  %v11020_v33 = vld [vmem:[#allocation3 + $0x5c] sm:$0xf] }
 0x48c   : > { %16571 = vmatmul.mubr.bf16.gmra.mxu0 %v14207_v1  ;;  %v20745_v5 = vpop.f32.mrf.mxu0  ;;  %23473 = vst [vmem:[#allocation52_spill] sm:$0xff] %v20747_v58  ;;  %v11271_v1 = vshrl.u32 %v14261_v23, 16  ;;  %v11282_v60 = vrot.slane %v11280_v54, 3 }
 0x48d   : > { %16574 = vmatprep.mubr.bf16.mxu0 %v14208_v14  ;;  %23472 = vst [vmem:[#allocation48_spill] sm:$0xff] %v20745_v5  ;;  %v20753_v14 = vsel %vm989_vm0, %v9135_v19, %v9144_v45  ;;  %v20756_v51 = vpop.f32.mrf.mxu1  ;;  %v9153_v58 = vor.u32 %v9152_v31, %v9149_v32  ;;  %v11292_v31 = vshll.u32 %v14263_v56, 16  ;;  %v21072_v5 = vld [vmem:[#allocation3 + $0x38] sm:$0xff]  }
 0x48e   : > { %16435 = vmatmul.mubr.bf16.vlgmr.msra.gmra.mxu1 %v20433_v50  ;;  %v20750_v39 = vpop.f32.mrf.mxu0  ;;  %23475 = vst [vmem:[#allocation93_spill] sm:$0xff] %v20756_v51  ;;  %v14209_v50 = vcombine.low %v20399_v22, %v20712_v59  ;;  %v11273_v19 = vrot.slane %v11271_v1, 3 }
 0x48f   : > { %23474 = vst [vmem:[#allocation49_spill] sm:$0xff] %v20750_v39  ;;  %16438 = vmatprep.mubr.bf16.mxu1 %v20443_v17  ;;  %16579 = vmatpush3.bf16.msra.mxu1 %v17528_v49  ;;  %v20762_v48 = vpop.f32.mrf.mxu1  ;;  %v11019_v17 = vld [vmem:[#allocation3 + $0x58] sm:$0xf]  ;;  %v11269_v49 = vsel %vm989_vm0, %v11260_v4, %v11268_v28  ;;  %v20770_v59 = vsel %vm989_vm0, %v9144_v45, %v9153_v58  ;;  %v11289_v4 = vshrl.u32 %v14263_v56, 16  ;;  %v11022_v58 = vld [vmem:[#allocation3 + $0x64] sm:$0xf] }
 0x490   : > { %v20758_v23 = vpop.f32.mrf.mxu0  ;;  %16580 = vmatprep.subr.bf16.mxu1 %v17372_v7  ;;  %23477 = vst [vmem:[#allocation53_spill] sm:$0xff] %v20762_v48  ;;  %v14264_v39 = vcombine.low %v11018_v24, %v11019_v17  ;;  %v11277_v61 = vor.u32 %v11276_v15, %v11273_v19  ;;  %v17387_v17 = vld [vmem:[#allocation8 + $0x158] sm:$0xff]  }
 0x491   : > { %23476 = vst [vmem:[#allocation94_spill] sm:$0xff] %v20758_v23  ;;  %v11285_v23 = vrot.slane %v11283_v29, 4  ;;  %v20767_v22 = vpop.f32.mrf.mxu1  ;;  %v11291_v56 = vrot.slane %v11289_v4, 3 }
 0x492   : > { %v20765_v51 = vpop.f32.mrf.mxu0  ;;  %23479 = vst [vmem:[#allocation46_spill] sm:$0xff] %v20767_v22  ;;  %v11298_v24 = vshrl.u32 %v14264_v39, 16 }
 0x493   : > { %23478 = vst [vmem:[#allocation97_spill] sm:$0xff] %v20765_v51  ;;  %16581 = vmatpush3.bf16.msra.mxu1 %v17372_v7  ;;  %v20774_v32 = vpop.f32.mrf.mxu1  ;;  %v11286_v29 = vor.u32 %v11285_v23, %v11282_v60  ;;  %v11021_v7 = vld [vmem:[#allocation3 + $0x60] sm:$0xf]  ;;  %v11294_v23 = vrot.slane %v11292_v31, 4  ;;  %v17404_v60 = vld [vmem:[#allocation8 + $0x230] sm:$0xff]  }
 0x494   : > { %16575 = vmatmul.mubr.bf16.gmra.mxu0 %v14209_v50  ;;  %v20772_v1 = vpop.f32.mrf.mxu0  ;;  %16582 = vmatprep.subr.bf16.mxu1 %v17377_v41  ;;  %23481 = vst [vmem:[#allocation50_spill] sm:$0xff] %v20774_v32  ;;  %v11301_v50 = vshll.u32 %v14264_v39, 16  ;;  %v11023_v39 = vld [vmem:[#allocation3 + $0x68] sm:$0xf] }
 0x495   : > { %16674 = vmatprep.mubr.bf16.mxu0 %v11269_v49  ;;  %23480 = vst [vmem:[#allocation56_spill] sm:$0xff] %v20772_v1  ;;  %v20780_v45 = vpop.f32.mrf.mxu1  ;;  %v14265_v49 = vcombine.low %v11020_v33, %v11021_v7  ;;  %v11295_v31 = vor.u32 %v11294_v23, %v11291_v56  ;;  %v17397_v56 = vld [vmem:[#allocation8 + $0x148] sm:$0xff]  }
 0x496   : > { %16439 = vmatmul.mubr.bf16.gmra.mxu1 %v20450_v52  ;;  %v20777_v54 = vpop.f32.mrf.mxu0  ;;  %23483 = vst [vmem:[#allocation103_spill] sm:$0xff] %v20780_v45  ;;  %v11278_v52 = vsel %vm989_vm0, %v11268_v28, %v11277_v61  ;;  %v11300_v45 = vrot.slane %v11298_v24, 3  ;;  %v11303_v32 = vrot.slane %v11301_v50, 4  ;;  %v17406_v24 = vld [vmem:[#allocation8 + $0x228] sm:$0xff]  }
 0x497   : > { %23482 = vst [vmem:[#allocation102_spill] sm:$0xff] %v20777_v54  ;;  %16442 = vmatprep.mubr.bf16.mxu1 %v20460_v0  ;;  %16583 = vmatpush3.bf16.msra.mxu1 %v17377_v41  ;;  %v20782_v19 = vpop.f32.mrf.mxu1  ;;  %v11287_v0 = vsel %vm989_vm0, %v11277_v61, %v11286_v29  ;;  %v14266_v41 = vcombine.low %v11022_v58, %v11023_v39  ;;  %v11307_v7 = vshrl.u32 %v14265_v49, 16  ;;  %v11310_v61 = vshll.u32 %v14265_v49, 16  ;;  %v11026_v39 = vld [vmem:[#allocation3 + $0x74] sm:$0xf] }
 0x498   : > { %16584 = vmatprep.subr.bf16.mxu1 %v17382_v6  ;;  %23484 = vst [vmem:[#allocation64_spill] sm:$0xff] %v20782_v19  ;;  %v17392_v19 = vld [vmem:[#allocation8 + $0x150] sm:$0xff]   ;;  %v11304_v50 = vor.u32 %v11303_v32, %v11300_v45 }
 0x499   : > { %v20784_v15 = vpop.f32.mrf.mxu0  ;;  %v20788_v22 = vpop.f32.mrf.mxu1  ;;  %v11316_v58 = vshrl.u32 %v14266_v41, 16  ;;  %v11319_v33 = vshll.u32 %v14266_v41, 16  ;;  %v11309_v32 = vrot.slane %v11307_v7, 3  ;;  %v11312_v45 = vrot.slane %v11310_v61, 4 }
 0x49a   : > { %23485 = vst [vmem:[#allocation51_spill] sm:$0xff] %v20784_v15  ;;  %23486 = vst [vmem:[#allocation57_spill] sm:$0xff] %v20788_v22 }
 0x49b   : > { %v20790_v48 = vpop.f32.mrf.mxu0  ;;  %16585 = vmatpush3.bf16.msra.mxu1 %v17382_v6  ;;  %v20793_v28 = vpop.f32.mrf.mxu1  ;;  %v11321_v22 = vrot.slane %v11319_v33, 4 }
 0x49c   : > { %16675 = vmatmul.mubr.bf16.vlgmr.msra.gmra.mxu0 %v11278_v52  ;;  %23487 = vst [vmem:[#allocation98_spill] sm:$0xff] %v20790_v48  ;;  %16586 = vmatprep.subr.bf16.mxu1 %v17387_v17  ;;  %23488 = vst [vmem:[#allocation60_spill] sm:$0xff] %v20793_v28  ;;  %v11025_v52 = vld [vmem:[#allocation3 + $0x70] sm:$0xf]  ;;  %v11305_v28 = vsel %vm989_vm0, %v11295_v31, %v11304_v50 }
 0x49d   : > { %16678 = vmatprep.mubr.bf16.mxu0 %v11287_v0  ;;  %16819 = vmatpush3.bf16.msra.mxu0 %v20669_v26  ;;  %v20795_v4 = vpop.f32.mrf.mxu0  ;;  %v20799_v6 = vpop.f32.mrf.mxu1  ;;  %v11024_v0 = vld [vmem:[#allocation3 + $0x6c] sm:$0xf] }
 0x49e   : > { %23489 = vst [vmem:[#allocation106_spill] sm:$0xff] %v20795_v4  ;;  %16820 = vmatprep.subr.bf16.mxu0 %v17404_v60  ;;  %16443 = vmatmul.mubr.bf16.gmra.mxu1 %v20464_v21  ;;  %23490 = vst [vmem:[#allocation68_spill] sm:$0xff] %v20799_v6  ;;  %v11296_v21 = vsel %vm989_vm0, %v11286_v29, %v11295_v31  ;;  %v14267_v41 = vcombine.low %v11024_v0, %v11025_v52  ;;  %v17408_v6 = vld [vmem:[#allocation8 + $0x220] sm:$0xff]   ;;  %v17412_v31 = vld [vmem:[#allocation8 + $0x218] sm:$0xff]  }
 0x49f   : > { %16446 = vmatprep.mubr.bf16.mxu1 %v20479_v25  ;;  %v20801_v26 = vpop.f32.mrf.mxu0  ;;  %16587 = vmatpush3.bf16.msra.mxu1 %v17387_v17  ;;  %v20803_v23 = vpop.f32.mrf.mxu1  ;;  %v11027_v25 = vld [vmem:[#allocation3 + $0x78] sm:$0xf]  ;;  %v11318_v17 = vrot.slane %v11316_v58, 3  ;;  %v17403_v29 = vld [vmem:[#allocation8 + $0x140] sm:$0xff]   ;;  %v11313_v52 = vor.u32 %v11312_v45, %v11309_v32  ;;  %v17414_v4 = vld [vmem:[#allocation3 + $0x30] sm:$0xff]  }
 0x4a0   : > { %23491 = vst [vmem:[#allocation66_spill] sm:$0xff] %v20801_v26  ;;  %16588 = vmatprep.subr.bf16.mxu1 %v17392_v19  ;;  %23492 = vst [vmem:[#allocation99_spill] sm:$0xff] %v20803_v23  ;;  %v14268_v26 = vcombine.low %v11026_v39, %v11027_v25  ;;  %v11325_v0 = vshrl.u32 %v14267_v41, 16  ;;  %v11029_v39 = vld [vmem:[#allocation3 + $0x80] sm:$0xf]  ;;  %v20823_v32 = vld [vmem:[#allocation8 + $0x1f8] sm:$0xff]  }
 0x4a1   : > { %16821 = vmatpush3.bf16.msra.mxu0 %v17404_v60  ;;  %v20805_v49 = vpop.f32.mrf.mxu0  ;;  %v20809_v60 = vpop.f32.mrf.mxu1  ;;  %v11030_v25 = vld [vmem:[#allocation3 + $0x84] sm:$0xf] }
 0x4a2   : > { %23493 = vst [vmem:[#allocation65_spill] sm:$0xff] %v20805_v49  ;;  %16822 = vmatprep.subr.bf16.mxu0 %v17406_v24  ;;  %23494 = vst [vmem:[#allocation61_spill] sm:$0xff] %v20809_v60  ;;  %v11334_v58 = vshrl.u32 %v14268_v26, 16  ;;  %v11337_v33 = vshll.u32 %v14268_v26, 16 }
 0x4a3   : > { %v20811_v23 = vpop.f32.mrf.mxu0  ;;  %16589 = vmatpush3.bf16.msra.mxu1 %v17392_v19  ;;  %v20813_v7 = vpop.f32.mrf.mxu1 }
 0x4a4   : > { %16679 = vmatmul.mubr.bf16.gmra.mxu0 %v11296_v21  ;;  %23495 = vst [vmem:[#allocation63_spill] sm:$0xff] %v20811_v23  ;;  %16590 = vmatprep.subr.bf16.mxu1 %v17397_v56  ;;  %23496 = vst [vmem:[#allocation69_spill] sm:$0xff] %v20813_v7  ;;  %v11328_v21 = vshll.u32 %v14267_v41, 16  ;;  %v11028_v7 = vld [vmem:[#allocation3 + $0x7c] sm:$0xf]  ;;  %v11336_v60 = vrot.slane %v11334_v58, 3 }
 0x4a5   : > { %16682 = vmatprep.mubr.bf16.mxu0 %v11305_v28  ;;  %16823 = vmatpush3.bf16.msra.mxu0 %v17406_v24  ;;  %v20815_v61 = vpop.f32.mrf.mxu0  ;;  %v11322_v28 = vor.u32 %v11321_v22, %v11318_v17  ;;  %v20819_v19 = vpop.f32.mrf.mxu1  ;;  %v11327_v22 = vrot.slane %v11325_v0, 3  ;;  %v14269_v41 = vcombine.low %v11028_v7, %v11029_v39  ;;  %v11031_v17 = vld [vmem:[#allocation3 + $0x88] sm:$0xf] }
 0x4a6   : > { %23497 = vst [vmem:[#allocation55_spill] sm:$0xff] %v20815_v61  ;;  %16824 = vmatprep.subr.bf16.mxu0 %v17408_v6  ;;  %16447 = vmatmul.mubr.bf16.gmra.mxu1 %v20482_v2  ;;  %23498 = vst [vmem:[#allocation54_spill] sm:$0xff] %v20819_v19  ;;  %v11314_v2 = vsel %vm989_vm0, %v11304_v50, %v11313_v52  ;;  %v11330_v26 = vrot.slane %v11328_v21, 4  ;;  %v17419_v21 = vld [vmem:[#allocation8 + $0x208] sm:$0xff]  }
 0x4a7   : > { %16450 = vmatprep.mubr.bf16.mxu1 %v20505_v27  ;;  %v20821_v24 = vpop.f32.mrf.mxu0  ;;  %16591 = vmatpush3.bf16.msra.mxu1 %v17397_v56  ;;  %v20825_v45 = vpop.f32.mrf.mxu1  ;;  %v17416_v27 = vld [vmem:[#allocation8 + $0x210] sm:$0xff]   ;;  %v11323_v56 = vsel %vm989_vm0, %v11313_v52, %v11322_v28  ;;  %v11343_v7 = vshrl.u32 %v14269_v41, 16  ;;  %v11346_v0 = vshll.u32 %v14269_v41, 16 }
 0x4a8   : > { %23499 = vst [vmem:[#allocation67_spill] sm:$0xff] %v20821_v24  ;;  %16592 = vmatprep.subr.bf16.mxu1 %v17403_v29  ;;  %23500 = vst [vmem:[#allocation72_spill] sm:$0xff] %v20825_v45  ;;  %v11339_v24 = vrot.slane %v11337_v33, 4  ;;  %v11331_v50 = vor.u32 %v11330_v26, %v11327_v22  ;;  %v11032_v26 = vld [vmem:[#allocation3 + $0x8c] sm:$0xf] }
 0x4a9   : > { %16825 = vmatpush3.bf16.msra.mxu0 %v17408_v6  ;;  %v20828_v19 = vpop.f32.mrf.mxu0  ;;  %v14270_v6 = vcombine.low %v11030_v25, %v11031_v17  ;;  %v20831_v61 = vpop.f32.mrf.mxu1  ;;  %v11345_v17 = vrot.slane %v11343_v7, 3 }
 0x4aa   : > { %16826 = vmatprep.subr.bf16.mxu0 %v17412_v31  ;;  %23501 = vst [vmem:[#allocation70_spill] sm:$0xff] %v20828_v19  ;;  %23502 = vst [vmem:[#allocation129_spill] sm:$0xff] %v20831_v61  ;;  %v11340_v58 = vor.u32 %v11339_v24, %v11336_v60  ;;  %v11332_v41 = vsel %vm989_vm0, %v11322_v28, %v11331_v50  ;;  %v11035_v61 = vld [vmem:[#allocation3 + $0x98] sm:$0xf] }
 0x4ab   : > { %16593 = vmatpush3.bf16.msra.mxu1 %v17403_v29  ;;  %v20833_v45 = vpop.f32.mrf.mxu0  ;;  %v11352_v33 = vshrl.u32 %v14270_v6, 16  ;;  %v11355_v25 = vshll.u32 %v14270_v6, 16  ;;  %v11033_v29 = vld [vmem:[#allocation3 + $0x90] sm:$0xf] }
 0x4ac   : > { %16683 = vmatmul.mubr.bf16.gmra.mxu0 %v11314_v2  ;;  %23503 = vst [vmem:[#allocation71_spill] sm:$0xff] %v20833_v45  ;;  %16738 = vmatprep.subr.bf16.mxu1 %v20823_v32  ;;  %v20836_v39 = vpop.f32.mrf.mxu1 }
 0x4ad   : > { %16686 = vmatprep.mubr.bf16.mxu0 %v11323_v56  ;;  %16827 = vmatpush3.bf16.msra.mxu0 %v17412_v31  ;;  %23504 = vst [vmem:[#allocation107_spill] sm:$0xff] %v20836_v39  ;;  %v20838_v52 = vpop.f32.mrf.mxu0  ;;  %v11034_v31 = vld [vmem:[#allocation3 + $0x94] sm:$0xf]  ;;  %v11348_v56 = vrot.slane %v11346_v0, 4  ;;  %v14271_v39 = vcombine.low %v11032_v26, %v11033_v29  ;;  %v11354_v6 = vrot.slane %v11352_v33, 3 }
 0x4ae   : > { %16828 = vmatprep.subr.bf16.mxu0 %v17416_v27  ;;  %23505 = vst [vmem:[#allocation73_spill] sm:$0xff] %v20838_v52  ;;  %16451 = vmatmul.mubr.bf16.gmra.mxu1 %v20508_v57  ;;  %v20842_v2 = vpop.f32.mrf.mxu1  ;;  %v17423_v57 = vld [vmem:[#allocation8 + $0x200] sm:$0xff]  }
 0x4af   : > { %16454 = vmatprep.mubr.bf16.mxu1 %v20531_v18  ;;  %23506 = vst [vmem:[#allocation110_spill] sm:$0xff] %v20842_v2  ;;  %v20844_v22 = vpop.f32.mrf.mxu0  ;;  %v11341_v18 = vsel %vm989_vm0, %v11331_v50, %v11340_v58  ;;  %v11357_v2 = vrot.slane %v11355_v25, 4  ;;  %v11349_v7 = vor.u32 %v11348_v56, %v11345_v17  ;;  %v11361_v0 = vshrl.u32 %v14271_v39, 16  ;;  %v11036_v17 = vld [vmem:[#allocation3 + $0x9c] sm:$0xf] }
 0x4b0   : > { %23507 = vst [vmem:[#allocation127_spill] sm:$0xff] %v20844_v22  ;;  %v20847_v60 = vpop.f32.mrf.mxu1  ;;  %v14272_v22 = vcombine.low %v11034_v31, %v11035_v61  ;;  %v11364_v29 = vshll.u32 %v14271_v39, 16  ;;  %v11037_v61 = vld [vmem:[#allocation3 + $0xa0] sm:$0xf]  ;;  %v11038_v31 = vld [vmem:[#allocation3 + $0xa4] sm:$0xf] }
 0x4b1   : > { %16829 = vmatpush3.bf16.msra.mxu0 %v17416_v27  ;;  %23508 = vst [vmem:[#allocation125_spill] sm:$0xff] %v20847_v60  ;;  %v20849_v24 = vpop.f32.mrf.mxu0  ;;  %v11358_v50 = vor.u32 %v11357_v2, %v11354_v6  ;;  %v11350_v39 = vsel %vm989_vm0, %v11340_v58, %v11349_v7  ;;  %v11363_v56 = vrot.slane %v11361_v0, 3 }
 0x4b2   : > { %16830 = vmatprep.subr.bf16.mxu0 %v17419_v21  ;;  %23509 = vst [vmem:[#allocation74_spill] sm:$0xff] %v20849_v24  ;;  %v20852_v27 = vpop.f32.mrf.mxu1  ;;  %v11370_v33 = vshrl.u32 %v14272_v22, 16  ;;  %v11373_v25 = vshll.u32 %v14272_v22, 16 }
 0x4b3   : > { %23510 = vst [vmem:[#allocation77_spill] sm:$0xff] %v20852_v27  ;;  %v20854_v28 = vpop.f32.mrf.mxu0  ;;  %v11039_v27 = vld [vmem:[#allocation3 + $0xa8] sm:$0xf] }
 0x4b4   : > { %16687 = vmatmul.mubr.bf16.gmra.mxu0 %v11332_v41  ;;  %23511 = vst [vmem:[#allocation81_spill] sm:$0xff] %v20854_v28  ;;  %v20856_v26 = vpop.f32.mrf.mxu1  ;;  %v11372_v22 = vrot.slane %v11370_v33, 3  ;;  %v11375_v6 = vrot.slane %v11373_v25, 4  ;;  %v11041_v33 = vld [vmem:[#allocation3 + $0xb0] sm:$0xf] }
 0x4b5   : > { %16690 = vmatprep.mubr.bf16.mxu0 %v11341_v18  ;;  %16831 = vmatpush3.bf16.msra.mxu0 %v17419_v21  ;;  %23512 = vst [vmem:[#allocation76_spill] sm:$0xff] %v20856_v26  ;;  %v20858_v60 = vpop.f32.mrf.mxu0  ;;  %v11366_v18 = vrot.slane %v11364_v29, 4  ;;  %v14273_v26 = vcombine.low %v11036_v17, %v11037_v61 }
 0x4b6   : > { %16832 = vmatprep.subr.bf16.mxu0 %v17423_v57  ;;  %23513 = vst [vmem:[#allocation83_spill] sm:$0xff] %v20858_v60  ;;  %16455 = vmatmul.mubr.bf16.gmra.mxu1 %v20535_v47  ;;  %v20862_v41 = vpop.f32.mrf.mxu1  ;;  %v11063_v60 = vld [vmem:[#allocation3 + $0x108] sm:$0xf] }
 0x4b7   : > { %16458 = vmatprep.mubr.bf16.mxu1 %v20538_v12  ;;  %23514 = vst [vmem:[#allocation78_spill] sm:$0xff] %v20862_v41  ;;  %v20864_v21 = vpop.f32.mrf.mxu0  ;;  %v11359_v12 = vsel %vm989_vm0, %v11349_v7, %v11358_v50  ;;  %v14274_v41 = vcombine.low %v11038_v31, %v11039_v27  ;;  %v11367_v58 = vor.u32 %v11366_v18, %v11363_v56  ;;  %v11379_v0 = vshrl.u32 %v14273_v26, 16  ;;  %v11042_v27 = vld [vmem:[#allocation3 + $0xb4] sm:$0xf]  ;;  %v11040_v56 = vld [vmem:[#allocation3 + $0xac] sm:$0xf] }
 0x4b8   : > { %23515 = vst [vmem:[#allocation80_spill] sm:$0xff] %v20864_v21  ;;  %v20867_v47 = vpop.f32.mrf.mxu1  ;;  %v11382_v29 = vshll.u32 %v14273_v26, 16 }
 0x4b9   : > { %16833 = vmatpush3.bf16.msra.mxu0 %v17423_v57  ;;  %23516 = vst [vmem:[#allocation79_spill] sm:$0xff] %v20867_v47  ;;  %v20869_v2 = vpop.f32.mrf.mxu0  ;;  %v11388_v47 = vshrl.u32 %v14274_v41, 16  ;;  %v11391_v7 = vshll.u32 %v14274_v41, 16  ;;  %v11368_v26 = vsel %vm989_vm0, %v11358_v50, %v11367_v58  ;;  %v11381_v18 = vrot.slane %v11379_v0, 3 }
 0x4ba   : > { %23517 = vst [vmem:[#allocation85_spill] sm:$0xff] %v20869_v2  ;;  %v20872_v21 = vpop.f32.mrf.mxu1 }
 0x4bb   : > { %23518 = vst [vmem:[#allocation91_spill] sm:$0xff] %v20872_v21  ;;  %v20874_v57 = vpop.f32.mrf.mxu0  ;;  %v11043_v21 = vld [vmem:[#allocation3 + $0xb8] sm:$0xf] }
 0x4bc   : > { %16691 = vmatmul.mubr.bf16.gmra.mxu0 %v11350_v39  ;;  %23519 = vst [vmem:[#allocation104_spill] sm:$0xff] %v20874_v57  ;;  %v11376_v39 = vor.u32 %v11375_v6, %v11372_v22  ;;  %v11393_v22 = vrot.slane %v11391_v7, 4  ;;  %v14276_v6 = vcombine.low %v11042_v27, %v11043_v21  ;;  %v11046_v21 = vld [vmem:[#allocation3 + $0xc4] sm:$0xf] }
 0x4bd   : > { %16694 = vmatprep.mubr.bf16.mxu0 %v11359_v12  ;;  %v20876_v61 = vpop.f32.mrf.mxu1  ;;  %v20878_v17 = vpop.f32.mrf.mxu0  ;;  %v11384_v12 = vrot.slane %v11382_v29, 4 }
 0x4be   : > { %23520 = vst [vmem:[#allocation86_spill] sm:$0xff] %v20876_v61  ;;  %23521 = vst [vmem:[#allocation82_spill] sm:$0xff] %v20878_v17  ;;  %16459 = vmatmul.mubr.bf16.gmra.mxu1 %v20557_v38  ;;  %v14275_v61 = vcombine.low %v11040_v56, %v11041_v33  ;;  %v11377_v41 = vsel %vm989_vm0, %v11367_v58, %v11376_v39  ;;  %v11409_v58 = vshll.u32 %v14276_v6, 16 }
 0x4bf   : > { %16462 = vmatprep.mubr.bf16.mxu1 %v20563_v46  ;;  %v20882_v25 = vpop.f32.mrf.mxu1  ;;  %v20884_v31 = vpop.f32.mrf.mxu0  ;;  %v11390_v46 = vrot.slane %v11388_v47, 3  ;;  %v11385_v50 = vor.u32 %v11384_v12, %v11381_v18  ;;  %v11045_v47 = vld [vmem:[#allocation3 + $0xc0] sm:$0xf]  ;;  %v11044_v18 = vld [vmem:[#allocation3 + $0xbc] sm:$0xf] }
 0x4c0   : > { %23522 = vst [vmem:[#allocation87_spill] sm:$0xff] %v20882_v25  ;;  %23523 = vst [vmem:[#allocation84_spill] sm:$0xff] %v20884_v31  ;;  %v11397_v0 = vshrl.u32 %v14275_v61, 16  ;;  %v11400_v29 = vshll.u32 %v14275_v61, 16 }
 0x4c1   : > { %v20887_v17 = vpop.f32.mrf.mxu1  ;;  %v20889_v38 = vpop.f32.mrf.mxu0  ;;  %v11386_v61 = vsel %vm989_vm0, %v11376_v39, %v11385_v50 }
 0x4c2   : > { %23524 = vst [vmem:[#allocation100_spill] sm:$0xff] %v20887_v17  ;;  %23525 = vst [vmem:[#allocation109_spill] sm:$0xff] %v20889_v38  ;;  %v11406_v17 = vshrl.u32 %v14276_v6, 16  ;;  %v11399_v12 = vrot.slane %v11397_v0, 3 }
 0x4c3   : > { %v20892_v25 = vpop.f32.mrf.mxu1  ;;  %v20894_v31 = vpop.f32.mrf.mxu0 }
 0x4c4   : > { %16695 = vmatmul.mubr.bf16.gmra.mxu0 %v11368_v26  ;;  %23526 = vst [vmem:[#allocation108_spill] sm:$0xff] %v20892_v25  ;;  %23527 = vst [vmem:[#allocation101_spill] sm:$0xff] %v20894_v31  ;;  %v11394_v26 = vor.u32 %v11393_v22, %v11390_v46  ;;  %v11047_v25 = vld [vmem:[#allocation3 + $0xc8] sm:$0xf]  ;;  %v11411_v22 = vrot.slane %v11409_v58, 4 }
 0x4c5   : > { %16698 = vmatprep.mubr.bf16.mxu0 %v11377_v41  ;;  %v20898_v56 = vpop.f32.mrf.mxu0  ;;  %v11402_v41 = vrot.slane %v11400_v29, 4  ;;  %v14278_v6 = vcombine.low %v11046_v21, %v11047_v25  ;;  %v11050_v25 = vld [vmem:[#allocation3 + $0xd4] sm:$0xf] }
 0x4c6   : > { %v20896_v33 = vpop.f32.mrf.mxu1  ;;  %23529 = vst [vmem:[#allocation111_spill] sm:$0xff] %v20898_v56  ;;  %16463 = vmatmul.mubr.bf16.gmra.mxu1 %v20575_v43  ;;  %v11395_v46 = vsel %vm989_vm0, %v11385_v50, %v11394_v26 }
 0x4c7   : > { %23528 = vst [vmem:[#allocation90_spill] sm:$0xff] %v20896_v33  ;;  %16466 = vmatprep.mubr.bf16.mxu1 %v20594_v37  ;;  %v20904_v27 = vpop.f32.mrf.mxu0  ;;  %v14277_v33 = vcombine.low %v11044_v18, %v11045_v47  ;;  %v11408_v37 = vrot.slane %v11406_v17, 3  ;;  %v11403_v39 = vor.u32 %v11402_v41, %v11399_v12  ;;  %v11427_v50 = vshll.u32 %v14278_v6, 16  ;;  %v11049_v17 = vld [vmem:[#allocation3 + $0xd0] sm:$0xf] }
 0x4c8   : > { %v20902_v7 = vpop.f32.mrf.mxu1  ;;  %23531 = vst [vmem:[#allocation96_spill] sm:$0xff] %v20904_v27  ;;  %v11048_v12 = vld [vmem:[#allocation3 + $0xcc] sm:$0xf] }
 0x4c9   : > { %23530 = vst [vmem:[#allocation62_spill] sm:$0xff] %v20902_v7  ;;  %v20909_v43 = vpop.f32.mrf.mxu0  ;;  %v11415_v0 = vshrl.u32 %v14277_v33, 16  ;;  %v11418_v29 = vshll.u32 %v14277_v33, 16  ;;  %v11404_v33 = vsel %vm989_vm0, %v11394_v26, %v11403_v39 }
 0x4ca   : > { %v20907_v56 = vpop.f32.mrf.mxu1  ;;  %23533 = vst [vmem:[#allocation105_spill] sm:$0xff] %v20909_v43 }
 0x4cb   : > { %23532 = vst [vmem:[#allocation95_spill] sm:$0xff] %v20907_v56  ;;  %v20914_v27 = vpop.f32.mrf.mxu0  ;;  %v11424_v56 = vshrl.u32 %v14278_v6, 16  ;;  %v11417_v41 = vrot.slane %v11415_v0, 3 }
 0x4cc   : > { %16699 = vmatmul.mubr.bf16.gmra.mxu0 %v11386_v61  ;;  %v20912_v7 = vpop.f32.mrf.mxu1  ;;  %23535 = vst [vmem:[#allocation136_spill] sm:$0xff] %v20914_v27  ;;  %v11412_v61 = vor.u32 %v11411_v22, %v11408_v37  ;;  %v11429_v22 = vrot.slane %v11427_v50, 4 }
 0x4cd   : > { %16702 = vmatprep.mubr.bf16.mxu0 %v11395_v46  ;;  %23534 = vst [vmem:[#allocation114_spill] sm:$0xff] %v20912_v7  ;;  %v20918_v18 = vpop.f32.mrf.mxu0  ;;  %v11420_v46 = vrot.slane %v11418_v29, 4  ;;  %v14279_v7 = vcombine.low %v11048_v12, %v11049_v17 }
 0x4ce   : > { %v20916_v47 = vpop.f32.mrf.mxu1  ;;  %23536 = vst [vmem:[#allocation137_spill] sm:$0xff] %v20918_v18  ;;  %16467 = vmatmul.mubr.bf16.gmra.mxu1 %v20601_v11  ;;  %v11051_v18 = vld [vmem:[#allocation3 + $0xd8] sm:$0xf]  ;;  %v11413_v37 = vsel %vm989_vm0, %v11403_v39, %v11412_v61 }
 0x4cf   : > { %16470 = vmatprep.mubr.bf16.mxu1 %v20617_v10  ;;  %v20924_v21 = vpop.f32.mrf.mxu0  ;;  %v11426_v10 = vrot.slane %v11424_v56, 3  ;;  %v14280_v6 = vcombine.low %v11050_v25, %v11051_v18  ;;  %v11421_v26 = vor.u32 %v11420_v46, %v11417_v41  ;;  %v11433_v0 = vshrl.u32 %v14279_v7, 16  ;;  %v11053_v56 = vld [vmem:[#allocation3 + $0xe0] sm:$0xf]  ;;  %v11054_v18 = vld [vmem:[#allocation3 + $0xe4] sm:$0xf] }
 0x4d0   : > { %v20922_v58 = vpop.f32.mrf.mxu1  ;;  %23537 = vst [vmem:[#allocation138_spill] sm:$0xff] %v20924_v21  ;;  %v11436_v29 = vshll.u32 %v14279_v7, 16  ;;  %v11052_v41 = vld [vmem:[#allocation3 + $0xdc] sm:$0xf] }
 0x4d1   : > { %v20929_v11 = vpop.f32.mrf.mxu0  ;;  %v11445_v39 = vshll.u32 %v14280_v6, 16  ;;  %v11422_v7 = vsel %vm989_vm0, %v11412_v61, %v11421_v26  ;;  %v11435_v46 = vrot.slane %v11433_v0, 3 }
 0x4d2   : > { %v20927_v27 = vpop.f32.mrf.mxu1  ;;  %23538 = vst [vmem:[#allocation139_spill] sm:$0xff] %v20929_v11  ;;  %v11442_v11 = vshrl.u32 %v14280_v6, 16 }
 0x4d3   : > { %v20934_v21 = vpop.f32.mrf.mxu0 }
 0x4d4   : > { %16703 = vmatmul.mubr.bf16.gmra.mxu0 %v11404_v33  ;;  %v20932_v43 = vpop.f32.mrf.mxu1  ;;  %23539 = vst [vmem:[#allocation140_spill] sm:$0xff] %v20934_v21  ;;  %v11430_v33 = vor.u32 %v11429_v22, %v11426_v10  ;;  %v14281_v21 = vcombine.low %v11052_v41, %v11053_v56  ;;  %v11447_v22 = vrot.slane %v11445_v39, 4 }
 0x4d5   : > { %16706 = vmatprep.mubr.bf16.mxu0 %v11413_v37  ;;  %v20938_v12 = vpop.f32.mrf.mxu0  ;;  %v11438_v37 = vrot.slane %v11436_v29, 4 }
 0x4d6   : > { %v20936_v17 = vpop.f32.mrf.mxu1  ;;  %23540 = vst [vmem:[#allocation141_spill] sm:$0xff] %v20938_v12  ;;  %16471 = vmatmul.mubr.bf16.gmra.mxu1 %v20620_v44  ;;  %v11055_v12 = vld [vmem:[#allocation3 + $0xe8] sm:$0xf]  ;;  %v11431_v10 = vsel %vm989_vm0, %v11421_v26, %v11430_v33  ;;  %v11451_v0 = vshrl.u32 %v14281_v21, 16  ;;  %v11454_v29 = vshll.u32 %v14281_v21, 16 }
 0x4d7   : > { %16474 = vmatprep.mubr.bf16.mxu1 %v20641_v35  ;;  %v20944_v25 = vpop.f32.mrf.mxu0  ;;  %v11444_v35 = vrot.slane %v11442_v11, 3  ;;  %v14282_v6 = vcombine.low %v11054_v18, %v11055_v12  ;;  %v11439_v61 = vor.u32 %v11438_v37, %v11435_v46  ;;  %v11057_v11 = vld [vmem:[#allocation3 + $0xf0] sm:$0xf]  ;;  %v11058_v12 = vld [vmem:[#allocation3 + $0xf4] sm:$0xf] }
 0x4d8   : > { %v20942_v50 = vpop.f32.mrf.mxu1  ;;  %23541 = vst [vmem:[#allocation142_spill] sm:$0xff] %v20944_v25  ;;  %v11056_v46 = vld [vmem:[#allocation3 + $0xec] sm:$0xf]  ;;  %v11453_v37 = vrot.slane %v11451_v0, 3 }
 0x4d9   : > { %v20949_v44 = vpop.f32.mrf.mxu0  ;;  %v11463_v26 = vshll.u32 %v14282_v6, 16  ;;  %v11440_v21 = vsel %vm989_vm0, %v11430_v33, %v11439_v61 }
 0x4da   : > { %v20947_v31 = vpop.f32.mrf.mxu1  ;;  %23542 = vst [vmem:[#allocation143_spill] sm:$0xff] %v20949_v44  ;;  %v11460_v44 = vshrl.u32 %v14282_v6, 16 }
 0x4db   : > { %v20954_v25 = vpop.f32.mrf.mxu0  ;;  %v11465_v6 = vrot.slane %v11463_v26, 4  ;;  %v11060_v26 = vld [vmem:[#allocation3 + $0xfc] sm:$0xf] }
 0x4dc   : > { %16707 = vmatmul.mubr.bf16.gmra.mxu0 %v11422_v7  ;;  %v20952_v38 = vpop.f32.mrf.mxu1  ;;  %23543 = vst [vmem:[#allocation144_spill] sm:$0xff] %v20954_v25  ;;  %v11448_v7 = vor.u32 %v11447_v22, %v11444_v35  ;;  %v14283_v25 = vcombine.low %v11056_v46, %v11057_v11  ;;  %v11061_v11 = vld [vmem:[#allocation3 + $0x100] sm:$0xf] }
 0x4dd   : > { %16710 = vmatprep.mubr.bf16.mxu0 %v11431_v10  ;;  %v20959_v41 = vpop.f32.mrf.mxu0  ;;  %v11456_v10 = vrot.slane %v11454_v29, 4 }
 0x4de   : > { %v20956_v56 = vpop.f32.mrf.mxu1  ;;  %16475 = vmatmul.mubr.bf16.gmra.mxu1 %v20644_v13  ;;  %23544 = vst [vmem:[#allocation145_spill] sm:$0xff] %v20959_v41  ;;  %v11059_v13 = vld [vmem:[#allocation3 + $0xf8] sm:$0xf]  ;;  %v11449_v22 = vsel %vm989_vm0, %v11439_v61, %v11448_v7  ;;  %v11469_v0 = vshrl.u32 %v14283_v25, 16  ;;  %v11472_v29 = vshll.u32 %v14283_v25, 16 }
 0x4df   : > { %16478 = vmatprep.mubr.bf16.mxu1 %v20667_v30  ;;  %v20964_v18 = vpop.f32.mrf.mxu0  ;;  %v11462_v30 = vrot.slane %v11460_v44, 3  ;;  %v14284_v41 = vcombine.low %v11058_v12, %v11059_v13  ;;  %v11457_v33 = vor.u32 %v11456_v10, %v11453_v37  ;;  %v11062_v12 = vld [vmem:[#allocation3 + $0x104] sm:$0xf]  ;;  %v14285_v37 = vcombine.low %v11060_v26, %v11061_v11 }
 0x4e0   : > { %v20962_v39 = vpop.f32.mrf.mxu1  ;;  %23545 = vst [vmem:[#allocation146_spill] sm:$0xff] %v20964_v18  ;;  %v11471_v10 = vrot.slane %v11469_v0, 3 }
 0x4e1   : > { %v20969_v35 = vpop.f32.mrf.mxu0  ;;  %v11478_v61 = vshrl.u32 %v14284_v41, 16  ;;  %v11481_v44 = vshll.u32 %v14284_v41, 16  ;;  %v11458_v25 = vsel %vm989_vm0, %v11448_v7, %v11457_v33  ;;  %v11487_v11 = vshrl.u32 %v14285_v37, 16 }
 0x4e2   : > { %v20967_v57 = vpop.f32.mrf.mxu1  ;;  %23546 = vst [vmem:[#allocation147_spill] sm:$0xff] %v20969_v35  ;;  %v11490_v7 = vshll.u32 %v14285_v37, 16 }
 0x4e3   : > { %v20974_v18 = vpop.f32.mrf.mxu0  ;;  %v11489_v37 = vrot.slane %v11487_v11, 3 }
 0x4e4   : > { %16711 = vmatmul.mubr.bf16.gmra.mxu0 %v11440_v21  ;;  %v20972_v2 = vpop.f32.mrf.mxu1  ;;  %23547 = vst [vmem:[#allocation148_spill] sm:$0xff] %v20974_v18  ;;  %v11466_v21 = vor.u32 %v11465_v6, %v11462_v30  ;;  %v11474_v18 = vrot.slane %v11472_v29, 4  ;;  %v11483_v30 = vrot.slane %v11481_v44, 4  ;;  %v14286_v6 = vcombine.low %v11062_v12, %v11063_v60  ;;  %v11065_v29 = vld [vmem:[#allocation3 + $0x110] sm:$0xf] }
 0x4e5   : > { %16714 = vmatprep.mubr.bf16.mxu0 %v11449_v22  ;;  %v20979_v35 = vpop.f32.mrf.mxu0  ;;  %v11066_v44 = vld [vmem:[#allocation3 + $0x114] sm:$0xf]  ;;  %v11064_v60 = vld [vmem:[#allocation3 + $0x10c] sm:$0xf] }
 0x4e6   : > { %v20976_v46 = vpop.f32.mrf.mxu1  ;;  %16479 = vmatmul.mubr.bf16.gmra.mxu1 %v20674_v36  ;;  %23548 = vst [vmem:[#allocation149_spill] sm:$0xff] %v20979_v35  ;;  %v11467_v41 = vsel %vm989_vm0, %v11457_v33, %v11466_v21  ;;  %v11475_v0 = vor.u32 %v11474_v18, %v11471_v10  ;;  %v11496_v33 = vshrl.u32 %v14286_v6, 16  ;;  %v11492_v18 = vrot.slane %v11490_v7, 4 }
 0x4e7   : > { %16482 = vmatprep.mubr.bf16.mxu1 %v20677_v40  ;;  %v20984_v22 = vpop.f32.mrf.mxu0  ;;  %v11480_v40 = vrot.slane %v11478_v61, 3  ;;  %v11499_v61 = vshll.u32 %v14286_v6, 16  ;;  %v14287_v10 = vcombine.low %v11064_v60, %v11065_v29 }
 0x4e8   : > { %v20982_v13 = vpop.f32.mrf.mxu1  ;;  %23549 = vst [vmem:[#allocation150_spill] sm:$0xff] %v20984_v22  ;;  %v11476_v24 = vsel %vm989_vm0, %v11466_v21, %v11475_v0  ;;  %v11493_v11 = vor.u32 %v11492_v18, %v11489_v37 }
 0x4e9   : > { %v11501_v6 = vrot.slane %v11499_v61, 4  ;;  %v11505_v7 = vshrl.u32 %v14287_v10, 16  ;;  %v11508_v29 = vshll.u32 %v14287_v10, 16  ;;  %v11069_v61 = vld [vmem:[#allocation3 + $0x120] sm:$0xf] }
 0x4ea   : > { %v20987_v36 = vpop.f32.mrf.mxu1  ;;  %v20989_v35 = vpop.f32.mrf.mxu0 }
 0x4eb   : > { %23550 = vst [vmem:[#allocation151_spill] sm:$0xff] %v20989_v35  ;;  %v11507_v10 = vrot.slane %v11505_v7, 3  ;;  %v11072_v7 = vld [vmem:[#allocation3 + $0x12c] sm:$0xf] }
 0x4ec   : > { %16715 = vmatmul.mubr.bf16.gmra.mxu0 %v11458_v25  ;;  %v20992_v28 = vpop.f32.mrf.mxu1  ;;  %v20994_v22 = vpop.f32.mrf.mxu0  ;;  %v11484_v25 = vor.u32 %v11483_v30, %v11480_v40 }
 0x4ed   : > { %16718 = vmatprep.mubr.bf16.mxu0 %v11467_v41  ;;  %23551 = vst [vmem:[#allocation152_spill] sm:$0xff] %v20994_v22  ;;  %v11067_v22 = vld [vmem:[#allocation3 + $0x118] sm:$0xf] }
 0x4ee   : > { %v20996_v26 = vpop.f32.mrf.mxu1  ;;  %16483 = vmatmul.mubr.bf16.gmra.mxu1 %v20696_v53  ;;  %v20999_v35 = vpop.f32.mrf.mxu0  ;;  %v14288_v53 = vcombine.low %v11066_v44, %v11067_v22  ;;  %v11485_v30 = vsel %vm989_vm0, %v11475_v0, %v11484_v25  ;;  %v17409_v22 = vld [vmem:[#allocation3 + $0x20] sm:$0xff]   ;;  %v11494_v18 = vsel %vm989_vm0, %v11484_v25, %v11493_v11  ;;  %v21036_v25 = vld [vmem:[#allocation3 + $0x28] sm:$0xff]  }
 0x4ef   : > { %23552 = vst [vmem:[#allocation153_spill] sm:$0xff] %v20999_v35  ;;  %16486 = vmatprep.mubr.bf16.mxu1 %v20705_v42  ;;  %v11498_v42 = vrot.slane %v11496_v33, 3  ;;  %v11068_v33 = vld [vmem:[#allocation3 + $0x11c] sm:$0xf] }
 0x4f0   : > { %v21002_v12 = vpop.f32.mrf.mxu1  ;;  %v21004_v41 = vpop.f32.mrf.mxu0  ;;  %v11514_v60 = vshrl.u32 %v14288_v53, 16  ;;  %v11517_v21 = vshll.u32 %v14288_v53, 16  ;;  %v11510_v53 = vrot.slane %v11508_v29, 4 }
 0x4f1   : > { %23553 = vst [vmem:[#allocation154_spill] sm:$0xff] %v21004_v41  ;;  %v11502_v0 = vor.u32 %v11501_v6, %v11498_v42  ;;  %v14289_v6 = vcombine.low %v11068_v33, %v11069_v61 }
 0x4f2   : > { %v21007_v52 = vpop.f32.mrf.mxu1  ;;  %v21009_v40 = vpop.f32.mrf.mxu0  ;;  %v11516_v45 = vrot.slane %v11514_v60, 3  ;;  %v11519_v19 = vrot.slane %v11517_v21, 4  ;;  %v11511_v29 = vor.u32 %v11510_v53, %v11507_v10 }
 0x4f3   : > { %23554 = vst [vmem:[#allocation155_spill] sm:$0xff] %v21009_v40  ;;  %v11071_v40 = vld [vmem:[#allocation3 + $0x128] sm:$0xf] }
 0x4f4   : > { %16719 = vmatmul.mubr.bf16.gmra.mxu0 %v11476_v24  ;;  %v21012_v35 = vpop.f32.mrf.mxu1  ;;  %v21014_v41 = vpop.f32.mrf.mxu0  ;;  %v11520_v60 = vor.u32 %v11519_v19, %v11516_v45  ;;  %v10323_v19 = vshll.u32 %v21036_v25, 16  ;;  %v11512_v45 = vsel %vm989_vm0, %v11502_v0, %v11511_v29 }
 0x4f5   : > { %16722 = vmatprep.mubr.bf16.mxu0 %v11485_v30  ;;  %23555 = vst [vmem:[#allocation156_spill] sm:$0xff] %v21014_v41  ;;  %v11070_v30 = vld [vmem:[#allocation3 + $0x124] sm:$0xf] }
 0x4f6   : > { %v21016_v44 = vpop.f32.mrf.mxu1  ;;  %16487 = vmatmul.mubr.bf16.gmra.mxu1 %v20715_v8  ;;  %v21019_v24 = vpop.f32.mrf.mxu0  ;;  %v10318_v8 = vshll.u32 %v17409_v22, 16 }
 0x4f7   : > { %23556 = vst [vmem:[#allocation157_spill] sm:$0xff] %v21019_v24  ;;  %16490 = vmatprep.mubr.bf16.mxu1 %v20736_v20  ;;  %v11503_v20 = vsel %vm989_vm0, %v11493_v11, %v11502_v0  ;;  %v14290_v24 = vcombine.low %v11070_v30, %v11071_v40  ;;  %v11523_v11 = vshrl.u32 %v14289_v6, 16  ;;  %v11526_v40 = vshll.u32 %v14289_v6, 16 }
 0x4f8   : > { %v21022_v41 = vpop.f32.mrf.mxu1  ;;  %v21024_v37 = vpop.f32.mrf.mxu0  ;;  %v10320_v21 = vrot.slane %v10318_v8, 1  ;;  %v10316_v30 = vshrl.u32 %v17409_v22, 16  ;;  %v10331_v8 = vshll.u32 %v17414_v4, 16 }
 0x4f9   : > { %23557 = vst [vmem:[#allocation158_spill] sm:$0xff] %v21024_v37  ;;  %v11532_v33 = vshrl.u32 %v14290_v24, 16  ;;  %v11535_v61 = vshll.u32 %v14290_v24, 16  ;;  %v11528_v22 = vrot.slane %v11526_v40, 4 }
 0x4fa   : > { %v21027_v23 = vpop.f32.mrf.mxu1  ;;  %v10321_v53 = vor.u32 %v10320_v21, %v10316_v30  ;;  %v21059_v21 = vld [vmem:[#allocation3 + $0x38] sm:$0xff]   ;;  %v10333_v30 = vrot.slane %v10331_v8, 1  ;;  %v10335_v8 = vshrl.u32 %v17414_v4, 16 }
 0x4fb   : > { %v11534_v24 = vrot.slane %v11532_v33, 3  ;;  %v10339_v51 = vshll.u32 %v21059_v21, 16 }
 0x4fc   : > { %v21029_v42 = vpop.f32.mrf.mxu0  ;;  %16723 = vmatmul.mubr.bf16.gmra.mxu0 %v11494_v18  ;;  %v21032_v49 = vpop.f32.mrf.mxu1 }
 0x4fd   : > { %23558 = vst [vmem:[#allocation159_spill] sm:$0xff] %v21029_v42  ;;  %16726 = vmatprep.mubr.bf16.mxu0 %v11503_v20  ;;  %v14291_v20 = vcombine.low %v11072_v7, %v11072_v7  ;;  %v11537_v7 = vrot.slane %v11535_v61, 4  ;;  %v17420_v42 = vld [vmem:[#allocation3 + $0x30] sm:$0xff]  }
 0x4fe   : > { %v21034_v37 = vpop.f32.mrf.mxu0  ;;  %v21038_v48 = vpop.f32.mrf.mxu1  ;;  %16491 = vmatmul.mubr.bf16.gmra.mxu1 %v20743_v9  ;;  %v11521_v9 = vsel %vm989_vm0, %v11511_v29, %v11520_v60  ;;  %v10325_v29 = vrot.slane %v10323_v19, 1 }
 0x4ff   : > { %23559 = vst [vmem:[#allocation160_spill] sm:$0xff] %v21034_v37  ;;  %16494 = vmatprep.mubr.bf16.mxu1 %v20753_v14  ;;  %v11525_v14 = vrot.slane %v11523_v11, 3  ;;  %v11544_v15 = vshll.u32 %v14291_v20, 16  ;;  %v11538_v61 = vor.u32 %v11537_v7, %v11534_v24 }
 0x500   : > { %v21041_v18 = vpop.f32.mrf.mxu0  ;;  %v21044_v37 = vpop.f32.mrf.mxu1  ;;  %v10326_v40 = vsel %vm1747_vm1, %v10321_v53, %v10325_v29 }
 0x501   : > { %23560 = vst [vmem:[#allocation161_spill] sm:$0xff] %v21041_v18  ;;  %v11529_v33 = vor.u32 %v11528_v22, %v11525_v14 }
 0x502   : > { %v21046_v10 = vpop.f32.mrf.mxu0  ;;  %v21051_v18 = vpop.f32.mrf.mxu1 }
 0x503   : > { %23561 = vst [vmem:[#allocation162_spill] sm:$0xff] %v21046_v10  ;;  %v11541_v10 = vshrl.u32 %v14291_v20, 16  ;;  %v17422_v20 = vld [vmem:[#allocation3 + $0x40] sm:$0xff]   ;;  %v11530_v53 = vsel %vm989_vm0, %v11520_v60, %v11529_v33  ;;  %v12710_v60 = vshrl.u32 %v17420_v42, 16 }
 0x504   : > { %v21053_v6 = vpop.f32.mrf.mxu0  ;;  %16727 = vmatmul.mubr.bf16.gmra.mxu0 %v11512_v45  ;;  %v21055_v54 = vpop.f32.mrf.mxu1  ;;  %v12712_v45 = vshll.u32 %v17420_v42, 16  ;;  %v10347_v7 = vshll.u32 %v17422_v20, 16 }
 0x505   : > { %23562 = vst [vmem:[#allocation163_spill] sm:$0xff] %v21053_v6  ;;  %16730 = vmatprep.mubr.bf16.mxu0 %v11521_v9  ;;  %v11543_v9 = vrot.slane %v11541_v10, 3  ;;  %v11546_v6 = vrot.slane %v11544_v15, 4  ;;  %v11539_v15 = vsel %vm989_vm0, %v11529_v33, %v11538_v61  ;;  %v10337_v10 = vor.u32 %v10335_v8, %v10333_v30 }
 0x506   : > { %v21057_v0 = vpop.f32.mrf.mxu0  ;;  %v21061_v1 = vpop.f32.mrf.mxu1  ;;  %16495 = vmatmul.mubr.bf16.gmra.mxu1 %v20770_v59  ;;  %v10327_v59 = vshrl.u32 %v21036_v25, 16  ;;  %v12714_v24 = vrot.slane %v12712_v45, 1  ;;  %v10341_v25 = vrot.slane %v10339_v51, 1 }
 0x507   : > { %23563 = vst [vmem:[#allocation164_spill] sm:$0xff] %v21057_v0  ;;  %23564 = vst [vmem:[#allocation165_spill] sm:$0xff] %v21061_v1  ;;  %16594 = vmatprep.mubr.bf16.mxu1 %v10326_v40  ;;  %v17425_v40 = vld [vmem:[#allocation3 + $0x40] sm:$0xff]   ;;  %v21086_v1 = vld [vmem:[#allocation3 + $0x48] sm:$0xff]  }
 0x508   : > { %v21064_v11 = vpop.f32.mrf.mxu0  ;;  %v21067_v0 = vpop.f32.mrf.mxu1  ;;  %v10329_v4 = vor.u32 %v10327_v59, %v10325_v29  ;;  %v12715_v29 = vor.u32 %v12714_v24, %v12710_v60  ;;  %v12725_v59 = vshll.u32 %v17425_v40, 16  ;;  %v10343_v24 = vshrl.u32 %v21059_v21, 16 }
 0x509   : > { %23565 = vst [vmem:[#allocation166_spill] sm:$0xff] %v21064_v11  ;;  %23566 = vst [vmem:[#allocation167_spill] sm:$0xff] %v21067_v0  ;;  %v12729_v21 = vshrl.u32 %v17425_v40, 16 }
 0x50a   : > { %v21069_v19 = vpop.f32.mrf.mxu0  ;;  %v21076_v14 = vpop.f32.mrf.mxu1  ;;  %v10334_v33 = vsel %vm1747_vm1, %v10329_v4, %v10333_v30  ;;  %v10351_v4 = vshrl.u32 %v17422_v20, 16  ;;  %v10345_v20 = vor.u32 %v10343_v24, %v10341_v25 }
 0x50b   : > { %23567 = vst [vmem:[#allocation168_spill] sm:$0xff] %v21069_v19  ;;  %23568 = vst [vmem:[#allocation169_spill] sm:$0xff] %v21076_v14  ;;  %v11547_v19 = vor.u32 %v11546_v6, %v11543_v9  ;;  %v12717_v14 = vshll.u32 %v21072_v5, 16  ;;  %v10342_v6 = vsel %vm1747_vm1, %v10337_v10, %v10341_v25  ;;  %v10349_v9 = vrot.slane %v10347_v7, 1  ;;  %v17437_v10 = vld [vmem:[#allocation8 + $0x1e8] sm:$0xff]  }
 0x50c   : > { %v21078_v22 = vpop.f32.mrf.mxu0  ;;  %16731 = vmatmul.mubr.bf16.gmra.mxu0 %v11530_v53  ;;  %v21081_v11 = vpop.f32.mrf.mxu1  ;;  %v17428_v53 = vld [vmem:[#allocation8 + $0x1f0] sm:$0xff]  }
 0x50d   : > { %23569 = vst [vmem:[#allocation170_spill] sm:$0xff] %v21078_v22  ;;  %16734 = vmatprep.mubr.bf16.mxu0 %v11539_v15  ;;  %v17427_v15 = vld [vmem:[#allocation3 + $0x50] sm:$0xff]   ;;  %v11548_v51 = vsel %vm989_vm0, %v11538_v61, %v11547_v19  ;;  %v12719_v30 = vrot.slane %v12717_v14, 1  ;;  %v10353_v61 = vor.u32 %v10351_v4, %v10349_v9  ;;  %v12727_v19 = vrot.slane %v12725_v59, 1 }
 0x50e   : > { %v21083_v0 = vpop.f32.mrf.mxu0  ;;  %v21089_v8 = vpop.f32.mrf.mxu1  ;;  %16595 = vmatmul.mubr.bf16.vlgmr.msra.gmra.mxu1 %v10334_v33  ;;  %v21101_v33 = vld [vmem:[#allocation3 + $0x48] sm:$0xff]   ;;  %v17430_v14 = vld [vmem:[#allocation3 + $0x50] sm:$0xff]   ;;  %v10350_v59 = vsel %vm1747_vm1, %v10345_v20, %v10349_v9  ;;  %v10367_v9 = vshrl.u32 %v17427_v15, 16 }
 0x50f   : > { %23570 = vst [vmem:[#allocation171_spill] sm:$0xff] %v21083_v0  ;;  %23571 = vst [vmem:[#allocation172_spill] sm:$0xff] %v21089_v8  ;;  %16598 = vmatprep.mubr.bf16.mxu1 %v10342_v6  ;;  %16739 = vmatpush3.bf16.msra.mxu1 %v20823_v32  ;;  %v12720_v32 = vsel %vm1747_vm1, %v12715_v29, %v12719_v30  ;;  %v10363_v6 = vshll.u32 %v17427_v15, 16  ;;  %v21114_v8 = vld [vmem:[#allocation3 + $0x58] sm:$0xff]   ;;  %v12721_v29 = vshrl.u32 %v21072_v5, 16  ;;  %v12741_v40 = vshll.u32 %v17430_v14, 16 }
 0x510   : > { %v21091_v45 = vpop.f32.mrf.mxu0  ;;  %v21096_v42 = vpop.f32.mrf.mxu1  ;;  %16740 = vmatprep.subr.bf16.mxu1 %v17428_v53  ;;  %v12731_v24 = vor.u32 %v12729_v21, %v12727_v19  ;;  %v10371_v20 = vshll.u32 %v21114_v8, 16 }
 0x511   : > { %23572 = vst [vmem:[#allocation173_spill] sm:$0xff] %v21091_v45  ;;  %23573 = vst [vmem:[#allocation174_spill] sm:$0xff] %v21096_v42  ;;  %v10355_v45 = vshll.u32 %v21086_v1, 16 }
 0x512   : > { %v21098_v0 = vpop.f32.mrf.mxu0  ;;  %v21104_v7 = vpop.f32.mrf.mxu1 }
 0x513   : > { %23574 = vst [vmem:[#allocation175_spill] sm:$0xff] %v21098_v0  ;;  %23575 = vst [vmem:[#allocation176_spill] sm:$0xff] %v21104_v7  ;;  %16741 = vmatpush3.bf16.msra.mxu1 %v17428_v53  ;;  %v10357_v42 = vrot.slane %v10355_v45, 1  ;;  %v12733_v7 = vshll.u32 %v21101_v33, 16  ;;  %v10365_v45 = vrot.slane %v10363_v6, 1  ;;  %v10359_v6 = vshrl.u32 %v21086_v1, 16 }
 0x514   : > { %v21106_v60 = vpop.f32.mrf.mxu0  ;;  %16735 = vmatmul.mubr.bf16.gmra.mxu0 %v11548_v51  ;;  %v21109_v0 = vpop.f32.mrf.mxu1  ;;  %16742 = vmatprep.subr.bf16.mxu1 %v17437_v10  ;;  %v17446_v51 = vld [vmem:[#allocation8 + $0x1e0] sm:$0xff]   ;;  %v12745_v1 = vshrl.u32 %v17430_v14, 16 }
 0x515   : > { %23576 = vst [vmem:[#allocation177_spill] sm:$0xff] %v21106_v60  ;;  %16834 = vmatprep.mubr.bf16.mxu0 %v12720_v32  ;;  %23577 = vst [vmem:[#allocation178_spill] sm:$0xff] %v21109_v0  ;;  %v10358_v53 = vsel %vm1747_vm1, %v10353_v61, %v10357_v42  ;;  %v17432_v32 = vld [vmem:[#allocation3 + $0x60] sm:$0xff]   ;;  %v12735_v5 = vrot.slane %v12733_v7, 1  ;;  %v12743_v7 = vrot.slane %v12741_v40, 1  ;;  %v12737_v40 = vshrl.u32 %v21101_v33, 16 }
 0x516   : > { %v21111_v22 = vpop.f32.mrf.mxu0  ;;  %v21118_v4 = vpop.f32.mrf.mxu1  ;;  %16599 = vmatmul.mubr.bf16.gmra.mxu1 %v10350_v59  ;;  %v17455_v59 = vld [vmem:[#allocation8 + $0x1d8] sm:$0xff]   ;;  %v10379_v15 = vshll.u32 %v17432_v32, 16  ;;  %v10383_v33 = vshrl.u32 %v17432_v32, 16 }
 0x517   : > { %23578 = vst [vmem:[#allocation179_spill] sm:$0xff] %v21111_v22  ;;  %23579 = vst [vmem:[#allocation180_spill] sm:$0xff] %v21118_v4  ;;  %v12723_v22 = vor.u32 %v12721_v29, %v12719_v30  ;;  %16602 = vmatprep.mubr.bf16.mxu1 %v10358_v53  ;;  %16743 = vmatpush3.bf16.msra.mxu1 %v17437_v10  ;;  %v21128_v4 = vld [vmem:[#allocation3 + $0x58] sm:$0xff]   ;;  %v12736_v10 = vsel %vm1747_vm1, %v12731_v24, %v12735_v5  ;;  %v17434_v53 = vld [vmem:[#allocation3 + $0x60] sm:$0xff]  }
 0x518   : > { %v21120_v25 = vpop.f32.mrf.mxu0  ;;  %v21123_v60 = vpop.f32.mrf.mxu1  ;;  %16744 = vmatprep.subr.bf16.mxu1 %v17446_v51  ;;  %v10369_v29 = vor.u32 %v10367_v9, %v10365_v45  ;;  %v12757_v14 = vshll.u32 %v17434_v53, 16 }
 0x519   : > { %23580 = vst [vmem:[#allocation181_spill] sm:$0xff] %v21120_v25  ;;  %23581 = vst [vmem:[#allocation182_spill] sm:$0xff] %v21123_v60  ;;  %v12728_v61 = vsel %vm1747_vm1, %v12723_v22, %v12727_v19  ;;  %v10373_v22 = vrot.slane %v10371_v20, 1  ;;  %v12749_v19 = vshll.u32 %v21128_v4, 16  ;;  %v10381_v20 = vrot.slane %v10379_v15, 1 }
 0x51a   : > { %v21125_v0 = vpop.f32.mrf.mxu0  ;;  %v21132_v21 = vpop.f32.mrf.mxu1  ;;  %v10375_v15 = vshrl.u32 %v21114_v8, 16  ;;  %v12761_v8 = vshrl.u32 %v17434_v53, 16 }
 0x51b   : > { %23582 = vst [vmem:[#allocation183_spill] sm:$0xff] %v21125_v0  ;;  %23583 = vst [vmem:[#allocation184_spill] sm:$0xff] %v21132_v21  ;;  %v10361_v0 = vor.u32 %v10359_v6, %v10357_v42  ;;  %16745 = vmatpush3.bf16.msra.mxu1 %v17446_v51  ;;  %v21142_v21 = vld [vmem:[#allocation3 + $0x68] sm:$0xff]   ;;  %v10374_v51 = vsel %vm1747_vm1, %v10369_v29, %v10373_v22  ;;  %v12747_v6 = vor.u32 %v12745_v1, %v12743_v7 }
 0x51c   : > { %v21134_v30 = vpop.f32.mrf.mxu0  ;;  %16835 = vmatmul.mubr.bf16.vlgmr.msra.gmra.mxu0 %v12728_v61  ;;  %v21137_v25 = vpop.f32.mrf.mxu1  ;;  %16746 = vmatprep.subr.bf16.mxu1 %v17455_v59  ;;  %v17464_v61 = vld [vmem:[#allocation8 + $0x1d0] sm:$0xff]  }
 0x51d   : > { %23584 = vst [vmem:[#allocation185_spill] sm:$0xff] %v21134_v30  ;;  %16838 = vmatprep.mubr.bf16.mxu0 %v12736_v10  ;;  %23585 = vst [vmem:[#allocation186_spill] sm:$0xff] %v21137_v25  ;;  %v10366_v24 = vsel %vm1747_vm1, %v10361_v0, %v10365_v45  ;;  %v17436_v10 = vld [vmem:[#allocation3 + $0x70] sm:$0xff]   ;;  %v12751_v0 = vrot.slane %v12749_v19, 1  ;;  %v10387_v45 = vshll.u32 %v21142_v21, 16  ;;  %v12759_v19 = vrot.slane %v12757_v14, 1 }
 0x51e   : > { %v21139_v60 = vpop.f32.mrf.mxu0  ;;  %v21146_v9 = vpop.f32.mrf.mxu1  ;;  %16603 = vmatmul.mubr.bf16.gmra.mxu1 %v10366_v24  ;;  %v17473_v24 = vld [vmem:[#allocation8 + $0x1c8] sm:$0xff]   ;;  %v10395_v32 = vshll.u32 %v17436_v10, 16  ;;  %v12753_v14 = vshrl.u32 %v21128_v4, 16  ;;  %v10399_v4 = vshrl.u32 %v17436_v10, 16  ;;  %v17443_v10 = vld [vmem:[#allocation3 + $0x80] sm:$0xff]  }
 0x51f   : > { %23586 = vst [vmem:[#allocation187_spill] sm:$0xff] %v21139_v60  ;;  %23587 = vst [vmem:[#allocation188_spill] sm:$0xff] %v21146_v9  ;;  %16606 = vmatprep.mubr.bf16.mxu1 %v10374_v51  ;;  %v12739_v60 = vor.u32 %v12737_v40, %v12735_v5  ;;  %16747 = vmatpush3.bf16.msra.mxu1 %v17455_v59  ;;  %v21156_v9 = vld [vmem:[#allocation3 + $0x68] sm:$0xff]   ;;  %v12752_v59 = vsel %vm1747_vm1, %v12747_v6, %v12751_v0  ;;  %v17439_v51 = vld [vmem:[#allocation3 + $0x70] sm:$0xff]  }
 0x520   : > { %v21148_v42 = vpop.f32.mrf.mxu0  ;;  %v21151_v30 = vpop.f32.mrf.mxu1  ;;  %16748 = vmatprep.subr.bf16.mxu1 %v17464_v61  ;;  %v10385_v40 = vor.u32 %v10383_v33, %v10381_v20  ;;  %v12773_v53 = vshll.u32 %v17439_v51, 16 }
 0x521   : > { %23588 = vst [vmem:[#allocation189_spill] sm:$0xff] %v21148_v42  ;;  %23589 = vst [vmem:[#allocation190_spill] sm:$0xff] %v21151_v30  ;;  %v12744_v29 = vsel %vm1747_vm1, %v12739_v60, %v12743_v7  ;;  %v10389_v60 = vrot.slane %v10387_v45, 1  ;;  %v12765_v7 = vshll.u32 %v21156_v9, 16  ;;  %v10397_v45 = vrot.slane %v10395_v32, 1 }
 0x522   : > { %v21153_v25 = vpop.f32.mrf.mxu0  ;;  %v21160_v1 = vpop.f32.mrf.mxu1  ;;  %v10391_v32 = vshrl.u32 %v21142_v21, 16  ;;  %v12777_v21 = vshrl.u32 %v17439_v51, 16 }
 0x523   : > { %23590 = vst [vmem:[#allocation191_spill] sm:$0xff] %v21153_v25  ;;  %23591 = vst [vmem:[#allocation192_spill] sm:$0xff] %v21160_v1  ;;  %v10377_v25 = vor.u32 %v10375_v15, %v10373_v22  ;;  %16749 = vmatpush3.bf16.msra.mxu1 %v17464_v61  ;;  %v21170_v1 = vld [vmem:[#allocation3 + $0x78] sm:$0xff]   ;;  %v10390_v61 = vsel %vm1747_vm1, %v10385_v40, %v10389_v60  ;;  %v12763_v15 = vor.u32 %v12761_v8, %v12759_v19 }
 0x524   : > { %v21162_v5 = vpop.f32.mrf.mxu0  ;;  %16839 = vmatmul.mubr.bf16.gmra.mxu0 %v12744_v29  ;;  %v21165_v42 = vpop.f32.mrf.mxu1  ;;  %16750 = vmatprep.subr.bf16.mxu1 %v17473_v24  ;;  %v17482_v29 = vld [vmem:[#allocation8 + $0x1c0] sm:$0xff]  }
 0x525   : > { %23592 = vst [vmem:[#allocation193_spill] sm:$0xff] %v21162_v5  ;;  %16842 = vmatprep.mubr.bf16.mxu0 %v12752_v59  ;;  %23593 = vst [vmem:[#allocation194_spill] sm:$0xff] %v21165_v42  ;;  %v10382_v6 = vsel %vm1747_vm1, %v10377_v25, %v10381_v20  ;;  %v17441_v59 = vld [vmem:[#allocation3 + $0x80] sm:$0xff]   ;;  %v12767_v25 = vrot.slane %v12765_v7, 1  ;;  %v10403_v20 = vshll.u32 %v21170_v1, 16 }
 0x526   : > { %v21167_v30 = vpop.f32.mrf.mxu0  ;;  %v21174_v33 = vpop.f32.mrf.mxu1  ;;  %16607 = vmatmul.mubr.bf16.gmra.mxu1 %v10382_v6  ;;  %v10411_v7 = vshll.u32 %v17441_v59, 16 }
 0x527   : > { %23594 = vst [vmem:[#allocation195_spill] sm:$0xff] %v21167_v30  ;;  %23595 = vst [vmem:[#allocation196_spill] sm:$0xff] %v21174_v33  ;;  %16610 = vmatprep.mubr.bf16.mxu1 %v10390_v61  ;;  %v12755_v30 = vor.u32 %v12753_v14, %v12751_v0  ;;  %16751 = vmatpush3.bf16.msra.mxu1 %v17473_v24  ;;  %v21184_v33 = vld [vmem:[#allocation3 + $0x78] sm:$0xff]   ;;  %v12768_v0 = vsel %vm1747_vm1, %v12763_v15, %v12767_v25  ;;  %v12775_v14 = vrot.slane %v12773_v53, 1 }
 0x528   : > { %v21176_v22 = vpop.f32.mrf.mxu0  ;;  %v21179_v5 = vpop.f32.mrf.mxu1  ;;  %16752 = vmatprep.subr.bf16.mxu1 %v17482_v29  ;;  %v10401_v24 = vor.u32 %v10399_v4, %v10397_v45  ;;  %v10393_v61 = vor.u32 %v10391_v32, %v10389_v60  ;;  %v12769_v53 = vshrl.u32 %v21156_v9, 16  ;;  %v12789_v32 = vshll.u32 %v17443_v10, 16 }
 0x529   : > { %23596 = vst [vmem:[#allocation197_spill] sm:$0xff] %v21176_v22  ;;  %v12760_v40 = vsel %vm1747_vm1, %v12755_v30, %v12759_v19  ;;  %v10405_v30 = vrot.slane %v10403_v20, 1  ;;  %v12781_v19 = vshll.u32 %v21184_v33, 16  ;;  %v12779_v51 = vor.u32 %v12777_v21, %v12775_v14 }
 0x52a   : > { %v21181_v42 = vpop.f32.mrf.mxu0  ;;  %v21188_v8 = vpop.f32.mrf.mxu1  ;;  %v10398_v15 = vsel %vm1747_vm1, %v10393_v61, %v10397_v45  ;;  %v10413_v20 = vrot.slane %v10411_v7, 1  ;;  %v10415_v61 = vshrl.u32 %v17441_v59, 16 }
 0x52b   : > { %23597 = vst [vmem:[#allocation198_spill] sm:$0xff] %v21181_v42  ;;  %23598 = vst [vmem:[#allocation199_spill] sm:$0xff] %v21188_v8  ;;  %16753 = vmatpush3.bf16.msra.mxu1 %v17482_v29  ;;  %v21198_v8 = vld [vmem:[#allocation3 + $0x88] sm:$0xff]   ;;  %v10406_v4 = vsel %vm1747_vm1, %v10401_v24, %v10405_v30  ;;  %v12783_v45 = vrot.slane %v12781_v19, 1  ;;  %v10407_v24 = vshrl.u32 %v21170_v1, 16  ;;  %v17448_v19 = vld [vmem:[#allocation3 + $0x90] sm:$0xff]  }
 0x52c   : > { %v21190_v6 = vpop.f32.mrf.mxu0  ;;  %16843 = vmatmul.mubr.bf16.gmra.mxu0 %v12760_v40  ;;  %v21193_v42 = vpop.f32.mrf.mxu1  ;;  %v21200_v40 = vld [vmem:[#allocation8 + $0x238] sm:$0xff]   ;;  %v10419_v9 = vshll.u32 %v21198_v8, 16 }
 0x52d   : > { %23599 = vst [vmem:[#allocation200_spill] sm:$0xff] %v21190_v6  ;;  %16846 = vmatprep.mubr.bf16.mxu0 %v12768_v0  ;;  %23600 = vst [vmem:[#allocation201_spill] sm:$0xff] %v21193_v42  ;;  %16898 = vmatprep.subr.bf16.mxu1 %v21200_v40  ;;  %v17445_v0 = vld [vmem:[#allocation3 + $0x90] sm:$0xff]   ;;  %v10409_v59 = vor.u32 %v10407_v24, %v10405_v30 }
 0x52e   : > { %v21195_v22 = vpop.f32.mrf.mxu0  ;;  %v21205_v60 = vpop.f32.mrf.mxu1  ;;  %16611 = vmatmul.mubr.bf16.gmra.mxu1 %v10398_v15 }
 0x52f   : > { %23601 = vst [vmem:[#allocation202_spill] sm:$0xff] %v21195_v22  ;;  %23602 = vst [vmem:[#allocation203_spill] sm:$0xff] %v21205_v60  ;;  %16614 = vmatprep.mubr.bf16.mxu1 %v10406_v4  ;;  %v12771_v22 = vor.u32 %v12769_v53, %v12767_v25  ;;  %v21215_v60 = vld [vmem:[#allocation3 + $0x88] sm:$0xff]   ;;  %v12784_v25 = vsel %vm1747_vm1, %v12779_v51, %v12783_v45  ;;  %v10417_v53 = vor.u32 %v10415_v61, %v10413_v20 }
 0x530   : > { %v21207_v29 = vpop.f32.mrf.mxu0  ;;  %v21210_v6 = vpop.f32.mrf.mxu1  ;;  %v12791_v4 = vrot.slane %v12789_v32, 1  ;;  %v12797_v1 = vshll.u32 %v21215_v60, 16  ;;  %v12785_v51 = vshrl.u32 %v21184_v33, 16 }
 0x531   : > { %23603 = vst [vmem:[#allocation204_spill] sm:$0xff] %v21207_v29  ;;  %23604 = vst [vmem:[#allocation205_spill] sm:$0xff] %v21210_v6  ;;  %v12776_v15 = vsel %vm1747_vm1, %v12771_v22, %v12775_v14  ;;  %v10421_v22 = vrot.slane %v10419_v9, 1  ;;  %v12793_v14 = vshrl.u32 %v17443_v10, 16  ;;  %v17450_v9 = vld [vmem:[#allocation3 + $0xa0] sm:$0xff]  }
 0x532   : > { %v21212_v42 = vpop.f32.mrf.mxu0  ;;  %v21219_v21 = vpop.f32.mrf.mxu1  ;;  %v12787_v10 = vor.u32 %v12785_v51, %v12783_v45 }
 0x533   : > { %23605 = vst [vmem:[#allocation206_spill] sm:$0xff] %v21212_v42  ;;  %23606 = vst [vmem:[#allocation207_spill] sm:$0xff] %v21219_v21  ;;  %v10427_v42 = vshll.u32 %v17445_v0, 16  ;;  %v21229_v21 = vld [vmem:[#allocation3 + $0x98] sm:$0xff]   ;;  %v10422_v30 = vsel %vm1747_vm1, %v10417_v53, %v10421_v22  ;;  %v12795_v24 = vor.u32 %v12793_v14, %v12791_v4  ;;  %v10423_v53 = vshrl.u32 %v21198_v8, 16 }
 0x534   : > { %v21221_v7 = vpop.f32.mrf.mxu0  ;;  %16847 = vmatmul.mubr.bf16.gmra.mxu0 %v12776_v15  ;;  %v21224_v29 = vpop.f32.mrf.mxu1  ;;  %v10414_v15 = vsel %vm1747_vm1, %v10409_v59, %v10413_v20  ;;  %v12799_v20 = vrot.slane %v12797_v1, 1  ;;  %v10431_v59 = vshrl.u32 %v17445_v0, 16  ;;  %v10435_v33 = vshll.u32 %v21229_v21, 16  ;;  %v17452_v1 = vld [vmem:[#allocation3 + $0xa0] sm:$0xff]  }
 0x535   : > { %23607 = vst [vmem:[#allocation208_spill] sm:$0xff] %v21221_v7  ;;  %16850 = vmatprep.mubr.bf16.mxu0 %v12784_v25  ;;  %23608 = vst [vmem:[#allocation209_spill] sm:$0xff] %v21224_v29  ;;  %v10429_v25 = vrot.slane %v10427_v42, 1  ;;  %v10425_v0 = vor.u32 %v10423_v53, %v10421_v22 }
 0x536   : > { %v21226_v6 = vpop.f32.mrf.mxu0  ;;  %v21233_v61 = vpop.f32.mrf.mxu1  ;;  %16615 = vmatmul.mubr.bf16.gmra.mxu1 %v10414_v15  ;;  %v12792_v15 = vsel %vm1747_vm1, %v12787_v10, %v12791_v4  ;;  %v12800_v45 = vsel %vm1747_vm1, %v12795_v24, %v12799_v20  ;;  %v10437_v4 = vrot.slane %v10435_v33, 1  ;;  %v12809_v10 = vshrl.u32 %v17448_v19, 16  ;;  %v17454_v33 = vld [vmem:[#allocation3 + $0xb0] sm:$0xff]  }
 0x537   : > { %23609 = vst [vmem:[#allocation210_spill] sm:$0xff] %v21226_v6  ;;  %23610 = vst [vmem:[#allocation211_spill] sm:$0xff] %v21233_v61  ;;  %v12805_v6 = vshll.u32 %v17448_v19, 16  ;;  %16618 = vmatprep.mubr.bf16.mxu1 %v10422_v30  ;;  %v21243_v61 = vld [vmem:[#allocation3 + $0x98] sm:$0xff]   ;;  %v10433_v51 = vor.u32 %v10431_v59, %v10429_v25  ;;  %v12801_v24 = vshrl.u32 %v21215_v60, 16 }
 0x538   : > { %v21235_v32 = vpop.f32.mrf.mxu0  ;;  %v21238_v7 = vpop.f32.mrf.mxu1  ;;  %v12813_v8 = vshll.u32 %v21243_v61, 16 }
 0x539   : > { %23611 = vst [vmem:[#allocation212_spill] sm:$0xff] %v21235_v32  ;;  %23612 = vst [vmem:[#allocation213_spill] sm:$0xff] %v21238_v7  ;;  %v12807_v30 = vrot.slane %v12805_v6, 1  ;;  %v10438_v22 = vsel %vm1747_vm1, %v10433_v51, %v10437_v4  ;;  %v12803_v19 = vor.u32 %v12801_v24, %v12799_v20  ;;  %v10439_v51 = vshrl.u32 %v21229_v21, 16 }
 0x53a   : > { %v21240_v29 = vpop.f32.mrf.mxu0  ;;  %v21247_v14 = vpop.f32.mrf.mxu1 }
 0x53b   : > { %23613 = vst [vmem:[#allocation214_spill] sm:$0xff] %v21240_v29  ;;  %23614 = vst [vmem:[#allocation215_spill] sm:$0xff] %v21247_v14  ;;  %v10443_v29 = vshll.u32 %v17450_v9, 16  ;;  %v21257_v14 = vld [vmem:[#allocation3 + $0xa8] sm:$0xff]   ;;  %v12811_v53 = vor.u32 %v12809_v10, %v12807_v30 }
 0x53c   : > { %v21249_v42 = vpop.f32.mrf.mxu0  ;;  %16851 = vmatmul.mubr.bf16.gmra.mxu0 %v12792_v15  ;;  %v21252_v32 = vpop.f32.mrf.mxu1  ;;  %v10430_v15 = vsel %vm1747_vm1, %v10425_v0, %v10429_v25  ;;  %v12815_v25 = vrot.slane %v12813_v8, 1  ;;  %v10447_v0 = vshrl.u32 %v17450_v9, 16  ;;  %v10451_v60 = vshll.u32 %v21257_v14, 16  ;;  %v17457_v8 = vld [vmem:[#allocation3 + $0xb0] sm:$0xff]  }
 0x53d   : > { %23615 = vst [vmem:[#allocation216_spill] sm:$0xff] %v21249_v42  ;;  %16854 = vmatprep.mubr.bf16.mxu0 %v12800_v45  ;;  %23616 = vst [vmem:[#allocation217_spill] sm:$0xff] %v21252_v32  ;;  %v10445_v45 = vrot.slane %v10443_v29, 1  ;;  %v10441_v9 = vor.u32 %v10439_v51, %v10437_v4 }
 0x53e   : > { %v21254_v7 = vpop.f32.mrf.mxu0  ;;  %v21261_v59 = vpop.f32.mrf.mxu1  ;;  %16619 = vmatmul.mubr.bf16.gmra.mxu1 %v10430_v15  ;;  %v12808_v15 = vsel %vm1747_vm1, %v12803_v19, %v12807_v30  ;;  %v12816_v20 = vsel %vm1747_vm1, %v12811_v53, %v12815_v25  ;;  %v10453_v30 = vrot.slane %v10451_v60, 1  ;;  %v12825_v19 = vshrl.u32 %v17452_v1, 16  ;;  %v17459_v60 = vld [vmem:[#allocation3 + $0xc0] sm:$0xff]  }
 0x53f   : > { %23617 = vst [vmem:[#allocation218_spill] sm:$0xff] %v21254_v7  ;;  %23618 = vst [vmem:[#allocation219_spill] sm:$0xff] %v21261_v59  ;;  %v12821_v7 = vshll.u32 %v17452_v1, 16  ;;  %16622 = vmatprep.mubr.bf16.mxu1 %v10438_v22  ;;  %v21271_v59 = vld [vmem:[#allocation3 + $0xa8] sm:$0xff]   ;;  %v10449_v24 = vor.u32 %v10447_v0, %v10445_v45  ;;  %v12817_v53 = vshrl.u32 %v21243_v61, 16 }
 0x540   : > { %v21263_v6 = vpop.f32.mrf.mxu0  ;;  %v21266_v42 = vpop.f32.mrf.mxu1  ;;  %v12829_v21 = vshll.u32 %v21271_v59, 16 }
 0x541   : > { %23619 = vst [vmem:[#allocation220_spill] sm:$0xff] %v21263_v6  ;;  %23620 = vst [vmem:[#allocation221_spill] sm:$0xff] %v21266_v42  ;;  %v12823_v22 = vrot.slane %v12821_v7, 1  ;;  %v10454_v4 = vsel %vm1747_vm1, %v10449_v24, %v10453_v30  ;;  %v12819_v1 = vor.u32 %v12817_v53, %v12815_v25 }
 0x542   : > { %v21268_v32 = vpop.f32.mrf.mxu0  ;;  %v21275_v10 = vpop.f32.mrf.mxu1 }
 0x543   : > { %23621 = vst [vmem:[#allocation222_spill] sm:$0xff] %v21268_v32  ;;  %23622 = vst [vmem:[#allocation223_spill] sm:$0xff] %v21275_v10  ;;  %v10459_v32 = vshll.u32 %v17454_v33, 16  ;;  %v21285_v10 = vld [vmem:[#allocation3 + $0xb8] sm:$0xff]   ;;  %v12827_v51 = vor.u32 %v12825_v19, %v12823_v22  ;;  %v12824_v24 = vsel %vm1747_vm1, %v12819_v1, %v12823_v22  ;;  %v12841_v1 = vshrl.u32 %v17457_v8, 16 }
 0x544   : > { %v21277_v29 = vpop.f32.mrf.mxu0  ;;  %16855 = vmatmul.mubr.bf16.gmra.mxu0 %v12808_v15  ;;  %v21280_v6 = vpop.f32.mrf.mxu1  ;;  %v10446_v15 = vsel %vm1747_vm1, %v10441_v9, %v10445_v45  ;;  %v12831_v45 = vrot.slane %v12829_v21, 1  ;;  %v10463_v9 = vshrl.u32 %v17454_v33, 16  ;;  %v10467_v61 = vshll.u32 %v21285_v10, 16 }
 0x545   : > { %23623 = vst [vmem:[#allocation224_spill] sm:$0xff] %v21277_v29  ;;  %16858 = vmatprep.mubr.bf16.mxu0 %v12816_v20  ;;  %23624 = vst [vmem:[#allocation225_spill] sm:$0xff] %v21280_v6  ;;  %v10461_v20 = vrot.slane %v10459_v32, 1  ;;  %v10455_v32 = vshrl.u32 %v21257_v14, 16 }
 0x546   : > { %v21282_v42 = vpop.f32.mrf.mxu0  ;;  %v21289_v0 = vpop.f32.mrf.mxu1  ;;  %16623 = vmatmul.mubr.bf16.gmra.mxu1 %v10446_v15  ;;  %v12832_v53 = vsel %vm1747_vm1, %v12827_v51, %v12831_v45 }
 0x547   : > { %23625 = vst [vmem:[#allocation226_spill] sm:$0xff] %v21282_v42  ;;  %23626 = vst [vmem:[#allocation227_spill] sm:$0xff] %v21289_v0  ;;  %v12837_v42 = vshll.u32 %v17457_v8, 16  ;;  %16626 = vmatprep.mubr.bf16.mxu1 %v10454_v4  ;;  %v21299_v0 = vld [vmem:[#allocation3 + $0xb8] sm:$0xff]   ;;  %v10465_v21 = vor.u32 %v10463_v9, %v10461_v20  ;;  %v10475_v4 = vshll.u32 %v17459_v60, 16 }
 0x548   : > { %v21291_v7 = vpop.f32.mrf.mxu0  ;;  %v21294_v29 = vpop.f32.mrf.mxu1 }
 0x549   : > { %23627 = vst [vmem:[#allocation228_spill] sm:$0xff] %v21291_v7  ;;  %23628 = vst [vmem:[#allocation229_spill] sm:$0xff] %v21294_v29  ;;  %v23630_v7 = vld [vmem:[#allocation118_spill] sm:$0xff]  ;;  %v12839_v33 = vrot.slane %v12837_v42, 1  ;;  %v7422_v29 = vadd.f32 %v20922_v58, %v20423_v16  ;;  %v7433_v42 = vadd.f32 %v20927_v27, %v20447_v3  ;;  %v12833_v16 = vshrl.u32 %v21271_v59, 16  ;;  %v23637_v27 = vld [vmem:[#allocation75_spill] sm:$0xff] }
 0x54a   : > { %v21296_v6 = vpop.f32.mrf.mxu0  ;;  %v7430_v15 = vadd.f32 %v20916_v47, %v23630_v7  ;;  %v21305_v19 = vpop.f32.mrf.mxu1  ;;  %v10457_v47 = vor.u32 %v10455_v32, %v10453_v30  ;;  %v10469_v7 = vrot.slane %v10467_v61, 1  ;;  %v10477_v32 = vrot.slane %v10475_v4, 1 }
 0x54b   : > { %23629 = vst [vmem:[#allocation230_spill] sm:$0xff] %v21296_v6  ;;  %23631 = vst [vmem:[#allocation118_spill] sm:$0xff] %v21305_v19  ;;  %v21310_v6 = vld [vmem:[#allocation3 + $0xc0] sm:$0xff]   ;;  %v12843_v8 = vor.u32 %v12841_v1, %v12839_v33  ;;  %v8550_v59 = vadd.f32 %v23637_v27, %v7422_v29  ;;  %v10479_v4 = vshrl.u32 %v17459_v60, 16  ;;  %v23639_v19 = vld [vmem:[#allocation116_spill] sm:$0xff] }
 0x54c   : > { %v21307_v25 = vpop.f32.mrf.mxu0  ;;  %16859 = vmatmul.mubr.bf16.gmra.mxu0 %v12824_v24  ;;  %v21314_v22 = vpop.f32.mrf.mxu1  ;;  %v12845_v24 = vshll.u32 %v21299_v0, 16  ;;  %v8552_v51 = vadd.f32 %v20487_v55, %v7430_v15  ;;  %v10462_v9 = vsel %vm1747_vm1, %v10457_v47, %v10461_v20  ;;  %v10470_v61 = vsel %vm1747_vm1, %v10465_v21, %v10469_v7  ;;  %v21353_v27 = vld [vmem:[#allocation3 + $0xd0] sm:$0xff]  }
 0x54d   : > { %23632 = vst [vmem:[#allocation231_spill] sm:$0xff] %v21307_v25  ;;  %16862 = vmatprep.mubr.bf16.mxu0 %v12832_v53  ;;  %23633 = vst [vmem:[#allocation232_spill] sm:$0xff] %v21314_v22  ;;  %v21319_v25 = vld [vmem:[#allocation3 + $0xc8] sm:$0xff]   ;;  %v12853_v53 = vshll.u32 %v21310_v6, 16  ;;  %v23636_v22 = vld [vmem:[#allocation121_spill] sm:$0xff]  ;;  %v12835_v20 = vor.u32 %v12833_v16, %v12831_v45  ;;  %v10471_v21 = vshrl.u32 %v21285_v10, 16  ;;  %v10481_v60 = vor.u32 %v10479_v4, %v10477_v32 }
 0x54e   : > { %v21316_v14 = vpop.f32.mrf.mxu0  ;;  %v16436_v58 = vpop.f32.mrf.mxu1  ;;  %16627 = vmatmul.mubr.bf16.gmra.mxu1 %v10462_v9  ;;  %v7425_v3 = vadd.f32 %v20932_v43, %v23636_v22  ;;  %v12847_v9 = vrot.slane %v12845_v24, 1  ;;  %v10483_v1 = vshll.u32 %v21319_v25, 16  ;;  %v7446_v43 = vadd.f32 %v20936_v17, %v23639_v19 }
 0x54f   : > { %23634 = vst [vmem:[#allocation233_spill] sm:$0xff] %v21316_v14  ;;  %v21330_v14 = vld [vmem:[#allocation3 + $0xd0] sm:$0xff]   ;;  %v21334_v55 = vadd.f32 %v16436_v58, %v8552_v51  ;;  %16630 = vmatprep.mubr.bf16.mxu1 %v10470_v61  ;;  %v23640_v51 = vld [vmem:[#allocation124_spill] sm:$0xff]  ;;  %v12840_v29 = vsel %vm1747_vm1, %v12835_v20, %v12839_v33  ;;  %v12855_v24 = vrot.slane %v12853_v53, 1  ;;  %v12857_v53 = vshrl.u32 %v21310_v6, 16 }
 0x550   : > { %v21326_v30 = vpop.f32.mrf.mxu0  ;;  %v9269_v15 = vpop.f32.mrf.mxu1  ;;  %v8553_v58 = vadd.f32 %v23640_v51, %v7433_v42  ;;  %v12848_v10 = vsel %vm1747_vm1, %v12843_v8, %v12847_v9  ;;  %v10491_v61 = vshll.u32 %v21330_v14, 16  ;;  %v23643_v42 = vld [vmem:[#allocation19_spill] sm:$0xff]  ;;  %v10485_v51 = vrot.slane %v10483_v1, 1 }
 0x551   : > { %23635 = vst [vmem:[#allocation234_spill] sm:$0xff] %v21326_v30  ;;  %v21341_v30 = vld [vmem:[#allocation3 + $0xc8] sm:$0xff]   ;;  %v21345_v22 = vadd.f32 %v9269_v15, %v8550_v59  ;;  %v8551_v33 = vadd.f32 %v23643_v42, %v7425_v3  ;;  %v10473_v59 = vor.u32 %v10471_v21, %v10469_v7  ;;  %v12849_v8 = vshrl.u32 %v21299_v0, 16  ;;  %v23647_v42 = vld [vmem:[#allocation115_spill] sm:$0xff] }
 0x552   : > { %v21337_v47 = vpop.f32.mrf.mxu0  ;;  %v16437_v45 = vpop.f32.mrf.mxu1  ;;  %v12861_v4 = vshll.u32 %v21341_v30, 16  ;;  %v8556_v3 = vadd.f32 %v20520_v63, %v7446_v43  ;;  %v10486_v0 = vsel %vm1747_vm1, %v10481_v60, %v10485_v51  ;;  %v12859_v6 = vor.u32 %v12857_v53, %v12855_v24  ;;  %v23648_v63 = vld [vmem:[#allocation126_spill] sm:$0xff] }
 0x553   : > { %23638 = vst [vmem:[#allocation121_spill] sm:$0xff] %v21337_v47  ;;  %v23642_v47 = vld [vmem:[#allocation120_spill] sm:$0xff]  ;;  %v21357_v19 = vadd.f32 %v16437_v45, %v8553_v58  ;;  %v10478_v7 = vsel %vm1747_vm1, %v10473_v59, %v10477_v32  ;;  %v10493_v1 = vrot.slane %v10491_v61, 1  ;;  %v12869_v45 = vshll.u32 %v21353_v27, 16 }
 0x554   : > { %v21349_v16 = vpop.f32.mrf.mxu0  ;;  %16863 = vmatmul.mubr.bf16.gmra.mxu0 %v12840_v29  ;;  %v7438_v17 = vadd.f32 %v20942_v50, %v23642_v47  ;;  %v9272_v20 = vpop.f32.mrf.mxu1  ;;  %v21365_v29 = vld [vmem:[#allocation3 + $0xd8] sm:$0xff]   ;;  %v12851_v43 = vor.u32 %v12849_v8, %v12847_v9  ;;  %v10487_v60 = vshrl.u32 %v21319_v25, 16  ;;  %v10495_v61 = vshrl.u32 %v21330_v14, 16 }
 0x555   : > { %23641 = vst [vmem:[#allocation75_spill] sm:$0xff] %v21349_v16  ;;  %16866 = vmatprep.mubr.bf16.mxu0 %v12848_v10  ;;  %v23645_v16 = vld [vmem:[#allocation117_spill] sm:$0xff]  ;;  %v21369_v47 = vadd.f32 %v9272_v20, %v8551_v33  ;;  %v21377_v10 = vld [vmem:[#allocation3 + $0xe0] sm:$0xff]   ;;  %v12863_v20 = vrot.slane %v12861_v4, 1  ;;  %v10499_v53 = vshll.u32 %v21365_v29, 16  ;;  %v12871_v4 = vrot.slane %v12869_v45, 1 }
 0x556   : > { %v21360_v15 = vpop.f32.mrf.mxu0  ;;  %v7449_v50 = vadd.f32 %v20947_v31, %v23645_v16  ;;  %v16440_v21 = vpop.f32.mrf.mxu1  ;;  %16631 = vmatmul.mubr.bf16.gmra.mxu1 %v10478_v7  ;;  %v7441_v31 = vadd.f32 %v20952_v38, %v23647_v42  ;;  %v8554_v32 = vadd.f32 %v23648_v63, %v7438_v17  ;;  %v21389_v7 = vld [vmem:[#allocation3 + $0xd8] sm:$0xff]   ;;  %v12856_v9 = vsel %vm1747_vm1, %v12851_v43, %v12855_v24  ;;  %v21401_v63 = vld [vmem:[#allocation3 + $0xe0] sm:$0xff]  }
 0x557   : > { %23644 = vst [vmem:[#allocation116_spill] sm:$0xff] %v21360_v15  ;;  %v21381_v16 = vadd.f32 %v16440_v21, %v8556_v3  ;;  %16634 = vmatprep.mubr.bf16.mxu1 %v10486_v0  ;;  %v23651_v21 = vld [vmem:[#allocation58_spill] sm:$0xff]  ;;  %v12864_v25 = vsel %vm1747_vm1, %v12859_v6, %v12863_v20  ;;  %v10497_v14 = vor.u32 %v10495_v61, %v10493_v1  ;;  %v10507_v42 = vshll.u32 %v21377_v10, 16 }
 0x558   : > { %v21373_v58 = vpop.f32.mrf.mxu0  ;;  %v9285_v33 = vpop.f32.mrf.mxu1  ;;  %v8557_v17 = vadd.f32 %v23651_v21, %v7449_v50  ;;  %v23654_v50 = vld [vmem:[#allocation113_spill] sm:$0xff]  ;;  %v10501_v21 = vrot.slane %v10499_v53, 1  ;;  %v12865_v6 = vshrl.u32 %v21341_v30, 16  ;;  %v12873_v45 = vshrl.u32 %v21353_v27, 16 }
 0x559   : > { %23646 = vst [vmem:[#allocation124_spill] sm:$0xff] %v21373_v58  ;;  %v23650_v58 = vld [vmem:[#allocation122_spill] sm:$0xff]  ;;  %v21393_v3 = vadd.f32 %v9285_v33, %v8554_v32  ;;  %v8555_v24 = vadd.f32 %v23654_v50, %v7441_v31  ;;  %v10489_v32 = vor.u32 %v10487_v60, %v10485_v51  ;;  %v12877_v61 = vshll.u32 %v21389_v7, 16  ;;  %v21425_v50 = vld [vmem:[#allocation3 + $0xf0] sm:$0xff]  }
 0x55a   : > { %v21384_v59 = vpop.f32.mrf.mxu0  ;;  %v7462_v38 = vadd.f32 %v20956_v56, %v23650_v58  ;;  %v16441_v8 = vpop.f32.mrf.mxu1  ;;  %v10502_v30 = vsel %vm1747_vm1, %v10497_v14, %v10501_v21  ;;  %v12875_v27 = vor.u32 %v12873_v45, %v12871_v4  ;;  %v10503_v14 = vshrl.u32 %v21365_v29, 16 }
 0x55b   : > { %23649 = vst [vmem:[#allocation120_spill] sm:$0xff] %v21384_v59  ;;  %v23653_v59 = vld [vmem:[#allocation123_spill] sm:$0xff]  ;;  %v21405_v58 = vadd.f32 %v16441_v8, %v8557_v17  ;;  %v23657_v17 = vld [vmem:[#allocation36_spill] sm:$0xff]  ;;  %v10494_v51 = vsel %vm1747_vm1, %v10489_v32, %v10493_v1  ;;  %v10509_v8 = vrot.slane %v10507_v42, 1  ;;  %v10511_v42 = vshrl.u32 %v21377_v10, 16 }
 0x55c   : > { %v21397_v0 = vpop.f32.mrf.mxu0  ;;  %16867 = vmatmul.mubr.bf16.gmra.mxu0 %v12856_v9  ;;  %v7454_v56 = vadd.f32 %v20962_v39, %v23653_v59  ;;  %v9288_v43 = vpop.f32.mrf.mxu1  ;;  %v21413_v9 = vld [vmem:[#allocation3 + $0xe8] sm:$0xff]   ;;  %v8560_v31 = vadd.f32 %v23657_v17, %v7462_v38  ;;  %v23660_v38 = vld [vmem:[#allocation35_spill] sm:$0xff]  ;;  %v12879_v17 = vrot.slane %v12877_v61, 1 }
 0x55d   : > { %23652 = vst [vmem:[#allocation19_spill] sm:$0xff] %v21397_v0  ;;  %16870 = vmatprep.mubr.bf16.mxu0 %v12864_v25  ;;  %v23656_v0 = vld [vmem:[#allocation20_spill] sm:$0xff]  ;;  %v21417_v59 = vadd.f32 %v9288_v43, %v8555_v24  ;;  %v12885_v25 = vshll.u32 %v21401_v63, 16  ;;  %v12867_v24 = vor.u32 %v12865_v6, %v12863_v20  ;;  %v10515_v45 = vshll.u32 %v21413_v9, 16 }
 0x55e   : > { %v21408_v33 = vpop.f32.mrf.mxu0  ;;  %v7465_v39 = vadd.f32 %v20967_v57, %v23656_v0  ;;  %v16444_v60 = vpop.f32.mrf.mxu1  ;;  %16635 = vmatmul.mubr.bf16.gmra.mxu1 %v10494_v51  ;;  %v8558_v1 = vadd.f32 %v23660_v38, %v7454_v56  ;;  %v21437_v51 = vld [vmem:[#allocation3 + $0xe8] sm:$0xff]   ;;  %v12880_v29 = vsel %vm1747_vm1, %v12875_v27, %v12879_v17  ;;  %v10513_v10 = vor.u32 %v10511_v42, %v10509_v8  ;;  %v21449_v38 = vld [vmem:[#allocation3 + $0xf0] sm:$0xff]  }
 0x55f   : > { %23655 = vst [vmem:[#allocation117_spill] sm:$0xff] %v21408_v33  ;;  %v23659_v33 = vld [vmem:[#allocation21_spill] sm:$0xff]  ;;  %v21429_v0 = vadd.f32 %v16444_v60, %v8560_v31  ;;  %16638 = vmatprep.mubr.bf16.mxu1 %v10502_v30  ;;  %v23663_v31 = vld [vmem:[#allocation23_spill] sm:$0xff]  ;;  %v12872_v20 = vsel %vm1747_vm1, %v12867_v24, %v12871_v4  ;;  %v12887_v61 = vrot.slane %v12885_v25, 1  ;;  %v10523_v30 = vshll.u32 %v21425_v50, 16 }
 0x560   : > { %v21421_v53 = vpop.f32.mrf.mxu0  ;;  %v7457_v57 = vadd.f32 %v20972_v2, %v23659_v33  ;;  %v9301_v32 = vpop.f32.mrf.mxu1  ;;  %v8561_v56 = vadd.f32 %v23663_v31, %v7465_v39  ;;  %v23666_v39 = vld [vmem:[#allocation38_spill] sm:$0xff]  ;;  %v10517_v31 = vrot.slane %v10515_v45, 1  ;;  %v12881_v27 = vshrl.u32 %v21389_v7, 16 }
 0x561   : > { %23658 = vst [vmem:[#allocation115_spill] sm:$0xff] %v21421_v53  ;;  %v23662_v53 = vld [vmem:[#allocation128_spill] sm:$0xff]  ;;  %v21441_v33 = vadd.f32 %v9301_v32, %v8558_v1  ;;  %v10505_v1 = vor.u32 %v10503_v14, %v10501_v21  ;;  %v12889_v25 = vshrl.u32 %v21401_v63, 16  ;;  %v12893_v42 = vshll.u32 %v21437_v51, 16 }
 0x562   : > { %v21432_v43 = vpop.f32.mrf.mxu0  ;;  %v7478_v2 = vadd.f32 %v20976_v46, %v23662_v53  ;;  %v16445_v6 = vpop.f32.mrf.mxu1  ;;  %v8559_v4 = vadd.f32 %v23666_v39, %v7457_v57  ;;  %v10518_v7 = vsel %vm1747_vm1, %v10513_v10, %v10517_v31  ;;  %v21473_v39 = vld [vmem:[#allocation3 + $0x100] sm:$0xff]   ;;  %v10519_v10 = vshrl.u32 %v21413_v9, 16 }
 0x563   : > { %23661 = vst [vmem:[#allocation126_spill] sm:$0xff] %v21432_v43  ;;  %v23665_v43 = vld [vmem:[#allocation59_spill] sm:$0xff]  ;;  %v21453_v53 = vadd.f32 %v16445_v6, %v8561_v56  ;;  %v23669_v56 = vld [vmem:[#allocation88_spill] sm:$0xff]  ;;  %v10510_v21 = vsel %vm1747_vm1, %v10505_v1, %v10509_v8  ;;  %v12891_v63 = vor.u32 %v12889_v25, %v12887_v61  ;;  %v10525_v6 = vrot.slane %v10523_v30, 1 }
 0x564   : > { %v21445_v60 = vpop.f32.mrf.mxu0  ;;  %16871 = vmatmul.mubr.bf16.gmra.mxu0 %v12872_v20  ;;  %v7470_v46 = vadd.f32 %v20982_v13, %v23665_v43  ;;  %v9304_v24 = vpop.f32.mrf.mxu1  ;;  %v21461_v20 = vld [vmem:[#allocation3 + $0xf8] sm:$0xff]   ;;  %v8564_v57 = vadd.f32 %v23669_v56, %v7478_v2  ;;  %v23672_v2 = vld [vmem:[#allocation44_spill] sm:$0xff]  ;;  %v12895_v56 = vrot.slane %v12893_v42, 1  ;;  %v10527_v30 = vshrl.u32 %v21425_v50, 16 }
 0x565   : > { %23664 = vst [vmem:[#allocation122_spill] sm:$0xff] %v21445_v60  ;;  %16874 = vmatprep.mubr.bf16.mxu0 %v12880_v29  ;;  %v23668_v60 = vld [vmem:[#allocation34_spill] sm:$0xff]  ;;  %v21465_v43 = vadd.f32 %v9304_v24, %v8559_v4  ;;  %v12901_v29 = vshll.u32 %v21449_v38, 16  ;;  %v12883_v4 = vor.u32 %v12881_v27, %v12879_v17  ;;  %v10531_v25 = vshll.u32 %v21461_v20, 16 }
 0x566   : > { %v21456_v32 = vpop.f32.mrf.mxu0  ;;  %v7481_v13 = vadd.f32 %v20987_v36, %v23668_v60  ;;  %v16448_v14 = vpop.f32.mrf.mxu1  ;;  %16639 = vmatmul.mubr.bf16.gmra.mxu1 %v10510_v21  ;;  %v8562_v8 = vadd.f32 %v23672_v2, %v7470_v46  ;;  %v21485_v21 = vld [vmem:[#allocation3 + $0xf8] sm:$0xff]   ;;  %v12896_v9 = vsel %vm1747_vm1, %v12891_v63, %v12895_v56  ;;  %v10529_v50 = vor.u32 %v10527_v30, %v10525_v6  ;;  %v21497_v2 = vld [vmem:[#allocation3 + $0x100] sm:$0xff]  }
 0x567   : > { %23667 = vst [vmem:[#allocation58_spill] sm:$0xff] %v21456_v32  ;;  %v23671_v32 = vld [vmem:[#allocation37_spill] sm:$0xff]  ;;  %v21477_v60 = vadd.f32 %v16448_v14, %v8564_v57  ;;  %16642 = vmatprep.mubr.bf16.mxu1 %v10518_v7  ;;  %v12888_v17 = vsel %vm1747_vm1, %v12883_v4, %v12887_v61  ;;  %v12903_v42 = vrot.slane %v12901_v29, 1  ;;  %v10539_v7 = vshll.u32 %v21473_v39, 16 }
 0x568   : > { %v21469_v45 = vpop.f32.mrf.mxu0  ;;  %v7473_v36 = vadd.f32 %v20992_v28, %v23671_v32  ;;  %v9317_v1 = vpop.f32.mrf.mxu1  ;;  %v23675_v57 = vld [vmem:[#allocation25_spill] sm:$0xff]  ;;  %v12897_v63 = vshrl.u32 %v21437_v51, 16  ;;  %v12905_v29 = vshrl.u32 %v21449_v38, 16  ;;  %v12909_v30 = vshll.u32 %v21485_v21, 16 }
 0x569   : > { %23670 = vst [vmem:[#allocation123_spill] sm:$0xff] %v21469_v45  ;;  %v23674_v45 = vld [vmem:[#allocation22_spill] sm:$0xff]  ;;  %v21489_v32 = vadd.f32 %v9317_v1, %v8562_v8  ;;  %v8565_v46 = vadd.f32 %v23675_v57, %v7481_v13  ;;  %v23678_v13 = vld [vmem:[#allocation28_spill] sm:$0xff]  ;;  %v10521_v8 = vor.u32 %v10519_v10, %v10517_v31  ;;  %v10533_v57 = vrot.slane %v10531_v25, 1 }
 0x56a   : > { %v21480_v24 = vpop.f32.mrf.mxu0  ;;  %v7494_v28 = vadd.f32 %v20996_v26, %v23674_v45  ;;  %v16449_v27 = vpop.f32.mrf.mxu1  ;;  %v8563_v61 = vadd.f32 %v23678_v13, %v7473_v36  ;;  %v12907_v38 = vor.u32 %v12905_v29, %v12903_v42  ;;  %v21521_v13 = vld [vmem:[#allocation3 + $0x110] sm:$0xff]  }
 0x56b   : > { %23673 = vst [vmem:[#allocation113_spill] sm:$0xff] %v21480_v24  ;;  %v23677_v24 = vld [vmem:[#allocation40_spill] sm:$0xff]  ;;  %v21501_v45 = vadd.f32 %v16449_v27, %v8565_v46  ;;  %v23681_v46 = vld [vmem:[#allocation29_spill] sm:$0xff]  ;;  %v10526_v31 = vsel %vm1747_vm1, %v10521_v8, %v10525_v6  ;;  %v10534_v51 = vsel %vm1747_vm1, %v10529_v50, %v10533_v57  ;;  %v10541_v27 = vrot.slane %v10539_v7, 1 }
 0x56c   : > { %v21493_v14 = vpop.f32.mrf.mxu0  ;;  %16875 = vmatmul.mubr.bf16.gmra.mxu0 %v12888_v17  ;;  %v7486_v26 = vadd.f32 %v21002_v12, %v23677_v24  ;;  %v9320_v4 = vpop.f32.mrf.mxu1  ;;  %v21509_v17 = vld [vmem:[#allocation3 + $0x108] sm:$0xff]   ;;  %v8568_v36 = vadd.f32 %v23681_v46, %v7494_v28  ;;  %v23684_v28 = vld [vmem:[#allocation131_spill] sm:$0xff]  ;;  %v12911_v46 = vrot.slane %v12909_v30, 1  ;;  %v10535_v50 = vshrl.u32 %v21461_v20, 16 }
 0x56d   : > { %23676 = vst [vmem:[#allocation20_spill] sm:$0xff] %v21493_v14  ;;  %16878 = vmatprep.mubr.bf16.mxu0 %v12896_v9  ;;  %v23680_v14 = vld [vmem:[#allocation41_spill] sm:$0xff]  ;;  %v21513_v24 = vadd.f32 %v9320_v4, %v8563_v61  ;;  %v12917_v9 = vshll.u32 %v21497_v2, 16  ;;  %v12899_v61 = vor.u32 %v12897_v63, %v12895_v56  ;;  %v10543_v7 = vshrl.u32 %v21473_v39, 16 }
 0x56e   : > { %v21504_v1 = vpop.f32.mrf.mxu0  ;;  %v7497_v12 = vadd.f32 %v21007_v52, %v23680_v14  ;;  %v16452_v10 = vpop.f32.mrf.mxu1  ;;  %16643 = vmatmul.mubr.bf16.gmra.mxu1 %v10526_v31  ;;  %v8566_v6 = vadd.f32 %v23684_v28, %v7486_v26  ;;  %v10547_v29 = vshll.u32 %v21509_v17, 16  ;;  %v21533_v31 = vld [vmem:[#allocation3 + $0x108] sm:$0xff]   ;;  %v12912_v20 = vsel %vm1747_vm1, %v12907_v38, %v12911_v46  ;;  %v21545_v28 = vld [vmem:[#allocation3 + $0x110] sm:$0xff]  }
 0x56f   : > { %23679 = vst [vmem:[#allocation36_spill] sm:$0xff] %v21504_v1  ;;  %v23683_v1 = vld [vmem:[#allocation39_spill] sm:$0xff]  ;;  %v21525_v14 = vadd.f32 %v16452_v10, %v8568_v36  ;;  %16646 = vmatprep.mubr.bf16.mxu1 %v10534_v51  ;;  %v23687_v36 = vld [vmem:[#allocation32_spill] sm:$0xff]  ;;  %v12904_v56 = vsel %vm1747_vm1, %v12899_v61, %v12903_v42  ;;  %v10545_v39 = vor.u32 %v10543_v7, %v10541_v27  ;;  %v12919_v30 = vrot.slane %v12917_v9, 1 }
 0x570   : > { %v21517_v25 = vpop.f32.mrf.mxu0  ;;  %v7489_v52 = vadd.f32 %v21012_v35, %v23683_v1  ;;  %v9333_v8 = vpop.f32.mrf.mxu1  ;;  %v8569_v26 = vadd.f32 %v23687_v36, %v7497_v12  ;;  %v10555_v51 = vshll.u32 %v21521_v13, 16  ;;  %v23690_v12 = vld [vmem:[#allocation133_spill] sm:$0xff]  ;;  %v10549_v36 = vrot.slane %v10547_v29, 1 }
 0x571   : > { %23682 = vst [vmem:[#allocation21_spill] sm:$0xff] %v21517_v25  ;;  %v23686_v25 = vld [vmem:[#allocation24_spill] sm:$0xff]  ;;  %v21537_v1 = vadd.f32 %v9333_v8, %v8566_v6  ;;  %v10537_v6 = vor.u32 %v10535_v50, %v10533_v57  ;;  %v12913_v38 = vshrl.u32 %v21485_v21, 16  ;;  %v12921_v9 = vshrl.u32 %v21497_v2, 16 }
 0x572   : > { %v21528_v4 = vpop.f32.mrf.mxu0  ;;  %v7510_v35 = vadd.f32 %v21016_v44, %v23686_v25  ;;  %v16453_v63 = vpop.f32.mrf.mxu1  ;;  %v8567_v42 = vadd.f32 %v23690_v12, %v7489_v52  ;;  %v12925_v7 = vshll.u32 %v21533_v31, 16  ;;  %v10550_v21 = vsel %vm1747_vm1, %v10545_v39, %v10549_v36  ;;  %v23695_v12 = vld [vmem:[#allocation26_spill] sm:$0xff] }
 0x573   : > { %23685 = vst [vmem:[#allocation35_spill] sm:$0xff] %v21528_v4  ;;  %v23689_v4 = vld [vmem:[#allocation42_spill] sm:$0xff]  ;;  %v21549_v25 = vadd.f32 %v16453_v63, %v8569_v26  ;;  %v10542_v57 = vsel %vm1747_vm1, %v10537_v6, %v10541_v27  ;;  %v12923_v2 = vor.u32 %v12921_v9, %v12919_v30  ;;  %v10557_v63 = vrot.slane %v10555_v51, 1  ;;  %v17486_v27 = vld [vmem:[#allocation3 + $0x120] ss:$0 sps:$4 sm:$0x11]  }
 0x574   : > { %v21541_v10 = vpop.f32.mrf.mxu0  ;;  %16879 = vmatmul.mubr.bf16.gmra.mxu0 %v12904_v56  ;;  %v7502_v44 = vadd.f32 %v21022_v41, %v23689_v4  ;;  %v9336_v61 = vpop.f32.mrf.mxu1  ;;  %v21557_v56 = vld [vmem:[#allocation3 + $0x118] sm:$0xff]   ;;  %v10551_v39 = vshrl.u32 %v21509_v17, 16  ;;  %v10559_v51 = vshrl.u32 %v21521_v13, 16 }
 0x575   : > { %23688 = vst [vmem:[#allocation128_spill] sm:$0xff] %v21541_v10  ;;  %16882 = vmatprep.mubr.bf16.mxu0 %v12912_v20  ;;  %v23692_v10 = vld [vmem:[#allocation130_spill] sm:$0xff]  ;;  %v21561_v4 = vadd.f32 %v9336_v61, %v8567_v42  ;;  %v12933_v20 = vshll.u32 %v21545_v28, 16  ;;  %v12915_v42 = vor.u32 %v12913_v38, %v12911_v46  ;;  %v10563_v9 = vshll.u32 %v21557_v56, 16 }
 0x576   : > { %v21552_v8 = vpop.f32.mrf.mxu0  ;;  %v7513_v41 = vadd.f32 %v21027_v23, %v23692_v10  ;;  %v23693_v26 = vld [vmem:[#allocation30_spill] sm:$0xff]  ;;  %v16456_v50 = vpop.f32.mrf.mxu1  ;;  %16647 = vmatmul.mubr.bf16.gmra.mxu1 %v10542_v57  ;;  %v23696_v10 = vld [vmem:[#allocation33_spill] sm:$0xff]  ;;  %v10553_v13 = vor.u32 %v10551_v39, %v10549_v36 }
 0x577   : > { %23691 = vst [vmem:[#allocation23_spill] sm:$0xff] %v21552_v8  ;;  %v8572_v52 = vadd.f32 %v23693_v26, %v7510_v35  ;;  %v7505_v8 = vadd.f32 %v21032_v49, %v23695_v12  ;;  %16650 = vmatprep.mubr.bf16.mxu1 %v10550_v21  ;;  %v8570_v35 = vadd.f32 %v23696_v10, %v7502_v44  ;;  %v12927_v26 = vrot.slane %v12925_v7, 1  ;;  %v21579_v57 = vld [vmem:[#allocation3 + $0x118] sm:$0xff]   ;;  %v23698_v49 = vld [vmem:[#allocation27_spill] sm:$0xff]  ;;  %v23699_v44 = vld [vmem:[#allocation92_spill] sm:$0xff] }
 0x578   : > { %v21565_v29 = vpop.f32.mrf.mxu0  ;;  %v9349_v6 = vpop.f32.mrf.mxu1  ;;  %v8573_v46 = vadd.f32 %v23699_v44, %v7513_v41  ;;  %v12920_v38 = vsel %vm1747_vm1, %v12915_v42, %v12919_v30  ;;  %v10561_v7 = vor.u32 %v10559_v51, %v10557_v63  ;;  %v12935_v10 = vrot.slane %v12933_v20, 1  ;;  %v23704_v20 = vld [vmem:[#allocation45_spill] sm:$0xff]  ;;  %v21606_v51 = vld [vmem:[#allocation3 + $0x120] sm:$0xff]  }
 0x579   : > { %23694 = vst [vmem:[#allocation59_spill] sm:$0xff] %v21565_v29  ;;  %v21571_v23 = vadd.f32 %v16456_v50, %v8572_v52  ;;  %v7526_v52 = vadd.f32 %v21038_v48, %v23698_v49  ;;  %v21583_v50 = vadd.f32 %v9349_v6, %v8570_v35  ;;  %v12928_v17 = vsel %vm1747_vm1, %v12923_v2, %v12927_v26  ;;  %v23702_v48 = vld [vmem:[#allocation47_spill] sm:$0xff] }
 0x57a   : > { %v21574_v61 = vpop.f32.mrf.mxu0  ;;  %v16457_v21 = vpop.f32.mrf.mxu1  ;;  %v8571_v35 = vadd.f32 %v23702_v48, %v7505_v8  ;;  %v12929_v41 = vshrl.u32 %v21533_v31, 16  ;;  %v10565_v6 = vrot.slane %v10563_v9, 1  ;;  %v12937_v49 = vshrl.u32 %v21545_v28, 16 }
 0x57b   : > { %23697 = vst [vmem:[#allocation38_spill] sm:$0xff] %v21574_v61  ;;  %v23701_v61 = vld [vmem:[#allocation132_spill] sm:$0xff]  ;;  %v21592_v15 = vadd.f32 %v16457_v21, %v8573_v46  ;;  %v12941_v36 = vshll.u32 %v21579_v57, 16  ;;  %v10571_v2 = vshll.u32 %v17486_v27, 16  ;;  %v7529_v39 = vadd.f32 %v21051_v18, %v23704_v20 }
 0x57c   : > { %v21587_v12 = vpop.f32.mrf.mxu0  ;;  %16883 = vmatmul.mubr.bf16.gmra.mxu0 %v12920_v38  ;;  %v7518_v29 = vadd.f32 %v21044_v37, %v23701_v61  ;;  %v9352_v30 = vpop.f32.mrf.mxu1  ;;  %v8576_v61 = vadd.f32 %v20732_v62, %v7526_v52  ;;  %v10558_v8 = vsel %vm1747_vm1, %v10553_v13, %v10557_v63  ;;  %v10566_v28 = vsel %vm1747_vm1, %v10561_v7, %v10565_v6  ;;  %v23706_v38 = vld [vmem:[#allocation43_spill] sm:$0xff] }
 0x57d   : > { %23700 = vst [vmem:[#allocation34_spill] sm:$0xff] %v21587_v12  ;;  %16886 = vmatprep.mubr.bf16.mxu0 %v12928_v17  ;;  %v21602_v37 = vadd.f32 %v9352_v30, %v8571_v35  ;;  %v12931_v9 = vor.u32 %v12929_v41, %v12927_v26  ;;  %v12939_v46 = vor.u32 %v12937_v49, %v12935_v10  ;;  %v10567_v27 = vshrl.u32 %v21557_v56, 16  ;;  %v23708_v26 = vld [vmem:[#allocation31_spill] sm:$0xff]  ;;  %v23709_v35 = vld [vmem:[#allocation165_spill] sm:$0xff]  ;;  %v23710_v30 = vld [vmem:[#allocation48_spill] sm:$0xff] }
 0x57e   : > { %v21596_v42 = vpop.f32.mrf.mxu0  ;;  %v16460_v31 = vpop.f32.mrf.mxu1  ;;  %16651 = vmatmul.mubr.bf16.gmra.mxu1 %v10558_v8  ;;  %v7521_v18 = vadd.f32 %v21055_v54, %v23706_v38  ;;  %v8574_v62 = vadd.f32 %v20740_v34, %v7518_v29  ;;  %v12943_v13 = vrot.slane %v12941_v36, 1  ;;  %v10573_v7 = vrot.slane %v10571_v2, 1  ;;  %v23714_v8 = vld [vmem:[#allocation49_spill] sm:$0xff] }
 0x57f   : > { %23703 = vst [vmem:[#allocation88_spill] sm:$0xff] %v21596_v42  ;;  %v21614_v21 = vadd.f32 %v16460_v31, %v8576_v61  ;;  %16654 = vmatprep.mubr.bf16.mxu1 %v10566_v28  ;;  %v12936_v17 = vsel %vm1747_vm1, %v12931_v9, %v12935_v10  ;;  %v10569_v48 = vor.u32 %v10567_v27, %v10565_v6  ;;  %v12949_v49 = vshll.u32 %v21606_v51, 16  ;;  %v23712_v10 = vld [vmem:[#allocation89_spill] sm:$0xff]  ;;  %v23713_v6 = vld [vmem:[#allocation167_spill] sm:$0xff]  ;;  %v23769_v42 = vld [vmem:[#allocation70_spill] sm:$0xff] }
 0x580   : > { %v21608_v44 = vpop.f32.mrf.mxu0  ;;  %v9365_v63 = vpop.f32.mrf.mxu1  ;;  %v7542_v41 = vadd.f32 %v23709_v35, %v23708_v26  ;;  %v8577_v54 = vadd.f32 %v23710_v30, %v7529_v39  ;;  %v12944_v34 = vsel %vm1747_vm1, %v12939_v46, %v12943_v13  ;;  %v12945_v29 = vshrl.u32 %v21579_v57, 16  ;;  %v17530_v27 = vld [vmem:[#allocation3 + $0x30] sm:$0xf]  ;;  %v17531_v38 = vld [vmem:[#allocation3 + $0x34] sm:$0xf]  ;;  %v23716_v46 = vld [vmem:[#allocation134_spill] sm:$0xff] }
 0x581   : > { %23705 = vst [vmem:[#allocation37_spill] sm:$0xff] %v21608_v44  ;;  %v21622_v56 = vadd.f32 %v9365_v63, %v8574_v62  ;;  %v7534_v36 = vadd.f32 %v23713_v6, %v23712_v10  ;;  %v8575_v31 = vadd.f32 %v23714_v8, %v7521_v18  ;;  %v10574_v9 = vsel %vm1747_vm1, %v10569_v48, %v10573_v7  ;;  %v23718_v35 = vld [vmem:[#allocation94_spill] sm:$0xff]  ;;  %v23723_v8 = vld [vmem:[#allocation52_spill] sm:$0xff] }
 0x582   : > { %v21617_v52 = vpop.f32.mrf.mxu0  ;;  %v16461_v20 = vpop.f32.mrf.mxu1  ;;  %v14300_v62 = vcombine.low %v17530_v27, %v17531_v38  ;;  %v12947_v63 = vor.u32 %v12945_v29, %v12943_v13  ;;  %v8580_v30 = vadd.f32 %v23718_v35, %v7542_v41  ;;  %v23721_v13 = vld [vmem:[#allocation97_spill] sm:$0xff]  ;;  %v23729_v35 = vld [vmem:[#allocation102_spill] sm:$0xff] }
 0x583   : > { %23707 = vst [vmem:[#allocation44_spill] sm:$0xff] %v21617_v52  ;;  %v21632_v2 = vadd.f32 %v16461_v20, %v8577_v54  ;;  %v21643_v54 = vrot.slane %v12949_v49, 1  ;;  %v8578_v29 = vadd.f32 %v23721_v13, %v7534_v36  ;;  %v23731_v13 = vld [vmem:[#allocation53_spill] sm:$0xff]  ;;  %v17541_v44 = vld [vmem:[#allocation3 + $0x58] sm:$0xf] }
 0x584   : > { %v21626_v61 = vpop.f32.mrf.mxu0  ;;  %16887 = vmatmul.mubr.bf16.gmra.mxu0 %v12936_v17  ;;  %v9368_v28 = vpop.f32.mrf.mxu1  ;;  %v23717_v17 = vld [vmem:[#allocation169_spill] sm:$0xff] }
 0x585   : > { %23711 = vst [vmem:[#allocation22_spill] sm:$0xff] %v21626_v61  ;;  %16890 = vmatprep.mubr.bf16.mxu0 %v12944_v34  ;;  %v7545_v57 = vadd.f32 %v23717_v17, %v23716_v46  ;;  %v21640_v26 = vadd.f32 %v9368_v28, %v8575_v31  ;;  %v23720_v34 = vld [vmem:[#allocation135_spill] sm:$0xff]  ;;  %v23724_v31 = vld [vmem:[#allocation172_spill] sm:$0xff]  ;;  %v12952_v27 = vsel %vm1747_vm1, %v12947_v63, %v21643_v54  ;;  %v23728_v46 = vld [vmem:[#allocation174_spill] sm:$0xff] }
 0x586   : > { %v21635_v39 = vpop.f32.mrf.mxu0  ;;  %v16464_v20 = vpop.f32.mrf.mxu1  ;;  %16655 = vmatmul.mubr.bf16.gmra.mxu1 %v10574_v9  ;;  %v7537_v48 = vadd.f32 %v21081_v11, %v23720_v34  ;;  %v7558_v41 = vadd.f32 %v23724_v31, %v23723_v8  ;;  %v23725_v28 = vld [vmem:[#allocation56_spill] sm:$0xff]  ;;  %v23733_v63 = vld [vmem:[#allocation51_spill] sm:$0xff] }
 0x587   : > { %23715 = vst [vmem:[#allocation25_spill] sm:$0xff] %v21635_v39  ;;  %v21649_v7 = vadd.f32 %v16464_v20, %v8580_v30  ;;  %16754 = vmatprep.mubr.bf16.mxu1 %v14300_v62  ;;  %v8581_v9 = vadd.f32 %v23725_v28, %v7545_v57  ;;  %v23727_v62 = vld [vmem:[#allocation93_spill] sm:$0xff]  ;;  %v17532_v31 = vld [vmem:[#allocation3 + $0x40] sm:$0xf]  ;;  %v17533_v28 = vld [vmem:[#allocation3 + $0x44] sm:$0xf] }
 0x588   : > { %v21645_v18 = vpop.f32.mrf.mxu0  ;;  %v9381_v10 = vpop.f32.mrf.mxu1  ;;  %v7550_v36 = vadd.f32 %v23728_v46, %v23727_v62  ;;  %v8579_v30 = vadd.f32 %v23729_v35, %v7537_v48  ;;  %v8584_v8 = vadd.f32 %v23733_v63, %v7558_v41  ;;  %v23738_v48 = vld [vmem:[#allocation46_spill] sm:$0xff]  ;;  %v23752_v39 = vld [vmem:[#allocation65_spill] sm:$0xff] }
 0x589   : > { %23719 = vst [vmem:[#allocation40_spill] sm:$0xff] %v21645_v18  ;;  %v21656_v49 = vadd.f32 %v9381_v10, %v8578_v29  ;;  %v23732_v29 = vld [vmem:[#allocation176_spill] sm:$0xff]  ;;  %v23739_v46 = vld [vmem:[#allocation178_spill] sm:$0xff] }
 0x58a   : > { %v21652_v6 = vpop.f32.mrf.mxu0  ;;  %v16465_v38 = vpop.f32.mrf.mxu1  ;;  %v7561_v57 = vadd.f32 %v23732_v29, %v23731_v13  ;;  %v7553_v35 = vadd.f32 %v23739_v46, %v23738_v48  ;;  %v17534_v29 = vld [vmem:[#allocation8 + $0x230] sm:$0xff]   ;;  %v23742_v63 = vld [vmem:[#allocation50_spill] sm:$0xff]  ;;  %v17535_v18 = vld [vmem:[#allocation3 + $0x48] sm:$0xf] }
 0x58b   : > { %23722 = vst [vmem:[#allocation28_spill] sm:$0xff] %v21652_v6  ;;  %v21665_v17 = vadd.f32 %v16465_v38, %v8581_v9  ;;  %v23735_v9 = vld [vmem:[#allocation112_spill] sm:$0xff]  ;;  %v23736_v38 = vld [vmem:[#allocation119_spill] sm:$0xff] }
 0x58c   : > { %v21661_v11 = vpop.f32.mrf.mxu0  ;;  %16891 = vmatmul.mubr.bf16.gmra.mxu0 %v12952_v27  ;;  %v9384_v20 = vpop.f32.mrf.mxu1  ;;  %v14302_v27 = vcombine.low %v17532_v31, %v17533_v28  ;;  %v23737_v62 = vcombine.low %v23735_v9, %v23736_v38  ;;  %v23743_v31 = vld [vmem:[#allocation180_spill] sm:$0xff]  ;;  %v23744_v38 = vld [vmem:[#allocation106_spill] sm:$0xff] }
 0x58d   : > { %23726 = vst [vmem:[#allocation41_spill] sm:$0xff] %v21661_v11  ;;  %v21672_v10 = vadd.f32 %v9384_v20, %v8579_v30  ;;  %v23740_v30 = vld [vmem:[#allocation98_spill] sm:$0xff]  ;;  %v7574_v28 = vadd.f32 %v23743_v31, %v23742_v63  ;;  %v17536_v63 = vld [vmem:[#allocation3 + $0x4c] sm:$0xf] }
 0x58e   : > { %v21668_v34 = vpop.f32.mrf.mxu0  ;;  %v16468_v11 = vpop.f32.mrf.mxu1  ;;  %16755 = vmatmul.mubr.bf16.vlgmr.msra.gmra.mxu1 %v23737_v62  ;;  %v8582_v41 = vadd.f32 %v23740_v30, %v7550_v36  ;;  %v8585_v62 = vadd.f32 %v23744_v38, %v7561_v57  ;;  %v23748_v36 = vld [vmem:[#allocation66_spill] sm:$0xff]  ;;  %v23750_v57 = vld [vmem:[#allocation64_spill] sm:$0xff] }
 0x58f   : > { %23730 = vst [vmem:[#allocation29_spill] sm:$0xff] %v21668_v34  ;;  %v21682_v34 = vadd.f32 %v16468_v11, %v8584_v8  ;;  %16758 = vmatprep.mubr.bf16.mxu1 %v14302_v27  ;;  %16906 = vmatpush3.bf16.msra.mxu1 %v21200_v40  ;;  %v23746_v8 = vld [vmem:[#allocation103_spill] sm:$0xff]  ;;  %v23747_v27 = vld [vmem:[#allocation182_spill] sm:$0xff]  ;;  %v8583_v30 = vadd.f32 %v23748_v36, %v7553_v35  ;;  %v23751_v31 = vld [vmem:[#allocation184_spill] sm:$0xff] }
 0x590   : > { %v21675_v6 = vpop.f32.mrf.mxu0  ;;  %v9397_v20 = vpop.f32.mrf.mxu1  ;;  %16899 = vmatprep.subr.bf16.mxu1 %v17534_v29  ;;  %v7566_v40 = vadd.f32 %v23747_v27, %v23746_v8  ;;  %v7577_v38 = vadd.f32 %v23751_v31, %v23750_v57  ;;  %v8588_v8 = vadd.f32 %v23752_v39, %v7574_v28  ;;  %v23754_v36 = vld [vmem:[#allocation57_spill] sm:$0xff]  ;;  %v17540_v39 = vld [vmem:[#allocation8 + $0x220] sm:$0xff]   ;;  %v23758_v28 = vld [vmem:[#allocation60_spill] sm:$0xff] }
 0x591   : > { %23734 = vst [vmem:[#allocation39_spill] sm:$0xff] %v21675_v6  ;;  %v21690_v9 = vadd.f32 %v9397_v20, %v8582_v41  ;;  %v14303_v41 = vcombine.low %v17535_v18, %v17536_v63  ;;  %v17537_v20 = vld [vmem:[#allocation8 + $0x228] sm:$0xff]   ;;  %v23756_v63 = vld [vmem:[#allocation63_spill] sm:$0xff] }
 0x592   : > { %v21686_v13 = vpop.f32.mrf.mxu0  ;;  %v16469_v48 = vpop.f32.mrf.mxu1  ;;  %v8586_v52 = vadd.f32 %v23756_v63, %v7566_v40  ;;  %v23759_v57 = vld [vmem:[#allocation188_spill] sm:$0xff] }
 0x593   : > { %23741 = vst [vmem:[#allocation131_spill] sm:$0xff] %v21686_v13  ;;  %v21697_v46 = vadd.f32 %v16469_v48, %v8585_v62  ;;  %16907 = vmatpush3.bf16.msra.mxu1 %v17534_v29  ;;  %v17538_v62 = vld [vmem:[#allocation3 + $0x50] sm:$0xf]  ;;  %v17539_v48 = vld [vmem:[#allocation3 + $0x54] sm:$0xf]  ;;  %v7590_v31 = vadd.f32 %v23759_v57, %v23758_v28  ;;  %v23768_v57 = vld [vmem:[#allocation192_spill] sm:$0xff] }
 0x594   : > { %v21693_v11 = vpop.f32.mrf.mxu0  ;;  %v9400_v13 = vpop.f32.mrf.mxu1  ;;  %16900 = vmatprep.subr.bf16.mxu1 %v17537_v20  ;;  %v14304_v27 = vcombine.low %v17538_v62, %v17539_v48  ;;  %v17542_v28 = vld [vmem:[#allocation3 + $0x5c] sm:$0xf] }
 0x595   : > { %23745 = vst [vmem:[#allocation24_spill] sm:$0xff] %v21693_v11  ;;  %v21704_v11 = vadd.f32 %v9400_v13, %v8583_v30 }
 0x596   : > { %v21700_v6 = vpop.f32.mrf.mxu0  ;;  %v16472_v35 = vpop.f32.mrf.mxu1  ;;  %16759 = vmatmul.mubr.bf16.gmra.mxu1 %v14303_v41  ;;  %v23760_v41 = vld [vmem:[#allocation55_spill] sm:$0xff] }
 0x597   : > { %23749 = vst [vmem:[#allocation32_spill] sm:$0xff] %v21700_v6  ;;  %v23755_v6 = vld [vmem:[#allocation186_spill] sm:$0xff]  ;;  %v21711_v18 = vadd.f32 %v16472_v35, %v8588_v8  ;;  %16762 = vmatprep.mubr.bf16.mxu1 %v14304_v27  ;;  %16908 = vmatpush3.bf16.msra.mxu1 %v17537_v20  ;;  %v8589_v48 = vadd.f32 %v23760_v41, %v7577_v38  ;;  %v23762_v8 = vld [vmem:[#allocation68_spill] sm:$0xff]  ;;  %v23765_v20 = vld [vmem:[#allocation67_spill] sm:$0xff] }
 0x598   : > { %v21707_v29 = vpop.f32.mrf.mxu0  ;;  %v7569_v61 = vadd.f32 %v23755_v6, %v23754_v36  ;;  %v9413_v13 = vpop.f32.mrf.mxu1  ;;  %16901 = vmatprep.subr.bf16.mxu1 %v17540_v39  ;;  %v23763_v27 = vld [vmem:[#allocation190_spill] sm:$0xff]  ;;  %v23767_v38 = vld [vmem:[#allocation99_spill] sm:$0xff] }
 0x599   : > { %23753 = vst [vmem:[#allocation42_spill] sm:$0xff] %v21707_v29  ;;  %v21718_v62 = vadd.f32 %v9413_v13, %v8586_v52  ;;  %v7582_v35 = vadd.f32 %v23763_v27, %v23762_v8  ;;  %v14305_v52 = vcombine.low %v17541_v44, %v17542_v28  ;;  %v17543_v13 = vld [vmem:[#allocation8 + $0x218] sm:$0xff]   ;;  %v7593_v41 = vadd.f32 %v23768_v57, %v23767_v38  ;;  %v23774_v28 = vld [vmem:[#allocation71_spill] sm:$0xff]  ;;  %v23777_v38 = vld [vmem:[#allocation196_spill] sm:$0xff] }
 0x59a   : > { %v21714_v30 = vpop.f32.mrf.mxu0  ;;  %v16473_v29 = vpop.f32.mrf.mxu1  ;;  %v8587_v36 = vadd.f32 %v23765_v20, %v7569_v61  ;;  %v8592_v8 = vadd.f32 %v23769_v42, %v7590_v31  ;;  %v23771_v20 = vld [vmem:[#allocation61_spill] sm:$0xff] }
 0x59b   : > { %23757 = vst [vmem:[#allocation133_spill] sm:$0xff] %v21714_v30  ;;  %v21725_v40 = vadd.f32 %v16473_v29, %v8589_v48  ;;  %16909 = vmatpush3.bf16.msra.mxu1 %v17540_v39  ;;  %v17544_v29 = vld [vmem:[#allocation3 + $0x60] sm:$0xf]  ;;  %v17545_v48 = vld [vmem:[#allocation3 + $0x64] sm:$0xf]  ;;  %v17546_v42 = vld [vmem:[#allocation8 + $0x210] sm:$0xff]  }
 0x59c   : > { %v21721_v6 = vpop.f32.mrf.mxu0  ;;  %v9416_v63 = vpop.f32.mrf.mxu1  ;;  %16902 = vmatprep.subr.bf16.mxu1 %v17543_v13  ;;  %v14306_v27 = vcombine.low %v17544_v29, %v17545_v48  ;;  %v23776_v31 = vld [vmem:[#allocation69_spill] sm:$0xff] }
 0x59d   : > { %23761 = vst [vmem:[#allocation130_spill] sm:$0xff] %v21721_v6  ;;  %23764 = vst [vmem:[#allocation30_spill] sm:$0xff] %v21725_v40  ;;  %v21732_v6 = vadd.f32 %v9416_v63, %v8587_v36  ;;  %v8590_v40 = vadd.f32 %v23774_v28, %v7582_v35  ;;  %v7606_v57 = vadd.f32 %v23777_v38, %v23776_v31  ;;  %v17548_v31 = vld [vmem:[#allocation3 + $0x6c] sm:$0xf]  ;;  %v23786_v38 = vld [vmem:[#allocation199_spill] sm:$0xff] }
 0x59e   : > { %v21728_v30 = vpop.f32.mrf.mxu0  ;;  %v16476_v61 = vpop.f32.mrf.mxu1  ;;  %16763 = vmatmul.mubr.bf16.gmra.mxu1 %v14305_v52  ;;  %v23779_v52 = vld [vmem:[#allocation73_spill] sm:$0xff] }
 0x59f   : > { %23766 = vst [vmem:[#allocation26_spill] sm:$0xff] %v21728_v30  ;;  %v23772_v30 = vld [vmem:[#allocation194_spill] sm:$0xff]  ;;  %v21739_v44 = vadd.f32 %v16476_v61, %v8592_v8  ;;  %16766 = vmatprep.mubr.bf16.mxu1 %v14306_v27  ;;  %16910 = vmatpush3.bf16.msra.mxu1 %v17543_v13  ;;  %v8593_v48 = vadd.f32 %v23779_v52, %v7593_v41  ;;  %v23783_v13 = vld [vmem:[#allocation127_spill] sm:$0xff]  ;;  %v23785_v41 = vld [vmem:[#allocation72_spill] sm:$0xff] }
 0x5a0   : > { %v21735_v39 = vpop.f32.mrf.mxu0  ;;  %v7585_v12 = vadd.f32 %v23772_v30, %v23771_v20  ;;  %v9429_v36 = vpop.f32.mrf.mxu1  ;;  %16903 = vmatprep.subr.bf16.mxu1 %v17546_v42  ;;  %v23781_v8 = vld [vmem:[#allocation54_spill] sm:$0xff]  ;;  %v7609_v52 = vadd.f32 %v23786_v38, %v23785_v41  ;;  %v23796_v41 = vld [vmem:[#allocation203_spill] sm:$0xff] }
 0x5a1   : > { %23770 = vst [vmem:[#allocation33_spill] sm:$0xff] %v21735_v39  ;;  %23773 = vst [vmem:[#allocation27_spill] sm:$0xff] %v21739_v44  ;;  %v21746_v29 = vadd.f32 %v9429_v36, %v8590_v40  ;;  %v7598_v27 = vadd.f32 %v21179_v5, %v23781_v8  ;;  %v17549_v36 = vld [vmem:[#allocation8 + $0x208] sm:$0xff]  }
 0x5a2   : > { %v21742_v63 = vpop.f32.mrf.mxu0  ;;  %v16477_v39 = vpop.f32.mrf.mxu1  ;;  %v8591_v61 = vadd.f32 %v23783_v13, %v7585_v12  ;;  %v23790_v13 = vld [vmem:[#allocation129_spill] sm:$0xff] }
 0x5a3   : > { %23775 = vst [vmem:[#allocation92_spill] sm:$0xff] %v21742_v63  ;;  %23778 = vst [vmem:[#allocation132_spill] sm:$0xff] %v21746_v29  ;;  %v21753_v35 = vadd.f32 %v16477_v39, %v8593_v48  ;;  %16911 = vmatpush3.bf16.msra.mxu1 %v17546_v42  ;;  %v17547_v63 = vld [vmem:[#allocation3 + $0x68] sm:$0xf]  ;;  %v23788_v29 = vld [vmem:[#allocation74_spill] sm:$0xff] }
 0x5a4   : > { %v21749_v30 = vpop.f32.mrf.mxu0  ;;  %v9432_v20 = vpop.f32.mrf.mxu1  ;;  %v14307_v40 = vcombine.low %v17547_v63, %v17548_v31  ;;  %16904 = vmatprep.subr.bf16.mxu1 %v17549_v36  ;;  %v8596_v5 = vadd.f32 %v23788_v29, %v7606_v57  ;;  %v17550_v39 = vld [vmem:[#allocation3 + $0x70] sm:$0xf]  ;;  %v17551_v48 = vld [vmem:[#allocation3 + $0x74] sm:$0xf]  ;;  %v17552_v57 = vld [vmem:[#allocation8 + $0x200] sm:$0xff]  }
 0x5a5   : > { %23780 = vst [vmem:[#allocation47_spill] sm:$0xff] %v21749_v30  ;;  %23782 = vst [vmem:[#allocation45_spill] sm:$0xff] %v21753_v35  ;;  %v21760_v30 = vadd.f32 %v9432_v20, %v8591_v61  ;;  %v14308_v8 = vcombine.low %v17550_v39, %v17551_v48  ;;  %v23793_v31 = vld [vmem:[#allocation81_spill] sm:$0xff]  ;;  %v23795_v29 = vld [vmem:[#allocation107_spill] sm:$0xff] }
 0x5a6   : > { %v21756_v28 = vpop.f32.mrf.mxu0  ;;  %v16480_v12 = vpop.f32.mrf.mxu1  ;;  %16767 = vmatmul.mubr.bf16.gmra.mxu1 %v14307_v40  ;;  %v8594_v44 = vadd.f32 %v23793_v31, %v7598_v27  ;;  %v7622_v38 = vadd.f32 %v23796_v41, %v23795_v29  ;;  %v23798_v40 = vld [vmem:[#allocation83_spill] sm:$0xff]  ;;  %v17554_v29 = vld [vmem:[#allocation3 + $0x7c] sm:$0xf] }
 0x5a7   : > { %23784 = vst [vmem:[#allocation43_spill] sm:$0xff] %v21756_v28  ;;  %23787 = vst [vmem:[#allocation31_spill] sm:$0xff] %v21760_v30  ;;  %v23791_v28 = vld [vmem:[#allocation201_spill] sm:$0xff]  ;;  %v21767_v63 = vadd.f32 %v16480_v12, %v8596_v5  ;;  %16770 = vmatprep.mubr.bf16.mxu1 %v14308_v8  ;;  %16912 = vmatpush3.bf16.msra.mxu1 %v17549_v36  ;;  %v8597_v48 = vadd.f32 %v23798_v40, %v7609_v52  ;;  %v23800_v5 = vld [vmem:[#allocation110_spill] sm:$0xff] }
 0x5a8   : > { %v21763_v42 = vpop.f32.mrf.mxu0  ;;  %v7601_v35 = vadd.f32 %v23791_v28, %v23790_v13  ;;  %v9445_v61 = vpop.f32.mrf.mxu1  ;;  %16905 = vmatprep.subr.bf16.mxu1 %v17552_v57  ;;  %v23801_v8 = vld [vmem:[#allocation205_spill] sm:$0xff]  ;;  %v23803_v36 = vld [vmem:[#allocation80_spill] sm:$0xff]  ;;  %v23806_v41 = vld [vmem:[#allocation207_spill] sm:$0xff] }
 0x5a9   : > { %23789 = vst [vmem:[#allocation165_spill] sm:$0xff] %v21763_v42  ;;  %23792 = vst [vmem:[#allocation48_spill] sm:$0xff] %v21767_v63  ;;  %v21774_v39 = vadd.f32 %v9445_v61, %v8594_v44  ;;  %v7614_v12 = vadd.f32 %v23801_v8, %v23800_v5  ;;  %v17553_v63 = vld [vmem:[#allocation3 + $0x78] sm:$0xf]  ;;  %v23805_v61 = vld [vmem:[#allocation125_spill] sm:$0xff] }
 0x5aa   : > { %v21770_v20 = vpop.f32.mrf.mxu0  ;;  %v16481_v42 = vpop.f32.mrf.mxu1  ;;  %v8595_v13 = vadd.f32 %v23803_v36, %v7601_v35  ;;  %v14309_v44 = vcombine.low %v17553_v63, %v17554_v29  ;;  %v7625_v52 = vadd.f32 %v23806_v41, %v23805_v61  ;;  %v17555_v30 = vld [vmem:[#allocation3 + $0x80] sm:$0xf]  ;;  %v17556_v5 = vld [vmem:[#allocation3 + $0x84] sm:$0xf]  ;;  %v23810_v35 = vld [vmem:[#allocation77_spill] sm:$0xff] }
 0x5ab   : > { %23794 = vst [vmem:[#allocation89_spill] sm:$0xff] %v21770_v20  ;;  %23797 = vst [vmem:[#allocation167_spill] sm:$0xff] %v21774_v39  ;;  %v21781_v27 = vadd.f32 %v16481_v42, %v8597_v48  ;;  %16913 = vmatpush3.bf16.msra.mxu1 %v17552_v57  ;;  %v14310_v42 = vcombine.low %v17555_v30, %v17556_v5  ;;  %v23811_v57 = vld [vmem:[#allocation209_spill] sm:$0xff]  ;;  %v23813_v63 = vld [vmem:[#allocation104_spill] sm:$0xff] }
 0x5ac   : > { %v21777_v28 = vpop.f32.mrf.mxu0  ;;  %v9448_v31 = vpop.f32.mrf.mxu1  ;;  %v7617_v36 = vadd.f32 %v23811_v57, %v23810_v35  ;;  %v8598_v29 = vadd.f32 %v23813_v63, %v7614_v12  ;;  %v23818_v30 = vld [vmem:[#allocation82_spill] sm:$0xff]  ;;  %v23821_v35 = vld [vmem:[#allocation213_spill] sm:$0xff] }
 0x5ad   : > { %23799 = vst [vmem:[#allocation49_spill] sm:$0xff] %v21777_v28  ;;  %23802 = vst [vmem:[#allocation134_spill] sm:$0xff] %v21781_v27  ;;  %v21788_v40 = vadd.f32 %v9448_v31, %v8595_v13  ;;  %v23808_v28 = vld [vmem:[#allocation85_spill] sm:$0xff]  ;;  %v23815_v31 = vld [vmem:[#allocation76_spill] sm:$0xff]  ;;  %v8601_v5 = vadd.f32 %v23818_v30, %v7625_v52 }
 0x5ae   : > { %v21784_v20 = vpop.f32.mrf.mxu0  ;;  %v8600_v39 = vadd.f32 %v23808_v28, %v7622_v38  ;;  %v16484_v48 = vpop.f32.mrf.mxu1  ;;  %16771 = vmatmul.mubr.bf16.gmra.mxu1 %v14309_v44  ;;  %v23816_v38 = vld [vmem:[#allocation211_spill] sm:$0xff]  ;;  %v23828_v30 = vld [vmem:[#allocation109_spill] sm:$0xff] }
 0x5af   : > { %23804 = vst [vmem:[#allocation169_spill] sm:$0xff] %v21784_v20  ;;  %23807 = vst [vmem:[#allocation94_spill] sm:$0xff] %v21788_v40  ;;  %16774 = vmatprep.mubr.bf16.mxu1 %v14310_v42  ;;  %v7638_v28 = vadd.f32 %v23816_v38, %v23815_v31  ;;  %v23820_v40 = vld [vmem:[#allocation78_spill] sm:$0xff]  ;;  %v23823_v42 = vld [vmem:[#allocation84_spill] sm:$0xff] }
 0x5b0   : > { %v21791_v8 = vpop.f32.mrf.mxu0  ;;  %v21795_v20 = vadd.f32 %v16484_v48, %v8600_v39  ;;  %v9461_v61 = vpop.f32.mrf.mxu1  ;;  %v7630_v39 = vadd.f32 %v23821_v35, %v23820_v40  ;;  %v8599_v12 = vadd.f32 %v23823_v42, %v7617_v36  ;;  %v17560_v27 = vld [vmem:[#allocation3 + $0x94] sm:$0xf]  ;;  %v23830_v36 = vld [vmem:[#allocation91_spill] sm:$0xff] }
 0x5b1   : > { %23809 = vst [vmem:[#allocation135_spill] sm:$0xff] %v21791_v8  ;;  %v21802_v41 = vadd.f32 %v9461_v61, %v8598_v29  ;;  %v23825_v29 = vld [vmem:[#allocation79_spill] sm:$0xff]  ;;  %v23831_v35 = vld [vmem:[#allocation217_spill] sm:$0xff] }
 0x5b2   : > { %23812 = vst [vmem:[#allocation97_spill] sm:$0xff] %v21795_v20  ;;  %v21798_v13 = vpop.f32.mrf.mxu0  ;;  %v16485_v8 = vpop.f32.mrf.mxu1  ;;  %v17558_v20 = vld [vmem:[#allocation3 + $0x8c] sm:$0xf]  ;;  %v23826_v61 = vld [vmem:[#allocation215_spill] sm:$0xff]  ;;  %v7633_v42 = vadd.f32 %v23831_v35, %v23830_v36  ;;  %v23841_v36 = vld [vmem:[#allocation221_spill] sm:$0xff] }
 0x5b3   : > { %23814 = vst [vmem:[#allocation52_spill] sm:$0xff] %v21798_v13  ;;  %23817 = vst [vmem:[#allocation172_spill] sm:$0xff] %v21802_v41  ;;  %v21809_v48 = vadd.f32 %v16485_v8, %v8601_v5  ;;  %v17557_v13 = vld [vmem:[#allocation3 + $0x88] sm:$0xf]  ;;  %v7641_v38 = vadd.f32 %v23826_v61, %v23825_v29  ;;  %v17559_v41 = vld [vmem:[#allocation3 + $0x90] sm:$0xf] }
 0x5b4   : > { %v21805_v44 = vpop.f32.mrf.mxu0  ;;  %v9464_v57 = vpop.f32.mrf.mxu1  ;;  %v14311_v31 = vcombine.low %v17557_v13, %v17558_v20  ;;  %v14312_v40 = vcombine.low %v17559_v41, %v17560_v27  ;;  %v23833_v20 = vld [vmem:[#allocation101_spill] sm:$0xff]  ;;  %v23838_v27 = vld [vmem:[#allocation111_spill] sm:$0xff] }
 0x5b5   : > { %23819 = vst [vmem:[#allocation56_spill] sm:$0xff] %v21805_v44  ;;  %23822 = vst [vmem:[#allocation93_spill] sm:$0xff] %v21809_v48  ;;  %v21816_v52 = vadd.f32 %v9464_v57, %v8599_v12  ;;  %v8604_v44 = vadd.f32 %v23828_v30, %v7638_v28  ;;  %v8602_v13 = vadd.f32 %v23833_v20, %v7630_v39  ;;  %v23835_v57 = vld [vmem:[#allocation86_spill] sm:$0xff]  ;;  %v23836_v28 = vld [vmem:[#allocation219_spill] sm:$0xff] }
 0x5b6   : > { %v21812_v63 = vpop.f32.mrf.mxu0  ;;  %v16488_v8 = vpop.f32.mrf.mxu1  ;;  %16775 = vmatmul.mubr.bf16.gmra.mxu1 %v14311_v31  ;;  %v7654_v61 = vadd.f32 %v23836_v28, %v23835_v57  ;;  %v8605_v41 = vadd.f32 %v23838_v27, %v7641_v38  ;;  %v23848_v27 = vld [vmem:[#allocation105_spill] sm:$0xff]  ;;  %v17564_v48 = vld [vmem:[#allocation3 + $0xa4] sm:$0xf] }
 0x5b7   : > { %23824 = vst [vmem:[#allocation174_spill] sm:$0xff] %v21812_v63  ;;  %23827 = vst [vmem:[#allocation102_spill] sm:$0xff] %v21816_v52  ;;  %v21823_v63 = vadd.f32 %v16488_v8, %v8604_v44  ;;  %16778 = vmatprep.mubr.bf16.mxu1 %v14312_v40  ;;  %v23840_v52 = vld [vmem:[#allocation87_spill] sm:$0xff]  ;;  %v23843_v40 = vld [vmem:[#allocation96_spill] sm:$0xff] }
 0x5b8   : > { %v21819_v5 = vpop.f32.mrf.mxu0  ;;  %v9477_v29 = vpop.f32.mrf.mxu1  ;;  %v7646_v44 = vadd.f32 %v23841_v36, %v23840_v52  ;;  %v8603_v39 = vadd.f32 %v23843_v40, %v7633_v42  ;;  %v23850_v42 = vld [vmem:[#allocation108_spill] sm:$0xff]  ;;  %v23851_v36 = vld [vmem:[#allocation225_spill] sm:$0xff] }
 0x5b9   : > { %23829 = vst [vmem:[#allocation53_spill] sm:$0xff] %v21819_v5  ;;  %23832 = vst [vmem:[#allocation176_spill] sm:$0xff] %v21823_v63  ;;  %v21830_v30 = vadd.f32 %v9477_v29, %v8602_v13  ;;  %v17562_v63 = vld [vmem:[#allocation3 + $0x9c] sm:$0xf]  ;;  %v23845_v13 = vld [vmem:[#allocation100_spill] sm:$0xff]  ;;  %v7649_v40 = vadd.f32 %v23851_v36, %v23850_v42 }
 0x5ba   : > { %v21826_v12 = vpop.f32.mrf.mxu0  ;;  %v16489_v5 = vpop.f32.mrf.mxu1  ;;  %v23846_v29 = vld [vmem:[#allocation223_spill] sm:$0xff]  ;;  %v23861_v42 = vld [vmem:[#allocation229_spill] sm:$0xff] }
 0x5bb   : > { %23834 = vst [vmem:[#allocation51_spill] sm:$0xff] %v21826_v12  ;;  %23837 = vst [vmem:[#allocation112_spill] sm:$0xff] %v21830_v30  ;;  %v21837_v8 = vadd.f32 %v16489_v5, %v8605_v41  ;;  %v17561_v12 = vld [vmem:[#allocation3 + $0x98] sm:$0xf]  ;;  %v7657_v28 = vadd.f32 %v23846_v29, %v23845_v13  ;;  %v17563_v30 = vld [vmem:[#allocation3 + $0xa0] sm:$0xf] }
 0x5bc   : > { %v21833_v31 = vpop.f32.mrf.mxu0  ;;  %v9480_v35 = vpop.f32.mrf.mxu1  ;;  %v14313_v57 = vcombine.low %v17561_v12, %v17562_v63  ;;  %v14314_v52 = vcombine.low %v17563_v30, %v17564_v48  ;;  %v23853_v63 = vld [vmem:[#allocation136_spill] sm:$0xff]  ;;  %v23858_v48 = vld [vmem:[#allocation137_spill] sm:$0xff] }
 0x5bd   : > { %23839 = vst [vmem:[#allocation119_spill] sm:$0xff] %v21833_v31  ;;  %23842 = vst [vmem:[#allocation46_spill] sm:$0xff] %v21837_v8  ;;  %v21844_v38 = vadd.f32 %v9480_v35, %v8603_v39  ;;  %v8608_v31 = vadd.f32 %v23848_v27, %v7654_v61  ;;  %v8606_v12 = vadd.f32 %v23853_v63, %v7646_v44  ;;  %v23855_v35 = vld [vmem:[#allocation90_spill] sm:$0xff]  ;;  %v23856_v61 = vld [vmem:[#allocation227_spill] sm:$0xff] }
 0x5be   : > { %v21840_v20 = vpop.f32.mrf.mxu0  ;;  %v16492_v5 = vpop.f32.mrf.mxu1  ;;  %16779 = vmatmul.mubr.bf16.gmra.mxu1 %v14313_v57  ;;  %v7670_v29 = vadd.f32 %v23856_v61, %v23855_v35  ;;  %v8609_v30 = vadd.f32 %v23858_v48, %v7657_v28  ;;  %v23866_v48 = vld [vmem:[#allocation139_spill] sm:$0xff]  ;;  %v17568_v8 = vld [vmem:[#allocation3 + $0xb4] sm:$0xf] }
 0x5bf   : > { %23844 = vst [vmem:[#allocation178_spill] sm:$0xff] %v21840_v20  ;;  %23847 = vst [vmem:[#allocation98_spill] sm:$0xff] %v21844_v38  ;;  %v21851_v20 = vadd.f32 %v16492_v5, %v8608_v31  ;;  %16782 = vmatprep.mubr.bf16.mxu1 %v14314_v52  ;;  %v23860_v38 = vld [vmem:[#allocation62_spill] sm:$0xff] }
 0x5c0   : > { %v21847_v41 = vpop.f32.mrf.mxu0  ;;  %v9493_v13 = vpop.f32.mrf.mxu1  ;;  %v7662_v31 = vadd.f32 %v23861_v42, %v23860_v38  ;;  %v23862_v52 = vld [vmem:[#allocation138_spill] sm:$0xff]  ;;  %v23869_v42 = vld [vmem:[#allocation232_spill] sm:$0xff] }
 0x5c1   : > { %23849 = vst [vmem:[#allocation50_spill] sm:$0xff] %v21847_v41  ;;  %23852 = vst [vmem:[#allocation180_spill] sm:$0xff] %v21851_v20  ;;  %v21858_v27 = vadd.f32 %v9493_v13, %v8606_v12  ;;  %v8607_v44 = vadd.f32 %v23862_v52, %v7649_v40  ;;  %v17566_v20 = vld [vmem:[#allocation3 + $0xac] sm:$0xf]  ;;  %v23864_v12 = vld [vmem:[#allocation95_spill] sm:$0xff] }
 0x5c2   : > { %v21854_v39 = vpop.f32.mrf.mxu0  ;;  %v16493_v41 = vpop.f32.mrf.mxu1  ;;  %v23865_v13 = vld [vmem:[#allocation118_spill] sm:$0xff] }
 0x5c3   : > { %23854 = vst [vmem:[#allocation106_spill] sm:$0xff] %v21854_v39  ;;  %23857 = vst [vmem:[#allocation103_spill] sm:$0xff] %v21858_v27  ;;  %v21865_v5 = vadd.f32 %v16493_v41, %v8609_v30  ;;  %v17565_v39 = vld [vmem:[#allocation3 + $0xa8] sm:$0xf]  ;;  %v7673_v61 = vadd.f32 %v23865_v13, %v23864_v12  ;;  %v17567_v27 = vld [vmem:[#allocation3 + $0xb0] sm:$0xf] }
 0x5c4   : > { %v21861_v57 = vpop.f32.mrf.mxu0  ;;  %v9496_v36 = vpop.f32.mrf.mxu1  ;;  %v14315_v35 = vcombine.low %v17565_v39, %v17566_v20  ;;  %v14316_v38 = vcombine.low %v17567_v27, %v17568_v8  ;;  %v23868_v40 = vld [vmem:[#allocation114_spill] sm:$0xff]  ;;  %v23870_v20 = vld [vmem:[#allocation140_spill] sm:$0xff] }
 0x5c5   : > { %23859 = vst [vmem:[#allocation182_spill] sm:$0xff] %v21861_v57  ;;  %v21872_v28 = vadd.f32 %v9496_v36, %v8607_v44  ;;  %v8612_v57 = vadd.f32 %v23866_v48, %v7670_v29  ;;  %v7665_v52 = vadd.f32 %v23869_v42, %v23868_v40  ;;  %v8610_v39 = vadd.f32 %v23870_v20, %v7662_v31  ;;  %v23872_v29 = vld [vmem:[#allocation141_spill] sm:$0xff]  ;;  %v23876_v20 = vld [vmem:[#allocation143_spill] sm:$0xff] }
 0x5c6   : > { %v21868_v63 = vpop.f32.mrf.mxu0  ;;  %v16496_v41 = vpop.f32.mrf.mxu1  ;;  %16783 = vmatmul.mubr.bf16.gmra.mxu1 %v14315_v35  ;;  %v8613_v13 = vadd.f32 %v23872_v29, %v7673_v61  ;;  %v23874_v35 = vld [vmem:[#allocation142_spill] sm:$0xff]  ;;  %v17572_v61 = vld [vmem:[#allocation3 + $0xc4] sm:$0xf] }
 0x5c7   : > { %23863 = vst [vmem:[#allocation66_spill] sm:$0xff] %v21868_v63  ;;  %v21879_v63 = vadd.f32 %v16496_v41, %v8612_v57  ;;  %16786 = vmatprep.mubr.bf16.mxu1 %v14316_v38  ;;  %v17569_v38 = vld [vmem:[#allocation3 + $0xb8] sm:$0xf]  ;;  %v17570_v41 = vld [vmem:[#allocation3 + $0xbc] sm:$0xf] }
 0x5c8   : > { %v21875_v30 = vpop.f32.mrf.mxu0  ;;  %v9509_v12 = vpop.f32.mrf.mxu1  ;;  %v14317_v31 = vcombine.low %v17569_v38, %v17570_v41 }
 0x5c9   : > { %23867 = vst [vmem:[#allocation64_spill] sm:$0xff] %v21875_v30  ;;  %v21884_v36 = vadd.f32 %v9509_v12, %v8610_v39  ;;  %v8611_v30 = vadd.f32 %v23874_v35, %v7665_v52  ;;  %v10008_v39 = vadd.f32 %v23876_v20, %v21334_v55  ;;  %v17571_v12 = vld [vmem:[#allocation3 + $0xc0] sm:$0xf]  ;;  %v23878_v52 = vld [vmem:[#allocation144_spill] sm:$0xff]  ;;  %v23880_v55 = vld [vmem:[#allocation145_spill] sm:$0xff] }
 0x5ca   : > { %v21882_v44 = vpop.f32.mrf.mxu0  ;;  %v16497_v8 = vpop.f32.mrf.mxu1  ;;  %v14318_v29 = vcombine.low %v17571_v12, %v17572_v61 }
 0x5cb   : > { %23871 = vst [vmem:[#allocation184_spill] sm:$0xff] %v21882_v44  ;;  %v21889_v48 = vadd.f32 %v16497_v8, %v8613_v13  ;;  %v10006_v8 = vadd.f32 %v23878_v52, %v21345_v22  ;;  %v17573_v22 = vld [vmem:[#allocation3 + $0xc8] sm:$0xf] }
 0x5cc   : > { %v21887_v27 = vpop.f32.mrf.mxu0  ;;  %v9512_v40 = vpop.f32.mrf.mxu1 }
 0x5cd   : > { %23873 = vst [vmem:[#allocation65_spill] sm:$0xff] %v21887_v27  ;;  %v21894_v42 = vadd.f32 %v9512_v40, %v8611_v30  ;;  %v10009_v40 = vadd.f32 %v23880_v55, %v21357_v19  ;;  %v17575_v19 = vld [vmem:[#allocation3 + $0xd0] sm:$0xf]  ;;  %v17576_v55 = vld [vmem:[#allocation3 + $0xd4] sm:$0xf] }
 0x5ce   : > { %v21892_v57 = vpop.f32.mrf.mxu0  ;;  %v16596_v44 = vpop.f32.mrf.mxu1  ;;  %16787 = vmatmul.mubr.bf16.gmra.mxu1 %v14317_v31 }
 0x5cf   : > { %23875 = vst [vmem:[#allocation57_spill] sm:$0xff] %v21892_v57  ;;  %v21900_v13 = vadd.f32 %v16596_v44, %v10008_v39  ;;  %16790 = vmatprep.mubr.bf16.mxu1 %v14318_v29  ;;  %v23882_v44 = vld [vmem:[#allocation146_spill] sm:$0xff]  ;;  %v17574_v29 = vld [vmem:[#allocation3 + $0xcc] sm:$0xf] }
 0x5d0   : > { %v21898_v27 = vpop.f32.mrf.mxu0  ;;  %v10689_v35 = vpop.f32.mrf.mxu1  ;;  %v10007_v31 = vadd.f32 %v23882_v44, %v21369_v47  ;;  %v14319_v52 = vcombine.low %v17573_v22, %v17574_v29  ;;  %v23886_v47 = vld [vmem:[#allocation148_spill] sm:$0xff] }
 0x5d1   : > { %23877 = vst [vmem:[#allocation186_spill] sm:$0xff] %v21898_v27  ;;  %v21906_v30 = vadd.f32 %v10689_v35, %v10006_v8  ;;  %v23884_v8 = vld [vmem:[#allocation147_spill] sm:$0xff]  ;;  %v14320_v27 = vcombine.low %v17575_v19, %v17576_v55  ;;  %v10010_v44 = vadd.f32 %v23886_v47, %v21393_v3  ;;  %v17578_v55 = vld [vmem:[#allocation3 + $0xdc] sm:$0xf] }
 0x5d2   : > { %v21904_v38 = vpop.f32.mrf.mxu0  ;;  %v16597_v41 = vpop.f32.mrf.mxu1  ;;  %v10012_v35 = vadd.f32 %v23884_v8, %v21381_v16  ;;  %v23888_v16 = vld [vmem:[#allocation149_spill] sm:$0xff] }
 0x5d3   : > { %23879 = vst [vmem:[#allocation63_spill] sm:$0xff] %v21904_v38  ;;  %v21912_v12 = vadd.f32 %v16597_v41, %v10009_v40 }
 0x5d4   : > { %v21910_v20 = vpop.f32.mrf.mxu0  ;;  %v10692_v39 = vpop.f32.mrf.mxu1 }
 0x5d5   : > { %23881 = vst [vmem:[#allocation60_spill] sm:$0xff] %v21910_v20  ;;  %v21918_v38 = vadd.f32 %v10692_v39, %v10007_v31  ;;  %v10013_v39 = vadd.f32 %v23888_v16, %v21405_v58 }
 0x5d6   : > { %v21916_v61 = vpop.f32.mrf.mxu0  ;;  %v16600_v20 = vpop.f32.mrf.mxu1  ;;  %16791 = vmatmul.mubr.bf16.gmra.mxu1 %v14319_v52 }
 0x5d7   : > { %23883 = vst [vmem:[#allocation188_spill] sm:$0xff] %v21916_v61  ;;  %v21924_v41 = vadd.f32 %v16600_v20, %v10012_v35  ;;  %16794 = vmatprep.mubr.bf16.mxu1 %v14320_v27  ;;  %v23889_v20 = vld [vmem:[#allocation150_spill] sm:$0xff] }
 0x5d8   : > { %v21922_v40 = vpop.f32.mrf.mxu0  ;;  %v10705_v61 = vpop.f32.mrf.mxu1  ;;  %v10011_v52 = vadd.f32 %v23889_v20, %v21417_v59  ;;  %v17577_v35 = vld [vmem:[#allocation3 + $0xd8] sm:$0xf]  ;;  %v23892_v59 = vld [vmem:[#allocation152_spill] sm:$0xff] }
 0x5d9   : > { %23885 = vst [vmem:[#allocation55_spill] sm:$0xff] %v21922_v40  ;;  %v21930_v31 = vadd.f32 %v10705_v61, %v10010_v44  ;;  %v14321_v3 = vcombine.low %v17577_v35, %v17578_v55  ;;  %v23890_v61 = vld [vmem:[#allocation151_spill] sm:$0xff] }
 0x5da   : > { %v21928_v22 = vpop.f32.mrf.mxu0  ;;  %v16601_v29 = vpop.f32.mrf.mxu1  ;;  %v10016_v44 = vadd.f32 %v23890_v61, %v21429_v0  ;;  %v17580_v40 = vld [vmem:[#allocation3 + $0xe4] sm:$0xf]  ;;  %v17581_v61 = vld [vmem:[#allocation3 + $0xe8] sm:$0xf] }
 0x5db   : > { %23887 = vst [vmem:[#allocation68_spill] sm:$0xff] %v21928_v22  ;;  %v21936_v19 = vadd.f32 %v16601_v29, %v10013_v39  ;;  %v17579_v22 = vld [vmem:[#allocation3 + $0xe0] sm:$0xf]  ;;  %v10014_v29 = vadd.f32 %v23892_v59, %v21441_v33 }
 0x5dc   : > { %v21934_v8 = vpop.f32.mrf.mxu0  ;;  %v10708_v27 = vpop.f32.mrf.mxu1  ;;  %v14322_v58 = vcombine.low %v17579_v22, %v17580_v40  ;;  %v23895_v22 = vld [vmem:[#allocation154_spill] sm:$0xff]  ;;  %v23896_v33 = vld [vmem:[#allocation155_spill] sm:$0xff] }
 0x5dd   : > { %v21940_v47 = vadd.f32 %v10708_v27, %v10011_v52  ;;  %v23894_v52 = vld [vmem:[#allocation153_spill] sm:$0xff]  ;;  %v10020_v59 = vadd.f32 %v23896_v33, %v21477_v60 }
 0x5de   : > { %v21944_v16 = vpop.f32.mrf.mxu0  ;;  %v16604_v57 = vpop.f32.mrf.mxu1  ;;  %16795 = vmatmul.mubr.bf16.gmra.mxu1 %v14321_v3  ;;  %v10017_v27 = vadd.f32 %v23894_v52, %v21453_v53  ;;  %v10015_v3 = vadd.f32 %v23895_v22, %v21465_v43  ;;  %v23898_v43 = vld [vmem:[#allocation156_spill] sm:$0xff] }
 0x5df   : > { %v21946_v39 = vadd.f32 %v16604_v57, %v10016_v44  ;;  %16798 = vmatprep.mubr.bf16.mxu1 %v14322_v58  ;;  %v17582_v44 = vld [vmem:[#allocation3 + $0xec] sm:$0xf] }
 0x5e0   : > { %v10721_v20 = vpop.f32.mrf.mxu1  ;;  %v21954_v0 = vpop.f32.mrf.mxu0  ;;  %v14323_v58 = vcombine.low %v17581_v61, %v17582_v44 }
 0x5e1   : > { %23891 = vst [vmem:[#allocation190_spill] sm:$0xff] %v21946_v39  ;;  %v21950_v35 = vadd.f32 %v10721_v20, %v10014_v29  ;;  %v17583_v29 = vld [vmem:[#allocation3 + $0xf0] sm:$0xf]  ;;  %v17584_v20 = vld [vmem:[#allocation3 + $0xf4] sm:$0xf] }
 0x5e2   : > { %v16605_v55 = vpop.f32.mrf.mxu1  ;;  %v14324_v53 = vcombine.low %v17583_v29, %v17584_v20  ;;  %v21964_v52 = vpop.f32.mrf.mxu0  ;;  %v23901_v29 = vld [vmem:[#allocation158_spill] sm:$0xff] }
 0x5e3   : > { %23893 = vst [vmem:[#allocation67_spill] sm:$0xff] %v21950_v35  ;;  %v21956_v40 = vadd.f32 %v16605_v55, %v10017_v27  ;;  %v10018_v55 = vadd.f32 %v23898_v43, %v21489_v32  ;;  %v17586_v20 = vld [vmem:[#allocation3 + $0xfc] sm:$0xf]  ;;  %v23902_v32 = vld [vmem:[#allocation159_spill] sm:$0xff] }
 0x5e4   : > { %v10724_v57 = vpop.f32.mrf.mxu1  ;;  %v21974_v60 = vpop.f32.mrf.mxu0  ;;  %v10024_v43 = vadd.f32 %v23902_v32, %v21525_v14 }
 0x5e5   : > { %v21960_v39 = vadd.f32 %v10724_v57, %v10015_v3  ;;  %v23900_v3 = vld [vmem:[#allocation157_spill] sm:$0xff] }
 0x5e6   : > { %v16608_v35 = vpop.f32.mrf.mxu1  ;;  %16799 = vmatmul.mubr.bf16.gmra.mxu1 %v14323_v58  ;;  %v10021_v57 = vadd.f32 %v23900_v3, %v21501_v45  ;;  %v10019_v58 = vadd.f32 %v23901_v29, %v21513_v24  ;;  %v21984_v3 = vpop.f32.mrf.mxu0  ;;  %v23904_v24 = vld [vmem:[#allocation160_spill] sm:$0xff] }
 0x5e7   : > { %v21966_v27 = vadd.f32 %v16608_v35, %v10020_v59  ;;  %16802 = vmatprep.mubr.bf16.mxu1 %v14324_v53  ;;  %v17585_v59 = vld [vmem:[#allocation3 + $0xf8] sm:$0xf] }
 0x5e8   : > { %v10737_v22 = vpop.f32.mrf.mxu1  ;;  %v14325_v53 = vcombine.low %v17585_v59, %v17586_v20  ;;  %v21994_v14 = vpop.f32.mrf.mxu0 }
 0x5e9   : > { %23897 = vst [vmem:[#allocation99_spill] sm:$0xff] %v21966_v27  ;;  %v21970_v61 = vadd.f32 %v10737_v22, %v10018_v55  ;;  %v17587_v55 = vld [vmem:[#allocation3 + $0x100] sm:$0xf]  ;;  %v17588_v22 = vld [vmem:[#allocation3 + $0x104] sm:$0xf] }
 0x5ea   : > { %v16609_v44 = vpop.f32.mrf.mxu1  ;;  %v14326_v45 = vcombine.low %v17587_v55, %v17588_v22  ;;  %v23907_v55 = vld [vmem:[#allocation162_spill] sm:$0xff]  ;;  %v17590_v22 = vld [vmem:[#allocation3 + $0x10c] sm:$0xf] }
 0x5eb   : > { %23899 = vst [vmem:[#allocation192_spill] sm:$0xff] %v21970_v61  ;;  %v21976_v33 = vadd.f32 %v16609_v44, %v10021_v57  ;;  %v10022_v44 = vadd.f32 %v23904_v24, %v21537_v1  ;;  %v23909_v1 = vld [vmem:[#allocation163_spill] sm:$0xff] }
 0x5ec   : > { %v10740_v35 = vpop.f32.mrf.mxu1  ;;  %v10028_v24 = vadd.f32 %v23909_v1, %v21571_v23 }
 0x5ed   : > { %v21980_v27 = vadd.f32 %v10740_v35, %v10019_v58  ;;  %v23906_v58 = vld [vmem:[#allocation161_spill] sm:$0xff] }
 0x5ee   : > { %v16612_v61 = vpop.f32.mrf.mxu1  ;;  %16803 = vmatmul.mubr.bf16.gmra.mxu1 %v14325_v53  ;;  %v10025_v35 = vadd.f32 %v23906_v58, %v21549_v25  ;;  %v10023_v53 = vadd.f32 %v23907_v55, %v21561_v4  ;;  %v22004_v58 = vpop.f32.mrf.mxu0  ;;  %v23911_v4 = vld [vmem:[#allocation164_spill] sm:$0xff] }
 0x5ef   : > { %v21986_v57 = vadd.f32 %v16612_v61, %v10024_v43  ;;  %16806 = vmatprep.mubr.bf16.mxu1 %v14326_v45  ;;  %v17589_v43 = vld [vmem:[#allocation3 + $0x108] sm:$0xf] }
 0x5f0   : > { %v10753_v29 = vpop.f32.mrf.mxu1  ;;  %v14327_v45 = vcombine.low %v17589_v43, %v17590_v22  ;;  %v17519_v43 = vld [vmem:[#allocation3 + $0x128] sm:$0xff]   ;;  %v22014_v22 = vpop.f32.mrf.mxu0 }
 0x5f1   : > { %23903 = vst [vmem:[#allocation70_spill] sm:$0xff] %v21986_v57  ;;  %v21990_v59 = vadd.f32 %v10753_v29, %v10022_v44  ;;  %v17591_v44 = vld [vmem:[#allocation3 + $0x110] sm:$0xf]  ;;  %v17592_v29 = vld [vmem:[#allocation3 + $0x114] sm:$0xf] }
 0x5f2   : > { %v16613_v20 = vpop.f32.mrf.mxu1  ;;  %v14328_v25 = vcombine.low %v17591_v44, %v17592_v29  ;;  %v17594_v29 = vld [vmem:[#allocation3 + $0x124] sm:$0xf] }
 0x5f3   : > { %23905 = vst [vmem:[#allocation61_spill] sm:$0xff] %v21990_v59  ;;  %v21996_v32 = vadd.f32 %v16613_v20, %v10025_v35  ;;  %v10026_v20 = vadd.f32 %v23911_v4, %v21583_v50  ;;  %v17595_v50 = vld [vmem:[#allocation3 + $0x118] sm:$0xf]  ;;  %v17596_v4 = vld [vmem:[#allocation3 + $0x11c] sm:$0xf] }
 0x5f4   : > { %v10756_v61 = vpop.f32.mrf.mxu1 }
 0x5f5   : > { %v22000_v57 = vadd.f32 %v10756_v61, %v10023_v53  ;;  %v23913_v61 = vld [vmem:[#allocation166_spill] sm:$0xff] }
 0x5f6   : > { %v16616_v59 = vpop.f32.mrf.mxu1  ;;  %16807 = vmatmul.mubr.bf16.gmra.mxu1 %v14327_v45  ;;  %v10029_v23 = vadd.f32 %v23913_v61, %v21592_v15  ;;  %v23915_v45 = vld [vmem:[#allocation168_spill] sm:$0xff]  ;;  %v23917_v15 = vld [vmem:[#allocation170_spill] sm:$0xff] }
 0x5f7   : > { %23908 = vst [vmem:[#allocation194_spill] sm:$0xff] %v22000_v57  ;;  %v22006_v35 = vadd.f32 %v16616_v59, %v10028_v24  ;;  %16810 = vmatprep.mubr.bf16.mxu1 %v14328_v25  ;;  %v10027_v59 = vadd.f32 %v23915_v45, %v21602_v37  ;;  %v17593_v24 = vld [vmem:[#allocation3 + $0x120] sm:$0xf]  ;;  %v14329_v57 = vcombine.low %v17595_v50, %v17596_v4 }
 0x5f8   : > { %v10769_v55 = vpop.f32.mrf.mxu1  ;;  %v14330_v25 = vcombine.low %v17593_v24, %v17594_v29  ;;  %v10032_v61 = vadd.f32 %v23917_v15, %v21614_v21  ;;  %v23919_v45 = vld [vmem:[#allocation171_spill] sm:$0xff]  ;;  %v17520_v29 = vld [vmem:[#allocation3 + $0x130] ss:$0 sps:$4 sm:$0x11]  }
 0x5f9   : > { %23910 = vst [vmem:[#allocation71_spill] sm:$0xff] %v22006_v35  ;;  %v22010_v53 = vadd.f32 %v10769_v55, %v10026_v20  ;;  %v12953_v20 = vshrl.u32 %v21606_v51, 16  ;;  %v12957_v55 = vshll.u32 %v17519_v43, 16  ;;  %v10030_v24 = vadd.f32 %v23919_v45, %v21622_v56  ;;  %v23921_v56 = vld [vmem:[#allocation175_spill] sm:$0xff] }
 0x5fa   : > { %v16617_v1 = vpop.f32.mrf.mxu1  ;;  %v12961_v45 = vshrl.u32 %v17519_v43, 16 }
 0x5fb   : > { %23912 = vst [vmem:[#allocation69_spill] sm:$0xff] %v22010_v53  ;;  %v22016_v44 = vadd.f32 %v16617_v1, %v10029_v23  ;;  %v22025_v23 = vpop.f32.mrf.mxu0  ;;  %v12955_v51 = vor.u32 %v12953_v20, %v21643_v54  ;;  %v12959_v4 = vrot.slane %v12957_v55, 1 }
 0x5fc   : > { %v10772_v35 = vpop.f32.mrf.mxu1 }
 0x5fd   : > { %23914 = vst [vmem:[#allocation196_spill] sm:$0xff] %v22016_v44  ;;  %v22021_v53 = vadd.f32 %v10772_v35, %v10027_v59  ;;  %v23920_v59 = vld [vmem:[#allocation173_spill] sm:$0xff]  ;;  %v22036_v15 = vpop.f32.mrf.mxu0  ;;  %v12965_v44 = vshll.u32 %v17520_v29, 16  ;;  %v12960_v20 = vsel %vm1747_vm1, %v12955_v51, %v12959_v4 }
 0x5fe   : > { %v16620_v1 = vpop.f32.mrf.mxu1  ;;  %16811 = vmatmul.mubr.bf16.gmra.mxu1 %v14329_v57  ;;  %v10033_v21 = vadd.f32 %v23920_v59, %v21632_v2  ;;  %v17597_v57 = vld [vmem:[#allocation3 + $0x128] sm:$0xf]  ;;  %v23923_v2 = vld [vmem:[#allocation177_spill] sm:$0xff] }
 0x5ff   : > { %23916 = vst [vmem:[#allocation73_spill] sm:$0xff] %v22021_v53  ;;  %v22027_v37 = vadd.f32 %v16620_v1, %v10032_v61  ;;  %16814 = vmatprep.mubr.bf16.mxu1 %v14330_v25  ;;  %v17598_v61 = vld [vmem:[#allocation3 + $0x12c] sm:$0xf]  ;;  %v10031_v25 = vadd.f32 %v23921_v56, %v21640_v26  ;;  %v12963_v26 = vor.u32 %v12961_v45, %v12959_v4  ;;  %v12967_v43 = vrot.slane %v12965_v44, 1  ;;  %v23927_v51 = vld [vmem:[#allocation181_spill] sm:$0xff] }
 0x600   : > { %v10785_v50 = vpop.f32.mrf.mxu1  ;;  %v14331_v1 = vcombine.low %v17597_v57, %v17598_v61  ;;  %v10037_v56 = vadd.f32 %v23927_v51, %v21665_v17  ;;  %v23931_v44 = vld [vmem:[#allocation185_spill] sm:$0xff] }
 0x601   : > { %23918 = vst [vmem:[#allocation54_spill] sm:$0xff] %v22027_v37  ;;  %v22032_v35 = vadd.f32 %v10785_v50, %v10030_v24  ;;  %v10036_v24 = vadd.f32 %v23923_v2, %v21649_v7  ;;  %v22047_v50 = vpop.f32.mrf.mxu0  ;;  %v10040_v45 = vadd.f32 %v23931_v44, %v21682_v34  ;;  %v23937_v34 = vld [vmem:[#allocation191_spill] sm:$0xff] }
 0x602   : > { %v16621_v53 = vpop.f32.mrf.mxu1 }
 0x603   : > { %v22038_v37 = vadd.f32 %v16621_v53, %v10033_v21  ;;  %v23925_v53 = vld [vmem:[#allocation179_spill] sm:$0xff] }
 0x604   : > { %v10788_v54 = vpop.f32.mrf.mxu1  ;;  %v10034_v21 = vadd.f32 %v23925_v53, %v21656_v49  ;;  %v23933_v53 = vld [vmem:[#allocation187_spill] sm:$0xff] }
 0x605   : > { %v22043_v55 = vadd.f32 %v10788_v54, %v10031_v25  ;;  %v22057_v25 = vpop.f32.mrf.mxu0 }
 0x606   : > { %v16624_v59 = vpop.f32.mrf.mxu1  ;;  %16815 = vmatmul.mubr.bf16.gmra.mxu1 %v14331_v1  ;;  %v23929_v1 = vld [vmem:[#allocation183_spill] sm:$0xff] }
 0x607   : > { %23922 = vst [vmem:[#allocation127_spill] sm:$0xff] %v22043_v55  ;;  %v22049_v57 = vadd.f32 %v16624_v59, %v10036_v24  ;;  %16894 = vmatprep.mubr.bf16.mxu1 %v12960_v20  ;;  %v10035_v2 = vadd.f32 %v23929_v1, %v21672_v10  ;;  %v12968_v24 = vsel %vm1747_vm1, %v12963_v26, %v12967_v43  ;;  %v22068_v20 = vpop.f32.mrf.mxu0  ;;  %v23935_v10 = vld [vmem:[#allocation189_spill] sm:$0xff] }
 0x608   : > { %v10801_v29 = vpop.f32.mrf.mxu1  ;;  %v10041_v26 = vadd.f32 %v23935_v10, %v21697_v46  ;;  %v10039_v1 = vadd.f32 %v23937_v34, %v21704_v11  ;;  %v23941_v46 = vld [vmem:[#allocation195_spill] sm:$0xff]  ;;  %v23943_v10 = vld [vmem:[#allocation30_spill] sm:$0xff] }
 0x609   : > { %23924 = vst [vmem:[#allocation72_spill] sm:$0xff] %v22049_v57  ;;  %v22053_v61 = vadd.f32 %v10801_v29, %v10034_v21  ;;  %v10038_v21 = vadd.f32 %v23933_v53, %v21690_v9  ;;  %v22078_v43 = vpop.f32.mrf.mxu0  ;;  %v10042_v53 = vadd.f32 %v23941_v46, %v21718_v62 }
 0x60a   : > { %v16625_v7 = vpop.f32.mrf.mxu1 }
 0x60b   : > { %23926 = vst [vmem:[#allocation199_spill] sm:$0xff] %v22053_v61  ;;  %v22059_v54 = vadd.f32 %v16625_v7, %v10037_v56  ;;  %v22088_v44 = vpop.f32.mrf.mxu0 }
 0x60c   : > { %v10804_v49 = vpop.f32.mrf.mxu1 }
 0x60d   : > { %23928 = vst [vmem:[#allocation74_spill] sm:$0xff] %v22059_v54  ;;  %v22064_v4 = vadd.f32 %v10804_v49, %v10035_v2  ;;  %v23939_v49 = vld [vmem:[#allocation193_spill] sm:$0xff] }
 0x60e   : > { %v16628_v59 = vpop.f32.mrf.mxu1  ;;  %16895 = vmatmul.mubr.bf16.vlgmr.msra.gmra.mxu1 %v12968_v24  ;;  %v10044_v9 = vadd.f32 %v23939_v49, %v21711_v18  ;;  %v23946_v18 = vld [vmem:[#allocation198_spill] sm:$0xff] }
 0x60f   : > { %23930 = vst [vmem:[#allocation129_spill] sm:$0xff] %v22064_v4  ;;  %v22070_v17 = vadd.f32 %v16628_v59, %v10040_v45 }
 0x610   : > { %v10817_v29 = vpop.f32.mrf.mxu1 }
 0x611   : > { %23932 = vst [vmem:[#allocation201_spill] sm:$0xff] %v22070_v17  ;;  %v22074_v51 = vadd.f32 %v10817_v29, %v10038_v21 }
 0x612   : > { %v16629_v56 = vpop.f32.mrf.mxu1 }
 0x613   : > { %23934 = vst [vmem:[#allocation81_spill] sm:$0xff] %v22074_v51  ;;  %v22080_v7 = vadd.f32 %v16629_v56, %v10041_v26  ;;  %v23944_v26 = vld [vmem:[#allocation197_spill] sm:$0xff]  ;;  %v22098_v56 = vpop.f32.mrf.mxu0 }
 0x614   : > { %v10820_v2 = vpop.f32.mrf.mxu1  ;;  %v10045_v11 = vadd.f32 %v23944_v26, %v23943_v10  ;;  %v23951_v10 = vld [vmem:[#allocation132_spill] sm:$0xff]  ;;  %v23952_v26 = vld [vmem:[#allocation202_spill] sm:$0xff] }
 0x615   : > { %23936 = vst [vmem:[#allocation107_spill] sm:$0xff] %v22080_v7  ;;  %v22084_v24 = vadd.f32 %v10820_v2, %v10039_v1  ;;  %v10043_v2 = vadd.f32 %v23946_v18, %v21732_v6  ;;  %v22108_v46 = vpop.f32.mrf.mxu0 }
 0x616   : > { %v16632_v45 = vpop.f32.mrf.mxu1 }
 0x617   : > { %23938 = vst [vmem:[#allocation203_spill] sm:$0xff] %v22084_v24  ;;  %v22090_v59 = vadd.f32 %v16632_v45, %v10044_v9  ;;  %v23948_v45 = vld [vmem:[#allocation27_spill] sm:$0xff]  ;;  %v22118_v18 = vpop.f32.mrf.mxu0 }
 0x618   : > { %v10833_v21 = vpop.f32.mrf.mxu1 }
 0x619   : > { %23940 = vst [vmem:[#allocation83_spill] sm:$0xff] %v22090_v59  ;;  %v22094_v29 = vadd.f32 %v10833_v21, %v10042_v53  ;;  %v23949_v59 = vld [vmem:[#allocation200_spill] sm:$0xff] }
 0x61a   : > { %v16633_v34 = vpop.f32.mrf.mxu1  ;;  %v10048_v62 = vadd.f32 %v23949_v59, %v23948_v45  ;;  %v23957_v59 = vld [vmem:[#allocation31_spill] sm:$0xff]  ;;  %v23958_v45 = vld [vmem:[#allocation206_spill] sm:$0xff] }
 0x61b   : > { %23942 = vst [vmem:[#allocation110_spill] sm:$0xff] %v22094_v29  ;;  %v22100_v1 = vadd.f32 %v16633_v34, %v10045_v11  ;;  %v10046_v29 = vadd.f32 %v23952_v26, %v23951_v10  ;;  %v23954_v34 = vld [vmem:[#allocation45_spill] sm:$0xff]  ;;  %v22128_v26 = vpop.f32.mrf.mxu0 }
 0x61c   : > { %v10836_v49 = vpop.f32.mrf.mxu1 }
 0x61d   : > { %23945 = vst [vmem:[#allocation205_spill] sm:$0xff] %v22100_v1  ;;  %v22104_v9 = vadd.f32 %v10836_v49, %v10043_v2  ;;  %v23955_v1 = vld [vmem:[#allocation204_spill] sm:$0xff] }
 0x61e   : > { %v16636_v53 = vpop.f32.mrf.mxu1  ;;  %v10049_v6 = vadd.f32 %v23955_v1, %v23954_v34  ;;  %v23963_v1 = vld [vmem:[#allocation167_spill] sm:$0xff]  ;;  %v23964_v34 = vld [vmem:[#allocation210_spill] sm:$0xff] }
 0x61f   : > { %23947 = vst [vmem:[#allocation80_spill] sm:$0xff] %v22104_v9  ;;  %v22110_v21 = vadd.f32 %v16636_v53, %v10048_v62  ;;  %v10047_v9 = vadd.f32 %v23958_v45, %v23957_v59  ;;  %v23960_v53 = vld [vmem:[#allocation48_spill] sm:$0xff]  ;;  %v22138_v45 = vpop.f32.mrf.mxu0 }
 0x620   : > { %v10849_v24 = vpop.f32.mrf.mxu1 }
 0x621   : > { %23950 = vst [vmem:[#allocation125_spill] sm:$0xff] %v22110_v21  ;;  %v22114_v11 = vadd.f32 %v10849_v24, %v10046_v29  ;;  %v23961_v21 = vld [vmem:[#allocation208_spill] sm:$0xff] }
 0x622   : > { %v16637_v2 = vpop.f32.mrf.mxu1  ;;  %v10052_v10 = vadd.f32 %v23961_v21, %v23960_v53  ;;  %v23969_v21 = vld [vmem:[#allocation94_spill] sm:$0xff] }
 0x623   : > { %23953 = vst [vmem:[#allocation207_spill] sm:$0xff] %v22114_v11  ;;  %v22120_v49 = vadd.f32 %v16637_v2, %v10049_v6  ;;  %v10050_v11 = vadd.f32 %v23964_v34, %v23963_v1  ;;  %v23966_v2 = vld [vmem:[#allocation134_spill] sm:$0xff]  ;;  %v22148_v34 = vpop.f32.mrf.mxu0 }
 0x624   : > { %v10852_v7 = vpop.f32.mrf.mxu1  ;;  %v23970_v53 = vld [vmem:[#allocation214_spill] sm:$0xff] }
 0x625   : > { %23956 = vst [vmem:[#allocation85_spill] sm:$0xff] %v22120_v49  ;;  %v22124_v62 = vadd.f32 %v10852_v7, %v10047_v9  ;;  %v23967_v49 = vld [vmem:[#allocation212_spill] sm:$0xff] }
 0x626   : > { %v16640_v24 = vpop.f32.mrf.mxu1  ;;  %v10053_v59 = vadd.f32 %v23967_v49, %v23966_v2  ;;  %v23975_v49 = vld [vmem:[#allocation172_spill] sm:$0xff]  ;;  %v23976_v2 = vld [vmem:[#allocation218_spill] sm:$0xff] }
 0x627   : > { %23959 = vst [vmem:[#allocation77_spill] sm:$0xff] %v22124_v62  ;;  %v22130_v29 = vadd.f32 %v16640_v24, %v10052_v10  ;;  %v10051_v62 = vadd.f32 %v23970_v53, %v23969_v21  ;;  %v23972_v24 = vld [vmem:[#allocation97_spill] sm:$0xff]  ;;  %v22158_v53 = vpop.f32.mrf.mxu0 }
 0x628   : > { %v10865_v51 = vpop.f32.mrf.mxu1 }
 0x629   : > { %23962 = vst [vmem:[#allocation209_spill] sm:$0xff] %v22130_v29  ;;  %v22134_v6 = vadd.f32 %v10865_v51, %v10050_v11  ;;  %v23973_v29 = vld [vmem:[#allocation216_spill] sm:$0xff] }
 0x62a   : > { %v16641_v7 = vpop.f32.mrf.mxu1  ;;  %v10056_v1 = vadd.f32 %v23973_v29, %v23972_v24  ;;  %v23981_v29 = vld [vmem:[#allocation102_spill] sm:$0xff] }
 0x62b   : > { %23965 = vst [vmem:[#allocation104_spill] sm:$0xff] %v22134_v6  ;;  %v22140_v9 = vadd.f32 %v16641_v7, %v10053_v59  ;;  %v10054_v6 = vadd.f32 %v23976_v2, %v23975_v49  ;;  %v23978_v7 = vld [vmem:[#allocation93_spill] sm:$0xff]  ;;  %v23982_v24 = vld [vmem:[#allocation222_spill] sm:$0xff]  ;;  %v22168_v2 = vpop.f32.mrf.mxu0 }
 0x62c   : > { %v10868_v17 = vpop.f32.mrf.mxu1 }
 0x62d   : > { %23968 = vst [vmem:[#allocation76_spill] sm:$0xff] %v22140_v9  ;;  %v22144_v10 = vadd.f32 %v10868_v17, %v10051_v62  ;;  %v23979_v9 = vld [vmem:[#allocation220_spill] sm:$0xff] }
 0x62e   : > { %v16644_v51 = vpop.f32.mrf.mxu1  ;;  %v10057_v21 = vadd.f32 %v23979_v9, %v23978_v7  ;;  %v23987_v9 = vld [vmem:[#allocation112_spill] sm:$0xff]  ;;  %v23988_v7 = vld [vmem:[#allocation226_spill] sm:$0xff] }
 0x62f   : > { %23971 = vst [vmem:[#allocation211_spill] sm:$0xff] %v22144_v10  ;;  %v22150_v11 = vadd.f32 %v16644_v51, %v10056_v1  ;;  %v10055_v10 = vadd.f32 %v23982_v24, %v23981_v29  ;;  %v23984_v51 = vld [vmem:[#allocation176_spill] sm:$0xff]  ;;  %v22178_v24 = vpop.f32.mrf.mxu0 }
 0x630   : > { %v10881_v4 = vpop.f32.mrf.mxu1 }
 0x631   : > { %23974 = vst [vmem:[#allocation82_spill] sm:$0xff] %v22150_v11  ;;  %v22154_v59 = vadd.f32 %v10881_v4, %v10054_v6  ;;  %v23985_v11 = vld [vmem:[#allocation224_spill] sm:$0xff] }
 0x632   : > { %v16645_v17 = vpop.f32.mrf.mxu1  ;;  %v10060_v49 = vadd.f32 %v23985_v11, %v23984_v51  ;;  %v23992_v11 = vld [vmem:[#allocation98_spill] sm:$0xff] }
 0x633   : > { %23977 = vst [vmem:[#allocation78_spill] sm:$0xff] %v22154_v59  ;;  %v22160_v62 = vadd.f32 %v16645_v17, %v10057_v21  ;;  %v10058_v59 = vadd.f32 %v23988_v7, %v23987_v9  ;;  %v23990_v17 = vld [vmem:[#allocation46_spill] sm:$0xff]  ;;  %v22188_v7 = vpop.f32.mrf.mxu0 }
 0x634   : > { %v10884_v54 = vpop.f32.mrf.mxu1  ;;  %v23993_v51 = vld [vmem:[#allocation230_spill] sm:$0xff] }
 0x635   : > { %23980 = vst [vmem:[#allocation213_spill] sm:$0xff] %v22160_v62  ;;  %v22164_v1 = vadd.f32 %v10884_v54, %v10055_v10  ;;  %v23991_v62 = vld [vmem:[#allocation228_spill] sm:$0xff] }
 0x636   : > { %v16648_v4 = vpop.f32.mrf.mxu1  ;;  %v10061_v29 = vadd.f32 %v23991_v62, %v23990_v17  ;;  %v23998_v62 = vld [vmem:[#allocation103_spill] sm:$0xff]  ;;  %v23999_v17 = vld [vmem:[#allocation233_spill] sm:$0xff] }
 0x637   : > { %23983 = vst [vmem:[#allocation84_spill] sm:$0xff] %v22164_v1  ;;  %v22170_v6 = vadd.f32 %v16648_v4, %v10060_v49  ;;  %v10059_v1 = vadd.f32 %v23993_v51, %v23992_v11  ;;  %v23995_v4 = vld [vmem:[#allocation180_spill] sm:$0xff]  ;;  %v22198_v51 = vpop.f32.mrf.mxu0 }
 0x638   : > { %v10897_v61 = vpop.f32.mrf.mxu1 }
 0x639   : > { %23986 = vst [vmem:[#allocation79_spill] sm:$0xff] %v22170_v6  ;;  %v22174_v21 = vadd.f32 %v10897_v61, %v10058_v59  ;;  %v23996_v6 = vld [vmem:[#allocation231_spill] sm:$0xff] }
 0x63a   : > { %v16649_v54 = vpop.f32.mrf.mxu1  ;;  %v10064_v9 = vadd.f32 %v23996_v6, %v23995_v4  ;;  %v24003_v6 = vld [vmem:[#allocation121_spill] sm:$0xff] }
 0x63b   : > { %23989 = vst [vmem:[#allocation215_spill] sm:$0xff] %v22174_v21  ;;  %v22180_v10 = vadd.f32 %v16649_v54, %v10061_v29  ;;  %v10062_v21 = vadd.f32 %v23999_v17, %v23998_v62  ;;  %v24001_v54 = vld [vmem:[#allocation234_spill] sm:$0xff]  ;;  %v10063_v4 = vadd.f32 %v24003_v6, %v21872_v28  ;;  %v22208_v17 = vpop.f32.mrf.mxu0 }
 0x63c   : > { %v10900_v57 = vpop.f32.mrf.mxu1  ;;  %v10065_v11 = vadd.f32 %v24001_v54, %v21865_v5  ;;  %v24007_v5 = vld [vmem:[#allocation116_spill] sm:$0xff] }
 0x63d   : > { %v22184_v49 = vadd.f32 %v10900_v57, %v10059_v1  ;;  %v10066_v54 = vadd.f32 %v24007_v5, %v21884_v36  ;;  %v22218_v6 = vpop.f32.mrf.mxu0 }
 0x63e   : > { %v16652_v61 = vpop.f32.mrf.mxu1 }
 0x63f   : > { %23994 = vst [vmem:[#allocation109_spill] sm:$0xff] %v22184_v49  ;;  %v22190_v59 = vadd.f32 %v16652_v61, %v10064_v9  ;;  %v24005_v61 = vld [vmem:[#allocation75_spill] sm:$0xff]  ;;  %v22228_v5 = vpop.f32.mrf.mxu0 }
 0x640   : > { %v10913_v55 = vpop.f32.mrf.mxu1  ;;  %v10068_v62 = vadd.f32 %v24005_v61, %v21879_v63  ;;  %v24011_v63 = vld [vmem:[#allocation120_spill] sm:$0xff] }
 0x641   : > { %23997 = vst [vmem:[#allocation91_spill] sm:$0xff] %v22190_v59  ;;  %v22194_v29 = vadd.f32 %v10913_v55, %v10062_v21  ;;  %v10067_v61 = vadd.f32 %v24011_v63, %v21894_v42 }
 0x642   : > { %v16653_v57 = vpop.f32.mrf.mxu1 }
 0x643   : > { %24000 = vst [vmem:[#allocation217_spill] sm:$0xff] %v22194_v29  ;;  %v22200_v1 = vadd.f32 %v16653_v57, %v10065_v11  ;;  %v24009_v57 = vld [vmem:[#allocation124_spill] sm:$0xff] }
 0x644   : > { %v10916_v49 = vpop.f32.mrf.mxu1  ;;  %v10069_v28 = vadd.f32 %v24009_v57, %v21889_v48  ;;  %v24014_v48 = vld [vmem:[#allocation117_spill] sm:$0xff] }
 0x645   : > { %24002 = vst [vmem:[#allocation101_spill] sm:$0xff] %v22200_v1  ;;  %v22204_v9 = vadd.f32 %v10916_v49, %v10063_v4  ;;  %v11918_v57 = vadd.f32 %v24014_v48, %v21906_v30 }
 0x646   : > { %v16656_v55 = vpop.f32.mrf.mxu1 }
 0x647   : > { %24004 = vst [vmem:[#allocation86_spill] sm:$0xff] %v22204_v9  ;;  %v22210_v21 = vadd.f32 %v16656_v55, %v10068_v62  ;;  %v24013_v55 = vld [vmem:[#allocation19_spill] sm:$0xff] }
 0x648   : > { %v10929_v29 = vpop.f32.mrf.mxu1  ;;  %v11920_v36 = vadd.f32 %v24013_v55, %v21900_v13  ;;  %v24015_v13 = vld [vmem:[#allocation115_spill] sm:$0xff] }
 0x649   : > { %24006 = vst [vmem:[#allocation219_spill] sm:$0xff] %v22210_v21  ;;  %v22214_v11 = vadd.f32 %v10929_v29, %v10066_v54  ;;  %v11921_v55 = vadd.f32 %v24015_v13, %v21912_v12  ;;  %v24016_v21 = vld [vmem:[#allocation126_spill] sm:$0xff] }
 0x64a   : > { %v16657_v49 = vpop.f32.mrf.mxu1 }
 0x64b   : > { %24008 = vst [vmem:[#allocation111_spill] sm:$0xff] %v22214_v11  ;;  %v22220_v4 = vadd.f32 %v16657_v49, %v10069_v28  ;;  %v22235_v28 = vld [vmem:[%s22650_s4] ss:$0 sm:$0xff] }
 0x64c   : > { %v10932_v9 = vpop.f32.mrf.mxu1 }
 0x64d   : > { %24010 = vst [vmem:[#allocation87_spill] sm:$0xff] %v22220_v4  ;;  %v22224_v62 = vadd.f32 %v10932_v9, %v10067_v61  ;;  %v17599_v9 = vld [vmem:[#allocation2 + $0x38] sm:$0xf] }
 0x64e   : > { %v16756_v29 = vpop.f32.mrf.mxu1  ;;  %v13404_v63 = vunpack.c.l.bf16 %v17599_v9 }
 0x64f   : > { %24012 = vst [vmem:[#allocation221_spill] sm:$0xff] %v22224_v62  ;;  %v12402_v54 = vadd.f32 %v16756_v29, %v11920_v36  ;;  %v22240_v62 = vpop.f32.mrf.mxu0  ;;  %v17600_v36 = vld [vmem:[#allocation2 + $0x30] sm:$0xf] }
 0x650   : > { %v12145_v49 = vpop.f32.mrf.mxu1  ;;  %v13402_v29 = vunpack.c.l.bf16 %v17600_v36 }
 0x651   : > { %v13340_v42 = vadd.f32 %v21934_v8, %v12402_v54  ;;  %v12400_v61 = vadd.f32 %v12145_v49, %v11918_v57  ;;  %v11919_v8 = vadd.f32 %v24016_v21, %v21918_v38  ;;  %v17601_v54 = vld [vmem:[#allocation2 + $0x3c] sm:$0xf]  ;;  %v22250_v59 = vpop.f32.mrf.mxu0 }
 0x652   : > { %v16757_v4 = vpop.f32.mrf.mxu1  ;;  %v13405_v9 = vunpack.c.l.bf16 %v17601_v54  ;;  %v24017_v49 = vld [vmem:[#allocation122_spill] sm:$0xff] }
 0x653   : > { %v13475_v30 = vadd.f32 %v22235_v28, %v13340_v42  ;;  %v13338_v48 = vadd.f32 %v21944_v16, %v12400_v61  ;;  %v12403_v11 = vadd.f32 %v16757_v4, %v11921_v55  ;;  %v11924_v12 = vadd.f32 %v24017_v49, %v21924_v41  ;;  %v17602_v16 = vld [vmem:[#allocation2 + $0x34] sm:$0xf]  ;;  %v24018_v38 = vld [vmem:[#allocation58_spill] sm:$0xff] }
 0x654   : > { %v12148_v57 = vpop.f32.mrf.mxu1  ;;  %v13403_v4 = vunpack.c.l.bf16 %v17602_v16  ;;  %v11922_v21 = vadd.f32 %v24018_v38, %v21930_v31  ;;  %v17605_v38 = vld [vmem:[#allocation2 + $0x4c] sm:$0xf] }
 0x655   : > { %v13539_v13 = vadd.f32 %v13475_v30, %v13404_v63  ;;  %v13473_v1 = vadd.f32 %v22235_v28, %v13338_v48  ;;  %v13341_v36 = vadd.f32 %v21954_v0, %v12403_v11  ;;  %v12401_v42 = vadd.f32 %v12148_v57, %v11919_v8  ;;  %v17603_v30 = vld [vmem:[#allocation2 + $0x48] sm:$0xf]  ;;  %v24019_v48 = vld [vmem:[#allocation123_spill] sm:$0xff] }
 0x656   : > { %v16760_v61 = vpop.f32.mrf.mxu1  ;;  %v13408_v0 = vunpack.c.l.bf16 %v17603_v30  ;;  %v11925_v8 = vadd.f32 %v24019_v48, %v21936_v19  ;;  %v17606_v48 = vld [vmem:[#allocation2 + $0x44] sm:$0xf] }
 0x657   : > { %13603 = vst [vmem:[%s17979_s14 + $0x10] sm:$0xff] %v13539_v13  ;;  %v13537_v55 = vadd.f32 %v13473_v1, %v13402_v29  ;;  %v13476_v54 = vadd.f32 %v22235_v28, %v13341_v36  ;;  %v13339_v41 = vadd.f32 %v21964_v52, %v12401_v42  ;;  %v12406_v63 = vadd.f32 %v16760_v61, %v11924_v12  ;;  %v22262_v29 = vpop.f32.mrf.mxu0  ;;  %v17604_v13 = vld [vmem:[#allocation2 + $0x40] sm:$0xf]  ;;  %v24020_v12 = vld [vmem:[#allocation113_spill] sm:$0xff] }
 0x658   : > { %v12161_v11 = vpop.f32.mrf.mxu1  ;;  %v13406_v52 = vunpack.c.l.bf16 %v17604_v13  ;;  %v11923_v42 = vadd.f32 %v24020_v12, %v21940_v47  ;;  %v17607_v12 = vld [vmem:[#allocation2 + $0x58] sm:$0xf] }
 0x659   : > { %13601 = vst [vmem:[%s17979_s14] sm:$0xff] %v13537_v55  ;;  %v13540_v57 = vadd.f32 %v13476_v54, %v13405_v9  ;;  %v13474_v49 = vadd.f32 %v22235_v28, %v13339_v41  ;;  %v13344_v31 = vadd.f32 %v21974_v60, %v12406_v63  ;;  %v12404_v1 = vadd.f32 %v12161_v11, %v11922_v21  ;;  %v24021_v21 = vld [vmem:[#allocation190_spill] sm:$0xff]  ;;  %v24022_v54 = vld [vmem:[#allocation20_spill] sm:$0xff]  ;;  %v22274_v11 = vpop.f32.mrf.mxu0 }
 0x65a   : > { %v16761_v36 = vpop.f32.mrf.mxu1  ;;  %v13409_v60 = vunpack.c.l.bf16 %v17605_v38  ;;  %v11928_v41 = vadd.f32 %v24022_v54, %v24021_v21  ;;  %v17608_v21 = vld [vmem:[#allocation2 + $0x50] sm:$0xf] }
 0x65b   : > { %13604 = vst [vmem:[%s17979_s14 + $0x18] sm:$0xff] %v13540_v57  ;;  %v13538_v16 = vadd.f32 %v13474_v49, %v13403_v4  ;;  %v13479_v19 = vadd.f32 %v22235_v28, %v13344_v31  ;;  %v13342_v9 = vadd.f32 %v21984_v3, %v12404_v1  ;;  %v12407_v61 = vadd.f32 %v16761_v36, %v11925_v8  ;;  %v24023_v8 = vld [vmem:[#allocation67_spill] sm:$0xff]  ;;  %v24024_v49 = vld [vmem:[#allocation36_spill] sm:$0xff] }
 0x65c   : > { %v12164_v55 = vpop.f32.mrf.mxu1  ;;  %v13407_v3 = vunpack.c.l.bf16 %v17606_v48  ;;  %v11926_v31 = vadd.f32 %v24024_v49, %v24023_v8  ;;  %v24028_v8 = vld [vmem:[#allocation128_spill] sm:$0xff] }
 0x65d   : > { %13602 = vst [vmem:[%s17979_s14 + $0x8] sm:$0xff] %v13538_v16  ;;  %v13543_v63 = vadd.f32 %v13479_v19, %v13408_v0  ;;  %v13477_v30 = vadd.f32 %v22235_v28, %v13342_v9  ;;  %v13345_v47 = vadd.f32 %v21994_v14, %v12407_v61  ;;  %v12405_v4 = vadd.f32 %v12164_v55, %v11923_v42  ;;  %v24025_v42 = vld [vmem:[#allocation21_spill] sm:$0xff]  ;;  %v22286_v55 = vpop.f32.mrf.mxu0 }
 0x65e   : > { %v16764_v57 = vpop.f32.mrf.mxu1  ;;  %v13412_v14 = vunpack.c.l.bf16 %v17607_v12  ;;  %v11929_v19 = vadd.f32 %v24025_v42, %v21956_v40  ;;  %v24029_v12 = vld [vmem:[#allocation192_spill] sm:$0xff] }
 0x65f   : > { %13607 = vst [vmem:[%s17979_s14 + $0x30] sm:$0xff] %v13543_v63  ;;  %v13541_v1 = vadd.f32 %v13477_v30, %v13406_v52  ;;  %v13480_v13 = vadd.f32 %v22235_v28, %v13345_v47  ;;  %v13343_v0 = vadd.f32 %v22004_v58, %v12405_v4  ;;  %v12410_v36 = vadd.f32 %v16764_v57, %v11928_v41  ;;  %v24026_v41 = vld [vmem:[#allocation35_spill] sm:$0xff]  ;;  %v17609_v4 = vld [vmem:[#allocation2 + $0x5c] sm:$0xf] }
 0x660   : > { %v12177_v16 = vpop.f32.mrf.mxu1  ;;  %v13410_v58 = vunpack.c.l.bf16 %v17608_v21  ;;  %v11927_v63 = vadd.f32 %v24026_v41, %v21960_v39  ;;  %v24027_v57 = vld [vmem:[#allocation99_spill] sm:$0xff] }
 0x661   : > { %13605 = vst [vmem:[%s17979_s14 + $0x20] sm:$0xff] %v13541_v1  ;;  %v13544_v9 = vadd.f32 %v13480_v13, %v13409_v60  ;;  %v13478_v61 = vadd.f32 %v22235_v28, %v13343_v0  ;;  %v13348_v38 = vadd.f32 %v22014_v22, %v12410_v36  ;;  %v12408_v52 = vadd.f32 %v12177_v16, %v11926_v31  ;;  %v22298_v13 = vpop.f32.mrf.mxu0  ;;  %v17610_v0 = vld [vmem:[#allocation2 + $0x54] sm:$0xf]  ;;  %v24030_v16 = vld [vmem:[#allocation23_spill] sm:$0xff] }
 0x662   : > { %v16765_v54 = vpop.f32.mrf.mxu1  ;;  %v13413_v22 = vunpack.c.l.bf16 %v17609_v4  ;;  %v11932_v49 = vadd.f32 %v24028_v8, %v24027_v57  ;;  %v11930_v42 = vadd.f32 %v24030_v16, %v24029_v12  ;;  %v24031_v21 = vld [vmem:[#allocation59_spill] sm:$0xff]  ;;  %v24032_v4 = vld [vmem:[#allocation38_spill] sm:$0xff] }
 0x663   : > { %13608 = vst [vmem:[%s17979_s14 + $0x38] sm:$0xff] %v13544_v9  ;;  %v13542_v30 = vadd.f32 %v13478_v61, %v13407_v3  ;;  %v13483_v40 = vadd.f32 %v22235_v28, %v13348_v38  ;;  %v13346_v60 = vadd.f32 %v22025_v23, %v12408_v52  ;;  %v12411_v47 = vadd.f32 %v16765_v54, %v11929_v19  ;;  %v17611_v38 = vld [vmem:[#allocation2 + $0x68] sm:$0xf]  ;;  %v17614_v16 = vld [vmem:[#allocation2 + $0x64] sm:$0xf] }
 0x664   : > { %v12180_v48 = vpop.f32.mrf.mxu1  ;;  %v13411_v23 = vunpack.c.l.bf16 %v17610_v0  ;;  %v11933_v54 = vadd.f32 %v24031_v21, %v21976_v33  ;;  %v17615_v21 = vld [vmem:[#allocation2 + $0x78] sm:$0xf] }
 0x665   : > { %13606 = vst [vmem:[%s17979_s14 + $0x28] sm:$0xff] %v13542_v30  ;;  %v13547_v31 = vadd.f32 %v13483_v40, %v13412_v14  ;;  %v13481_v1 = vadd.f32 %v22235_v28, %v13346_v60  ;;  %v13349_v39 = vadd.f32 %v22036_v15, %v12411_v47  ;;  %v12409_v3 = vadd.f32 %v12180_v48, %v11927_v63  ;;  %v22310_v40 = vpop.f32.mrf.mxu0  ;;  %v17612_v60 = vld [vmem:[#allocation2 + $0x60] sm:$0xf] }
 0x666   : > { %v16768_v36 = vpop.f32.mrf.mxu1  ;;  %v13416_v15 = vunpack.c.l.bf16 %v17611_v38  ;;  %v11931_v48 = vadd.f32 %v24032_v4, %v21980_v27  ;;  %v17616_v4 = vld [vmem:[#allocation2 + $0x70] sm:$0xf] }
 0x667   : > { %13611 = vst [vmem:[%s17979_s14 + $0x50] sm:$0xff] %v13547_v31  ;;  %v13545_v19 = vadd.f32 %v13481_v1, %v13410_v58  ;;  %v13484_v9 = vadd.f32 %v22235_v28, %v13349_v39  ;;  %v13347_v14 = vadd.f32 %v22047_v50, %v12409_v3  ;;  %v12414_v61 = vadd.f32 %v16768_v36, %v11932_v49  ;;  %v17613_v49 = vld [vmem:[#allocation2 + $0x6c] sm:$0xf]  ;;  %v24033_v1 = vld [vmem:[#allocation70_spill] sm:$0xff]  ;;  %v22322_v12 = vpop.f32.mrf.mxu0 }
 0x668   : > { %v12193_v52 = vpop.f32.mrf.mxu1  ;;  %v13414_v50 = vunpack.c.l.bf16 %v17612_v60  ;;  %v24034_v39 = vld [vmem:[#allocation34_spill] sm:$0xff] }
 0x669   : > { %13609 = vst [vmem:[%s17979_s14 + $0x40] sm:$0xff] %v13545_v19  ;;  %v13548_v41 = vadd.f32 %v13484_v9, %v13413_v22  ;;  %v13482_v63 = vadd.f32 %v22235_v28, %v13347_v14  ;;  %v13352_v30 = vadd.f32 %v22057_v25, %v12414_v61  ;;  %v12412_v58 = vadd.f32 %v12193_v52, %v11930_v42  ;;  %v24035_v19 = vld [vmem:[#allocation61_spill] sm:$0xff]  ;;  %v24036_v9 = vld [vmem:[#allocation88_spill] sm:$0xff] }
 0x66a   : > { %v16769_v47 = vpop.f32.mrf.mxu1  ;;  %v13417_v25 = vunpack.c.l.bf16 %v17613_v49  ;;  %v11936_v3 = vadd.f32 %v24034_v39, %v24033_v1  ;;  %v11934_v14 = vadd.f32 %v24036_v9, %v24035_v19  ;;  %v24040_v39 = vld [vmem:[#allocation71_spill] sm:$0xff]  ;;  %v24042_v9 = vld [vmem:[#allocation69_spill] sm:$0xff] }
 0x66b   : > { %13612 = vst [vmem:[%s17979_s14 + $0x58] sm:$0xff] %v13548_v41  ;;  %v13546_v57 = vadd.f32 %v13482_v63, %v13411_v23  ;;  %v13487_v33 = vadd.f32 %v22235_v28, %v13352_v30  ;;  %v13350_v22 = vadd.f32 %v22068_v20, %v12412_v58  ;;  %v12415_v8 = vadd.f32 %v16769_v47, %v11933_v54  ;;  %v24037_v41 = vld [vmem:[#allocation37_spill] sm:$0xff]  ;;  %v22334_v47 = vpop.f32.mrf.mxu0 }
 0x66c   : > { %v12196_v31 = vpop.f32.mrf.mxu1  ;;  %v13415_v20 = vunpack.c.l.bf16 %v17614_v16  ;;  %v11937_v63 = vadd.f32 %v24037_v41, %v21996_v32  ;;  %v24044_v41 = vld [vmem:[#allocation196_spill] sm:$0xff] }
 0x66d   : > { %13610 = vst [vmem:[%s17979_s14 + $0x48] sm:$0xff] %v13546_v57  ;;  %v13551_v0 = vadd.f32 %v13487_v33, %v13416_v15  ;;  %v13485_v36 = vadd.f32 %v22235_v28, %v13350_v22  ;;  %v13353_v27 = vadd.f32 %v22078_v43, %v12415_v8  ;;  %v12413_v23 = vadd.f32 %v12196_v31, %v11931_v48  ;;  %v24038_v57 = vld [vmem:[#allocation194_spill] sm:$0xff]  ;;  %v24039_v33 = vld [vmem:[#allocation44_spill] sm:$0xff] }
 0x66e   : > { %v16772_v42 = vpop.f32.mrf.mxu1  ;;  %v13420_v43 = vunpack.c.l.bf16 %v17615_v21  ;;  %v11935_v22 = vadd.f32 %v24039_v33, %v24038_v57  ;;  %v17617_v31 = vld [vmem:[#allocation2 + $0x7c] sm:$0xf]  ;;  %v24046_v33 = vld [vmem:[#allocation73_spill] sm:$0xff] }
 0x66f   : > { %13615 = vst [vmem:[%s17979_s14 + $0x70] sm:$0xff] %v13551_v0  ;;  %v13549_v61 = vadd.f32 %v13485_v36, %v13414_v50  ;;  %v13488_v38 = vadd.f32 %v22235_v28, %v13353_v27  ;;  %v13351_v15 = vadd.f32 %v22088_v44, %v12413_v23  ;;  %v12418_v52 = vadd.f32 %v16772_v42, %v11936_v3  ;;  %v24041_v3 = vld [vmem:[#allocation22_spill] sm:$0xff]  ;;  %v17618_v42 = vld [vmem:[#allocation2 + $0x74] sm:$0xf] }
 0x670   : > { %v12209_v54 = vpop.f32.mrf.mxu1  ;;  %v13418_v44 = vunpack.c.l.bf16 %v17616_v4  ;;  %v11940_v0 = vadd.f32 %v24041_v3, %v24040_v39  ;;  %v24048_v39 = vld [vmem:[#allocation54_spill] sm:$0xff]  ;;  %v24049_v3 = vld [vmem:[#allocation41_spill] sm:$0xff] }
 0x671   : > { %13613 = vst [vmem:[%s17979_s14 + $0x60] sm:$0xff] %v13549_v61  ;;  %v13552_v30 = vadd.f32 %v13488_v38, %v13417_v25  ;;  %v13486_v58 = vadd.f32 %v22235_v28, %v13351_v15  ;;  %v13356_v60 = vadd.f32 %v22098_v56, %v12418_v52  ;;  %v12416_v50 = vadd.f32 %v12209_v54, %v11934_v14  ;;  %v24043_v14 = vld [vmem:[#allocation25_spill] sm:$0xff] }
 0x672   : > { %v16773_v48 = vpop.f32.mrf.mxu1  ;;  %v13421_v56 = vunpack.c.l.bf16 %v17617_v31  ;;  %v11938_v61 = vadd.f32 %v24043_v14, %v24042_v9  ;;  %v24050_v9 = vld [vmem:[#allocation29_spill] sm:$0xff] }
 0x673   : > { %13616 = vst [vmem:[%s17979_s14 + $0x78] sm:$0xff] %v13552_v30  ;;  %v13550_v8 = vadd.f32 %v13486_v58, %v13415_v20  ;;  %v13491_v32 = vadd.f32 %v22235_v28, %v13356_v60  ;;  %v13354_v49 = vadd.f32 %v22108_v46, %v12416_v50  ;;  %v12419_v25 = vadd.f32 %v16773_v48, %v11937_v63  ;;  %v22346_v20 = vpop.f32.mrf.mxu0  ;;  %v24045_v63 = vld [vmem:[#allocation40_spill] sm:$0xff]  ;;  %v17620_v48 = vld [vmem:[#allocation2 + $0x80] sm:$0xf] }
 0x674   : > { %v12212_v1 = vpop.f32.mrf.mxu1  ;;  %v13419_v46 = vunpack.c.l.bf16 %v17618_v42  ;;  %v11941_v30 = vadd.f32 %v24045_v63, %v24044_v41  ;;  %v11942_v14 = vadd.f32 %v24050_v9, %v22032_v35 }
 0x675   : > { %13614 = vst [vmem:[%s17979_s14 + $0x68] sm:$0xff] %v13550_v8  ;;  %v13555_v36 = vadd.f32 %v13491_v32, %v13420_v43  ;;  %v13489_v27 = vadd.f32 %v22235_v28, %v13354_v49  ;;  %v13357_v23 = vadd.f32 %v22118_v18, %v12419_v25  ;;  %v12417_v16 = vadd.f32 %v12212_v1, %v11935_v22  ;;  %v17619_v43 = vld [vmem:[#allocation2 + $0x88] sm:$0xf] }
 0x676   : > { %v16776_v19 = vpop.f32.mrf.mxu1  ;;  %v13424_v18 = vunpack.c.l.bf16 %v17619_v43  ;;  %v24047_v22 = vld [vmem:[#allocation28_spill] sm:$0xff] }
 0x677   : > { %13619 = vst [vmem:[%s17979_s14 + $0x90] sm:$0xff] %v13555_v36  ;;  %v13553_v38 = vadd.f32 %v13489_v27, %v13418_v44  ;;  %v13492_v15 = vadd.f32 %v22235_v28, %v13357_v23  ;;  %v13355_v52 = vadd.f32 %v22128_v26, %v12417_v16  ;;  %v12422_v21 = vadd.f32 %v16776_v19, %v11940_v0  ;;  %v22358_v44 = vpop.f32.mrf.mxu0 }
 0x678   : > { %v12225_v54 = vpop.f32.mrf.mxu1  ;;  %v13422_v26 = vunpack.c.l.bf16 %v17620_v48  ;;  %v11939_v8 = vadd.f32 %v24047_v22, %v24046_v33  ;;  %v11944_v0 = vadd.f32 %v24049_v3, %v24048_v39  ;;  %v24053_v48 = vld [vmem:[#allocation131_spill] sm:$0xff] }
 0x679   : > { %13617 = vst [vmem:[%s17979_s14 + $0x80] sm:$0xff] %v13553_v38  ;;  %v13556_v58 = vadd.f32 %v13492_v15, %v13421_v56  ;;  %v13490_v60 = vadd.f32 %v22235_v28, %v13355_v52  ;;  %v13360_v50 = vadd.f32 %v22138_v45, %v12422_v21  ;;  %v12420_v4 = vadd.f32 %v12225_v54, %v11938_v61  ;;  %v17621_v56 = vld [vmem:[#allocation2 + $0x8c] sm:$0xf]  ;;  %v22370_v42 = vpop.f32.mrf.mxu0  ;;  %v17623_v21 = vld [vmem:[#allocation2 + $0x98] sm:$0xf] }
 0x67a   : > { %v16777_v57 = vpop.f32.mrf.mxu1  ;;  %v13425_v45 = vunpack.c.l.bf16 %v17621_v56 }
 0x67b   : > { %13620 = vst [vmem:[%s17979_s14 + $0x98] sm:$0xff] %v13556_v58  ;;  %v13554_v32 = vadd.f32 %v13490_v60, %v13419_v46  ;;  %v13495_v49 = vadd.f32 %v22235_v28, %v13360_v50  ;;  %v13358_v25 = vadd.f32 %v22148_v34, %v12420_v4  ;;  %v12423_v31 = vadd.f32 %v16777_v57, %v11941_v30  ;;  %v17622_v46 = vld [vmem:[#allocation2 + $0x84] sm:$0xf]  ;;  %v22382_v58 = vpop.f32.mrf.mxu0  ;;  %v17624_v60 = vld [vmem:[#allocation2 + $0x90] sm:$0xf] }
 0x67c   : > { %v12228_v1 = vpop.f32.mrf.mxu1  ;;  %v13423_v34 = vunpack.c.l.bf16 %v17622_v46  ;;  %v24052_v4 = vld [vmem:[#allocation127_spill] sm:$0xff] }
 0x67d   : > { %13618 = vst [vmem:[%s17979_s14 + $0x88] sm:$0xff] %v13554_v32  ;;  %v13559_v36 = vadd.f32 %v13495_v49, %v13424_v18  ;;  %v13493_v27 = vadd.f32 %v22235_v28, %v13358_v25  ;;  %v13361_v23 = vadd.f32 %v22158_v53, %v12423_v31  ;;  %v12421_v16 = vadd.f32 %v12228_v1, %v11939_v8  ;;  %v24051_v18 = vld [vmem:[#allocation39_spill] sm:$0xff]  ;;  %v17625_v8 = vld [vmem:[#allocation2 + $0x9c] sm:$0xf]  ;;  %v24054_v49 = vld [vmem:[#allocation72_spill] sm:$0xff]  ;;  %v22394_v3 = vpop.f32.mrf.mxu0 }
 0x67e   : > { %v16780_v19 = vpop.f32.mrf.mxu1  ;;  %v13428_v53 = vunpack.c.l.bf16 %v17623_v21  ;;  %v11945_v54 = vadd.f32 %v24051_v18, %v22038_v37  ;;  %v24055_v25 = vld [vmem:[#allocation24_spill] sm:$0xff] }
 0x67f   : > { %13623 = vst [vmem:[%s17979_s14 + $0xb0] sm:$0xff] %v13559_v36  ;;  %v13557_v61 = vadd.f32 %v13493_v27, %v13422_v26  ;;  %v13496_v38 = vadd.f32 %v22235_v28, %v13361_v23  ;;  %v13359_v15 = vadd.f32 %v22168_v2, %v12421_v16  ;;  %v12426_v52 = vadd.f32 %v16780_v19, %v11944_v0  ;;  %v17626_v0 = vld [vmem:[#allocation2 + $0x94] sm:$0xf]  ;;  %v24056_v27 = vld [vmem:[#allocation199_spill] sm:$0xff]  ;;  %v24057_v23 = vld [vmem:[#allocation32_spill] sm:$0xff] }
 0x680   : > { %v12241_v43 = vpop.f32.mrf.mxu1  ;;  %v13426_v2 = vunpack.c.l.bf16 %v17624_v60  ;;  %v11943_v26 = vadd.f32 %v24053_v48, %v24052_v4  ;;  %v11948_v31 = vadd.f32 %v24055_v25, %v24054_v49  ;;  %v11946_v16 = vadd.f32 %v24057_v23, %v24056_v27  ;;  %v17631_v23 = vld [vmem:[#allocation2 + $0xb8] sm:$0xf] }
 0x681   : > { %13621 = vst [vmem:[%s17979_s14 + $0xa0] sm:$0xff] %v13557_v61  ;;  %v13560_v41 = vadd.f32 %v13496_v38, %v13425_v45  ;;  %v13494_v63 = vadd.f32 %v22235_v28, %v13359_v15  ;;  %v13364_v35 = vadd.f32 %v22178_v24, %v12426_v52  ;;  %v12424_v30 = vadd.f32 %v12241_v43, %v11942_v14  ;;  %v17627_v14 = vld [vmem:[#allocation2 + $0xa8] sm:$0xf]  ;;  %v24058_v38 = vld [vmem:[#allocation74_spill] sm:$0xff] }
 0x682   : > { %v16781_v50 = vpop.f32.mrf.mxu1  ;;  %v13429_v24 = vunpack.c.l.bf16 %v17625_v8  ;;  %v24059_v15 = vld [vmem:[#allocation42_spill] sm:$0xff] }
 0x683   : > { %13624 = vst [vmem:[%s17979_s14 + $0xb8] sm:$0xff] %v13560_v41  ;;  %v13558_v57 = vadd.f32 %v13494_v63, %v13423_v34  ;;  %v13499_v37 = vadd.f32 %v22235_v28, %v13364_v35  ;;  %v13362_v33 = vadd.f32 %v22188_v7, %v12424_v30  ;;  %v12427_v22 = vadd.f32 %v16781_v50, %v11945_v54  ;;  %v22406_v54 = vpop.f32.mrf.mxu0  ;;  %v17628_v41 = vld [vmem:[#allocation2 + $0xa0] sm:$0xf]  ;;  %v24060_v35 = vld [vmem:[#allocation129_spill] sm:$0xff] }
 0x684   : > { %v12244_v32 = vpop.f32.mrf.mxu1  ;;  %v13427_v7 = vunpack.c.l.bf16 %v17626_v0  ;;  %v11949_v52 = vadd.f32 %v24059_v15, %v24058_v38  ;;  %v24061_v30 = vld [vmem:[#allocation133_spill] sm:$0xff] }
 0x685   : > { %13622 = vst [vmem:[%s17979_s14 + $0xa8] sm:$0xff] %v13558_v57  ;;  %v13563_v56 = vadd.f32 %v13499_v37, %v13428_v53  ;;  %v13497_v45 = vadd.f32 %v22235_v28, %v13362_v33  ;;  %v13365_v1 = vadd.f32 %v22198_v51, %v12427_v22  ;;  %v12425_v39 = vadd.f32 %v12244_v32, %v11943_v26  ;;  %v17629_v26 = vld [vmem:[#allocation2 + $0xac] sm:$0xf]  ;;  %v24062_v37 = vld [vmem:[#allocation201_spill] sm:$0xff]  ;;  %v24063_v33 = vld [vmem:[#allocation130_spill] sm:$0xff]  ;;  %v22418_v25 = vpop.f32.mrf.mxu0 }
 0x686   : > { %v16784_v36 = vpop.f32.mrf.mxu1  ;;  %v13432_v51 = vunpack.c.l.bf16 %v17627_v14  ;;  %v11947_v60 = vadd.f32 %v24061_v30, %v24060_v35  ;;  %v11952_v22 = vadd.f32 %v24063_v33, %v24062_v37  ;;  %v17632_v15 = vld [vmem:[#allocation2 + $0xb0] sm:$0xf]  ;;  %v17633_v35 = vld [vmem:[#allocation2 + $0xbc] sm:$0xf]  ;;  %v17634_v37 = vld [vmem:[#allocation2 + $0xb4] sm:$0xf] }
 0x687   : > { %13627 = vst [vmem:[%s17979_s14 + $0xd0] sm:$0xff] %v13563_v56  ;;  %v13561_v46 = vadd.f32 %v13497_v45, %v13426_v2  ;;  %v13500_v34 = vadd.f32 %v22235_v28, %v13365_v1  ;;  %v13363_v19 = vadd.f32 %v22208_v17, %v12425_v39  ;;  %v12430_v9 = vadd.f32 %v16784_v36, %v11948_v31  ;;  %v17630_v31 = vld [vmem:[#allocation2 + $0xa4] sm:$0xf]  ;;  %v24064_v45 = vld [vmem:[#allocation81_spill] sm:$0xff]  ;;  %v24065_v1 = vld [vmem:[#allocation26_spill] sm:$0xff]  ;;  %v22430_v38 = vpop.f32.mrf.mxu0 }
 0x688   : > { %v12257_v61 = vpop.f32.mrf.mxu1  ;;  %v13430_v17 = vunpack.c.l.bf16 %v17628_v41  ;;  %v11950_v39 = vadd.f32 %v24065_v1, %v24064_v45  ;;  %v24074_v1 = vld [vmem:[#allocation205_spill] sm:$0xff] }
 0x689   : > { %13625 = vst [vmem:[%s17979_s14 + $0xc0] sm:$0xff] %v13561_v46  ;;  %v13564_v21 = vadd.f32 %v13500_v34, %v13429_v24  ;;  %v13498_v53 = vadd.f32 %v22235_v28, %v13363_v19  ;;  %v13368_v43 = vadd.f32 %v22218_v6, %v12430_v9  ;;  %v12428_v18 = vadd.f32 %v12257_v61, %v11946_v16  ;;  %v24066_v46 = vld [vmem:[#allocation107_spill] sm:$0xff]  ;;  %v24067_v34 = vld [vmem:[#allocation33_spill] sm:$0xff] }
 0x68a   : > { %v16785_v63 = vpop.f32.mrf.mxu1  ;;  %v13433_v6 = vunpack.c.l.bf16 %v17629_v26  ;;  %v11953_v19 = vadd.f32 %v24067_v34, %v24066_v46  ;;  %v24076_v34 = vld [vmem:[#allocation80_spill] sm:$0xff] }
 0x68b   : > { %13628 = vst [vmem:[%s17979_s14 + $0xd8] sm:$0xff] %v13564_v21  ;;  %v13562_v2 = vadd.f32 %v13498_v53, %v13427_v7  ;;  %v13503_v50 = vadd.f32 %v22235_v28, %v13368_v43  ;;  %v13366_v4 = vadd.f32 %v22228_v5, %v12428_v18  ;;  %v12431_v48 = vadd.f32 %v16785_v63, %v11949_v52  ;;  %v24068_v21 = vld [vmem:[#allocation203_spill] sm:$0xff]  ;;  %v24069_v53 = vld [vmem:[#allocation92_spill] sm:$0xff] }
 0x68c   : > { %v12260_v57 = vpop.f32.mrf.mxu1  ;;  %v13431_v5 = vunpack.c.l.bf16 %v17630_v31  ;;  %v11951_v43 = vadd.f32 %v24069_v53, %v24068_v21  ;;  %v24078_v21 = vld [vmem:[#allocation125_spill] sm:$0xff] }
 0x68d   : > { %13626 = vst [vmem:[%s17979_s14 + $0xc8] sm:$0xff] %v13562_v2  ;;  %v13567_v8 = vadd.f32 %v13503_v50, %v13432_v51  ;;  %v13501_v24 = vadd.f32 %v22235_v28, %v13366_v4  ;;  %v13369_v32 = vadd.f32 %v22240_v62, %v12431_v48  ;;  %v12429_v49 = vadd.f32 %v12260_v57, %v11947_v60  ;;  %v24070_v60 = vld [vmem:[#allocation83_spill] sm:$0xff]  ;;  %v22442_v57 = vpop.f32.mrf.mxu0  ;;  %v24079_v53 = vld [vmem:[#allocation49_spill] sm:$0xff] }
 0x68e   : > { %v16788_v56 = vpop.f32.mrf.mxu1  ;;  %v13436_v62 = vunpack.c.l.bf16 %v17631_v23  ;;  %v24071_v2 = vld [vmem:[#allocation47_spill] sm:$0xff] }
 0x68f   : > { %13631 = vst [vmem:[%s17979_s14 + $0xf0] sm:$0xff] %v13567_v8  ;;  %v13565_v0 = vadd.f32 %v13501_v24, %v13430_v17  ;;  %v13504_v7 = vadd.f32 %v22235_v28, %v13369_v32  ;;  %v13367_v36 = vadd.f32 %v22250_v59, %v12429_v49  ;;  %v12434_v27 = vadd.f32 %v16788_v56, %v11952_v22  ;;  %v24072_v22 = vld [vmem:[#allocation110_spill] sm:$0xff]  ;;  %v24073_v8 = vld [vmem:[#allocation43_spill] sm:$0xff]  ;;  %v17635_v56 = vld [vmem:[#allocation2 + $0xc8] sm:$0xf] }
 0x690   : > { %v12273_v16 = vpop.f32.mrf.mxu1  ;;  %v13434_v59 = vunpack.c.l.bf16 %v17632_v15  ;;  %v11956_v50 = vadd.f32 %v24071_v2, %v24070_v60  ;;  %v11954_v24 = vadd.f32 %v24073_v8, %v24072_v22  ;;  %v24080_v60 = vld [vmem:[#allocation207_spill] sm:$0xff]  ;;  %v24081_v2 = vld [vmem:[#allocation169_spill] sm:$0xff] }
 0x691   : > { %13629 = vst [vmem:[%s17979_s14 + $0xe0] sm:$0xff] %v13565_v0  ;;  %v13568_v9 = vadd.f32 %v13504_v7, %v13433_v6  ;;  %v13502_v14 = vadd.f32 %v22235_v28, %v13367_v36  ;;  %v13372_v51 = vadd.f32 %v22262_v29, %v12434_v27  ;;  %v12432_v61 = vadd.f32 %v12273_v16, %v11950_v39  ;;  %v24075_v39 = vld [vmem:[#allocation165_spill] sm:$0xff]  ;;  %v17636_v16 = vld [vmem:[#allocation2 + $0xc0] sm:$0xf] }
 0x692   : > { %v16789_v52 = vpop.f32.mrf.mxu1  ;;  %v13437_v29 = vunpack.c.l.bf16 %v17633_v35  ;;  %v11957_v0 = vadd.f32 %v24075_v39, %v24074_v1  ;;  %v24083_v22 = vld [vmem:[#allocation135_spill] sm:$0xff]  ;;  %v24085_v1 = vld [vmem:[#allocation52_spill] sm:$0xff] }
 0x693   : > { %13632 = vst [vmem:[%s17979_s14 + $0xf8] sm:$0xff] %v13568_v9  ;;  %v13566_v18 = vadd.f32 %v13502_v14, %v13431_v5  ;;  %v13507_v41 = vadd.f32 %v22235_v28, %v13372_v51  ;;  %v13370_v17 = vadd.f32 %v22274_v11, %v12432_v61  ;;  %v12435_v63 = vadd.f32 %v16789_v52, %v11953_v19  ;;  %v24077_v19 = vld [vmem:[#allocation89_spill] sm:$0xff] }
 0x694   : > { %v12276_v30 = vpop.f32.mrf.mxu1  ;;  %v13435_v11 = vunpack.c.l.bf16 %v17634_v37  ;;  %v11955_v9 = vadd.f32 %v24077_v19, %v24076_v34  ;;  %v17639_v37 = vld [vmem:[#allocation2 + $0xd8] sm:$0xf] }
 0x695   : > { %13630 = vst [vmem:[%s17979_s14 + $0xe8] sm:$0xff] %v13566_v18  ;;  %v13571_v4 = vadd.f32 %v13507_v41, %v13436_v62  ;;  %v13505_v48 = vadd.f32 %v22235_v28, %v13370_v17  ;;  %v13373_v26 = vadd.f32 %v22286_v55, %v12435_v63  ;;  %v12433_v6 = vadd.f32 %v12276_v30, %v11951_v43  ;;  %v22454_v62 = vpop.f32.mrf.mxu0 }
 0x696   : > { %v16792_v33 = vpop.f32.mrf.mxu1  ;;  %v13440_v55 = vunpack.c.l.bf16 %v17635_v56  ;;  %v11960_v43 = vadd.f32 %v24079_v53, %v24078_v21  ;;  %v17640_v56 = vld [vmem:[#allocation2 + $0xd0] sm:$0xf] }
 0x697   : > { %13635 = vst [vmem:[%s17979_s14 + $0x110] sm:$0xff] %v13571_v4  ;;  %v13569_v32 = vadd.f32 %v13505_v48, %v13434_v59  ;;  %v13508_v49 = vadd.f32 %v22235_v28, %v13373_v26  ;;  %v13371_v31 = vadd.f32 %v22298_v13, %v12433_v6  ;;  %v12438_v5 = vadd.f32 %v16792_v33, %v11956_v50  ;;  %v17637_v59 = vld [vmem:[#allocation2 + $0xcc] sm:$0xf]  ;;  %v22466_v35 = vpop.f32.mrf.mxu0  ;;  %v24082_v33 = vld [vmem:[#allocation85_spill] sm:$0xff] }
 0x698   : > { %v12289_v45 = vpop.f32.mrf.mxu1  ;;  %v13438_v13 = vunpack.c.l.bf16 %v17636_v16  ;;  %v11958_v50 = vadd.f32 %v24081_v2, %v24080_v60  ;;  %v11961_v8 = vadd.f32 %v24083_v22, %v24082_v33 }
 0x699   : > { %13633 = vst [vmem:[%s17979_s14 + $0x100] sm:$0xff] %v13569_v32  ;;  %v13572_v7 = vadd.f32 %v13508_v49, %v13437_v29  ;;  %v13506_v36 = vadd.f32 %v22235_v28, %v13371_v31  ;;  %v13376_v27 = vadd.f32 %v22310_v40, %v12438_v5  ;;  %v12436_v23 = vadd.f32 %v12289_v45, %v11954_v24  ;;  %v17638_v29 = vld [vmem:[#allocation2 + $0xc4] sm:$0xf]  ;;  %v22478_v5 = vpop.f32.mrf.mxu0  ;;  %v24084_v45 = vld [vmem:[#allocation77_spill] sm:$0xff] }
 0x69a   : > { %v16793_v46 = vpop.f32.mrf.mxu1  ;;  %v13441_v40 = vunpack.c.l.bf16 %v17637_v59  ;;  %v11959_v39 = vadd.f32 %v24085_v1, %v24084_v45 }
 0x69b   : > { %13636 = vst [vmem:[%s17979_s14 + $0x118] sm:$0xff] %v13572_v7  ;;  %v13570_v14 = vadd.f32 %v13506_v36, %v13435_v11  ;;  %v13511_v51 = vadd.f32 %v22235_v28, %v13376_v27  ;;  %v13374_v61 = vadd.f32 %v22322_v12, %v12436_v23  ;;  %v12439_v15 = vadd.f32 %v16793_v46, %v11957_v0  ;;  %v17641_v23 = vld [vmem:[#allocation2 + $0xdc] sm:$0xf]  ;;  %v24087_v46 = vld [vmem:[#allocation56_spill] sm:$0xff] }
 0x69c   : > { %v12292_v52 = vpop.f32.mrf.mxu1  ;;  %v13439_v12 = vunpack.c.l.bf16 %v17638_v29  ;;  %v24090_v29 = vld [vmem:[#allocation76_spill] sm:$0xff] }
 0x69d   : > { %13634 = vst [vmem:[%s17979_s14 + $0x108] sm:$0xff] %v13570_v14  ;;  %v13575_v18 = vadd.f32 %v13511_v51, %v13440_v55  ;;  %v13509_v41 = vadd.f32 %v22235_v28, %v13374_v61  ;;  %v13377_v17 = vadd.f32 %v22334_v47, %v12439_v15  ;;  %v12437_v63 = vadd.f32 %v12292_v52, %v11955_v9  ;;  %v22490_v61 = vpop.f32.mrf.mxu0  ;;  %v17642_v15 = vld [vmem:[#allocation2 + $0xd4] sm:$0xf]  ;;  %v24089_v52 = vld [vmem:[#allocation174_spill] sm:$0xff] }
 0x69e   : > { %v16796_v30 = vpop.f32.mrf.mxu1  ;;  %v13444_v47 = vunpack.c.l.bf16 %v17639_v37  ;;  %v24092_v37 = vld [vmem:[#allocation211_spill] sm:$0xff] }
 0x69f   : > { %13639 = vst [vmem:[%s17979_s14 + $0x130] sm:$0xff] %v13575_v18  ;;  %v13573_v4 = vadd.f32 %v13509_v41, %v13438_v13  ;;  %v13512_v48 = vadd.f32 %v22235_v28, %v13377_v17  ;;  %v13375_v26 = vadd.f32 %v22346_v20, %v12437_v63  ;;  %v12442_v6 = vadd.f32 %v16796_v30, %v11960_v43  ;;  %v24086_v13 = vld [vmem:[#allocation209_spill] sm:$0xff]  ;;  %v17643_v17 = vld [vmem:[#allocation2 + $0xe8] sm:$0xf] }
 0x6a0   : > { %v12305_v11 = vpop.f32.mrf.mxu1  ;;  %v13442_v20 = vunpack.c.l.bf16 %v17640_v56  ;;  %v11964_v34 = vadd.f32 %v24087_v46, %v24086_v13  ;;  %v24095_v56 = vld [vmem:[#allocation119_spill] sm:$0xff] }
 0x6a1   : > { %13637 = vst [vmem:[%s17979_s14 + $0x120] sm:$0xff] %v13573_v4  ;;  %v13576_v24 = vadd.f32 %v13512_v48, %v13441_v40  ;;  %v13510_v32 = vadd.f32 %v22235_v28, %v13375_v26  ;;  %v13380_v49 = vadd.f32 %v22358_v44, %v12442_v6  ;;  %v12440_v31 = vadd.f32 %v12305_v11, %v11958_v50  ;;  %v24088_v40 = vld [vmem:[#allocation104_spill] sm:$0xff]  ;;  %v22502_v48 = vpop.f32.mrf.mxu0  ;;  %v17644_v26 = vld [vmem:[#allocation2 + $0xe0] sm:$0xf] }
 0x6a2   : > { %v16797_v55 = vpop.f32.mrf.mxu1  ;;  %v13445_v44 = vunpack.c.l.bf16 %v17641_v23  ;;  %v11962_v21 = vadd.f32 %v24089_v52, %v24088_v40  ;;  %v24097_v23 = vld [vmem:[#allocation178_spill] sm:$0xff] }
 0x6a3   : > { %13640 = vst [vmem:[%s17979_s14 + $0x138] sm:$0xff] %v13576_v24  ;;  %v13574_v0 = vadd.f32 %v13510_v32, %v13439_v12  ;;  %v13515_v7 = vadd.f32 %v22235_v28, %v13380_v49  ;;  %v13378_v36 = vadd.f32 %v22370_v42, %v12440_v31  ;;  %v12443_v27 = vadd.f32 %v16797_v55, %v11961_v8  ;;  %v24091_v12 = vld [vmem:[#allocation53_spill] sm:$0xff]  ;;  %v17645_v32 = vld [vmem:[#allocation2 + $0xec] sm:$0xf]  ;;  %v24094_v31 = vld [vmem:[#allocation82_spill] sm:$0xff] }
 0x6a4   : > { %v12308_v16 = vpop.f32.mrf.mxu1  ;;  %v13443_v42 = vunpack.c.l.bf16 %v17642_v15  ;;  %v11965_v30 = vadd.f32 %v24091_v12, %v24090_v29 }
 0x6a5   : > { %13638 = vst [vmem:[%s17979_s14 + $0x128] sm:$0xff] %v13574_v0  ;;  %v13579_v19 = vadd.f32 %v13515_v7, %v13444_v47  ;;  %v13513_v9 = vadd.f32 %v22235_v28, %v13378_v36  ;;  %v13381_v14 = vadd.f32 %v22382_v58, %v12443_v27  ;;  %v12441_v51 = vadd.f32 %v12308_v16, %v11959_v39  ;;  %v24093_v47 = vld [vmem:[#allocation51_spill] sm:$0xff]  ;;  %v22514_v0 = vpop.f32.mrf.mxu0  ;;  %v24096_v27 = vld [vmem:[#allocation78_spill] sm:$0xff] }
 0x6a6   : > { %v16800_v59 = vpop.f32.mrf.mxu1  ;;  %v13448_v58 = vunpack.c.l.bf16 %v17643_v17  ;;  %v11963_v11 = vadd.f32 %v24093_v47, %v24092_v37  ;;  %v17646_v7 = vld [vmem:[#allocation2 + $0xe4] sm:$0xf] }
 0x6a7   : > { %13643 = vst [vmem:[%s17979_s14 + $0x150] sm:$0xff] %v13579_v19  ;;  %v13577_v53 = vadd.f32 %v13513_v9, %v13442_v20  ;;  %v13516_v43 = vadd.f32 %v22235_v28, %v13381_v14  ;;  %v13379_v18 = vadd.f32 %v22394_v3, %v12441_v51  ;;  %v12446_v41 = vadd.f32 %v16800_v59, %v11964_v34  ;;  %v17647_v19 = vld [vmem:[#allocation2 + $0xf8] sm:$0xf]  ;;  %v24098_v14 = vld [vmem:[#allocation213_spill] sm:$0xff] }
 0x6a8   : > { %v12321_v63 = vpop.f32.mrf.mxu1  ;;  %v13446_v3 = vunpack.c.l.bf16 %v17644_v26  ;;  %v11968_v20 = vadd.f32 %v24095_v56, %v24094_v31  ;;  %v24099_v51 = vld [vmem:[#allocation50_spill] sm:$0xff]  ;;  %v17651_v56 = vld [vmem:[#allocation2 + $0x108] sm:$0xf] }
 0x6a9   : > { %13641 = vst [vmem:[%s17979_s14 + $0x140] sm:$0xff] %v13577_v53  ;;  %v13580_v60 = vadd.f32 %v13516_v43, %v13445_v44  ;;  %v13514_v2 = vadd.f32 %v22235_v28, %v13379_v18  ;;  %v13384_v50 = vadd.f32 %v22406_v54, %v12446_v41  ;;  %v12444_v4 = vadd.f32 %v12321_v63, %v11962_v21  ;;  %v16889_v21 = vpop.f32.mrf.mxu0  ;;  %v17648_v53 = vld [vmem:[#allocation2 + $0xf0] sm:$0xf]  ;;  %v24100_v18 = vld [vmem:[#allocation84_spill] sm:$0xff]  ;;  %v24101_v41 = vld [vmem:[#allocation106_spill] sm:$0xff] }
 0x6aa   : > { %v16801_v6 = vpop.f32.mrf.mxu1  ;;  %v13449_v54 = vunpack.c.l.bf16 %v17645_v32  ;;  %v11966_v44 = vadd.f32 %v24097_v23, %v24096_v27  ;;  %v11969_v15 = vadd.f32 %v24099_v51, %v24098_v14  ;;  %v13450_v43 = vunpack.c.l.bf16 %v17648_v53  ;;  %v17652_v27 = vld [vmem:[#allocation2 + $0x100] sm:$0xf]  ;;  %v24110_v51 = vld [vmem:[#allocation65_spill] sm:$0xff] }
 0x6ab   : > { %13644 = vst [vmem:[%s17979_s14 + $0x158] sm:$0xff] %v13580_v60  ;;  %v13578_v33 = vadd.f32 %v13514_v2, %v13443_v42  ;;  %v13519_v22 = vadd.f32 %v22235_v28, %v13384_v50  ;;  %v13382_v8 = vadd.f32 %v22418_v25, %v12444_v4  ;;  %v12447_v24 = vadd.f32 %v16801_v6, %v11965_v30  ;;  %v17649_v30 = vld [vmem:[#allocation2 + $0xfc] sm:$0xf]  ;;  %v24102_v2 = vld [vmem:[#allocation79_spill] sm:$0xff]  ;;  %v13294_v47 = vpop.f32.mrf.mxu0 }
 0x6ac   : > { %v12324_v49 = vpop.f32.mrf.mxu1  ;;  %v13447_v25 = vunpack.c.l.bf16 %v17646_v7  ;;  %v11967_v17 = vadd.f32 %v24101_v41, %v24100_v18  ;;  %v13453_v60 = vunpack.c.l.bf16 %v17649_v30  ;;  %v24103_v50 = vld [vmem:[#allocation182_spill] sm:$0xff]  ;;  %v13454_v23 = vunpack.c.l.bf16 %v17652_v27  ;;  %v24109_v14 = vld [vmem:[#allocation91_spill] sm:$0xff]  ;;  %v24112_v41 = vld [vmem:[#allocation57_spill] sm:$0xff] }
 0x6ad   : > { %13642 = vst [vmem:[%s17979_s14 + $0x148] sm:$0xff] %v13578_v33  ;;  %v13583_v55 = vadd.f32 %v13519_v22, %v13448_v58  ;;  %v13517_v45 = vadd.f32 %v22235_v28, %v13382_v8  ;;  %v13385_v1 = vadd.f32 %v22430_v38, %v12447_v24  ;;  %v12445_v39 = vadd.f32 %v12324_v49, %v11963_v11  ;;  %v17650_v11 = vld [vmem:[#allocation2 + $0xf4] sm:$0xf]  ;;  %v24104_v22 = vld [vmem:[#allocation215_spill] sm:$0xff]  ;;  %v24105_v8 = vld [vmem:[#allocation66_spill] sm:$0xff] }
 0x6ae   : > { %v16804_v36 = vpop.f32.mrf.mxu1  ;;  %v13452_v38 = vunpack.c.l.bf16 %v17647_v19  ;;  %v11972_v4 = vadd.f32 %v24103_v50, %v24102_v2  ;;  %v13451_v33 = vunpack.c.l.bf16 %v17650_v11  ;;  %v11970_v24 = vadd.f32 %v24105_v8, %v24104_v22  ;;  %v17655_v30 = vld [vmem:[#allocation2 + $0x118] sm:$0xf]  ;;  %v17656_v11 = vld [vmem:[#allocation2 + $0x110] sm:$0xf]  ;;  %v24116_v22 = vld [vmem:[#allocation63_spill] sm:$0xff] }
 0x6af   : > { %13647 = vst [vmem:[%s17979_s14 + $0x170] sm:$0xff] %v13583_v55  ;;  %v13581_v16 = vadd.f32 %v13517_v45, %v13446_v3  ;;  %v13520_v13 = vadd.f32 %v22235_v28, %v13385_v1  ;;  %v13383_v46 = vadd.f32 %v22442_v57, %v12445_v39  ;;  %v12450_v34 = vadd.f32 %v16804_v36, %v11968_v20  ;;  %v24106_v55 = vld [vmem:[#allocation64_spill] sm:$0xff]  ;;  %v16892_v36 = vpop.f32.mrf.mxu0  ;;  %v24114_v2 = vld [vmem:[#allocation186_spill] sm:$0xff] }
 0x6b0   : > { %v12337_v9 = vpop.f32.mrf.mxu1  ;;  %v13456_v20 = vunpack.c.l.bf16 %v17651_v56  ;;  %v11973_v45 = vadd.f32 %v24106_v55, %v22180_v10 }
 0x6b1   : > { %13645 = vst [vmem:[%s17979_s14 + $0x160] sm:$0xff] %v13581_v16  ;;  %v13584_v42 = vadd.f32 %v13520_v13, %v13449_v54  ;;  %v13518_v59 = vadd.f32 %v22235_v28, %v13383_v46  ;;  %v13388_v40 = vadd.f32 %v22454_v62, %v12450_v34  ;;  %v12448_v52 = vadd.f32 %v12337_v9, %v11966_v44  ;;  %v24107_v44 = vld [vmem:[#allocation109_spill] sm:$0xff]  ;;  %v24108_v16 = vld [vmem:[#allocation184_spill] sm:$0xff]  ;;  %v13307_v53 = vpop.f32.mrf.mxu0 }
 0x6b2   : > { %v16805_v57 = vpop.f32.mrf.mxu1  ;;  %v11971_v13 = vadd.f32 %v24108_v16, %v24107_v44 }
 0x6b3   : > { %13648 = vst [vmem:[%s17979_s14 + $0x178] sm:$0xff] %v13584_v42  ;;  %v13582_v58 = vadd.f32 %v13518_v59, %v13447_v25  ;;  %v13523_v63 = vadd.f32 %v22235_v28, %v13388_v40  ;;  %v13386_v29 = vadd.f32 %v22466_v35, %v12448_v52  ;;  %v12451_v12 = vadd.f32 %v16805_v57, %v11969_v15 }
 0x6b4   : > { %v12340_v62 = vpop.f32.mrf.mxu1  ;;  %v11976_v15 = vadd.f32 %v24110_v51, %v24109_v14  ;;  %v24119_v14 = vld [vmem:[#allocation111_spill] sm:$0xff]  ;;  %v24120_v51 = vld [vmem:[#allocation188_spill] sm:$0xff] }
 0x6b5   : > { %13646 = vst [vmem:[%s17979_s14 + $0x168] sm:$0xff] %v13582_v58  ;;  %v13587_v26 = vadd.f32 %v13523_v63, %v13452_v38  ;;  %v13521_v3 = vadd.f32 %v22235_v28, %v13386_v29  ;;  %v13389_v6 = vadd.f32 %v22478_v5, %v12451_v12  ;;  %v12449_v37 = vadd.f32 %v12340_v62, %v11967_v17  ;;  %v17653_v38 = vld [vmem:[#allocation2 + $0x10c] sm:$0xf] }
 0x6b6   : > { %v16808_v35 = vpop.f32.mrf.mxu1  ;;  %v13457_v9 = vunpack.c.l.bf16 %v17653_v38 }
 0x6b7   : > { %13651 = vst [vmem:[%s17979_s14 + $0x190] sm:$0xff] %v13587_v26  ;;  %v13585_v32 = vadd.f32 %v13521_v3, %v13450_v43  ;;  %v13524_v54 = vadd.f32 %v22235_v28, %v13389_v6  ;;  %v13387_v49 = vadd.f32 %v22490_v61, %v12449_v37  ;;  %v12454_v31 = vadd.f32 %v16808_v35, %v11972_v4  ;;  %v17654_v43 = vld [vmem:[#allocation2 + $0x104] sm:$0xf]  ;;  %v16893_v37 = vpop.f32.mrf.mxu0 }
 0x6b8   : > { %v12353_v5 = vpop.f32.mrf.mxu1  ;;  %v13455_v57 = vunpack.c.l.bf16 %v17654_v43 }
 0x6b9   : > { %13649 = vst [vmem:[%s17979_s14 + $0x180] sm:$0xff] %v13585_v32  ;;  %v13588_v1 = vadd.f32 %v13524_v54, %v13453_v60  ;;  %v13522_v39 = vadd.f32 %v22235_v28, %v13387_v49  ;;  %v13392_v7 = vadd.f32 %v22502_v48, %v12454_v31  ;;  %v12452_v25 = vadd.f32 %v12353_v5, %v11970_v24  ;;  %v17657_v31 = vld [vmem:[#allocation2 + $0x11c] sm:$0xf] }
 0x6ba   : > { %v16809_v61 = vpop.f32.mrf.mxu1  ;;  %v13460_v60 = vunpack.c.l.bf16 %v17655_v30  ;;  %v13461_v56 = vunpack.c.l.bf16 %v17657_v31  ;;  %v17661_v30 = vld [vmem:[#allocation2 + $0x120] sm:$0xf] }
 0x6bb   : > { %13652 = vst [vmem:[%s17979_s14 + $0x198] sm:$0xff] %v13588_v1  ;;  %v13586_v46 = vadd.f32 %v13522_v39, %v13451_v33  ;;  %v13527_v34 = vadd.f32 %v22235_v28, %v13392_v7  ;;  %v13390_v10 = vadd.f32 %v22514_v0, %v12452_v25  ;;  %v12455_v19 = vadd.f32 %v16809_v61, %v11973_v45  ;;  %v24111_v0 = vld [vmem:[#allocation217_spill] sm:$0xff]  ;;  %v13310_v39 = vpop.f32.mrf.mxu0 }
 0x6bc   : > { %v12356_v48 = vpop.f32.mrf.mxu1  ;;  %v11974_v17 = vadd.f32 %v24112_v41, %v24111_v0  ;;  %v13458_v33 = vunpack.c.l.bf16 %v17656_v11  ;;  %v24124_v0 = vld [vmem:[#allocation68_spill] sm:$0xff] }
 0x6bd   : > { %13650 = vst [vmem:[%s17979_s14 + $0x188] sm:$0xff] %v13586_v46  ;;  %v13591_v42 = vadd.f32 %v13527_v34, %v13456_v20  ;;  %v13525_v59 = vadd.f32 %v22235_v28, %v13390_v10  ;;  %v13393_v40 = vadd.f32 %v16889_v21, %v12455_v19  ;;  %v12453_v52 = vadd.f32 %v12356_v48, %v11971_v13  ;;  %v24113_v21 = vld [vmem:[#allocation101_spill] sm:$0xff]  ;;  %v24117_v10 = vld [vmem:[#allocation219_spill] sm:$0xff]  ;;  %v24118_v19 = vld [vmem:[#allocation60_spill] sm:$0xff] }
 0x6be   : > { %v16812_v18 = vpop.f32.mrf.mxu1  ;;  %v11977_v50 = vadd.f32 %v24114_v2, %v24113_v21  ;;  %v11980_v38 = vadd.f32 %v24118_v19, %v24117_v10  ;;  %v17662_v21 = vld [vmem:[#allocation2 + $0x12c] sm:$0xf] }
 0x6bf   : > { %13655 = vst [vmem:[%s17979_s14 + $0x1b0] sm:$0xff] %v13591_v42  ;;  %v13589_v58 = vadd.f32 %v13525_v59, %v13454_v23  ;;  %v13528_v63 = vadd.f32 %v22235_v28, %v13393_v40  ;;  %v13391_v29 = vadd.f32 %v13294_v47, %v12453_v52  ;;  %v12458_v12 = vadd.f32 %v16812_v18, %v11976_v15  ;;  %v24115_v47 = vld [vmem:[#allocation86_spill] sm:$0xff]  ;;  %v17658_v23 = vld [vmem:[#allocation2 + $0x114] sm:$0xf]  ;;  %v24121_v40 = vld [vmem:[#allocation87_spill] sm:$0xff] }
 0x6c0   : > { %v12369_v62 = vpop.f32.mrf.mxu1  ;;  %v11975_v8 = vadd.f32 %v24116_v22, %v24115_v47  ;;  %v13459_v61 = vunpack.c.l.bf16 %v17658_v23  ;;  %v11978_v15 = vadd.f32 %v24120_v51, %v24119_v14  ;;  %v24122_v52 = vld [vmem:[#allocation55_spill] sm:$0xff]  ;;  %v24123_v18 = vld [vmem:[#allocation221_spill] sm:$0xff]  ;;  %v13465_v2 = vunpack.c.l.bf16 %v17662_v21 }
 0x6c1   : > { %13653 = vst [vmem:[%s17979_s14 + $0x1a0] sm:$0xff] %v13589_v58  ;;  %v13592_v4 = vadd.f32 %v13528_v63, %v13457_v9  ;;  %v13526_v26 = vadd.f32 %v22235_v28, %v13391_v29  ;;  %v13396_v3 = vadd.f32 %v16892_v36, %v12458_v12  ;;  %v12456_v6 = vadd.f32 %v12369_v62, %v11974_v17  ;;  %v17660_v63 = vld [vmem:[%s22650_s4] ss:$0 sm:$0xff] }
 0x6c2   : > { %v16813_v35 = vpop.f32.mrf.mxu1  ;;  %v11979_v41 = vadd.f32 %v24124_v0, %v24123_v18 }
 0x6c3   : > { %13656 = vst [vmem:[%s17979_s14 + $0x1b8] sm:$0xff] %v13592_v4  ;;  %v13590_v24 = vadd.f32 %v13526_v26, %v13455_v57  ;;  %v13531_v32 = vadd.f32 %v22235_v28, %v13396_v3  ;;  %v13394_v54 = vadd.f32 %v13307_v53, %v12456_v6  ;;  %v12459_v49 = vadd.f32 %v16813_v35, %v11977_v50  ;;  %v17659_v57 = vld [vmem:[#allocation2 + $0x128] sm:$0xf]  ;;  %v17663_v35 = vld [vmem:[#allocation2 + $0x124] sm:$0xf] }
 0x6c4   : > { %v12372_v20 = vpop.f32.mrf.mxu1  ;;  %v11981_v53 = vadd.f32 %v24122_v52, %v24121_v40  ;;  %v13463_v47 = vunpack.c.l.bf16 %v17663_v35 }
 0x6c5   : > { %13654 = vst [vmem:[%s17979_s14 + $0x1a8] sm:$0xff] %v13590_v24  ;;  %v13595_v5 = vadd.f32 %v13531_v32, %v13460_v60  ;;  %v13529_v55 = vadd.f32 %v22235_v28, %v13394_v54  ;;  %v13397_v45 = vadd.f32 %v16893_v37, %v12459_v49  ;;  %v12457_v1 = vadd.f32 %v12372_v20, %v11975_v8 }
 0x6c6   : > { %v16816_v7 = vpop.f32.mrf.mxu1  ;;  %v13462_v60 = vunpack.c.l.bf16 %v17661_v30 }
 0x6c7   : > { %13659 = vst [vmem:[%s17979_s14 + $0x1d0] sm:$0xff] %v13595_v5  ;;  %v13593_v25 = vadd.f32 %v13529_v55, %v13458_v33  ;;  %v13532_v36 = vadd.f32 %v22235_v28, %v13397_v45  ;;  %v13395_v27 = vadd.f32 %v13310_v39, %v12457_v1  ;;  %v12462_v48 = vadd.f32 %v16816_v7, %v11980_v38 }
 0x6c8   : > { %v12385_v44 = vpop.f32.mrf.mxu1 }
 0x6c9   : > { %13657 = vst [vmem:[%s17979_s14 + $0x1c0] sm:$0xff] %v13593_v25  ;;  %v13596_v16 = vadd.f32 %v13532_v36, %v13461_v56  ;;  %v13530_v13 = vadd.f32 %v22235_v28, %v13395_v27  ;;  %v12460_v59 = vadd.f32 %v12385_v44, %v11978_v15  ;;  %v13464_v28 = vunpack.c.l.bf16 %v17659_v57 }
 0x6ca   : > { %v16817_v46 = vpop.f32.mrf.mxu1 }
 0x6cb   : > { %13660 = vst [vmem:[%s17979_s14 + $0x1d8] sm:$0xff] %v13596_v16  ;;  %v13594_v34 = vadd.f32 %v13530_v13, %v13459_v61  ;;  %v12463_v58 = vadd.f32 %v16817_v46, %v11981_v53 }
 0x6cc   : > { %v12388_v9 = vpop.f32.mrf.mxu1 }
 0x6cd   : > { %13658 = vst [vmem:[%s17979_s14 + $0x1c8] sm:$0xff] %v13594_v34  ;;  %v12461_v50 = vadd.f32 %v12388_v9, %v11979_v41 }
 0x6ce   : > { %v16896_v42 = vpop.f32.mrf.mxu1 }
 0x6cf   : > { %v13400_v43 = vadd.f32 %v16896_v42, %v12462_v48 }
 0x6d0   : > { %v13323_v17 = vpop.f32.mrf.mxu1 }
 0x6d1   : > { %v13535_v29 = vadd.f32 %v17660_v63, %v13400_v43  ;;  %v13398_v12 = vadd.f32 %v13323_v17, %v12460_v59 }
 0x6d2   : > { %v16897_v62 = vpop.f32.mrf.mxu1 }
 0x6d3   : > { %v13599_v4 = vadd.f32 %v13535_v29, %v13464_v28  ;;  %v13533_v26 = vadd.f32 %v17660_v63, %v13398_v12  ;;  %v13401_v3 = vadd.f32 %v16897_v62, %v12463_v58 }
 0x6d4   : > { %v13326_v6 = vpop.f32.mrf.mxu1 }
 0x6d5   : > { %13663 = vst [vmem:[%s17979_s14 + $0x1f0] sm:$0xff] %v13599_v4  ;;  %v13597_v37 = vadd.f32 %v13533_v26, %v13462_v60  ;;  %v13536_v11 = vadd.f32 %v17660_v63, %v13401_v3  ;;  %v13399_v33 = vadd.f32 %v13326_v6, %v12461_v50 }
 0x6d7   : > { %13661 = vst [vmem:[%s17979_s14 + $0x1e0] sm:$0xff] %v13597_v37  ;;  %v13600_v22 = vadd.f32 %v13536_v11, %v13465_v2  ;;  %v13534_v8 = vadd.f32 %v17660_v63, %v13399_v33 }
 0x6d9   : > { %13664 = vst [vmem:[%s17979_s14 + $0x1f8] sm:$0xff] %v13600_v22  ;;  %v13598_v24 = vadd.f32 %v13534_v8, %v13463_v47 }
 0x6db   : > { %13662 = vst [vmem:[%s17979_s14 + $0x1e8] sm:$0xff] %v13598_v24 }
 0x6dc   : > { %17751 = shalt.err (!%p17748_p11)
}
 0x6dd   : > { %s17752_s9 = scalar_lea.hbm %s22593_s12, 8192  ;;  %s17756_s24 = scalar_lea.hbm %s22651_s5, 16384 }
 0x6de   : > { %p17753_p13 = scmp.ne.s32.totalorder %s22593_s12, %s17752_s9  ;;  %p17757_p7 = scmp.lt.s32.totalorder %s22593_s12, %s22651_s5 }
 0x6df   : > { %p17758_p9 = scmp.lt.s32.totalorder %s17756_s24, %s17752_s9 }
 0x6e0   : > { %p17754_p0 = pnand %p17753_p13, %p24125_p2 }
 0x6e1   : > { %p17759_p12 = por %p17758_p9, %p17757_p7 }
 0x6e2   : > { %p17755_p6 = pneg %p17754_p0 }
 0x6e4   : > { %p17760_p1 = pnand %p17759_p12, %p17755_p6 }
 0x6e6   : > { %17763 = shalt.err (!%p17760_p1)
}
 0x6e7   : > { %s17835_s27 = smov 128   ;;  %s17836_s10 = smov 8  }
 0x6e8   : > { %16922 = dma.vmem_to_hbm [thread:$0]  (%p24125_p2), %s22595_s29, 8192, %s22593_s12, %s22601_s7, %s17835_s27, %s17835_s27, %s17836_s10  }
 0x6e9 PF: > { %p16939_p5 = scmp.ge.s32.totalorder %s17824_s23, 2  ;;  %s13696_s11 = sand.u32 1, %s17804_s18  }
 0x6ea   : > { %p24126_p3 = scmp.ne.s32.totalorder %s22866_s30, 0  ;;  %s13697_s21 = scalar_lea.sflag [#allocation7], %s13696_s11 }
 0x6ec   : > { %p16932_p4 = pnand %p16939_p5, %p24126_p3 }
 0x6ee   : > { %p16933_p8 = pneg %p16932_p4 }
 0x6f0   : > { %17799 = dma.done.wait (%p16933_p8), %s13697_s21, 8192  }
 0x6f1   : > { %17801 = vsyncadd (%p16933_p8), %s13697_s21, 4294959104  ;;  %s20_s23 = sadd.s32 1, %s17824_s23   ;;  %s24127_s18 = smov %s17808_s19 }
 0x6f2   : > { %p17_p10 = scmp.ge.s32.totalorder %s20_s23, 4   ;;  %s24128_s19 = smov %s17812_s20 }
 0x6f3   : > { %s24129_s20 = smov %s17920_s6  ;;  %s24130_s21 = smov %s17820_s22 }
 0x6f4   : > { %s24131_s22 = smov %s24133_s26  ;;  %19 = sbr.rel (!%p17_p10) target bundleno = 6 (0x6), region = 103 }
 0x6f9   :  { %13702 = vsyncpa [#allocation6], 1 }
 0x6fa   :  { %13704 = vsyncpa [#allocation6 + $0x1], 1 }
 0x6fb   :  { %13705 = vsyncpa [#allocation9], 1 }
 0x6fc   :  { %13706 = vsyncpa [#allocation7], 1 }
 0x6fd   :  { %13708 = vsyncpa [#allocation7 + $0x1], 1 }
 0x6fe   :  { %13709 = vsyncmov [#allocation4] }
 0x701   :  { %s13710_s28 = vpop.sfrf %13709 }
 0x702   :  { %p14387_p2 = scmp.ne.s32.totalorder %s13710_s28, 0 }
 0x704   :  { %13714 = shalt.err (%p14387_p2)  }

</bundles_post_ra>
